<compile_context>
chip_gen: v6e
topology: v6e:2x2x1
jax: 0.10.0
libtpu: 0.0.40
codegen_flags: <defaults>
</compile_context>

<pallas_src>
import jax
import jax.numpy as jnp
from jax import lax
from jax.experimental import pallas as pl
from jax.experimental.pallas import tpu as pltpu

# ---------------- small, module-consistent configuration --------------------
B = 4                      # batch*width (input is [b*width, chan, height])
IN_CHANNELS = 32
HEADS = 4
DIM = 16                   # axial spatial length ("dim" ctor arg)
DIM_HEAD = IN_CHANNELS // HEADS          # dim_head_v
DIM_HEAD_KQ = 8
QKV_CHANNELS = DIM_HEAD + 2 * DIM_HEAD_KQ
COUT = HEADS * QKV_CHANNELS
EPS = 1e-5


# ---------------- relative 2D positional embeddings (host-side, once) -------
def relative_embeddings(relative, dim, dim_kq):
    # all_emb[c, x, y] = relative[c, x - y + dim - 1]
    idx = jnp.arange(dim)[:, None] - jnp.arange(dim)[None, :] + dim - 1
    all_emb = jnp.take(relative, idx, axis=1)               # (C, D, D)
    rq = all_emb[:dim_kq]
    rk = all_emb[dim_kq:2 * dim_kq]
    rv = all_emb[2 * dim_kq:]
    return rq, rk, rv


# ---------------- parameter folding (host-side, once) -----------------------
def fold_params(params):
    """Permute conv rows to head-major order, fold eval-mode BN affines."""
    H, QKV, DKQ = HEADS, QKV_CHANNELS, DIM_HEAD_KQ
    # original conv channel layout: c = q_idx*H + h  ('b (q h) d -> b h q d')
    # new layout:                  n = h*QKV + q_idx
    perm = (jnp.arange(QKV)[None, :] * H + jnp.arange(H)[:, None]).reshape(-1)
    w = params["w_qkv"][perm]
    scale = params["qkv_bn_scale"][perm]
    shift = params["qkv_bn_shift"][perm]
    # fold out_norm scale of the `out` branch (out_bn_scale[1, h, i]) into the
    # v rows of the qkv affine (out = attn @ v is linear in v).
    vfold = jnp.ones((H, QKV), jnp.float32)
    vfold = vfold.at[:, 2 * DKQ:].set(params["out_bn_scale"][1])
    vfold = vfold.reshape(-1)
    scale = scale * vfold
    shift = shift * vfold
    rq, rk, rv = relative_embeddings(params["relative"], DIM, DKQ)
    return dict(
        w=w,
        qkv_scale=scale[:, None],                            # (COUT, 1)
        qkv_shift=shift[:, None],                            # (COUT, 1)
        rq=rq, rk=rk, rv=rv,                                 # (C, D, D)
        attn_scale=params["attn_bn_scale"],                  # (H, 3)  -> SMEM
        attn_shift=params["attn_bn_shift"],                  # (H, 3)  -> SMEM
        out_scale0=params["out_bn_scale"][0].reshape(-1, 1),  # (H*Cv, 1)
        out_shift=(params["out_bn_shift"][0]
                   + params["out_bn_shift"][1]).reshape(-1, 1),
    )


# ---------------- fused kernel: 1x1 conv+BN -> axial attention -> out BN ----
def _make_fused_kernel(bb):
    def kernel(attn_s_ref, attn_t_ref,                 # SMEM (H, 3)
               x_ref,                                  # (bb, Cin, D)
               w_ref, qs_ref, qt_ref,                  # (COUT,Cin),(COUT,1)x2
               rq_ref, rk_ref, rv_ref,                 # (C, D, D)
               os0_ref, ot_ref,                        # (H*Cv, 1)
               o_ref):                                 # (bb, H*Cv, D)
        w = w_ref[...]
        qs = qs_ref[...]
        qt = qt_ref[...]
        rq = rq_ref[...]
        rk = rk_ref[...]
        rv = rv_ref[...]
        os0 = os0_ref[...]
        ot = ot_ref[...]

        for b in range(bb):                            # static, fully unrolled
            x = x_ref[b]                               # (Cin, D)
            # 1x1 Conv1d + folded BatchNorm1d (head-major channel order)
            qkv = jnp.dot(w, x, preferred_element_type=jnp.float32)
            qkv = qkv * qs + qt                        # (COUT, D)

            for h in range(HEADS):                     # static, fully unrolled
                base = h * QKV_CHANNELS
                q = qkv[base:base + DIM_HEAD_KQ]                    # (Ckq, D)
                k = qkv[base + DIM_HEAD_KQ:base + 2 * DIM_HEAD_KQ]  # (Ckq, D)
                v = qkv[base + 2 * DIM_HEAD_KQ:base + QKV_CHANNELS]  # (Cv, D)

                # qr[d,j] = sum_i q[i,d]*r_q[i,d,j]  (same for kr)
                qr = jnp.sum(q[:, :, None] * rq, axis=0)            # (D, D)
                kr = jnp.sum(k[:, :, None] * rk, axis=0)            # (D, D)
                # dots[d,j] = sum_i q[i,d]*k[i,j]
                dots = lax.dot_general(q, k, (((0,), (0,)), ((), ())),
                                       preferred_element_type=jnp.float32)

                # BatchNorm2d(heads*3), eval mode (channel = h*3 + n), sum n.
                norm = (qr * attn_s_ref[h, 0] + attn_t_ref[h, 0]
                        + kr * attn_s_ref[h, 1] + attn_t_ref[h, 1]
                        + dots * attn_s_ref[h, 2] + attn_t_ref[h, 2])

                # softmax over last axis j
                m = jnp.max(norm, axis=-1, keepdims=True)
                e = jnp.exp(norm - m)
                attn = e * pl.reciprocal(
                    jnp.sum(e, axis=-1, keepdims=True), approx=True)  # (D, D)

                # out[i,d] = sum_j attn[d,j]*v[i,j]  (v pre-scaled by out BN)
                out = lax.dot_general(v, attn, (((1,), (1,)), ((), ())),
                                      preferred_element_type=jnp.float32)
                # kv[i,d] = sum_j attn[d,j]*r_v[i,d,j]
                kv = jnp.sum(attn[None, :, :] * rv, axis=-1)         # (Cv, D)

                sl = slice(h * DIM_HEAD, (h + 1) * DIM_HEAD)
                o_ref[b, sl, :] = out + kv * os0[sl] + ot[sl]
    return kernel


def axial_attention_forward(x, folded):
    Bsz, Cin, D = x.shape
    bb = 2 if Bsz % 2 == 0 else 1          # keep >=2 parallel steps for v7x
    Cout = folded["w"].shape[0]
    HCv = HEADS * DIM_HEAD
    smem = pl.BlockSpec(memory_space=pltpu.MemorySpace.SMEM)
    return pl.pallas_call(
        _make_fused_kernel(bb),
        out_shape=jax.ShapeDtypeStruct((Bsz, HCv, D), jnp.float32),
        grid_spec=pltpu.PrefetchScalarGridSpec(
            num_scalar_prefetch=0,
            grid=(Bsz // bb,),
            in_specs=[
                smem, smem,                                          # attn BN
                pl.BlockSpec((bb, Cin, D), lambda g: (g, 0, 0)),     # x
                pl.BlockSpec((Cout, Cin), lambda g: (0, 0)),         # w
                pl.BlockSpec((Cout, 1), lambda g: (0, 0)),           # qkv scale
                pl.BlockSpec((Cout, 1), lambda g: (0, 0)),           # qkv shift
                pl.BlockSpec((DIM_HEAD_KQ, D, D), lambda g: (0, 0, 0)),  # rq
                pl.BlockSpec((DIM_HEAD_KQ, D, D), lambda g: (0, 0, 0)),  # rk
                pl.BlockSpec((DIM_HEAD, D, D), lambda g: (0, 0, 0)),     # rv
                pl.BlockSpec((HCv, 1), lambda g: (0, 0)),            # out scale0
                pl.BlockSpec((HCv, 1), lambda g: (0, 0)),            # out shift
            ],
            out_specs=pl.BlockSpec((bb, HCv, D), lambda g: (g, 0, 0)),
        ),
        compiler_params=pltpu.CompilerParams(
            dimension_semantics=("parallel",)),
    )(folded["attn_scale"], folded["attn_shift"],
      x, folded["w"], folded["qkv_scale"], folded["qkv_shift"],
      folded["rq"], folded["rk"], folded["rv"],
      folded["out_scale0"], folded["out_shift"])


# ---------------- pure-JAX reference (unfolded params) ----------------------
def reference_forward(x, params):
    qkv = jnp.einsum('oc,bcd->bod', params["w_qkv"], x)
    qkv = (qkv * params["qkv_bn_scale"][None, :, None]
           + params["qkv_bn_shift"][None, :, None])
    Bsz, _, D = qkv.shape
    qkv = qkv.reshape(Bsz, QKV_CHANNELS, HEADS, D).transpose(0, 2, 1, 3)
    q = qkv[:, :, :DIM_HEAD_KQ]
    k = qkv[:, :, DIM_HEAD_KQ:2 * DIM_HEAD_KQ]
    v = qkv[:, :, 2 * DIM_HEAD_KQ:]
    rq, rk, rv = relative_embeddings(params["relative"], D, DIM_HEAD_KQ)
    qr = jnp.einsum('bhid,idj->bhdj', q, rq)
    kr = jnp.einsum('bhid,idj->bhdj', k, rk)
    dots = jnp.einsum('bhid,bhij->bhdj', q, k)
    s, t = params["attn_bn_scale"], params["attn_bn_shift"]        # (H,3)
    norm = (qr * s[None, :, 0, None, None] + t[None, :, 0, None, None]
            + kr * s[None, :, 1, None, None] + t[None, :, 1, None, None]
            + dots * s[None, :, 2, None, None] + t[None, :, 2, None, None])
    attn = jax.nn.softmax(norm, axis=-1)
    out = jnp.einsum('bhdj,bhij->bhid', attn, v)
    kv = jnp.einsum('bhdj,idj->bhid', attn, rv)
    so, to = params["out_bn_scale"], params["out_bn_shift"]        # (2,H,Cv)
    kv_n = kv * so[0][None, :, :, None] + to[0][None, :, :, None]
    out_n = out * so[1][None, :, :, None] + to[1][None, :, :, None]
    return (kv_n + out_n).reshape(Bsz, HEADS * DIM_HEAD, D)


# ---------------- deterministic parameter construction ----------------------
def _bn_affine(key, c):
    k1, k2, k3, k4 = jax.random.split(key, 4)
    gamma = jax.random.uniform(k1, (c,), minval=0.5, maxval=1.5)
    beta = 0.1 * jax.random.normal(k2, (c,))
    mean = 0.1 * jax.random.normal(k3, (c,))
    var = jax.random.uniform(k4, (c,), minval=0.5, maxval=1.5)
    scale = gamma / jnp.sqrt(var + EPS)
    shift = beta - mean * scale
    return scale.astype(jnp.float32), shift.astype(jnp.float32)


def make_params(key):
    ks = jax.random.split(key, 6)
    w_qkv = (jax.random.normal(ks[0], (COUT, IN_CHANNELS), jnp.float32)
             / jnp.sqrt(IN_CHANNELS))
    qkv_scale, qkv_shift = _bn_affine(ks[1], COUT)
    relative = jax.random.normal(ks[2], (QKV_CHANNELS, 2 * DIM - 1), jnp.float32)
    a_scale, a_shift = _bn_affine(ks[3], 3 * HEADS)        # channel = h*3 + n
    o_scale, o_shift = _bn_affine(ks[4], 2 * IN_CHANNELS)  # channel = n*C + h*Cv + i
    return dict(
        w_qkv=w_qkv,
        qkv_bn_scale=qkv_scale, qkv_bn_shift=qkv_shift,
        relative=relative,
        attn_bn_scale=a_scale.reshape(HEADS, 3),
        attn_bn_shift=a_shift.reshape(HEADS, 3),
        out_bn_scale=o_scale.reshape(2, HEADS, DIM_HEAD),
        out_bn_shift=o_shift.reshape(2, HEADS, DIM_HEAD),
    )


if __name__ == "__main__":
    key = jax.random.PRNGKey(0)
    kx, kp = jax.random.split(key)
    x = jax.random.normal(kx, (B, IN_CHANNELS, DIM), jnp.float32)
    params = make_params(kp)
    folded = fold_params(params)          # done once, not per forward

    out = axial_attention_forward(x, folded)
    out = jax.block_until_ready(out)
    assert out.shape == (B, IN_CHANNELS, DIM), out.shape

    ref = jax.block_until_ready(reference_forward(x, params))
    assert jnp.allclose(out, ref, atol=2e-2, rtol=2e-2), (
        float(jnp.max(jnp.abs(out - ref))))

    print("KERNEL_OK")
</pallas_src>

<mosaic_0001>
module attributes {stable_mosaic.version = 11 : i64} {
  func.func @kernel(%arg0: i32, %arg1: memref<4x3xf32, #tpu.memory_space<smem>>, %arg2: memref<4x3xf32, #tpu.memory_space<smem>>, %arg3: memref<2x32x16xf32, #tpu.memory_space<vmem>>, %arg4: memref<96x32xf32, #tpu.memory_space<vmem>>, %arg5: memref<96x1xf32, #tpu.memory_space<vmem>>, %arg6: memref<96x1xf32, #tpu.memory_space<vmem>>, %arg7: memref<8x16x16xf32, #tpu.memory_space<vmem>>, %arg8: memref<8x16x16xf32, #tpu.memory_space<vmem>>, %arg9: memref<8x16x16xf32, #tpu.memory_space<vmem>>, %arg10: memref<32x1xf32, #tpu.memory_space<vmem>>, %arg11: memref<32x1xf32, #tpu.memory_space<vmem>>, %arg12: memref<2x32x16xf32, #tpu.memory_space<vmem>>) attributes {dimension_semantics = [#tpu.dimension_semantics<parallel>], iteration_bounds = array<i64: 2>, scalar_prefetch = 0 : i64, scratch_operands = 0 : i64, tpu.core_type = #tpu.core_type<tc>, window_params = [{transform_indices = @transform_0, window_bounds = array<i64: 4, 3>}, {transform_indices = @transform_1, window_bounds = array<i64: 4, 3>}, {transform_indices = @transform_2, window_bounds = array<i64: 2, 32, 16>}, {pipeline_mode = #tpu.pipeline_mode<synchronous>, transform_indices = @transform_3, window_bounds = array<i64: 96, 32>}, {pipeline_mode = #tpu.pipeline_mode<synchronous>, transform_indices = @transform_4, window_bounds = array<i64: 96, 1>}, {pipeline_mode = #tpu.pipeline_mode<synchronous>, transform_indices = @transform_5, window_bounds = array<i64: 96, 1>}, {pipeline_mode = #tpu.pipeline_mode<synchronous>, transform_indices = @transform_6, window_bounds = array<i64: 8, 16, 16>}, {pipeline_mode = #tpu.pipeline_mode<synchronous>, transform_indices = @transform_7, window_bounds = array<i64: 8, 16, 16>}, {pipeline_mode = #tpu.pipeline_mode<synchronous>, transform_indices = @transform_8, window_bounds = array<i64: 8, 16, 16>}, {pipeline_mode = #tpu.pipeline_mode<synchronous>, transform_indices = @transform_9, window_bounds = array<i64: 32, 1>}, {pipeline_mode = #tpu.pipeline_mode<synchronous>, transform_indices = @transform_10, window_bounds = array<i64: 32, 1>}, {transform_indices = @transform_11, window_bounds = array<i64: 2, 32, 16>}]} {
    %c0 = arith.constant 0 : index
    %c0_0 = arith.constant 0 : index
    %0 = vector.load %arg4[%c0, %c0_0] : memref<96x32xf32, #tpu.memory_space<vmem>>, vector<96x32xf32>
    %c0_1 = arith.constant 0 : index
    %c0_2 = arith.constant 0 : index
    %1 = vector.load %arg5[%c0_1, %c0_2] : memref<96x1xf32, #tpu.memory_space<vmem>>, vector<96x1xf32>
    %c0_3 = arith.constant 0 : index
    %c0_4 = arith.constant 0 : index
    %2 = vector.load %arg6[%c0_3, %c0_4] : memref<96x1xf32, #tpu.memory_space<vmem>>, vector<96x1xf32>
    %c0_5 = arith.constant 0 : index
    %c0_6 = arith.constant 0 : index
    %c0_7 = arith.constant 0 : index
    %3 = vector.load %arg7[%c0_5, %c0_6, %c0_7] : memref<8x16x16xf32, #tpu.memory_space<vmem>>, vector<8x16x16xf32>
    %c0_8 = arith.constant 0 : index
    %c0_9 = arith.constant 0 : index
    %c0_10 = arith.constant 0 : index
    %4 = vector.load %arg8[%c0_8, %c0_9, %c0_10] : memref<8x16x16xf32, #tpu.memory_space<vmem>>, vector<8x16x16xf32>
    %c0_11 = arith.constant 0 : index
    %c0_12 = arith.constant 0 : index
    %c0_13 = arith.constant 0 : index
    %5 = vector.load %arg9[%c0_11, %c0_12, %c0_13] : memref<8x16x16xf32, #tpu.memory_space<vmem>>, vector<8x16x16xf32>
    %c0_14 = arith.constant 0 : index
    %c0_15 = arith.constant 0 : index
    %6 = vector.load %arg10[%c0_14, %c0_15] : memref<32x1xf32, #tpu.memory_space<vmem>>, vector<32x1xf32>
    %c0_16 = arith.constant 0 : index
    %c0_17 = arith.constant 0 : index
    %7 = vector.load %arg11[%c0_16, %c0_17] : memref<32x1xf32, #tpu.memory_space<vmem>>, vector<32x1xf32>
    %c0_18 = arith.constant 0 : index
    %c0_19 = arith.constant 0 : index
    %c0_20 = arith.constant 0 : index
    %8 = vector.load %arg3[%c0_18, %c0_19, %c0_20] : memref<2x32x16xf32, #tpu.memory_space<vmem>>, vector<1x32x16xf32>
    %9 = vector.shape_cast %8 : vector<1x32x16xf32> to vector<32x16xf32>
    %cst = arith.constant dense<0.000000e+00> : vector<96x16xf32>
    %10 = tpu.matmul %0, %9, %cst {dimension_numbers = #tpu.dot_dimension_numbers<[1], [0], [0], [1], [0, 0, 1, 1], [], []>} : vector<96x32xf32>, vector<32x16xf32>, vector<96x16xf32> -> vector<96x16xf32>
    %11 = vector.broadcast %1 : vector<96x1xf32> to vector<96x16xf32>
    %12 = arith.mulf %10, %11 : vector<96x16xf32>
    %13 = vector.broadcast %2 : vector<96x1xf32> to vector<96x16xf32>
    %14 = arith.addf %12, %13 : vector<96x16xf32>
    %15 = vector.extract_strided_slice %14 {offsets = [0, 0], sizes = [8, 16], strides = [1, 1]} : vector<96x16xf32> to vector<8x16xf32>
    %16 = vector.extract_strided_slice %14 {offsets = [8, 0], sizes = [8, 16], strides = [1, 1]} : vector<96x16xf32> to vector<8x16xf32>
    %17 = vector.extract_strided_slice %14 {offsets = [16, 0], sizes = [8, 16], strides = [1, 1]} : vector<96x16xf32> to vector<8x16xf32>
    %18 = vector.shape_cast %15 : vector<8x16xf32> to vector<8x16x1xf32>
    %19 = vector.broadcast %18 : vector<8x16x1xf32> to vector<8x16x16xf32>
    %20 = arith.mulf %19, %3 : vector<8x16x16xf32>
    %cst_21 = arith.constant dense<0.000000e+00> : vector<16x16xf32>
    %21 = vector.multi_reduction <add>, %20, %cst_21 [0] : vector<8x16x16xf32> to vector<16x16xf32>
    %22 = vector.shape_cast %16 : vector<8x16xf32> to vector<8x16x1xf32>
    %23 = vector.broadcast %22 : vector<8x16x1xf32> to vector<8x16x16xf32>
    %24 = arith.mulf %23, %4 : vector<8x16x16xf32>
    %cst_22 = arith.constant dense<0.000000e+00> : vector<16x16xf32>
    %25 = vector.multi_reduction <add>, %24, %cst_22 [0] : vector<8x16x16xf32> to vector<16x16xf32>
    %cst_23 = arith.constant dense<0.000000e+00> : vector<16x16xf32>
    %26 = tpu.matmul %15, %16, %cst_23 {dimension_numbers = #tpu.dot_dimension_numbers<[0], [0], [1], [1], [0, 1, 1, 1], [], []>} : vector<8x16xf32>, vector<8x16xf32>, vector<16x16xf32> -> vector<16x16xf32>
    %c0_24 = arith.constant 0 : index
    %c0_25 = arith.constant 0 : index
    %27 = memref.load %arg1[%c0_24, %c0_25] : memref<4x3xf32, #tpu.memory_space<smem>>
    %28 = vector.broadcast %27 : f32 to vector<16x16xf32>
    %29 = arith.mulf %21, %28 : vector<16x16xf32>
    %c0_26 = arith.constant 0 : index
    %c0_27 = arith.constant 0 : index
    %30 = memref.load %arg2[%c0_26, %c0_27] : memref<4x3xf32, #tpu.memory_space<smem>>
    %31 = vector.broadcast %30 : f32 to vector<16x16xf32>
    %32 = arith.addf %29, %31 : vector<16x16xf32>
    %c0_28 = arith.constant 0 : index
    %c1 = arith.constant 1 : index
    %33 = memref.load %arg1[%c0_28, %c1] : memref<4x3xf32, #tpu.memory_space<smem>>
    %34 = vector.broadcast %33 : f32 to vector<16x16xf32>
    %35 = arith.mulf %25, %34 : vector<16x16xf32>
    %36 = arith.addf %32, %35 : vector<16x16xf32>
    %c0_29 = arith.constant 0 : index
    %c1_30 = arith.constant 1 : index
    %37 = memref.load %arg2[%c0_29, %c1_30] : memref<4x3xf32, #tpu.memory_space<smem>>
    %38 = vector.broadcast %37 : f32 to vector<16x16xf32>
    %39 = arith.addf %36, %38 : vector<16x16xf32>
    %c0_31 = arith.constant 0 : index
    %c2 = arith.constant 2 : index
    %40 = memref.load %arg1[%c0_31, %c2] : memref<4x3xf32, #tpu.memory_space<smem>>
    %41 = vector.broadcast %40 : f32 to vector<16x16xf32>
    %42 = arith.mulf %26, %41 : vector<16x16xf32>
    %43 = arith.addf %39, %42 : vector<16x16xf32>
    %c0_32 = arith.constant 0 : index
    %c2_33 = arith.constant 2 : index
    %44 = memref.load %arg2[%c0_32, %c2_33] : memref<4x3xf32, #tpu.memory_space<smem>>
    %45 = vector.broadcast %44 : f32 to vector<16x16xf32>
    %46 = arith.addf %43, %45 : vector<16x16xf32>
    %cst_34 = arith.constant dense<0xFF800000> : vector<16xf32>
    %47 = vector.multi_reduction <maximumf>, %46, %cst_34 [1] : vector<16x16xf32> to vector<16xf32>
    %48 = vector.shape_cast %47 : vector<16xf32> to vector<16x1xf32>
    %49 = vector.broadcast %48 : vector<16x1xf32> to vector<16x16xf32>
    %50 = arith.subf %46, %49 : vector<16x16xf32>
    %51 = math.exp %50 : vector<16x16xf32>
    %cst_35 = arith.constant dense<0.000000e+00> : vector<16xf32>
    %52 = vector.multi_reduction <add>, %51, %cst_35 [1] : vector<16x16xf32> to vector<16xf32>
    %53 = vector.shape_cast %52 : vector<16xf32> to vector<16x1xf32>
    %54 = tpu.reciprocal %53 {approx = true} : vector<16x1xf32> -> vector<16x1xf32>
    %55 = vector.broadcast %54 : vector<16x1xf32> to vector<16x16xf32>
    %56 = arith.mulf %51, %55 : vector<16x16xf32>
    %cst_36 = arith.constant dense<0.000000e+00> : vector<8x16xf32>
    %57 = tpu.matmul %17, %56, %cst_36 {dimension_numbers = #tpu.dot_dimension_numbers<[1], [1], [0], [0], [0, 0, 1, 0], [], []>} : vector<8x16xf32>, vector<16x16xf32>, vector<8x16xf32> -> vector<8x16xf32>
    %58 = vector.shape_cast %56 : vector<16x16xf32> to vector<1x16x16xf32>
    %59 = vector.broadcast %58 : vector<1x16x16xf32> to vector<8x16x16xf32>
    %60 = arith.mulf %59, %5 : vector<8x16x16xf32>
    %cst_37 = arith.constant dense<0.000000e+00> : vector<8x16xf32>
    %61 = vector.multi_reduction <add>, %60, %cst_37 [2] : vector<8x16x16xf32> to vector<8x16xf32>
    %62 = vector.extract_strided_slice %6 {offsets = [0, 0], sizes = [8, 1], strides = [1, 1]} : vector<32x1xf32> to vector<8x1xf32>
    %63 = vector.broadcast %62 : vector<8x1xf32> to vector<8x16xf32>
    %64 = arith.mulf %61, %63 : vector<8x16xf32>
    %65 = arith.addf %57, %64 : vector<8x16xf32>
    %66 = vector.extract_strided_slice %7 {offsets = [0, 0], sizes = [8, 1], strides = [1, 1]} : vector<32x1xf32> to vector<8x1xf32>
    %67 = vector.broadcast %66 : vector<8x1xf32> to vector<8x16xf32>
    %68 = arith.addf %65, %67 : vector<8x16xf32>
    %c0_38 = arith.constant 0 : index
    %c0_39 = arith.constant 0 : index
    %c0_40 = arith.constant 0 : index
    %69 = vector.load %arg12[%c0_38, %c0_39, %c0_40] : memref<2x32x16xf32, #tpu.memory_space<vmem>>, vector<1x8x16xf32>
    %70 = vector.shape_cast %69 : vector<1x8x16xf32> to vector<8x16xf32>
    %71 = vector.shape_cast %68 : vector<8x16xf32> to vector<1x8x16xf32>
    tpu.vector_store %arg12[%c0_38, %c0_39, %c0_40], %71 {strides = array<i32>} : memref<2x32x16xf32, #tpu.memory_space<vmem>>, vector<1x8x16xf32>,
    %72 = vector.extract_strided_slice %14 {offsets = [24, 0], sizes = [8, 16], strides = [1, 1]} : vector<96x16xf32> to vector<8x16xf32>
    %73 = vector.extract_strided_slice %14 {offsets = [32, 0], sizes = [8, 16], strides = [1, 1]} : vector<96x16xf32> to vector<8x16xf32>
    %74 = vector.extract_strided_slice %14 {offsets = [40, 0], sizes = [8, 16], strides = [1, 1]} : vector<96x16xf32> to vector<8x16xf32>
    %75 = vector.shape_cast %72 : vector<8x16xf32> to vector<8x16x1xf32>
    %76 = vector.broadcast %75 : vector<8x16x1xf32> to vector<8x16x16xf32>
    %77 = arith.mulf %76, %3 : vector<8x16x16xf32>
    %cst_41 = arith.constant dense<0.000000e+00> : vector<16x16xf32>
    %78 = vector.multi_reduction <add>, %77, %cst_41 [0] : vector<8x16x16xf32> to vector<16x16xf32>
    %79 = vector.shape_cast %73 : vector<8x16xf32> to vector<8x16x1xf32>
    %80 = vector.broadcast %79 : vector<8x16x1xf32> to vector<8x16x16xf32>
    %81 = arith.mulf %80, %4 : vector<8x16x16xf32>
    %cst_42 = arith.constant dense<0.000000e+00> : vector<16x16xf32>
    %82 = vector.multi_reduction <add>, %81, %cst_42 [0] : vector<8x16x16xf32> to vector<16x16xf32>
    %cst_43 = arith.constant dense<0.000000e+00> : vector<16x16xf32>
    %83 = tpu.matmul %72, %73, %cst_43 {dimension_numbers = #tpu.dot_dimension_numbers<[0], [0], [1], [1], [0, 1, 1, 1], [], []>} : vector<8x16xf32>, vector<8x16xf32>, vector<16x16xf32> -> vector<16x16xf32>
    %c1_44 = arith.constant 1 : index
    %c0_45 = arith.constant 0 : index
    %84 = memref.load %arg1[%c1_44, %c0_45] : memref<4x3xf32, #tpu.memory_space<smem>>
    %85 = vector.broadcast %84 : f32 to vector<16x16xf32>
    %86 = arith.mulf %78, %85 : vector<16x16xf32>
    %c1_46 = arith.constant 1 : index
    %c0_47 = arith.constant 0 : index
    %87 = memref.load %arg2[%c1_46, %c0_47] : memref<4x3xf32, #tpu.memory_space<smem>>
    %88 = vector.broadcast %87 : f32 to vector<16x16xf32>
    %89 = arith.addf %86, %88 : vector<16x16xf32>
    %c1_48 = arith.constant 1 : index
    %c1_49 = arith.constant 1 : index
    %90 = memref.load %arg1[%c1_48, %c1_49] : memref<4x3xf32, #tpu.memory_space<smem>>
    %91 = vector.broadcast %90 : f32 to vector<16x16xf32>
    %92 = arith.mulf %82, %91 : vector<16x16xf32>
    %93 = arith.addf %89, %92 : vector<16x16xf32>
    %c1_50 = arith.constant 1 : index
    %c1_51 = arith.constant 1 : index
    %94 = memref.load %arg2[%c1_50, %c1_51] : memref<4x3xf32, #tpu.memory_space<smem>>
    %95 = vector.broadcast %94 : f32 to vector<16x16xf32>
    %96 = arith.addf %93, %95 : vector<16x16xf32>
    %c1_52 = arith.constant 1 : index
    %c2_53 = arith.constant 2 : index
    %97 = memref.load %arg1[%c1_52, %c2_53] : memref<4x3xf32, #tpu.memory_space<smem>>
    %98 = vector.broadcast %97 : f32 to vector<16x16xf32>
    %99 = arith.mulf %83, %98 : vector<16x16xf32>
    %100 = arith.addf %96, %99 : vector<16x16xf32>
    %c1_54 = arith.constant 1 : index
    %c2_55 = arith.constant 2 : index
    %101 = memref.load %arg2[%c1_54, %c2_55] : memref<4x3xf32, #tpu.memory_space<smem>>
    %102 = vector.broadcast %101 : f32 to vector<16x16xf32>
    %103 = arith.addf %100, %102 : vector<16x16xf32>
    %cst_56 = arith.constant dense<0xFF800000> : vector<16xf32>
    %104 = vector.multi_reduction <maximumf>, %103, %cst_56 [1] : vector<16x16xf32> to vector<16xf32>
    %105 = vector.shape_cast %104 : vector<16xf32> to vector<16x1xf32>
    %106 = vector.broadcast %105 : vector<16x1xf32> to vector<16x16xf32>
    %107 = arith.subf %103, %106 : vector<16x16xf32>
    %108 = math.exp %107 : vector<16x16xf32>
    %cst_57 = arith.constant dense<0.000000e+00> : vector<16xf32>
    %109 = vector.multi_reduction <add>, %108, %cst_57 [1] : vector<16x16xf32> to vector<16xf32>
    %110 = vector.shape_cast %109 : vector<16xf32> to vector<16x1xf32>
    %111 = tpu.reciprocal %110 {approx = true} : vector<16x1xf32> -> vector<16x1xf32>
    %112 = vector.broadcast %111 : vector<16x1xf32> to vector<16x16xf32>
    %113 = arith.mulf %108, %112 : vector<16x16xf32>
    %cst_58 = arith.constant dense<0.000000e+00> : vector<8x16xf32>
    %114 = tpu.matmul %74, %113, %cst_58 {dimension_numbers = #tpu.dot_dimension_numbers<[1], [1], [0], [0], [0, 0, 1, 0], [], []>} : vector<8x16xf32>, vector<16x16xf32>, vector<8x16xf32> -> vector<8x16xf32>
    %115 = vector.shape_cast %113 : vector<16x16xf32> to vector<1x16x16xf32>
    %116 = vector.broadcast %115 : vector<1x16x16xf32> to vector<8x16x16xf32>
    %117 = arith.mulf %116, %5 : vector<8x16x16xf32>
    %cst_59 = arith.constant dense<0.000000e+00> : vector<8x16xf32>
    %118 = vector.multi_reduction <add>, %117, %cst_59 [2] : vector<8x16x16xf32> to vector<8x16xf32>
    %119 = vector.extract_strided_slice %6 {offsets = [8, 0], sizes = [8, 1], strides = [1, 1]} : vector<32x1xf32> to vector<8x1xf32>
    %120 = vector.broadcast %119 : vector<8x1xf32> to vector<8x16xf32>
    %121 = arith.mulf %118, %120 : vector<8x16xf32>
    %122 = arith.addf %114, %121 : vector<8x16xf32>
    %123 = vector.extract_strided_slice %7 {offsets = [8, 0], sizes = [8, 1], strides = [1, 1]} : vector<32x1xf32> to vector<8x1xf32>
    %124 = vector.broadcast %123 : vector<8x1xf32> to vector<8x16xf32>
    %125 = arith.addf %122, %124 : vector<8x16xf32>
    %c0_60 = arith.constant 0 : index
    %c8 = arith.constant 8 : index
    %c0_61 = arith.constant 0 : index
    %126 = vector.load %arg12[%c0_60, %c8, %c0_61] : memref<2x32x16xf32, #tpu.memory_space<vmem>>, vector<1x8x16xf32>
    %127 = vector.shape_cast %126 : vector<1x8x16xf32> to vector<8x16xf32>
    %128 = vector.shape_cast %125 : vector<8x16xf32> to vector<1x8x16xf32>
    tpu.vector_store %arg12[%c0_60, %c8, %c0_61], %128 {strides = array<i32>} : memref<2x32x16xf32, #tpu.memory_space<vmem>>, vector<1x8x16xf32>,
    %129 = vector.extract_strided_slice %14 {offsets = [48, 0], sizes = [8, 16], strides = [1, 1]} : vector<96x16xf32> to vector<8x16xf32>
    %130 = vector.extract_strided_slice %14 {offsets = [56, 0], sizes = [8, 16], strides = [1, 1]} : vector<96x16xf32> to vector<8x16xf32>
    %131 = vector.extract_strided_slice %14 {offsets = [64, 0], sizes = [8, 16], strides = [1, 1]} : vector<96x16xf32> to vector<8x16xf32>
    %132 = vector.shape_cast %129 : vector<8x16xf32> to vector<8x16x1xf32>
    %133 = vector.broadcast %132 : vector<8x16x1xf32> to vector<8x16x16xf32>
    %134 = arith.mulf %133, %3 : vector<8x16x16xf32>
    %cst_62 = arith.constant dense<0.000000e+00> : vector<16x16xf32>
    %135 = vector.multi_reduction <add>, %134, %cst_62 [0] : vector<8x16x16xf32> to vector<16x16xf32>
    %136 = vector.shape_cast %130 : vector<8x16xf32> to vector<8x16x1xf32>
    %137 = vector.broadcast %136 : vector<8x16x1xf32> to vector<8x16x16xf32>
    %138 = arith.mulf %137, %4 : vector<8x16x16xf32>
    %cst_63 = arith.constant dense<0.000000e+00> : vector<16x16xf32>
    %139 = vector.multi_reduction <add>, %138, %cst_63 [0] : vector<8x16x16xf32> to vector<16x16xf32>
    %cst_64 = arith.constant dense<0.000000e+00> : vector<16x16xf32>
    %140 = tpu.matmul %129, %130, %cst_64 {dimension_numbers = #tpu.dot_dimension_numbers<[0], [0], [1], [1], [0, 1, 1, 1], [], []>} : vector<8x16xf32>, vector<8x16xf32>, vector<16x16xf32> -> vector<16x16xf32>
    %c2_65 = arith.constant 2 : index
    %c0_66 = arith.constant 0 : index
    %141 = memref.load %arg1[%c2_65, %c0_66] : memref<4x3xf32, #tpu.memory_space<smem>>
    %142 = vector.broadcast %141 : f32 to vector<16x16xf32>
    %143 = arith.mulf %135, %142 : vector<16x16xf32>
    %c2_67 = arith.constant 2 : index
    %c0_68 = arith.constant 0 : index
    %144 = memref.load %arg2[%c2_67, %c0_68] : memref<4x3xf32, #tpu.memory_space<smem>>
    %145 = vector.broadcast %144 : f32 to vector<16x16xf32>
    %146 = arith.addf %143, %145 : vector<16x16xf32>
    %c2_69 = arith.constant 2 : index
    %c1_70 = arith.constant 1 : index
    %147 = memref.load %arg1[%c2_69, %c1_70] : memref<4x3xf32, #tpu.memory_space<smem>>
    %148 = vector.broadcast %147 : f32 to vector<16x16xf32>
    %149 = arith.mulf %139, %148 : vector<16x16xf32>
    %150 = arith.addf %146, %149 : vector<16x16xf32>
    %c2_71 = arith.constant 2 : index
    %c1_72 = arith.constant 1 : index
    %151 = memref.load %arg2[%c2_71, %c1_72] : memref<4x3xf32, #tpu.memory_space<smem>>
    %152 = vector.broadcast %151 : f32 to vector<16x16xf32>
    %153 = arith.addf %150, %152 : vector<16x16xf32>
    %c2_73 = arith.constant 2 : index
    %c2_74 = arith.constant 2 : index
    %154 = memref.load %arg1[%c2_73, %c2_74] : memref<4x3xf32, #tpu.memory_space<smem>>
    %155 = vector.broadcast %154 : f32 to vector<16x16xf32>
    %156 = arith.mulf %140, %155 : vector<16x16xf32>
    %157 = arith.addf %153, %156 : vector<16x16xf32>
    %c2_75 = arith.constant 2 : index
    %c2_76 = arith.constant 2 : index
    %158 = memref.load %arg2[%c2_75, %c2_76] : memref<4x3xf32, #tpu.memory_space<smem>>
    %159 = vector.broadcast %158 : f32 to vector<16x16xf32>
    %160 = arith.addf %157, %159 : vector<16x16xf32>
    %cst_77 = arith.constant dense<0xFF800000> : vector<16xf32>
    %161 = vector.multi_reduction <maximumf>, %160, %cst_77 [1] : vector<16x16xf32> to vector<16xf32>
    %162 = vector.shape_cast %161 : vector<16xf32> to vector<16x1xf32>
    %163 = vector.broadcast %162 : vector<16x1xf32> to vector<16x16xf32>
    %164 = arith.subf %160, %163 : vector<16x16xf32>
    %165 = math.exp %164 : vector<16x16xf32>
    %cst_78 = arith.constant dense<0.000000e+00> : vector<16xf32>
    %166 = vector.multi_reduction <add>, %165, %cst_78 [1] : vector<16x16xf32> to vector<16xf32>
    %167 = vector.shape_cast %166 : vector<16xf32> to vector<16x1xf32>
    %168 = tpu.reciprocal %167 {approx = true} : vector<16x1xf32> -> vector<16x1xf32>
    %169 = vector.broadcast %168 : vector<16x1xf32> to vector<16x16xf32>
    %170 = arith.mulf %165, %169 : vector<16x16xf32>
    %cst_79 = arith.constant dense<0.000000e+00> : vector<8x16xf32>
    %171 = tpu.matmul %131, %170, %cst_79 {dimension_numbers = #tpu.dot_dimension_numbers<[1], [1], [0], [0], [0, 0, 1, 0], [], []>} : vector<8x16xf32>, vector<16x16xf32>, vector<8x16xf32> -> vector<8x16xf32>
    %172 = vector.shape_cast %170 : vector<16x16xf32> to vector<1x16x16xf32>
    %173 = vector.broadcast %172 : vector<1x16x16xf32> to vector<8x16x16xf32>
    %174 = arith.mulf %173, %5 : vector<8x16x16xf32>
    %cst_80 = arith.constant dense<0.000000e+00> : vector<8x16xf32>
    %175 = vector.multi_reduction <add>, %174, %cst_80 [2] : vector<8x16x16xf32> to vector<8x16xf32>
    %176 = vector.extract_strided_slice %6 {offsets = [16, 0], sizes = [8, 1], strides = [1, 1]} : vector<32x1xf32> to vector<8x1xf32>
    %177 = vector.broadcast %176 : vector<8x1xf32> to vector<8x16xf32>
    %178 = arith.mulf %175, %177 : vector<8x16xf32>
    %179 = arith.addf %171, %178 : vector<8x16xf32>
    %180 = vector.extract_strided_slice %7 {offsets = [16, 0], sizes = [8, 1], strides = [1, 1]} : vector<32x1xf32> to vector<8x1xf32>
    %181 = vector.broadcast %180 : vector<8x1xf32> to vector<8x16xf32>
    %182 = arith.addf %179, %181 : vector<8x16xf32>
    %c0_81 = arith.constant 0 : index
    %c16 = arith.constant 16 : index
    %c0_82 = arith.constant 0 : index
    %183 = vector.load %arg12[%c0_81, %c16, %c0_82] : memref<2x32x16xf32, #tpu.memory_space<vmem>>, vector<1x8x16xf32>
    %184 = vector.shape_cast %183 : vector<1x8x16xf32> to vector<8x16xf32>
    %185 = vector.shape_cast %182 : vector<8x16xf32> to vector<1x8x16xf32>
    tpu.vector_store %arg12[%c0_81, %c16, %c0_82], %185 {strides = array<i32>} : memref<2x32x16xf32, #tpu.memory_space<vmem>>, vector<1x8x16xf32>,
    %186 = vector.extract_strided_slice %14 {offsets = [72, 0], sizes = [8, 16], strides = [1, 1]} : vector<96x16xf32> to vector<8x16xf32>
    %187 = vector.extract_strided_slice %14 {offsets = [80, 0], sizes = [8, 16], strides = [1, 1]} : vector<96x16xf32> to vector<8x16xf32>
    %188 = vector.extract_strided_slice %14 {offsets = [88, 0], sizes = [8, 16], strides = [1, 1]} : vector<96x16xf32> to vector<8x16xf32>
    %189 = vector.shape_cast %186 : vector<8x16xf32> to vector<8x16x1xf32>
    %190 = vector.broadcast %189 : vector<8x16x1xf32> to vector<8x16x16xf32>
    %191 = arith.mulf %190, %3 : vector<8x16x16xf32>
    %cst_83 = arith.constant dense<0.000000e+00> : vector<16x16xf32>
    %192 = vector.multi_reduction <add>, %191, %cst_83 [0] : vector<8x16x16xf32> to vector<16x16xf32>
    %193 = vector.shape_cast %187 : vector<8x16xf32> to vector<8x16x1xf32>
    %194 = vector.broadcast %193 : vector<8x16x1xf32> to vector<8x16x16xf32>
    %195 = arith.mulf %194, %4 : vector<8x16x16xf32>
    %cst_84 = arith.constant dense<0.000000e+00> : vector<16x16xf32>
    %196 = vector.multi_reduction <add>, %195, %cst_84 [0] : vector<8x16x16xf32> to vector<16x16xf32>
    %cst_85 = arith.constant dense<0.000000e+00> : vector<16x16xf32>
    %197 = tpu.matmul %186, %187, %cst_85 {dimension_numbers = #tpu.dot_dimension_numbers<[0], [0], [1], [1], [0, 1, 1, 1], [], []>} : vector<8x16xf32>, vector<8x16xf32>, vector<16x16xf32> -> vector<16x16xf32>
    %c3 = arith.constant 3 : index
    %c0_86 = arith.constant 0 : index
    %198 = memref.load %arg1[%c3, %c0_86] : memref<4x3xf32, #tpu.memory_space<smem>>
    %199 = vector.broadcast %198 : f32 to vector<16x16xf32>
    %200 = arith.mulf %192, %199 : vector<16x16xf32>
    %c3_87 = arith.constant 3 : index
    %c0_88 = arith.constant 0 : index
    %201 = memref.load %arg2[%c3_87, %c0_88] : memref<4x3xf32, #tpu.memory_space<smem>>
    %202 = vector.broadcast %201 : f32 to vector<16x16xf32>
    %203 = arith.addf %200, %202 : vector<16x16xf32>
    %c3_89 = arith.constant 3 : index
    %c1_90 = arith.constant 1 : index
    %204 = memref.load %arg1[%c3_89, %c1_90] : memref<4x3xf32, #tpu.memory_space<smem>>
    %205 = vector.broadcast %204 : f32 to vector<16x16xf32>
    %206 = arith.mulf %196, %205 : vector<16x16xf32>
    %207 = arith.addf %203, %206 : vector<16x16xf32>
    %c3_91 = arith.constant 3 : index
    %c1_92 = arith.constant 1 : index
    %208 = memref.load %arg2[%c3_91, %c1_92] : memref<4x3xf32, #tpu.memory_space<smem>>
    %209 = vector.broadcast %208 : f32 to vector<16x16xf32>
    %210 = arith.addf %207, %209 : vector<16x16xf32>
    %c3_93 = arith.constant 3 : index
    %c2_94 = arith.constant 2 : index
    %211 = memref.load %arg1[%c3_93, %c2_94] : memref<4x3xf32, #tpu.memory_space<smem>>
    %212 = vector.broadcast %211 : f32 to vector<16x16xf32>
    %213 = arith.mulf %197, %212 : vector<16x16xf32>
    %214 = arith.addf %210, %213 : vector<16x16xf32>
    %c3_95 = arith.constant 3 : index
    %c2_96 = arith.constant 2 : index
    %215 = memref.load %arg2[%c3_95, %c2_96] : memref<4x3xf32, #tpu.memory_space<smem>>
    %216 = vector.broadcast %215 : f32 to vector<16x16xf32>
    %217 = arith.addf %214, %216 : vector<16x16xf32>
    %cst_97 = arith.constant dense<0xFF800000> : vector<16xf32>
    %218 = vector.multi_reduction <maximumf>, %217, %cst_97 [1] : vector<16x16xf32> to vector<16xf32>
    %219 = vector.shape_cast %218 : vector<16xf32> to vector<16x1xf32>
    %220 = vector.broadcast %219 : vector<16x1xf32> to vector<16x16xf32>
    %221 = arith.subf %217, %220 : vector<16x16xf32>
    %222 = math.exp %221 : vector<16x16xf32>
    %cst_98 = arith.constant dense<0.000000e+00> : vector<16xf32>
    %223 = vector.multi_reduction <add>, %222, %cst_98 [1] : vector<16x16xf32> to vector<16xf32>
    %224 = vector.shape_cast %223 : vector<16xf32> to vector<16x1xf32>
    %225 = tpu.reciprocal %224 {approx = true} : vector<16x1xf32> -> vector<16x1xf32>
    %226 = vector.broadcast %225 : vector<16x1xf32> to vector<16x16xf32>
    %227 = arith.mulf %222, %226 : vector<16x16xf32>
    %cst_99 = arith.constant dense<0.000000e+00> : vector<8x16xf32>
    %228 = tpu.matmul %188, %227, %cst_99 {dimension_numbers = #tpu.dot_dimension_numbers<[1], [1], [0], [0], [0, 0, 1, 0], [], []>} : vector<8x16xf32>, vector<16x16xf32>, vector<8x16xf32> -> vector<8x16xf32>
    %229 = vector.shape_cast %227 : vector<16x16xf32> to vector<1x16x16xf32>
    %230 = vector.broadcast %229 : vector<1x16x16xf32> to vector<8x16x16xf32>
    %231 = arith.mulf %230, %5 : vector<8x16x16xf32>
    %cst_100 = arith.constant dense<0.000000e+00> : vector<8x16xf32>
    %232 = vector.multi_reduction <add>, %231, %cst_100 [2] : vector<8x16x16xf32> to vector<8x16xf32>
    %233 = vector.extract_strided_slice %6 {offsets = [24, 0], sizes = [8, 1], strides = [1, 1]} : vector<32x1xf32> to vector<8x1xf32>
    %234 = vector.broadcast %233 : vector<8x1xf32> to vector<8x16xf32>
    %235 = arith.mulf %232, %234 : vector<8x16xf32>
    %236 = arith.addf %228, %235 : vector<8x16xf32>
    %237 = vector.extract_strided_slice %7 {offsets = [24, 0], sizes = [8, 1], strides = [1, 1]} : vector<32x1xf32> to vector<8x1xf32>
    %238 = vector.broadcast %237 : vector<8x1xf32> to vector<8x16xf32>
    %239 = arith.addf %236, %238 : vector<8x16xf32>
    %c0_101 = arith.constant 0 : index
    %c24 = arith.constant 24 : index
    %c0_102 = arith.constant 0 : index
    %240 = vector.load %arg12[%c0_101, %c24, %c0_102] : memref<2x32x16xf32, #tpu.memory_space<vmem>>, vector<1x8x16xf32>
    %241 = vector.shape_cast %240 : vector<1x8x16xf32> to vector<8x16xf32>
    %242 = vector.shape_cast %239 : vector<8x16xf32> to vector<1x8x16xf32>
    tpu.vector_store %arg12[%c0_101, %c24, %c0_102], %242 {strides = array<i32>} : memref<2x32x16xf32, #tpu.memory_space<vmem>>, vector<1x8x16xf32>,
    %c1_103 = arith.constant 1 : index
    %c0_104 = arith.constant 0 : index
    %c0_105 = arith.constant 0 : index
    %243 = vector.load %arg3[%c1_103, %c0_104, %c0_105] : memref<2x32x16xf32, #tpu.memory_space<vmem>>, vector<1x32x16xf32>
    %244 = vector.shape_cast %243 : vector<1x32x16xf32> to vector<32x16xf32>
    %cst_106 = arith.constant dense<0.000000e+00> : vector<96x16xf32>
    %245 = tpu.matmul %0, %244, %cst_106 {dimension_numbers = #tpu.dot_dimension_numbers<[1], [0], [0], [1], [0, 0, 1, 1], [], []>} : vector<96x32xf32>, vector<32x16xf32>, vector<96x16xf32> -> vector<96x16xf32>
    %246 = vector.broadcast %1 : vector<96x1xf32> to vector<96x16xf32>
    %247 = arith.mulf %245, %246 : vector<96x16xf32>
    %248 = vector.broadcast %2 : vector<96x1xf32> to vector<96x16xf32>
    %249 = arith.addf %247, %248 : vector<96x16xf32>
    %250 = vector.extract_strided_slice %249 {offsets = [0, 0], sizes = [8, 16], strides = [1, 1]} : vector<96x16xf32> to vector<8x16xf32>
    %251 = vector.extract_strided_slice %249 {offsets = [8, 0], sizes = [8, 16], strides = [1, 1]} : vector<96x16xf32> to vector<8x16xf32>
    %252 = vector.extract_strided_slice %249 {offsets = [16, 0], sizes = [8, 16], strides = [1, 1]} : vector<96x16xf32> to vector<8x16xf32>
    %253 = vector.shape_cast %250 : vector<8x16xf32> to vector<8x16x1xf32>
    %254 = vector.broadcast %253 : vector<8x16x1xf32> to vector<8x16x16xf32>
    %255 = arith.mulf %254, %3 : vector<8x16x16xf32>
    %cst_107 = arith.constant dense<0.000000e+00> : vector<16x16xf32>
    %256 = vector.multi_reduction <add>, %255, %cst_107 [0] : vector<8x16x16xf32> to vector<16x16xf32>
    %257 = vector.shape_cast %251 : vector<8x16xf32> to vector<8x16x1xf32>
    %258 = vector.broadcast %257 : vector<8x16x1xf32> to vector<8x16x16xf32>
    %259 = arith.mulf %258, %4 : vector<8x16x16xf32>
    %cst_108 = arith.constant dense<0.000000e+00> : vector<16x16xf32>
    %260 = vector.multi_reduction <add>, %259, %cst_108 [0] : vector<8x16x16xf32> to vector<16x16xf32>
    %cst_109 = arith.constant dense<0.000000e+00> : vector<16x16xf32>
    %261 = tpu.matmul %250, %251, %cst_109 {dimension_numbers = #tpu.dot_dimension_numbers<[0], [0], [1], [1], [0, 1, 1, 1], [], []>} : vector<8x16xf32>, vector<8x16xf32>, vector<16x16xf32> -> vector<16x16xf32>
    %c0_110 = arith.constant 0 : index
    %c0_111 = arith.constant 0 : index
    %262 = memref.load %arg1[%c0_110, %c0_111] : memref<4x3xf32, #tpu.memory_space<smem>>
    %263 = vector.broadcast %262 : f32 to vector<16x16xf32>
    %264 = arith.mulf %256, %263 : vector<16x16xf32>
    %c0_112 = arith.constant 0 : index
    %c0_113 = arith.constant 0 : index
    %265 = memref.load %arg2[%c0_112, %c0_113] : memref<4x3xf32, #tpu.memory_space<smem>>
    %266 = vector.broadcast %265 : f32 to vector<16x16xf32>
    %267 = arith.addf %264, %266 : vector<16x16xf32>
    %c0_114 = arith.constant 0 : index
    %c1_115 = arith.constant 1 : index
    %268 = memref.load %arg1[%c0_114, %c1_115] : memref<4x3xf32, #tpu.memory_space<smem>>
    %269 = vector.broadcast %268 : f32 to vector<16x16xf32>
    %270 = arith.mulf %260, %269 : vector<16x16xf32>
    %271 = arith.addf %267, %270 : vector<16x16xf32>
    %c0_116 = arith.constant 0 : index
    %c1_117 = arith.constant 1 : index
    %272 = memref.load %arg2[%c0_116, %c1_117] : memref<4x3xf32, #tpu.memory_space<smem>>
    %273 = vector.broadcast %272 : f32 to vector<16x16xf32>
    %274 = arith.addf %271, %273 : vector<16x16xf32>
    %c0_118 = arith.constant 0 : index
    %c2_119 = arith.constant 2 : index
    %275 = memref.load %arg1[%c0_118, %c2_119] : memref<4x3xf32, #tpu.memory_space<smem>>
    %276 = vector.broadcast %275 : f32 to vector<16x16xf32>
    %277 = arith.mulf %261, %276 : vector<16x16xf32>
    %278 = arith.addf %274, %277 : vector<16x16xf32>
    %c0_120 = arith.constant 0 : index
    %c2_121 = arith.constant 2 : index
    %279 = memref.load %arg2[%c0_120, %c2_121] : memref<4x3xf32, #tpu.memory_space<smem>>
    %280 = vector.broadcast %279 : f32 to vector<16x16xf32>
    %281 = arith.addf %278, %280 : vector<16x16xf32>
    %cst_122 = arith.constant dense<0xFF800000> : vector<16xf32>
    %282 = vector.multi_reduction <maximumf>, %281, %cst_122 [1] : vector<16x16xf32> to vector<16xf32>
    %283 = vector.shape_cast %282 : vector<16xf32> to vector<16x1xf32>
    %284 = vector.broadcast %283 : vector<16x1xf32> to vector<16x16xf32>
    %285 = arith.subf %281, %284 : vector<16x16xf32>
    %286 = math.exp %285 : vector<16x16xf32>
    %cst_123 = arith.constant dense<0.000000e+00> : vector<16xf32>
    %287 = vector.multi_reduction <add>, %286, %cst_123 [1] : vector<16x16xf32> to vector<16xf32>
    %288 = vector.shape_cast %287 : vector<16xf32> to vector<16x1xf32>
    %289 = tpu.reciprocal %288 {approx = true} : vector<16x1xf32> -> vector<16x1xf32>
    %290 = vector.broadcast %289 : vector<16x1xf32> to vector<16x16xf32>
    %291 = arith.mulf %286, %290 : vector<16x16xf32>
    %cst_124 = arith.constant dense<0.000000e+00> : vector<8x16xf32>
    %292 = tpu.matmul %252, %291, %cst_124 {dimension_numbers = #tpu.dot_dimension_numbers<[1], [1], [0], [0], [0, 0, 1, 0], [], []>} : vector<8x16xf32>, vector<16x16xf32>, vector<8x16xf32> -> vector<8x16xf32>
    %293 = vector.shape_cast %291 : vector<16x16xf32> to vector<1x16x16xf32>
    %294 = vector.broadcast %293 : vector<1x16x16xf32> to vector<8x16x16xf32>
    %295 = arith.mulf %294, %5 : vector<8x16x16xf32>
    %cst_125 = arith.constant dense<0.000000e+00> : vector<8x16xf32>
    %296 = vector.multi_reduction <add>, %295, %cst_125 [2] : vector<8x16x16xf32> to vector<8x16xf32>
    %297 = vector.extract_strided_slice %6 {offsets = [0, 0], sizes = [8, 1], strides = [1, 1]} : vector<32x1xf32> to vector<8x1xf32>
    %298 = vector.broadcast %297 : vector<8x1xf32> to vector<8x16xf32>
    %299 = arith.mulf %296, %298 : vector<8x16xf32>
    %300 = arith.addf %292, %299 : vector<8x16xf32>
    %301 = vector.extract_strided_slice %7 {offsets = [0, 0], sizes = [8, 1], strides = [1, 1]} : vector<32x1xf32> to vector<8x1xf32>
    %302 = vector.broadcast %301 : vector<8x1xf32> to vector<8x16xf32>
    %303 = arith.addf %300, %302 : vector<8x16xf32>
    %c1_126 = arith.constant 1 : index
    %c0_127 = arith.constant 0 : index
    %c0_128 = arith.constant 0 : index
    %304 = vector.load %arg12[%c1_126, %c0_127, %c0_128] : memref<2x32x16xf32, #tpu.memory_space<vmem>>, vector<1x8x16xf32>
    %305 = vector.shape_cast %304 : vector<1x8x16xf32> to vector<8x16xf32>
    %306 = vector.shape_cast %303 : vector<8x16xf32> to vector<1x8x16xf32>
    tpu.vector_store %arg12[%c1_126, %c0_127, %c0_128], %306 {strides = array<i32>} : memref<2x32x16xf32, #tpu.memory_space<vmem>>, vector<1x8x16xf32>,
    %307 = vector.extract_strided_slice %249 {offsets = [24, 0], sizes = [8, 16], strides = [1, 1]} : vector<96x16xf32> to vector<8x16xf32>
    %308 = vector.extract_strided_slice %249 {offsets = [32, 0], sizes = [8, 16], strides = [1, 1]} : vector<96x16xf32> to vector<8x16xf32>
    %309 = vector.extract_strided_slice %249 {offsets = [40, 0], sizes = [8, 16], strides = [1, 1]} : vector<96x16xf32> to vector<8x16xf32>
    %310 = vector.shape_cast %307 : vector<8x16xf32> to vector<8x16x1xf32>
    %311 = vector.broadcast %310 : vector<8x16x1xf32> to vector<8x16x16xf32>
    %312 = arith.mulf %311, %3 : vector<8x16x16xf32>
    %cst_129 = arith.constant dense<0.000000e+00> : vector<16x16xf32>
    %313 = vector.multi_reduction <add>, %312, %cst_129 [0] : vector<8x16x16xf32> to vector<16x16xf32>
    %314 = vector.shape_cast %308 : vector<8x16xf32> to vector<8x16x1xf32>
    %315 = vector.broadcast %314 : vector<8x16x1xf32> to vector<8x16x16xf32>
    %316 = arith.mulf %315, %4 : vector<8x16x16xf32>
    %cst_130 = arith.constant dense<0.000000e+00> : vector<16x16xf32>
    %317 = vector.multi_reduction <add>, %316, %cst_130 [0] : vector<8x16x16xf32> to vector<16x16xf32>
    %cst_131 = arith.constant dense<0.000000e+00> : vector<16x16xf32>
    %318 = tpu.matmul %307, %308, %cst_131 {dimension_numbers = #tpu.dot_dimension_numbers<[0], [0], [1], [1], [0, 1, 1, 1], [], []>} : vector<8x16xf32>, vector<8x16xf32>, vector<16x16xf32> -> vector<16x16xf32>
    %c1_132 = arith.constant 1 : index
    %c0_133 = arith.constant 0 : index
    %319 = memref.load %arg1[%c1_132, %c0_133] : memref<4x3xf32, #tpu.memory_space<smem>>
    %320 = vector.broadcast %319 : f32 to vector<16x16xf32>
    %321 = arith.mulf %313, %320 : vector<16x16xf32>
    %c1_134 = arith.constant 1 : index
    %c0_135 = arith.constant 0 : index
    %322 = memref.load %arg2[%c1_134, %c0_135] : memref<4x3xf32, #tpu.memory_space<smem>>
    %323 = vector.broadcast %322 : f32 to vector<16x16xf32>
    %324 = arith.addf %321, %323 : vector<16x16xf32>
    %c1_136 = arith.constant 1 : index
    %c1_137 = arith.constant 1 : index
    %325 = memref.load %arg1[%c1_136, %c1_137] : memref<4x3xf32, #tpu.memory_space<smem>>
    %326 = vector.broadcast %325 : f32 to vector<16x16xf32>
    %327 = arith.mulf %317, %326 : vector<16x16xf32>
    %328 = arith.addf %324, %327 : vector<16x16xf32>
    %c1_138 = arith.constant 1 : index
    %c1_139 = arith.constant 1 : index
    %329 = memref.load %arg2[%c1_138, %c1_139] : memref<4x3xf32, #tpu.memory_space<smem>>
    %330 = vector.broadcast %329 : f32 to vector<16x16xf32>
    %331 = arith.addf %328, %330 : vector<16x16xf32>
    %c1_140 = arith.constant 1 : index
    %c2_141 = arith.constant 2 : index
    %332 = memref.load %arg1[%c1_140, %c2_141] : memref<4x3xf32, #tpu.memory_space<smem>>
    %333 = vector.broadcast %332 : f32 to vector<16x16xf32>
    %334 = arith.mulf %318, %333 : vector<16x16xf32>
    %335 = arith.addf %331, %334 : vector<16x16xf32>
    %c1_142 = arith.constant 1 : index
    %c2_143 = arith.constant 2 : index
    %336 = memref.load %arg2[%c1_142, %c2_143] : memref<4x3xf32, #tpu.memory_space<smem>>
    %337 = vector.broadcast %336 : f32 to vector<16x16xf32>
    %338 = arith.addf %335, %337 : vector<16x16xf32>
    %cst_144 = arith.constant dense<0xFF800000> : vector<16xf32>
    %339 = vector.multi_reduction <maximumf>, %338, %cst_144 [1] : vector<16x16xf32> to vector<16xf32>
    %340 = vector.shape_cast %339 : vector<16xf32> to vector<16x1xf32>
    %341 = vector.broadcast %340 : vector<16x1xf32> to vector<16x16xf32>
    %342 = arith.subf %338, %341 : vector<16x16xf32>
    %343 = math.exp %342 : vector<16x16xf32>
    %cst_145 = arith.constant dense<0.000000e+00> : vector<16xf32>
    %344 = vector.multi_reduction <add>, %343, %cst_145 [1] : vector<16x16xf32> to vector<16xf32>
    %345 = vector.shape_cast %344 : vector<16xf32> to vector<16x1xf32>
    %346 = tpu.reciprocal %345 {approx = true} : vector<16x1xf32> -> vector<16x1xf32>
    %347 = vector.broadcast %346 : vector<16x1xf32> to vector<16x16xf32>
    %348 = arith.mulf %343, %347 : vector<16x16xf32>
    %cst_146 = arith.constant dense<0.000000e+00> : vector<8x16xf32>
    %349 = tpu.matmul %309, %348, %cst_146 {dimension_numbers = #tpu.dot_dimension_numbers<[1], [1], [0], [0], [0, 0, 1, 0], [], []>} : vector<8x16xf32>, vector<16x16xf32>, vector<8x16xf32> -> vector<8x16xf32>
    %350 = vector.shape_cast %348 : vector<16x16xf32> to vector<1x16x16xf32>
    %351 = vector.broadcast %350 : vector<1x16x16xf32> to vector<8x16x16xf32>
    %352 = arith.mulf %351, %5 : vector<8x16x16xf32>
    %cst_147 = arith.constant dense<0.000000e+00> : vector<8x16xf32>
    %353 = vector.multi_reduction <add>, %352, %cst_147 [2] : vector<8x16x16xf32> to vector<8x16xf32>
    %354 = vector.extract_strided_slice %6 {offsets = [8, 0], sizes = [8, 1], strides = [1, 1]} : vector<32x1xf32> to vector<8x1xf32>
    %355 = vector.broadcast %354 : vector<8x1xf32> to vector<8x16xf32>
    %356 = arith.mulf %353, %355 : vector<8x16xf32>
    %357 = arith.addf %349, %356 : vector<8x16xf32>
    %358 = vector.extract_strided_slice %7 {offsets = [8, 0], sizes = [8, 1], strides = [1, 1]} : vector<32x1xf32> to vector<8x1xf32>
    %359 = vector.broadcast %358 : vector<8x1xf32> to vector<8x16xf32>
    %360 = arith.addf %357, %359 : vector<8x16xf32>
    %c1_148 = arith.constant 1 : index
    %c8_149 = arith.constant 8 : index
    %c0_150 = arith.constant 0 : index
    %361 = vector.load %arg12[%c1_148, %c8_149, %c0_150] : memref<2x32x16xf32, #tpu.memory_space<vmem>>, vector<1x8x16xf32>
    %362 = vector.shape_cast %361 : vector<1x8x16xf32> to vector<8x16xf32>
    %363 = vector.shape_cast %360 : vector<8x16xf32> to vector<1x8x16xf32>
    tpu.vector_store %arg12[%c1_148, %c8_149, %c0_150], %363 {strides = array<i32>} : memref<2x32x16xf32, #tpu.memory_space<vmem>>, vector<1x8x16xf32>,
    %364 = vector.extract_strided_slice %249 {offsets = [48, 0], sizes = [8, 16], strides = [1, 1]} : vector<96x16xf32> to vector<8x16xf32>
    %365 = vector.extract_strided_slice %249 {offsets = [56, 0], sizes = [8, 16], strides = [1, 1]} : vector<96x16xf32> to vector<8x16xf32>
    %366 = vector.extract_strided_slice %249 {offsets = [64, 0], sizes = [8, 16], strides = [1, 1]} : vector<96x16xf32> to vector<8x16xf32>
    %367 = vector.shape_cast %364 : vector<8x16xf32> to vector<8x16x1xf32>
    %368 = vector.broadcast %367 : vector<8x16x1xf32> to vector<8x16x16xf32>
    %369 = arith.mulf %368, %3 : vector<8x16x16xf32>
    %cst_151 = arith.constant dense<0.000000e+00> : vector<16x16xf32>
    %370 = vector.multi_reduction <add>, %369, %cst_151 [0] : vector<8x16x16xf32> to vector<16x16xf32>
    %371 = vector.shape_cast %365 : vector<8x16xf32> to vector<8x16x1xf32>
    %372 = vector.broadcast %371 : vector<8x16x1xf32> to vector<8x16x16xf32>
    %373 = arith.mulf %372, %4 : vector<8x16x16xf32>
    %cst_152 = arith.constant dense<0.000000e+00> : vector<16x16xf32>
    %374 = vector.multi_reduction <add>, %373, %cst_152 [0] : vector<8x16x16xf32> to vector<16x16xf32>
    %cst_153 = arith.constant dense<0.000000e+00> : vector<16x16xf32>
    %375 = tpu.matmul %364, %365, %cst_153 {dimension_numbers = #tpu.dot_dimension_numbers<[0], [0], [1], [1], [0, 1, 1, 1], [], []>} : vector<8x16xf32>, vector<8x16xf32>, vector<16x16xf32> -> vector<16x16xf32>
    %c2_154 = arith.constant 2 : index
    %c0_155 = arith.constant 0 : index
    %376 = memref.load %arg1[%c2_154, %c0_155] : memref<4x3xf32, #tpu.memory_space<smem>>
    %377 = vector.broadcast %376 : f32 to vector<16x16xf32>
    %378 = arith.mulf %370, %377 : vector<16x16xf32>
    %c2_156 = arith.constant 2 : index
    %c0_157 = arith.constant 0 : index
    %379 = memref.load %arg2[%c2_156, %c0_157] : memref<4x3xf32, #tpu.memory_space<smem>>
    %380 = vector.broadcast %379 : f32 to vector<16x16xf32>
    %381 = arith.addf %378, %380 : vector<16x16xf32>
    %c2_158 = arith.constant 2 : index
    %c1_159 = arith.constant 1 : index
    %382 = memref.load %arg1[%c2_158, %c1_159] : memref<4x3xf32, #tpu.memory_space<smem>>
    %383 = vector.broadcast %382 : f32 to vector<16x16xf32>
    %384 = arith.mulf %374, %383 : vector<16x16xf32>
    %385 = arith.addf %381, %384 : vector<16x16xf32>
    %c2_160 = arith.constant 2 : index
    %c1_161 = arith.constant 1 : index
    %386 = memref.load %arg2[%c2_160, %c1_161] : memref<4x3xf32, #tpu.memory_space<smem>>
    %387 = vector.broadcast %386 : f32 to vector<16x16xf32>
    %388 = arith.addf %385, %387 : vector<16x16xf32>
    %c2_162 = arith.constant 2 : index
    %c2_163 = arith.constant 2 : index
    %389 = memref.load %arg1[%c2_162, %c2_163] : memref<4x3xf32, #tpu.memory_space<smem>>
    %390 = vector.broadcast %389 : f32 to vector<16x16xf32>
    %391 = arith.mulf %375, %390 : vector<16x16xf32>
    %392 = arith.addf %388, %391 : vector<16x16xf32>
    %c2_164 = arith.constant 2 : index
    %c2_165 = arith.constant 2 : index
    %393 = memref.load %arg2[%c2_164, %c2_165] : memref<4x3xf32, #tpu.memory_space<smem>>
    %394 = vector.broadcast %393 : f32 to vector<16x16xf32>
    %395 = arith.addf %392, %394 : vector<16x16xf32>
    %cst_166 = arith.constant dense<0xFF800000> : vector<16xf32>
    %396 = vector.multi_reduction <maximumf>, %395, %cst_166 [1] : vector<16x16xf32> to vector<16xf32>
    %397 = vector.shape_cast %396 : vector<16xf32> to vector<16x1xf32>
    %398 = vector.broadcast %397 : vector<16x1xf32> to vector<16x16xf32>
    %399 = arith.subf %395, %398 : vector<16x16xf32>
    %400 = math.exp %399 : vector<16x16xf32>
    %cst_167 = arith.constant dense<0.000000e+00> : vector<16xf32>
    %401 = vector.multi_reduction <add>, %400, %cst_167 [1] : vector<16x16xf32> to vector<16xf32>
    %402 = vector.shape_cast %401 : vector<16xf32> to vector<16x1xf32>
    %403 = tpu.reciprocal %402 {approx = true} : vector<16x1xf32> -> vector<16x1xf32>
    %404 = vector.broadcast %403 : vector<16x1xf32> to vector<16x16xf32>
    %405 = arith.mulf %400, %404 : vector<16x16xf32>
    %cst_168 = arith.constant dense<0.000000e+00> : vector<8x16xf32>
    %406 = tpu.matmul %366, %405, %cst_168 {dimension_numbers = #tpu.dot_dimension_numbers<[1], [1], [0], [0], [0, 0, 1, 0], [], []>} : vector<8x16xf32>, vector<16x16xf32>, vector<8x16xf32> -> vector<8x16xf32>
    %407 = vector.shape_cast %405 : vector<16x16xf32> to vector<1x16x16xf32>
    %408 = vector.broadcast %407 : vector<1x16x16xf32> to vector<8x16x16xf32>
    %409 = arith.mulf %408, %5 : vector<8x16x16xf32>
    %cst_169 = arith.constant dense<0.000000e+00> : vector<8x16xf32>
    %410 = vector.multi_reduction <add>, %409, %cst_169 [2] : vector<8x16x16xf32> to vector<8x16xf32>
    %411 = vector.extract_strided_slice %6 {offsets = [16, 0], sizes = [8, 1], strides = [1, 1]} : vector<32x1xf32> to vector<8x1xf32>
    %412 = vector.broadcast %411 : vector<8x1xf32> to vector<8x16xf32>
    %413 = arith.mulf %410, %412 : vector<8x16xf32>
    %414 = arith.addf %406, %413 : vector<8x16xf32>
    %415 = vector.extract_strided_slice %7 {offsets = [16, 0], sizes = [8, 1], strides = [1, 1]} : vector<32x1xf32> to vector<8x1xf32>
    %416 = vector.broadcast %415 : vector<8x1xf32> to vector<8x16xf32>
    %417 = arith.addf %414, %416 : vector<8x16xf32>
    %c1_170 = arith.constant 1 : index
    %c16_171 = arith.constant 16 : index
    %c0_172 = arith.constant 0 : index
    %418 = vector.load %arg12[%c1_170, %c16_171, %c0_172] : memref<2x32x16xf32, #tpu.memory_space<vmem>>, vector<1x8x16xf32>
    %419 = vector.shape_cast %418 : vector<1x8x16xf32> to vector<8x16xf32>
    %420 = vector.shape_cast %417 : vector<8x16xf32> to vector<1x8x16xf32>
    tpu.vector_store %arg12[%c1_170, %c16_171, %c0_172], %420 {strides = array<i32>} : memref<2x32x16xf32, #tpu.memory_space<vmem>>, vector<1x8x16xf32>,
    %421 = vector.extract_strided_slice %249 {offsets = [72, 0], sizes = [8, 16], strides = [1, 1]} : vector<96x16xf32> to vector<8x16xf32>
    %422 = vector.extract_strided_slice %249 {offsets = [80, 0], sizes = [8, 16], strides = [1, 1]} : vector<96x16xf32> to vector<8x16xf32>
    %423 = vector.extract_strided_slice %249 {offsets = [88, 0], sizes = [8, 16], strides = [1, 1]} : vector<96x16xf32> to vector<8x16xf32>
    %424 = vector.shape_cast %421 : vector<8x16xf32> to vector<8x16x1xf32>
    %425 = vector.broadcast %424 : vector<8x16x1xf32> to vector<8x16x16xf32>
    %426 = arith.mulf %425, %3 : vector<8x16x16xf32>
    %cst_173 = arith.constant dense<0.000000e+00> : vector<16x16xf32>
    %427 = vector.multi_reduction <add>, %426, %cst_173 [0] : vector<8x16x16xf32> to vector<16x16xf32>
    %428 = vector.shape_cast %422 : vector<8x16xf32> to vector<8x16x1xf32>
    %429 = vector.broadcast %428 : vector<8x16x1xf32> to vector<8x16x16xf32>
    %430 = arith.mulf %429, %4 : vector<8x16x16xf32>
    %cst_174 = arith.constant dense<0.000000e+00> : vector<16x16xf32>
    %431 = vector.multi_reduction <add>, %430, %cst_174 [0] : vector<8x16x16xf32> to vector<16x16xf32>
    %cst_175 = arith.constant dense<0.000000e+00> : vector<16x16xf32>
    %432 = tpu.matmul %421, %422, %cst_175 {dimension_numbers = #tpu.dot_dimension_numbers<[0], [0], [1], [1], [0, 1, 1, 1], [], []>} : vector<8x16xf32>, vector<8x16xf32>, vector<16x16xf32> -> vector<16x16xf32>
    %c3_176 = arith.constant 3 : index
    %c0_177 = arith.constant 0 : index
    %433 = memref.load %arg1[%c3_176, %c0_177] : memref<4x3xf32, #tpu.memory_space<smem>>
    %434 = vector.broadcast %433 : f32 to vector<16x16xf32>
    %435 = arith.mulf %427, %434 : vector<16x16xf32>
    %c3_178 = arith.constant 3 : index
    %c0_179 = arith.constant 0 : index
    %436 = memref.load %arg2[%c3_178, %c0_179] : memref<4x3xf32, #tpu.memory_space<smem>>
    %437 = vector.broadcast %436 : f32 to vector<16x16xf32>
    %438 = arith.addf %435, %437 : vector<16x16xf32>
    %c3_180 = arith.constant 3 : index
    %c1_181 = arith.constant 1 : index
    %439 = memref.load %arg1[%c3_180, %c1_181] : memref<4x3xf32, #tpu.memory_space<smem>>
    %440 = vector.broadcast %439 : f32 to vector<16x16xf32>
    %441 = arith.mulf %431, %440 : vector<16x16xf32>
    %442 = arith.addf %438, %441 : vector<16x16xf32>
    %c3_182 = arith.constant 3 : index
    %c1_183 = arith.constant 1 : index
    %443 = memref.load %arg2[%c3_182, %c1_183] : memref<4x3xf32, #tpu.memory_space<smem>>
    %444 = vector.broadcast %443 : f32 to vector<16x16xf32>
    %445 = arith.addf %442, %444 : vector<16x16xf32>
    %c3_184 = arith.constant 3 : index
    %c2_185 = arith.constant 2 : index
    %446 = memref.load %arg1[%c3_184, %c2_185] : memref<4x3xf32, #tpu.memory_space<smem>>
    %447 = vector.broadcast %446 : f32 to vector<16x16xf32>
    %448 = arith.mulf %432, %447 : vector<16x16xf32>
    %449 = arith.addf %445, %448 : vector<16x16xf32>
    %c3_186 = arith.constant 3 : index
    %c2_187 = arith.constant 2 : index
    %450 = memref.load %arg2[%c3_186, %c2_187] : memref<4x3xf32, #tpu.memory_space<smem>>
    %451 = vector.broadcast %450 : f32 to vector<16x16xf32>
    %452 = arith.addf %449, %451 : vector<16x16xf32>
    %cst_188 = arith.constant dense<0xFF800000> : vector<16xf32>
    %453 = vector.multi_reduction <maximumf>, %452, %cst_188 [1] : vector<16x16xf32> to vector<16xf32>
    %454 = vector.shape_cast %453 : vector<16xf32> to vector<16x1xf32>
    %455 = vector.broadcast %454 : vector<16x1xf32> to vector<16x16xf32>
    %456 = arith.subf %452, %455 : vector<16x16xf32>
    %457 = math.exp %456 : vector<16x16xf32>
    %cst_189 = arith.constant dense<0.000000e+00> : vector<16xf32>
    %458 = vector.multi_reduction <add>, %457, %cst_189 [1] : vector<16x16xf32> to vector<16xf32>
    %459 = vector.shape_cast %458 : vector<16xf32> to vector<16x1xf32>
    %460 = tpu.reciprocal %459 {approx = true} : vector<16x1xf32> -> vector<16x1xf32>
    %461 = vector.broadcast %460 : vector<16x1xf32> to vector<16x16xf32>
    %462 = arith.mulf %457, %461 : vector<16x16xf32>
    %cst_190 = arith.constant dense<0.000000e+00> : vector<8x16xf32>
    %463 = tpu.matmul %423, %462, %cst_190 {dimension_numbers = #tpu.dot_dimension_numbers<[1], [1], [0], [0], [0, 0, 1, 0], [], []>} : vector<8x16xf32>, vector<16x16xf32>, vector<8x16xf32> -> vector<8x16xf32>
    %464 = vector.shape_cast %462 : vector<16x16xf32> to vector<1x16x16xf32>
    %465 = vector.broadcast %464 : vector<1x16x16xf32> to vector<8x16x16xf32>
    %466 = arith.mulf %465, %5 : vector<8x16x16xf32>
    %cst_191 = arith.constant dense<0.000000e+00> : vector<8x16xf32>
    %467 = vector.multi_reduction <add>, %466, %cst_191 [2] : vector<8x16x16xf32> to vector<8x16xf32>
    %468 = vector.extract_strided_slice %6 {offsets = [24, 0], sizes = [8, 1], strides = [1, 1]} : vector<32x1xf32> to vector<8x1xf32>
    %469 = vector.broadcast %468 : vector<8x1xf32> to vector<8x16xf32>
    %470 = arith.mulf %467, %469 : vector<8x16xf32>
    %471 = arith.addf %463, %470 : vector<8x16xf32>
    %472 = vector.extract_strided_slice %7 {offsets = [24, 0], sizes = [8, 1], strides = [1, 1]} : vector<32x1xf32> to vector<8x1xf32>
    %473 = vector.broadcast %472 : vector<8x1xf32> to vector<8x16xf32>
    %474 = arith.addf %471, %473 : vector<8x16xf32>
    %c1_192 = arith.constant 1 : index
    %c24_193 = arith.constant 24 : index
    %c0_194 = arith.constant 0 : index
    %475 = vector.load %arg12[%c1_192, %c24_193, %c0_194] : memref<2x32x16xf32, #tpu.memory_space<vmem>>, vector<1x8x16xf32>
    %476 = vector.shape_cast %475 : vector<1x8x16xf32> to vector<8x16xf32>
    %477 = vector.shape_cast %474 : vector<8x16xf32> to vector<1x8x16xf32>
    tpu.vector_store %arg12[%c1_192, %c24_193, %c0_194], %477 {strides = array<i32>} : memref<2x32x16xf32, #tpu.memory_space<vmem>>, vector<1x8x16xf32>,
    return
  }
  func.func @transform_0(%arg0: i32) -> (i32, i32) {
    %c0_i32 = arith.constant 0 : i32
    %c0_i32_0 = arith.constant 0 : i32
    %c0_i32_1 = arith.constant 0 : i32
    return %c0_i32, %c0_i32_0 : i32, i32
  }
  func.func @transform_1(%arg0: i32) -> (i32, i32) {
    %c0_i32 = arith.constant 0 : i32
    %c0_i32_0 = arith.constant 0 : i32
    %c0_i32_1 = arith.constant 0 : i32
    return %c0_i32, %c0_i32_0 : i32, i32
  }
  func.func @transform_2(%arg0: i32) -> (i32, i32, i32) {
    %c0_i32 = arith.constant 0 : i32
    %c0_i32_0 = arith.constant 0 : i32
    %c0_i32_1 = arith.constant 0 : i32
    return %arg0, %c0_i32, %c0_i32_0 : i32, i32, i32
  }
  func.func @transform_3(%arg0: i32) -> (i32, i32) {
    %c0_i32 = arith.constant 0 : i32
    %c0_i32_0 = arith.constant 0 : i32
    %c0_i32_1 = arith.constant 0 : i32
    return %c0_i32, %c0_i32_0 : i32, i32
  }
  func.func @transform_4(%arg0: i32) -> (i32, i32) {
    %c0_i32 = arith.constant 0 : i32
    %c0_i32_0 = arith.constant 0 : i32
    %c0_i32_1 = arith.constant 0 : i32
    return %c0_i32, %c0_i32_0 : i32, i32
  }
  func.func @transform_5(%arg0: i32) -> (i32, i32) {
    %c0_i32 = arith.constant 0 : i32
    %c0_i32_0 = arith.constant 0 : i32
    %c0_i32_1 = arith.constant 0 : i32
    return %c0_i32, %c0_i32_0 : i32, i32
  }
  func.func @transform_6(%arg0: i32) -> (i32, i32, i32) {
    %c0_i32 = arith.constant 0 : i32
    %c0_i32_0 = arith.constant 0 : i32
    %c0_i32_1 = arith.constant 0 : i32
    %c0_i32_2 = arith.constant 0 : i32
    return %c0_i32, %c0_i32_0, %c0_i32_1 : i32, i32, i32
  }
  func.func @transform_7(%arg0: i32) -> (i32, i32, i32) {
    %c0_i32 = arith.constant 0 : i32
    %c0_i32_0 = arith.constant 0 : i32
    %c0_i32_1 = arith.constant 0 : i32
    %c0_i32_2 = arith.constant 0 : i32
    return %c0_i32, %c0_i32_0, %c0_i32_1 : i32, i32, i32
  }
  func.func @transform_8(%arg0: i32) -> (i32, i32, i32) {
    %c0_i32 = arith.constant 0 : i32
    %c0_i32_0 = arith.constant 0 : i32
    %c0_i32_1 = arith.constant 0 : i32
    %c0_i32_2 = arith.constant 0 : i32
    return %c0_i32, %c0_i32_0, %c0_i32_1 : i32, i32, i32
  }
  func.func @transform_9(%arg0: i32) -> (i32, i32) {
    %c0_i32 = arith.constant 0 : i32
    %c0_i32_0 = arith.constant 0 : i32
    %c0_i32_1 = arith.constant 0 : i32
    return %c0_i32, %c0_i32_0 : i32, i32
  }
  func.func @transform_10(%arg0: i32) -> (i32, i32) {
    %c0_i32 = arith.constant 0 : i32
    %c0_i32_0 = arith.constant 0 : i32
    %c0_i32_1 = arith.constant 0 : i32
    return %c0_i32, %c0_i32_0 : i32, i32
  }
  func.func @transform_11(%arg0: i32) -> (i32, i32, i32) {
    %c0_i32 = arith.constant 0 : i32
    %c0_i32_0 = arith.constant 0 : i32
    %c0_i32_1 = arith.constant 0 : i32
    return %arg0, %c0_i32, %c0_i32_0 : i32, i32, i32
  }
}

</mosaic_0001>

<bundles_post_ra>
// kernel: tpu_custom_call.1
= control target key start
LH: loop header
LB: loop body
LE: loop exit
PB: predicated region body
PF: predicated region fallthrough
CT: control target
= control target key end

     0   :  { %16 = vsyncpa [#allocation3], 0  ;;  %s11971_s0 = inlined_call_operand.vmem [shape: f32[4,3], index: 0, kind: input, shape index: {}]   ;;  %s11972_s1 = inlined_call_operand.vmem [shape: f32[4,3], index: 1, kind: input, shape index: {}]   ;;  %s11973_s2 = inlined_call_operand.vmem [shape: f32[4,32,16], index: 2, kind: input, shape index: {}]   ;;  %s11974_s3 = inlined_call_operand.vmem [shape: f32[96,32], index: 3, kind: input, shape index: {}]   ;;  %s11975_s4 = inlined_call_operand.vmem [shape: f32[96,1], index: 4, kind: input, shape index: {}]   ;;  %s11976_s5 = inlined_call_operand.vmem [shape: f32[96,1], index: 5, kind: input, shape index: {}]   ;;  %s11977_s6 = inlined_call_operand.vmem [shape: f32[8,16,16], index: 6, kind: input, shape index: {}]   ;;  %s11978_s7 = inlined_call_operand.vmem [shape: f32[8,16,16], index: 7, kind: input, shape index: {}]   ;;  %s11979_s8 = inlined_call_operand.vmem [shape: f32[8,16,16], index: 8, kind: input, shape index: {}]   ;;  %s11980_s9 = inlined_call_operand.vmem [shape: f32[32,1], index: 9, kind: input, shape index: {}]   ;;  %s11981_s10 = inlined_call_operand.vmem [shape: f32[32,1], index: 10, kind: input, shape index: {}]   ;;  %s11982_s11 = inlined_call_operand.vmem [shape: f32[4,32,16], index: 11, kind: output, shape index: {}]  }
   0x1   :  { %17 = vsyncpa [#allocation5], 0  ;;  %s7889_s17 = smov 0  }
   0x2 LB: > { %s7156_s18 = sadd.s32 4294967295, %s7822_s17   ;;  %p7158_p0 = scmp.ge.s32.totalorder %s7822_s17, 1  ;;  %s7822_s17 = sphi %s7889_s17, %s23_s17  }
   0x3   : > { %p290_p1 = scmp.lt.s32.totalorder %s7822_s17, 3  ;;  %s303_s21 = sshll.u32 %s11971_s0, 4  ;;  %s304_s21 = int_to_ptr.vmem [resolvable:$true] %s303_s21 }
   0x4   : > { %p7906_p3 = scmp.eq.s32.totalorder %s7156_s18, 0  ;;  %s314_s26 = sshll.u32 %s11972_s1, 4  ;;  %s315_s26 = int_to_ptr.vmem [resolvable:$true] %s314_s26 }
   0x5   : > { %p7900_p2 = pnand %p7158_p0, %p290_p1  ;;  %s7778_s28 = scalar_lea.vmem %s304_s21, 64 }
   0x6   : > { %s12167_s23 = scalar_select %p7906_p3, 1, 0 }
   0x7   : > { %s12166_s22 = scalar_select %p7900_p2, 1, 0 }
   0x8   : > { %p7527_p4 = pneg %p7900_p2  ;;  %p7779_p6 = scmp.ne.s32.totalorder %s304_s21, %s7778_s28 }
   0x9   : > { %p7786_p10 = scmp.lt.s32.totalorder %s304_s21, %s304_s21  ;;  %p7787_p11 = scmp.lt.s32.totalorder %s7778_s28, %s7778_s28 }
   0xa   : > { %p7917_p5 = pnand %p7906_p3, %p7527_p4 }
   0xb   : > { %p7788_p12 = por %p7787_p11, %p7786_p10 }
   0xc   : > { %p7780_p7 = pneg %p7917_p5 }
   0xe   : > { %p7781_p8 = pnand %p7780_p7, %p7779_p6 }
  0x10   : > { %p7782_p9 = pneg %p7781_p8 }
  0x12   : > { %p7789_p13 = pnand %p7788_p12, %p7782_p9 }
  0x14   : > { %7792 = shalt.err (!%p7789_p13)
}
  0x15   : > { %s7824_s29 = smov [#allocation2]   ;;  %s7793_s30 = scalar_lea.vmem %s315_s26, 64 }
  0x16   : > { %7530 = dma.vmem_to_smem (!%p7917_p5), %s304_s21, 64, %s7824_s29, [#allocation3]  }
  0x17   : > { %p7794_p0 = scmp.ne.s32.totalorder %s315_s26, %s7793_s30  ;;  %p7801_p3 = scmp.lt.s32.totalorder %s315_s26, %s315_s26 }
  0x18   : > { %p7802_p2 = scmp.lt.s32.totalorder %s7793_s30, %s7793_s30 }
  0x19   : > { %p7796_p1 = pnand %p7794_p0, %p7780_p7 }
  0x1a   : > { %p7803_p6 = por %p7802_p2, %p7801_p3 }
  0x1b   : > { %p7797_p4 = pneg %p7796_p1 }
  0x1d   : > { %p7804_p8 = pnand %p7803_p6, %p7797_p4 }
  0x1f   : > { %7807 = shalt.err (!%p7804_p8)
}
  0x20   : > { %s7825_s12 = smov [#allocation4]   ;;  %p12169_p9 = scmp.ne.s32.totalorder %s12166_s22, 0 }
  0x21   : > { %7533 = dma.vmem_to_smem (!%p7917_p5), %s315_s26, 64, %s7825_s12, [#allocation5]  }
  0x22   : > { %361 = sbr.rel (%p12169_p9) target bundleno = 4857 (0x12f9), region = 64 }
  0x27   : > { %p12170_p10 = scmp.ne.s32.totalorder %s12167_s23, 0 }
  0x29   : > { %7813 = dma.done.wait (%p12170_p10), [#allocation3], 64  }
  0x2a   : > { %7815 = vsyncadd (%p12170_p10), [#allocation3], 4294967232 }
  0x2b   : > { %7817 = dma.done.wait (%p12170_p10), [#allocation5], 64  }
  0x2c   : > { %7819 = vsyncadd (%p12170_p10), [#allocation5], 4294967232 }
  0x2d   : > { %371 = sfence }
  0x2e   : > { %s7165_s13 = sshll.u32 %s7156_s18, 1  ;;  %v422_v0 = vld [vmem:[%s11974_s3] sm:$0xff]  ;;  %vm518_vm0 = vcmask 261120   ;;  %v7826_v2 = vmov 0   ;;  %v435_v3 = vld [vmem:[%s11975_s4 + $0x8] sm:$0xff]  ;;  %v824_v11 = vlaneseq  ;;  %v424_v51 = vld [vmem:[%s11974_s3 + $0x10] sm:$0xff] }
  0x2f   : > { %v434_v1 = vld [vmem:[%s11975_s4] sm:$0xff]  ;;  %p409_p2 = scmp.lt.s32.totalorder %s7165_s13, 3  ;;  %7379 = vmatprep.mubr.msk.f32.mxu0 %vm518_vm0, %v422_v0  ;;  %7551 = vset.pattern.permute.xlu0 %v7826_v2  ;;  %v447_v5 = vld [vmem:[%s11976_s5 + $0x8] sm:$0xff]  ;;  %v425_v52 = vld [vmem:[%s11974_s3 + $0x18] sm:$0xff]  ;;  %vm1125_vm1 = vcmask 64512   ;;  %vm928_vm2 = vcmask 130048  }
  0x30   : > { %682 = vperm.xlu0 %7551, %v434_v1   ;;  %7552 = vset.pattern.permute.xlu1 %v7826_v2  ;;  %v446_v4 = vld [vmem:[%s11976_s5] sm:$0xff]  ;;  %v423_v10 = vld [vmem:[%s11974_s3 + $0x8] sm:$0xff]  ;;  %v825_v12 = vshrl.u32 %v824_v11, 7  ;;  %v1446_v13 = vand.u32 127, %v824_v11  ;;  %s8235_s12 = sld [smem:[#allocation2]]  ;;  %vm7828_vm3 = vmmov 0  }
  0x31   : > { %s12587_s13 = smov (!%p409_p2, %s7165_s13), 3  ;;  %687 = vperm.xlu1 %7552, %v435_v3   ;;  %v426_v53 = vld [vmem:[%s11974_s3 + $0x20] sm:$0xff]  ;;  %v427_v54 = vld [vmem:[%s11974_s3 + $0x28] sm:$0xff]  ;;  %s8282_s29 = sld [smem:[#allocation4]]  ;;  %vm1456_vm4 = vcmask 130112   ;;  %vm1521_vm5 = vcmask 1041409  }
  0x32   : > { %s7289_s25 = sshll.u32 %s12587_s13, 5  ;;  %v7973_v14 = vsub.s32 %v1446_v13, %v825_v12  ;;  %v1451_v15 = vadd.s32 4294967288, %v1446_v13  ;;  %v7984_v22 = vsub.s32 0, %v825_v12  ;;  %v7992_v29 = vsub.s32 1, %v825_v12  ;;  %s7185_s30 = sld [smem:[#allocation2 + $0x1]] }
  0x33   : > { %s7963_s28 = scalar_lea.vmem %s11973_s2, %s7289_s25  ;;  %v7995_v31 = vsub.s32 3, %v825_v12  ;;  %v7998_v33 = vsub.s32 2, %v825_v12  ;;  %v8001_v35 = vsub.s32 4, %v825_v12  ;;  %v8004_v37 = vsub.s32 5, %v825_v12  ;;  %s7187_s14 = sld [smem:[#allocation2 + $0x2]] }
  0x34   : > { %754 = vperm.xlu0 %7551, %v446_v4   ;;  %v517_v6 = vld [vmem:[%s7963_s28 + $0x18] sm:$0xff]  ;;  %v516_v7 = vld [vmem:[%s7963_s28 + $0x10] sm:$0xff]  ;;  %v515_v8 = vld [vmem:[%s7963_s28 + $0x8] sm:$0xff]  ;;  %12171 = vst [vmem:[#allocation8_spill] sm:$0xff] %v7973_v14  ;;  %v7975_v16 = vsub.s32 %v1451_v15, %v825_v12  ;;  %v8007_v39 = vsub.s32 6, %v825_v12  ;;  %v8013_v44 = vsub.s32 7, %v825_v12 }
  0x35   : > { %759 = vperm.xlu1 %7552, %v447_v5   ;;  %7371 = vmatprep.subr.mxu0 %v517_v6  ;;  %v514_v9 = vld [vmem:[%s7963_s28] sm:$0xff]  ;;  %12176 = vst [vmem:[#allocation13_spill] sm:$0xff] %v7984_v22  ;;  %12178 = vst [vmem:[#allocation15_spill] sm:$0xff] %v7992_v29  ;;  %s7188_s15 = sld [smem:[#allocation4 + $0x2]]  ;;  %vm1523_vm6 = vcmask 1042434   ;;  %vm1525_vm7 = vcmask 1043459  }
  0x36   : > { %7372 = vmatpush3.msra.mxu0 %v517_v6  ;;  %12172 = vst [vmem:[#allocation9_spill] sm:$0xff] %v7975_v16  ;;  %12179 = vst [vmem:[#allocation16_spill] sm:$0xff] %v7995_v31  ;;  %s8445_s19 = sld [smem:[#allocation2 + $0x80]]  ;;  %vm1527_vm8 = vcmask 1044484   ;;  %vm1529_vm9 = vcmask 1045509   ;;  %vm1531_vm10 = vcmask 1046534  }
  0x37   : > { %7373 = vmatprep.subr.mxu0 %v516_v7  ;;  %12180 = vst [vmem:[#allocation17_spill] sm:$0xff] %v7998_v33  ;;  %12181 = vst [vmem:[#allocation18_spill] sm:$0xff] %v8001_v35  ;;  %s8457_s20 = sld [smem:[#allocation2 + $0x81]]  ;;  %vm1533_vm11 = vcmask 1047559  }
  0x38   : > { %7374 = vmatpush3.msra.mxu0 %v516_v7  ;;  %12182 = vst [vmem:[#allocation19_spill] sm:$0xff] %v8004_v37  ;;  %12183 = vst [vmem:[#allocation20_spill] sm:$0xff] %v8007_v39  ;;  %s7195_s21 = sld [smem:[#allocation4 + $0x80]] }
  0x39   : > { %7375 = vmatprep.subr.mxu0 %v515_v8  ;;  %12184 = vst [vmem:[#allocation21_spill] sm:$0xff] %v8013_v44  ;;  %s7197_s18 = sld [smem:[#allocation4 + $0x81]] }
  0x3a   : > { %7376 = vmatpush3.msra.mxu0 %v515_v8  ;;  %s7198_s22 = sld [smem:[#allocation2 + $0x82]] }
  0x3b   : > { %7377 = vmatprep.subr.mxu0 %v514_v9  ;;  %s7199_s23 = sld [smem:[#allocation4 + $0x82]] }
  0x3c   : > { %7378 = vmatpush3.msra.mxu0 %v514_v9  ;;  %s9006_s27 = sld [smem:[#allocation2 + $0x180]] }
  0x3d   : > { %7380 = vmatmul.mubr.msk.f32.vlgmr.msra.gmra.mxu0 %vm518_vm0, %v423_v10  ;;  %s9030_s16 = sld [smem:[#allocation2 + $0x181]] }
  0x3e   : > { %7382 = vmatprep.mubr.msk.f32.mxu0 %vm518_vm0, %v424_v51  ;;  %s9071_s26 = sld [smem:[#allocation4 + $0x182]] }
  0x3f   : > { %s9966_s24 = sld [smem:[#allocation2 + $0x80]] }
  0x41   : > { %7383 = vmatmul.mubr.msk.f32.gmra.mxu0 %vm518_vm0, %v425_v52 }
  0x42   : > { %7385 = vmatprep.mubr.msk.f32.mxu0 %vm518_vm0, %v426_v53 }
  0x45   : > { %7386 = vmatmul.mubr.msk.f32.gmra.mxu0 %vm518_vm0, %v427_v54 }
  0xab   : > { %v7979_v18 = vpop.permute.xlu0 %682 }
  0xac   : > { %v7977_v17 = vpop.permute.xlu1 %687  ;;  %12174 = vst [vmem:[#allocation11_spill] sm:$0xff] %v7979_v18 }
  0xad   : > { %12173 = vst [vmem:[#allocation10_spill] sm:$0xff] %v7977_v17 }
  0xaf   : > { %v7988_v26 = vpop.permute.xlu0 %754 }
  0xb0   : > { %v7981_v20 = vpop.permute.xlu1 %759  ;;  %12177 = vst [vmem:[#allocation14_spill] sm:$0xff] %v7988_v26 }
  0xb1   : > { %12175 = vst [vmem:[#allocation12_spill] sm:$0xff] %v7981_v20 }
  0xfd   : > { %v7381_v19 = vpop.f32.mrf.mxu0 }
  0xfe   : > { %v741_v21 = vmul.f32 %v7381_v19, %v7977_v17 }
  0xff   : > { %v621_v23 = vpop.f32.mrf.mxu0 }
 0x100   : > { %v813_v24 = vadd.f32 %v7981_v20, %v741_v21  ;;  %v740_v25 = vmul.f32 %v7979_v18, %v621_v23  ;;  %v8058_v23 = vld [vmem:[%s11978_s7 + $0x18] sm:$0xff]  ;;  %v8192_v18 = vld [vmem:[%s11978_s7 + $0x40] sm:$0xff] }
 0x101   : > { %12186 = vst [vmem:[#allocation23_spill] sm:$0xff] %v8192_v18 }
 0x102   : > { %v812_v27 = vadd.f32 %v7988_v26, %v740_v25  ;;  %7397 = vmatprep.subr.mxu1 %v813_v24  ;;  %v962_v28 = vrot.slane %v813_v24, %v7984_v22  ;;  %v973_v30 = vrot.slane %v813_v24, %v7992_v29  ;;  %v995_v32 = vrot.slane %v813_v24, %v7995_v31  ;;  %v8068_v25 = vld [vmem:[%s11978_s7 + $0x10] sm:$0xff] }
 0x103   : > { %7398 = vmatpush3.msra.mxu1 %v813_v24  ;;  %v984_v34 = vrot.slane %v813_v24, %v7998_v33  ;;  %v1006_v36 = vrot.slane %v813_v24, %v8001_v35  ;;  %v1017_v38 = vrot.slane %v813_v24, %v8004_v37  ;;  %v1028_v40 = vrot.slane %v813_v24, %v8007_v39  ;;  %v8172_v26 = vld [vmem:[%s11978_s7 + $0x30] sm:$0xff] }
 0x104   : > { %968 = vbcast.lane.b32.xlu1 %v962_v28, 264  ;;  %1093 = vxpose.xlu0.b32.start.end [1/1] (short) (narrow) %v812_v27, 16  ;;  %v827_v41 = vrot.slane %v812_v27, %v7984_v22  ;;  %v838_v42 = vrot.slane %v812_v27, %v7992_v29  ;;  %v849_v43 = vrot.slane %v812_v27, %v7998_v33 }
 0x105   : > { %v1039_v45 = vrot.slane %v813_v24, %v8013_v44  ;;  %v860_v46 = vrot.slane %v812_v27, %v7995_v31  ;;  %v882_v47 = vrot.slane %v812_v27, %v8004_v37  ;;  %v893_v48 = vrot.slane %v812_v27, %v8007_v39  ;;  %v8063_v24 = vld [vmem:[%s11978_s7 + $0x8] sm:$0xff] }
 0x106   : > { %v871_v49 = vrot.slane %v812_v27, %v8001_v35  ;;  %v904_v50 = vrot.slane %v812_v27, %v8013_v44 }
 0x108   : > { %979 = vbcast.lane.b32.xlu1 %v973_v30, 264 }
 0x10c   : > { %964 = vbcast.lane.b32.xlu1 %v962_v28, 256 }
 0x110   : > { %975 = vbcast.lane.b32.xlu1 %v973_v30, 256  ;;  %v8076_v30 = vld [vmem:[%s11978_s7] sm:$0xff] }
 0x114   : > { %1001 = vbcast.lane.b32.xlu1 %v995_v32, 264 }
 0x118   : > { %986 = vbcast.lane.b32.xlu1 %v984_v34, 256 }
 0x11c   : > { %1012 = vbcast.lane.b32.xlu1 %v1006_v36, 264 }
 0x120   : > { %1023 = vbcast.lane.b32.xlu1 %v1017_v38, 264 }
 0x124   : > { %1034 = vbcast.lane.b32.xlu1 %v1028_v40, 264 }
 0x128   : > { %1019 = vbcast.lane.b32.xlu1 %v1017_v38, 256 }
 0x12c   : > { %833 = vbcast.lane.b32.xlu1 %v827_v41, 264 }
 0x130   : > { %844 = vbcast.lane.b32.xlu1 %v838_v42, 264 }
 0x131   : > { %990 = vbcast.lane.b32.xlu0 %v984_v34, 264  ;;  %v8086_v34 = vld [vmem:[%s11978_s7 + $0x28] sm:$0xff] }
 0x134   : > { %855 = vbcast.lane.b32.xlu1 %v849_v43, 264 }
 0x135   : > { %997 = vbcast.lane.b32.xlu0 %v995_v32, 256  ;;  %v8081_v32 = vld [vmem:[%s11977_s6 + $0x18] sm:$0xff] }
 0x138   : > { %829 = vbcast.lane.b32.xlu1 %v827_v41, 256 }
 0x139   : > { %1008 = vbcast.lane.b32.xlu0 %v1006_v36, 256  ;;  %v8091_v36 = vld [vmem:[%s11977_s6 + $0x10] sm:$0xff] }
 0x13c   : > { %840 = vbcast.lane.b32.xlu1 %v838_v42, 256  ;;  %v8100_v42 = vld [vmem:[%s11977_s6 + $0x8] sm:$0xff] }
 0x13d   : > { %1045 = vbcast.lane.b32.xlu0 %v1039_v45, 264 }
 0x140   : > { %866 = vbcast.lane.b32.xlu1 %v860_v46, 264 }
 0x141   : > { %884 = vbcast.lane.b32.xlu0 %v882_v47, 256 }
 0x144   : > { %851 = vbcast.lane.b32.xlu1 %v849_v43, 256  ;;  %v8105_v43 = vld [vmem:[%s11977_s6 + $0x28] sm:$0xff] }
 0x145   : > { %895 = vbcast.lane.b32.xlu0 %v893_v48, 256 }
 0x148   : > { %877 = vbcast.lane.b32.xlu1 %v871_v49, 264 }
 0x149   : > { %1030 = vbcast.lane.b32.xlu0 %v1028_v40, 256 }
 0x14c   : > { %862 = vbcast.lane.b32.xlu1 %v860_v46, 256 }
 0x150   : > { %888 = vbcast.lane.b32.xlu1 %v882_v47, 264  ;;  %v8112_v47 = vld [vmem:[%s11977_s6] sm:$0xff] }
 0x154   : > { %873 = vbcast.lane.b32.xlu1 %v871_v49, 256 }
 0x158   : > { %899 = vbcast.lane.b32.xlu1 %v893_v48, 264  ;;  %v8117_v48 = vld [vmem:[%s11977_s6 + $0x20] sm:$0xff] }
 0x15c   : > { %910 = vbcast.lane.b32.xlu1 %v904_v50, 264 }
 0x160   : > { %906 = vbcast.lane.b32.xlu1 %v904_v50, 256  ;;  %v8123_v50 = vld [vmem:[%s11978_s7 + $0x38] sm:$0xff] }
 0x164   : > { %1041 = vbcast.lane.b32.xlu1 %v1039_v45, 256 }
 0x176   : > { %v969_v57 = vpop.permute.xlu1 %968 }
 0x177   : > { %v1048_v40 = vmul.f32 %v969_v57, %v8063_v24  ;;  %v8137_v57 = vld [vmem:[%s11977_s6 + $0x30] sm:$0xff] }
 0x17a   : > { %v980_v58 = vpop.permute.xlu1 %979 }
 0x17b   : > { %v1050_v28 = vmul.f32 %v980_v58, %v8058_v23  ;;  %v1078_v58 = vsel %vm928_vm2, %v1048_v40, 0.0  ;;  %v8154_v40 = vld [vmem:[%s11977_s6 + $0x48] sm:$0xff] }
 0x17d   : > { %v1079_v49 = vsel %vm928_vm2, %v1050_v28, 0.0 }
 0x17e   : > { %v965_v59 = vpop.permute.xlu1 %964 }
 0x17f   : > { %v1047_v45 = vmul.f32 %v965_v59, %v8076_v30 }
 0x180   : > { %v1109_v55 = vpop.trf.xlu0 }
 0x181   : > { %7399 = vmatprep.mubr.msk.f32.mxu1 %vm1125_vm1, %v1109_v55  ;;  %v8132_v55 = vld [vmem:[%s11977_s6 + $0x38] sm:$0xff] }
 0x182   : > { %v976_v60 = vpop.permute.xlu1 %975 }
 0x183   : > { %v1049_v41 = vmul.f32 %v976_v60, %v8068_v25  ;;  %v8144_v60 = vld [vmem:[%s11978_s7 + $0x20] sm:$0xff] }
 0x184   : > { %v1110_v56 = vpop.trf.xlu0 }
 0x185   : > { %7400 = vmatmul.mubr.msk.f32.vlgmr.msra.gmra.mxu1 %vm1125_vm1, %v1110_v56  ;;  %v1064_v59 = vsel %vm928_vm2, %v1049_v41, 0.0  ;;  %v8159_v41 = vld [vmem:[%s11977_s6 + $0x40] sm:$0xff] }
 0x186   : > { %v1002_v61 = vpop.permute.xlu1 %1001 }
 0x18a   : > { %v8039_v62 = vpop.permute.xlu1 %986 }
 0x18e   : > { %v8041_v63 = vpop.permute.xlu1 %1012 }
 0x192   : > { %v8043_v0 = vpop.permute.xlu1 %1023 }
 0x196   : > { %v8045_v1 = vpop.permute.xlu1 %1034 }
 0x19a   : > { %v8047_v2 = vpop.permute.xlu1 %1019 }
 0x19e   : > { %v834_v3 = vpop.permute.xlu1 %833 }
 0x19f   : > { %v913_v53 = vmul.f32 %v834_v3, %v8100_v42 }
 0x1a1   : > { %v944_v16 = vsel %vm928_vm2, %v913_v53, 0.0 }
 0x1a2   : > { %v845_v4 = vpop.permute.xlu1 %844 }
 0x1a3   : > { %v991_v11 = vpop.permute.xlu0 %990  ;;  %v915_v46 = vmul.f32 %v845_v4, %v8081_v32 }
 0x1a4   : > { %v1052_v51 = vmul.f32 %v991_v11, %v8086_v34  ;;  %v1054_v11 = vmul.f32 %v1002_v61, %v8123_v50 }
 0x1a5   : > { %v945_v28 = vsel %vm928_vm2, %v915_v46, 0.0 }
 0x1a6   : > { %v856_v5 = vpop.permute.xlu1 %855 }
 0x1a7   : > { %v8049_v13 = vpop.permute.xlu0 %997  ;;  %v917_v54 = vmul.f32 %v856_v5, %v8105_v43  ;;  %v1080_v5 = vadd.f32 %v1079_v49, %v1078_v58  ;;  %v1051_v58 = vmul.f32 %v8039_v62, %v8144_v60 }
 0x1a9   : > { %v947_v14 = vsel %vm928_vm2, %v917_v54, 0.0  ;;  %v1083_v54 = vsel %vm928_vm2, %v1054_v11, 0.0  ;;  %v1066_v11 = vsel %vm928_vm2, %v1051_v58, 0.0 }
 0x1aa   : > { %v830_v6 = vpop.permute.xlu1 %829 }
 0x1ab   : > { %v8053_v19 = vpop.permute.xlu0 %1008  ;;  %v912_v3 = vmul.f32 %v830_v6, %v8112_v47 }
 0x1ad   : > { %v929_v62 = vsel %vm928_vm2, %v912_v3, 0.0  ;;  %v8197_v3 = vld [vmem:[%s11977_s6 + $0x68] sm:$0xff] }
 0x1ae   : > { %v841_v7 = vpop.permute.xlu1 %840  ;;  %12187 = vst [vmem:[#allocation24_spill] sm:$0xff] %v8197_v3 }
 0x1af   : > { %v8070_v27 = vpop.permute.xlu0 %1045  ;;  %v914_v52 = vmul.f32 %v841_v7, %v8091_v36  ;;  %v1063_v7 = vsel %vm928_vm2, %v1047_v45, 0.0 }
 0x1b0   : > { %v1065_v46 = vadd.f32 %v1064_v59, %v1063_v7  ;;  %v946_v59 = vadd.f32 %v945_v28, %v944_v16  ;;  %v8205_v16 = vld [vmem:[%s11977_s6 + $0x50] sm:$0xff] }
 0x1b1   : > { %v930_v49 = vsel %vm928_vm2, %v914_v52, 0.0 }
 0x1b2   : > { %v867_v8 = vpop.permute.xlu1 %866  ;;  %v931_v20 = vadd.f32 %v930_v49, %v929_v62  ;;  %v1055_v62 = vmul.f32 %v8053_v19, %v8192_v18 }
 0x1b3   : > { %v885_v56 = vpop.permute.xlu0 %884  ;;  %v919_v45 = vmul.f32 %v867_v8, %v8132_v55  ;;  %v8182_v8 = vld [vmem:[%s11978_s7 + $0x48] sm:$0xff] }
 0x1b4   : > { %v1056_v28 = vmul.f32 %v8041_v63, %v8182_v8  ;;  %v922_v19 = vmul.f32 %v885_v56, %v8205_v16  ;;  %v8249_v56 = vld [vmem:[%s11978_s7 + $0x60] sm:$0xff] }
 0x1b6   : > { %v852_v9 = vpop.permute.xlu1 %851  ;;  %v1085_v18 = vsel %vm928_vm2, %v1056_v28, 0.0 }
 0x1b7   : > { %v916_v4 = vmul.f32 %v852_v9, %v8117_v48  ;;  %v1081_v9 = vsel %vm928_vm2, %v1052_v51, 0.0  ;;  %v8177_v51 = vld [vmem:[%s11977_s6 + $0x58] sm:$0xff]  ;;  %v896_v17 = vpop.permute.xlu0 %895 }
 0x1b8   : > { %12185 = vst [vmem:[#allocation22_spill] sm:$0xff] %v8177_v51  ;;  %v1082_v7 = vadd.f32 %v1081_v9, %v1080_v5  ;;  %v948_v9 = vadd.f32 %v947_v14, %v946_v59  ;;  %v8227_v14 = vld [vmem:[%s11978_s7 + $0x58] sm:$0xff] }
 0x1ba   : > { %v878_v10 = vpop.permute.xlu1 %877  ;;  %v1084_v63 = vadd.f32 %v1083_v54, %v1082_v7 }
 0x1bb   : > { %v921_v52 = vmul.f32 %v878_v10, %v8154_v40  ;;  %v1053_v10 = vmul.f32 %v8049_v13, %v8172_v26  ;;  %v8216_v13 = vld [vmem:[%s11977_s6 + $0x78] sm:$0xff]  ;;  %v1031_v7 = vpop.permute.xlu0 %1030 }
 0x1bc   : > { %v1086_v28 = vadd.f32 %v1085_v18, %v1084_v63  ;;  %v1059_v18 = vmul.f32 %v1031_v7, %v8249_v56 }
 0x1be   : > { %v863_v12 = vpop.permute.xlu1 %862 }
 0x1bf   : > { %v918_v61 = vmul.f32 %v863_v12, %v8137_v57  ;;  %v932_v12 = vsel %vm928_vm2, %v916_v4, 0.0 }
 0x1c0   : > { %v933_v49 = vadd.f32 %v932_v12, %v931_v20  ;;  %v8232_v20 = vld [vmem:[%s11978_s7 + $0x50] sm:$0xff] }
 0x1c1   : > { %v934_v4 = vsel %vm928_vm2, %v918_v61, 0.0  ;;  %v951_v61 = vsel %vm928_vm2, %v921_v52, 0.0 }
 0x1c2   : > { %v8051_v15 = vpop.permute.xlu1 %888  ;;  %v935_v52 = vadd.f32 %v934_v4, %v933_v49  ;;  %v1070_v4 = vsel %vm928_vm2, %v1055_v62, 0.0  ;;  %v8270_v49 = vld [vmem:[%s11978_s7 + $0x78] sm:$0xff] }
 0x1c3   : > { %v923_v5 = vmul.f32 %v8051_v15, %v8177_v51  ;;  %v8244_v51 = vld [vmem:[%s11977_s6 + $0x60] sm:$0xff] }
 0x1c6   : > { %v874_v21 = vpop.permute.xlu1 %873 }
 0x1c7   : > { %v920_v53 = vmul.f32 %v874_v21, %v8159_v41  ;;  %v949_v21 = vsel %vm928_vm2, %v919_v45, 0.0 }
 0x1c8   : > { %v950_v12 = vadd.f32 %v949_v21, %v948_v9  ;;  %v1057_v21 = vmul.f32 %v8047_v2, %v8232_v20  ;;  %v8276_v2 = vld [vmem:[%s11978_s7 + $0x70] sm:$0xff] }
 0x1c9   : > { %v936_v15 = vsel %vm928_vm2, %v920_v53, 0.0  ;;  %v1068_v53 = vsel %vm928_vm2, %v1053_v10, 0.0  ;;  %12188 = vst [vmem:[#allocation25_spill] sm:$0xff] %v8276_v2 }
 0x1ca   : > { %v8093_v38 = vpop.permute.xlu1 %899  ;;  %v952_v54 = vadd.f32 %v951_v61, %v950_v12  ;;  %v937_v10 = vadd.f32 %v936_v15, %v935_v52  ;;  %v924_v15 = vmul.f32 %v896_v17, %v8244_v51  ;;  %v1062_v17 = vmul.f32 %v8070_v27, %v8270_v49 }
 0x1cb   : > { %v925_v58 = vmul.f32 %v8093_v38, %v8197_v3  ;;  %v953_v38 = vsel %vm928_vm2, %v923_v5, 0.0  ;;  %v1067_v3 = vadd.f32 %v1066_v11, %v1065_v46  ;;  %v1058_v46 = vmul.f32 %v8043_v0, %v8227_v14  ;;  %v8265_v11 = vld [vmem:[%s11978_s7 + $0x68] sm:$0xff] }
 0x1cc   : > { %v938_v0 = vsel %vm928_vm2, %v922_v19, 0.0  ;;  %v954_v61 = vadd.f32 %v953_v38, %v952_v54  ;;  %v1072_v7 = vsel %vm928_vm2, %v1057_v21, 0.0  ;;  %v1091_v27 = vsel %vm928_vm2, %v1062_v17, 0.0 }
 0x1cd   : > { %v955_v5 = vsel %vm928_vm2, %v925_v58, 0.0  ;;  %v1069_v9 = vadd.f32 %v1068_v53, %v1067_v3  ;;  %v939_v12 = vadd.f32 %v938_v0, %v937_v10  ;;  %v1087_v52 = vsel %vm928_vm2, %v1058_v46, 0.0 }
 0x1ce   : > { %v911_v6 = vpop.permute.xlu1 %910  ;;  %v956_v19 = vadd.f32 %v955_v5, %v954_v61  ;;  %v1060_v53 = vmul.f32 %v8045_v1, %v8265_v11  ;;  %v1088_v54 = vadd.f32 %v1087_v52, %v1086_v28  ;;  %v940_v10 = vsel %vm928_vm2, %v924_v15, 0.0 }
 0x1cf   : > { %v927_v59 = vmul.f32 %v911_v6, %v8216_v13  ;;  %v8254_v6 = vld [vmem:[%s11977_s6 + $0x70] sm:$0xff]  ;;  %v1071_v63 = vadd.f32 %v1070_v4, %v1069_v9  ;;  %v1074_v4 = vsel %vm928_vm2, %v1059_v18, 0.0  ;;  %v941_v1 = vadd.f32 %v940_v10, %v939_v12 }
 0x1d0   : > { %v1089_v9 = vsel %vm928_vm2, %v1060_v53, 0.0  ;;  %v1212_v21 = vstv %s8282_s29  ;;  %v1216_v18 = vstv %s7185_s30  ;;  %v1226_v10 = vstv %s7187_s14  ;;  %s8849_s30 = sld [smem:[#allocation4 + $0x100]] }
 0x1d1   : > { %v957_v3 = vsel %vm928_vm2, %v927_v59, 0.0  ;;  %v1208_v59 = vstv %s8235_s12  ;;  %v1073_v5 = vadd.f32 %v1072_v7, %v1071_v63  ;;  %v1090_v28 = vadd.f32 %v1089_v9, %v1088_v54  ;;  %s7186_s12 = sld [smem:[#allocation4 + $0x1]] }
 0x1d2   : > { %v907_v45 = vpop.permute.xlu1 %906  ;;  %s7208_s14 = sld [smem:[#allocation4 + $0x101]] }
 0x1d3   : > { %v926_v58 = vmul.f32 %v907_v45, %v8254_v6  ;;  %v958_v45 = vadd.f32 %v957_v3, %v956_v19  ;;  %v1075_v61 = vadd.f32 %v1074_v4, %v1073_v5  ;;  %v1092_v15 = vadd.f32 %v1091_v27, %v1090_v28  ;;  %s11165_s29 = sld [smem:[#allocation4 + $0x101]] }
 0x1d4   : > { %v1232_v5 = vstv %s7188_s15  ;;  %s7209_s15 = sld [smem:[#allocation2 + $0x102]] }
 0x1d5   : > { %v942_v46 = vsel %vm928_vm2, %v926_v58, 0.0  ;;  %v1218_v63 = vmul.f32 %v1216_v18, %v1092_v15  ;;  %v438_v15 = vld [vmem:[%s11975_s4 + $0x20] sm:$0xff] }
 0x1d6   : > { %v1042_v62 = vpop.permute.xlu1 %1041  ;;  %v943_v3 = vadd.f32 %v942_v46, %v941_v1 }
 0x1d7   : > { %v1061_v38 = vmul.f32 %v1042_v62, %v8276_v2  ;;  %v1210_v62 = vmul.f32 %v1208_v59, %v958_v45  ;;  %v1222_v17 = vstv %s7186_s12  ;;  %s8797_s12 = sld [smem:[#allocation2 + $0x100]] }
 0x1d8   : > { %v1209_v52 = vmul.f32 %v1208_v59, %v943_v3  ;;  %v449_v3 = vld [vmem:[%s11976_s5 + $0x18] sm:$0xff] }
 0x1d9   : > { %v1076_v0 = vsel %vm928_vm2, %v1061_v38, 0.0  ;;  %v1214_v58 = vadd.f32 %v1212_v21, %v1210_v62 }
 0x1da   : > { %v1077_v19 = vadd.f32 %v1076_v0, %v1075_v61  ;;  %v1213_v7 = vadd.f32 %v1212_v21, %v1209_v52  ;;  %v437_v21 = vld [vmem:[%s11975_s4 + $0x18] sm:$0xff] }
 0x1db   : > { %v1220_v53 = vadd.f32 %v1218_v63, %v1214_v58 }
 0x1dc   : > { %v1217_v12 = vmul.f32 %v1216_v18, %v1077_v19  ;;  %v436_v19 = vld [vmem:[%s11975_s4 + $0x10] sm:$0xff] }
 0x1dd   : > { %v1224_v4 = vadd.f32 %v1222_v17, %v1220_v53 }
 0x1de   : > { %v1219_v38 = vadd.f32 %v1217_v12, %v1213_v7 }
 0x1e0   : > { %v1223_v9 = vadd.f32 %v1222_v17, %v1219_v38 }
 0x245   : > { %v7401_v54 = vpop.f32.mrf.mxu1 }
 0x246   : > { %v1228_v45 = vmul.f32 %v7401_v54, %v1226_v10 }
 0x247   : > { %v1198_v46 = vpop.f32.mrf.mxu1 }
 0x248   : > { %v1230_v1 = vadd.f32 %v1228_v45, %v1224_v4  ;;  %v1227_v27 = vmul.f32 %v1226_v10, %v1198_v46  ;;  %v7384_v4 = vpop.f32.mrf.mxu0 }
 0x24a   : > { %v1229_v0 = vadd.f32 %v1227_v27, %v1223_v9  ;;  %v1234_v28 = vadd.f32 %v1232_v5, %v1230_v1  ;;  %v448_v9 = vld [vmem:[%s11976_s5 + $0x10] sm:$0xff] }
 0x24c   : > { %v1238_v59 = vsel %vm928_vm2, %v1234_v28, -inf  ;;  %v1233_v61 = vadd.f32 %v1232_v5, %v1229_v0  ;;  %v450_v5 = vld [vmem:[%s11976_s5 + $0x20] sm:$0xff] }
 0x24d   : > { %1239 = vmax.xlane.f32.xlu0 %v1238_v59 }
 0x24e   : > { %v1235_v62 = vsel %vm928_vm2, %v1233_v61, -inf }
 0x24f   : > { %1236 = vmax.xlane.f32.xlu1 %v1235_v62 }
 0x260   : > { %769 = vperm.xlu1 %7552, %v449_v3  }
 0x263   : > { %697 = vperm.xlu0 %7551, %v437_v21  }
 0x264   : > { %702 = vperm.xlu1 %7552, %v438_v15  }
 0x267   : > { %692 = vperm.xlu0 %7551, %v436_v19  }
 0x2d6   : > { %v1240_v18 = vpop.xlane.xlu0 %1239 }
 0x2d7   : > { %v1242_v52 = vsub.f32 %v1234_v28, %v1240_v18  ;;  %v11995_v28 = vmov 0.0  }
 0x2d8   : > { %v1237_v58 = vpop.xlane.xlu1 %1236  ;;  %7402 = vmatprep.subr.mxu1 %v11995_v28  ;;  %7426 = vmatprep.subr.mxu0 %v11995_v28 }
 0x2d9   : > { %v1245_v63 = vmul.f32 1.442695, %v1242_v52  ;;  %v1241_v12 = vsub.f32 %v1233_v61, %v1237_v58  ;;  %7406 = vmatprep.mubr.msk.f32.mxu1 %vm7828_vm3, %v11995_v28  ;;  %v631_v61 = vpop.f32.mrf.mxu0 }
 0x2db   : > { %7553 = vpow2.f32 %v1245_v63  ;;  %v1243_v53 = vmul.f32 1.442695, %v1241_v12  ;;  %v8342_v3 = vpop.f32.mrf.mxu0 }
 0x2dc   : > { %v8318_v46 = vpop.permute.xlu1 %769  ;;  %12192 = vst [vmem:[#allocation29_spill] sm:$0xff] %v8342_v3 }
 0x2dd   : > { %7555 = vpow2.f32 %v1243_v53  ;;  %12190 = vst [vmem:[#allocation27_spill] sm:$0xff] %v8318_v46  ;;  %v641_v19 = vpop.f32.mrf.mxu0 }
 0x2de   : > { %v8315_v54 = vpop.permute.xlu0 %697 }
 0x2df   : > { %12189 = vst [vmem:[#allocation26_spill] sm:$0xff] %v8315_v54  ;;  %v743_v45 = vmul.f32 %v7384_v4, %v8315_v54 }
 0x2e0   : > { %v8344_v21 = vpop.permute.xlu1 %702 }
 0x2e1   : > { %v8324_v1 = vadd.f32 %v8318_v46, %v743_v45  ;;  %12193 = vst [vmem:[#allocation30_spill] sm:$0xff] %v8344_v21  ;;  %v744_v52 = vmul.f32 %v8344_v21, %v641_v19 }
 0x2e2   : > { %v8340_v62 = vpop.permute.xlu0 %692 }
 0x2e3   : > { %v1625_v27 = vrot.slane %v8324_v1, %v7984_v22  ;;  %v1636_v0 = vrot.slane %v8324_v1, %v7992_v29  ;;  %v1647_v59 = vrot.slane %v8324_v1, %v7998_v33  ;;  %12191 = vst [vmem:[#allocation28_spill] sm:$0xff] %v8340_v62 }
 0x2e8   : > { %v7554_v7 = vpop.eup %7553 }
 0x2e9   : > { %v1250_v17 = vsel %vm928_vm2, %v7554_v7, 0.0 }
 0x2ea   : > { %v7556_v10 = vpop.eup %7555  ;;  %1251 = vadd.xlane.f32.xlu0 %v1250_v17 }
 0x2eb   : > { %v1247_v38 = vsel %vm928_vm2, %v7556_v10, 0.0 }
 0x2ec   : > { %1248 = vadd.xlane.f32.xlu1 %v1247_v38 }
 0x2fd   : > { %774 = vperm.xlu1 %7552, %v450_v5  }
 0x300   : > { %764 = vperm.xlu0 %7551, %v448_v9   ;;  %v1680_v9 = vrot.slane %v8324_v1, %v8004_v37 }
 0x301   : > { %1631 = vbcast.lane.b32.xlu1 %v1625_v27, 264 }
 0x305   : > { %1642 = vbcast.lane.b32.xlu1 %v1636_v0, 264 }
 0x309   : > { %1653 = vbcast.lane.b32.xlu1 %v1647_v59, 264 }
 0x31e   : > { %1890 = vxpose.xlu0.b32.start.end [1/1] (short) (narrow) %v8324_v1, 16 }
 0x373   : > { %v1252_v15 = vpop.xlane.xlu0 %1251 }
 0x374   : > { %7557 = vrcp.f32 %v1252_v15 }
 0x375   : > { %v1249_v18 = vpop.xlane.xlu1 %1248 }
 0x376   : > { %7559 = vrcp.f32 %v1249_v18 }
 0x379   : > { %v8347_v58 = vpop.permute.xlu1 %774 }
 0x37a   : > { %12194 = vst [vmem:[#allocation31_spill] sm:$0xff] %v8347_v58  ;;  %v816_v63 = vadd.f32 %v8347_v58, %v744_v52 }
 0x37b   : > { %v8363_v19 = vpop.permute.xlu0 %764 }
 0x37c   : > { %v1781_v12 = vrot.slane %v816_v63, %v7998_v33  ;;  %v1759_v53 = vrot.slane %v816_v63, %v7984_v22  ;;  %v1792_v17 = vrot.slane %v816_v63, %v7995_v31  ;;  %v1770_v38 = vrot.slane %v816_v63, %v7992_v29  ;;  %12197 = vst [vmem:[#allocation34_spill] sm:$0xff] %v8363_v19 }
 0x37d   : > { %v1803_v18 = vrot.slane %v816_v63, %v8001_v35 }
 0x37e   : > { %1787 = vbcast.lane.b32.xlu0 %v1781_v12, 264  ;;  %1765 = vbcast.lane.b32.xlu1 %v1759_v53, 264 }
 0x381   : > { %v7558_v4 = vpop.eup %7557 }
 0x382   : > { %v8354_v45 = vmul.f32 %v7558_v4, %v7554_v7  ;;  %1794 = vbcast.lane.b32.xlu0 %v1792_v17, 256  ;;  %1776 = vbcast.lane.b32.xlu1 %v1770_v38, 264  ;;  %v742_v7 = vmul.f32 %v8340_v62, %v631_v61  ;;  %v1836_v61 = vrot.slane %v816_v63, %v8013_v44 }
 0x383   : > { %v7560_v5 = vpop.eup %7559  ;;  %v1825_v4 = vrot.slane %v816_v63, %v8007_v39 }
 0x384   : > { %12195 = vst [vmem:[#allocation32_spill] sm:$0xff] %v8354_v45  ;;  %7403 = vmatpush3.xpose.msk.msra.mxu1 %vm928_vm2, %v8354_v45  ;;  %v8361_v15 = vmul.f32 %v7560_v5, %v7556_v10  ;;  %v814_v52 = vadd.f32 %v8363_v19, %v742_v7  ;;  %v1691_v10 = vrot.slane %v8324_v1, %v8007_v39 }
 0x385   : > { %7404 = vmatprep.subr.mxu1 %v11995_v28 }
 0x386   : > { %12196 = vst [vmem:[#allocation33_spill] sm:$0xff] %v8361_v15  ;;  %1682 = vbcast.lane.b32.xlu0 %v1680_v9, 256  ;;  %1627 = vbcast.lane.b32.xlu1 %v1625_v27, 256  ;;  %v1658_v27 = vrot.slane %v8324_v1, %v7995_v31 }
 0x388   : > { %7405 = vmatpush3.xpose.msk.msra.mxu1 %vm928_vm2, %v8361_v15 }
 0x389   : > { %7409 = vmatprep.subr.mxu1 %v816_v63 }
 0x38a   : > { %1805 = vbcast.lane.b32.xlu0 %v1803_v18, 256  ;;  %1638 = vbcast.lane.b32.xlu1 %v1636_v0, 256  ;;  %v1669_v0 = vrot.slane %v8324_v1, %v8001_v35 }
 0x38b   : > { %7407 = vmatmul.mubr.msk.f32.vlgmr.msra.gmra.mxu1 %vm928_vm2, %v814_v52 }
 0x38c   : > { %7410 = vmatpush3.msra.mxu1 %v816_v63 }
 0x38d   : > { %7414 = vmatprep.subr.mxu1 %v11995_v28 }
 0x38e   : > { %1693 = vbcast.lane.b32.xlu0 %v1691_v10, 256  ;;  %1664 = vbcast.lane.b32.xlu1 %v1658_v27, 264 }
 0x392   : > { %1842 = vbcast.lane.b32.xlu0 %v1836_v61, 264  ;;  %1649 = vbcast.lane.b32.xlu1 %v1647_v59, 256  ;;  %v428_v59 = vld [vmem:[%s11974_s3 + $0x30] sm:$0xff] }
 0x393   : > { %7388 = vmatprep.mubr.msk.f32.mxu0 %vm518_vm0, %v428_v59 }
 0x396   : > { %1827 = vbcast.lane.b32.xlu0 %v1825_v4, 256  ;;  %1675 = vbcast.lane.b32.xlu1 %v1669_v0, 264 }
 0x39a   : > { %v1906_v5 = vpop.trf.xlu0  ;;  %1761 = vbcast.lane.b32.xlu1 %v1759_v53, 256  ;;  %v429_v53 = vld [vmem:[%s11974_s3 + $0x38] sm:$0xff] }
 0x39b   : > { %7411 = vmatprep.mubr.msk.f32.mxu1 %vm1125_vm1, %v1906_v5  ;;  %7389 = vmatmul.mubr.msk.f32.gmra.mxu0 %vm518_vm0, %v429_v53 }
 0x39e   : > { %v1907_v7 = vpop.trf.xlu0  ;;  %1772 = vbcast.lane.b32.xlu1 %v1770_v38, 256  ;;  %v1632_v38 = vpop.permute.xlu1 %1631 }
 0x39f   : > { %7412 = vmatmul.mubr.msk.f32.vlgmr.msra.gmra.mxu1 %vm1125_vm1, %v1907_v7  ;;  %v1711_v45 = vmul.f32 %v1632_v38, %v8100_v42 }
 0x3a0   : > { %7418 = vmatprep.mubr.msk.f32.mxu1 %vm7828_vm3, %v11995_v28 }
 0x3a2   : > { %1798 = vbcast.lane.b32.xlu1 %v1792_v17, 264  ;;  %v1814_v17 = vrot.slane %v816_v63, %v8004_v37  ;;  %v1741_v37 = vsel %vm928_vm2, %v1711_v45, 0.0 }
 0x3a6   : > { %1660 = vbcast.lane.b32.xlu1 %v1658_v27, 256 }
 0x3aa   : > { %1686 = vbcast.lane.b32.xlu1 %v1680_v9, 264  ;;  %v1643_v9 = vpop.permute.xlu1 %1642 }
 0x3ab   : > { %v1713_v54 = vmul.f32 %v1643_v9, %v8081_v32 }
 0x3ad   : > { %v1742_v35 = vsel %vm928_vm2, %v1713_v54, 0.0 }
 0x3ae   : > { %1783 = vbcast.lane.b32.xlu1 %v1781_v12, 256  ;;  %v1702_v12 = vrot.slane %v8324_v1, %v8013_v44  ;;  %v1743_v2 = vadd.f32 %v1742_v35, %v1741_v37 }
 0x3b2   : > { %1809 = vbcast.lane.b32.xlu1 %v1803_v18, 264  ;;  %v1654_v18 = vpop.permute.xlu1 %1653 }
 0x3b3   : > { %v1715_v44 = vmul.f32 %v1654_v18, %v8105_v43 }
 0x3b5   : > { %v1744_v31 = vsel %vm928_vm2, %v1715_v44, 0.0 }
 0x3b6   : > { %1671 = vbcast.lane.b32.xlu1 %v1669_v0, 256  ;;  %v1745_v45 = vadd.f32 %v1744_v31, %v1743_v2 }
 0x3ba   : > { %1697 = vbcast.lane.b32.xlu1 %v1691_v10, 264 }
 0x3be   : > { %1820 = vbcast.lane.b32.xlu1 %v1814_v17, 264 }
 0x3c2   : > { %1708 = vbcast.lane.b32.xlu1 %v1702_v12, 264 }
 0x3c6   : > { %1831 = vbcast.lane.b32.xlu1 %v1825_v4, 264 }
 0x3ca   : > { %1816 = vbcast.lane.b32.xlu1 %v1814_v17, 256 }
 0x3ce   : > { %1704 = vbcast.lane.b32.xlu1 %v1702_v12, 256 }
 0x3d2   : > { %1838 = vbcast.lane.b32.xlu1 %v1836_v61, 256 }
 0x3f0   : > { %v1766_v52 = vpop.permute.xlu1 %1765  ;;  %v1788_v17 = vpop.permute.xlu0 %1787 }
 0x3f1   : > { %v1845_v32 = vmul.f32 %v1766_v52, %v8063_v24  ;;  %v1849_v44 = vmul.f32 %v1788_v17, %v8086_v34 }
 0x3f4   : > { %v1777_v27 = vpop.permute.xlu1 %1776  ;;  %v1795_v58 = vpop.permute.xlu0 %1794 }
 0x3f5   : > { %v1847_v33 = vmul.f32 %v1777_v27, %v8058_v23  ;;  %v1850_v23 = vmul.f32 %v1795_v58, %v8172_v26 }
 0x3f7   : > { %v1865_v58 = vsel %vm928_vm2, %v1850_v23, 0.0 }
 0x3f8   : > { %v1628_v0 = vpop.permute.xlu1 %1627  ;;  %v1683_v15 = vpop.permute.xlu0 %1682 }
 0x3f9   : > { %v1710_v42 = vmul.f32 %v1628_v0, %v8112_v47  ;;  %v1875_v47 = vsel %vm928_vm2, %v1845_v32, 0.0  ;;  %v1720_v18 = vmul.f32 %v1683_v15, %v8205_v16 }
 0x3fc   : > { %v1639_v5 = vpop.permute.xlu1 %1638  ;;  %v1806_v39 = vpop.permute.xlu0 %1805 }
 0x3fd   : > { %v1712_v29 = vmul.f32 %v1639_v5, %v8091_v36 }
 0x3ff   : > { %v1727_v35 = vsel %vm928_vm2, %v1712_v29, 0.0 }
 0x400   : > { %v1665_v7 = vpop.permute.xlu1 %1664  ;;  %v1694_v9 = vpop.permute.xlu0 %1693 }
 0x401   : > { %v1717_v31 = vmul.f32 %v1665_v7, %v8132_v55 }
 0x404   : > { %v1650_v10 = vpop.permute.xlu1 %1649 }
 0x405   : > { %v1714_v43 = vmul.f32 %v1650_v10, %v8117_v48 }
 0x407   : > { %v1729_v34 = vsel %vm928_vm2, %v1714_v43, 0.0 }
 0x408   : > { %v1676_v59 = vpop.permute.xlu1 %1675 }
 0x40c   : > { %v1762_v63 = vpop.permute.xlu1 %1761 }
 0x40d   : > { %v1844_v38 = vmul.f32 %v1762_v63, %v8076_v30  ;;  %v1726_v30 = vsel %vm928_vm2, %v1710_v42, 0.0 }
 0x40f   : > { %v1860_v26 = vsel %vm928_vm2, %v1844_v38, 0.0 }
 0x410   : > { %v1773_v53 = vpop.permute.xlu1 %1772 }
 0x411   : > { %v1846_v22 = vmul.f32 %v1773_v53, %v8068_v25  ;;  %v1876_v25 = vsel %vm928_vm2, %v1847_v33, 0.0 }
 0x413   : > { %v1861_v37 = vsel %vm928_vm2, %v1846_v22, 0.0  ;;  %v1728_v22 = vadd.f32 %v1727_v35, %v1726_v30 }
 0x414   : > { %v1799_v28 = vpop.permute.xlu1 %1798  ;;  %v1862_v2 = vadd.f32 %v1861_v37, %v1860_v26 }
 0x415   : > { %v1851_v48 = vmul.f32 %v1799_v28, %v8123_v50  ;;  %v1746_v50 = vsel %vm928_vm2, %v1717_v31, 0.0  ;;  %v1843_v28 = vpop.permute.xlu0 %1842  ;;  %v1730_v52 = vadd.f32 %v1729_v34, %v1728_v22  ;;  %v12202_v34 = vld [vmem:[#allocation25_spill] sm:$0xff] }
 0x416   : > { %v1747_v42 = vadd.f32 %v1746_v50, %v1745_v45 }
 0x417   : > { %v1880_v0 = vsel %vm928_vm2, %v1851_v48, 0.0 }
 0x418   : > { %v1661_v19 = vpop.permute.xlu1 %1660 }
 0x419   : > { %v1716_v24 = vmul.f32 %v1661_v19, %v8137_v57  ;;  %v1719_v57 = vmul.f32 %v1676_v59, %v8154_v40  ;;  %v12198_v40 = vld [vmem:[#allocation22_spill] sm:$0xff]  ;;  %v12199_v59 = vld [vmem:[#allocation23_spill] sm:$0xff] }
 0x41a   : > { %v1852_v63 = vmul.f32 %v1806_v39, %v12199_v59  ;;  %v2022_v59 = vstv %s7198_s22  ;;  %s9425_s22 = sld [smem:[#allocation4]] }
 0x41b   : > { %v1731_v55 = vsel %vm928_vm2, %v1716_v24, 0.0 }
 0x41c   : > { %v1687_v1 = vpop.permute.xlu1 %1686  ;;  %v1732_v16 = vadd.f32 %v1731_v55, %v1730_v52  ;;  %v2008_v52 = vstv %s7195_s21  ;;  %s10016_s21 = sld [smem:[#allocation4 + $0x81]] }
 0x41d   : > { %v1721_v5 = vmul.f32 %v1687_v1, %v12198_v40 }
 0x41f   : > { %v1750_v39 = vsel %vm928_vm2, %v1721_v5, 0.0 }
 0x420   : > { %v1784_v62 = vpop.permute.xlu1 %1783 }
 0x421   : > { %v1848_v54 = vmul.f32 %v1784_v62, %v8144_v60  ;;  %v1877_v60 = vadd.f32 %v1876_v25, %v1875_v47  ;;  %v1878_v62 = vsel %vm928_vm2, %v1849_v44, 0.0 }
 0x423   : > { %v1863_v33 = vsel %vm928_vm2, %v1848_v54, 0.0  ;;  %v1879_v53 = vadd.f32 %v1878_v62, %v1877_v60 }
 0x424   : > { %v1810_v4 = vpop.permute.xlu1 %1809 }
 0x425   : > { %v1853_v19 = vmul.f32 %v1810_v4, %v8182_v8  ;;  %v1748_v8 = vsel %vm928_vm2, %v1719_v57, 0.0  ;;  %v12200_v4 = vld [vmem:[#allocation24_spill] sm:$0xff]  ;;  %v1881_v1 = vadd.f32 %v1880_v0, %v1879_v53 }
 0x426   : > { %v1749_v45 = vadd.f32 %v1748_v8, %v1747_v42 }
 0x427   : > { %v1882_v15 = vsel %vm928_vm2, %v1853_v19, 0.0 }
 0x428   : > { %v1672_v12 = vpop.permute.xlu1 %1671  ;;  %v1883_v44 = vadd.f32 %v1882_v15, %v1881_v1 }
 0x429   : > { %v1718_v29 = vmul.f32 %v1672_v12, %v8159_v41  ;;  %v1864_v41 = vadd.f32 %v1863_v33, %v1862_v2 }
 0x42b   : > { %v1733_v7 = vsel %vm928_vm2, %v1718_v29, 0.0  ;;  %v1866_v43 = vadd.f32 %v1865_v58, %v1864_v41 }
 0x42c   : > { %v1698_v61 = vpop.permute.xlu1 %1697  ;;  %v1734_v38 = vadd.f32 %v1733_v7, %v1732_v16 }
 0x42d   : > { %v1723_v17 = vmul.f32 %v1698_v61, %v12200_v4  ;;  %v2028_v4 = vstv %s7199_s23  ;;  %s9428_s23 = sld [smem:[#allocation2 + $0x1]] }
 0x430   : > { %v1821_v21 = vpop.permute.xlu1 %1820 }
 0x431   : > { %v1855_v10 = vmul.f32 %v1821_v21, %v8227_v14  ;;  %v1735_v14 = vsel %vm928_vm2, %v1720_v18, 0.0  ;;  %v2012_v18 = vstv %s8457_s20  ;;  %s10083_s20 = scalar_lea.vmem %s11982_s11, %s7289_s25  ;;  %s10671_s25 = sld [smem:[#allocation2 + $0x180]] }
 0x432   : > { %v1736_v24 = vadd.f32 %v1735_v14, %v1734_v38 }
 0x433   : > { %v1884_v21 = vsel %vm928_vm2, %v1855_v10, 0.0  ;;  %v2018_v10 = vstv %s7197_s18  ;;  %s8827_s18 = sld [smem:[#allocation2 + $0x101]] }
 0x434   : > { %v8395_v46 = vpop.permute.xlu1 %1708  ;;  %v1885_v47 = vadd.f32 %v1884_v21, %v1883_v44  ;;  %v440_v21 = vld [vmem:[%s11975_s4 + $0x30] sm:$0xff]  ;;  %v433_v44 = vld [vmem:[%s11974_s3 + $0x58] sm:$0xff] }
 0x435   : > { %v1725_v54 = vmul.f32 %v8395_v46, %v8216_v13  ;;  %v1751_v46 = vadd.f32 %v1750_v39, %v1749_v45  ;;  %v452_v39 = vld [vmem:[%s11976_s5 + $0x30] sm:$0xff] }
 0x436   : > { %v432_v45 = vld [vmem:[%s11974_s3 + $0x50] sm:$0xff] }
 0x437   : > { %v1754_v31 = vsel %vm928_vm2, %v1725_v54, 0.0  ;;  %v441_v54 = vld [vmem:[%s11975_s4 + $0x38] sm:$0xff] }
 0x438   : > { %v1832_v3 = vpop.permute.xlu1 %1831 }
 0x439   : > { %v1857_v12 = vmul.f32 %v1832_v3, %v8265_v11  ;;  %v1867_v11 = vsel %vm928_vm2, %v1852_v63, 0.0  ;;  %v1828_v3 = vpop.permute.xlu0 %1827 }
 0x43a   : > { %v1856_v30 = vmul.f32 %v1828_v3, %v8249_v56  ;;  %v2004_v56 = vstv %s8445_s19  ;;  %v431_v3 = vld [vmem:[%s11974_s3 + $0x48] sm:$0xff]  ;;  %s9039_s19 = sld [smem:[#allocation2 + $0x182]] }
 0x43b   : > { %v1886_v25 = vsel %vm928_vm2, %v1857_v12, 0.0 }
 0x43c   : > { %v1817_v36 = vpop.permute.xlu1 %1816 }
 0x43d   : > { %v1854_v32 = vmul.f32 %v1817_v36, %v8232_v20  ;;  %v1722_v20 = vmul.f32 %v1694_v9, %v8244_v51  ;;  %v1752_v36 = vsel %vm928_vm2, %v1723_v17, 0.0  ;;  %v1868_v51 = vadd.f32 %v1867_v11, %v1866_v43  ;;  %v439_v11 = vld [vmem:[%s11975_s4 + $0x28] sm:$0xff] }
 0x43e   : > { %v1859_v9 = vmul.f32 %v1843_v28, %v8270_v49  ;;  %v1753_v48 = vadd.f32 %v1752_v36, %v1751_v46  ;;  %v1871_v49 = vsel %vm928_vm2, %v1856_v30, 0.0 }
 0x43f   : > { %v1869_v35 = vsel %vm928_vm2, %v1854_v32, 0.0  ;;  %v1737_v29 = vsel %vm928_vm2, %v1722_v20, 0.0  ;;  %v8487_v20 = vld [vmem:[%s11974_s3 + $0x40] sm:$0xff] }
 0x440   : > { %v1705_v27 = vpop.permute.xlu1 %1704  ;;  %v1870_v33 = vadd.f32 %v1869_v35, %v1868_v51  ;;  %v1755_v22 = vadd.f32 %v1754_v31, %v1753_v48  ;;  %v1738_v57 = vadd.f32 %v1737_v29, %v1736_v24  ;;  %v1888_v2 = vsel %vm928_vm2, %v1859_v9, 0.0  ;;  %12203 = vst [vmem:[#allocation23_spill] sm:$0xff] %v8487_v20  ;;  %7391 = vmatprep.mubr.msk.f32.mxu0 %vm518_vm0, %v8487_v20  ;;  %v451_v29 = vld [vmem:[%s11976_s5 + $0x28] sm:$0xff]  ;;  %v8749_v20 = vld [vmem:[%s11977_s6 + $0x58] sm:$0xff] }
 0x441   : > { %v1724_v37 = vmul.f32 %v1705_v27, %v8254_v6  ;;  %v1887_v6 = vadd.f32 %v1886_v25, %v1885_v47  ;;  %7392 = vmatmul.mubr.msk.f32.gmra.mxu0 %vm518_vm0, %v431_v3 }
 0x442   : > { %v1872_v19 = vadd.f32 %v1871_v49, %v1870_v33  ;;  %v2006_v50 = vmul.f32 %v2004_v56, %v1755_v22  ;;  %7394 = vmatprep.mubr.msk.f32.mxu0 %vm518_vm0, %v432_v45  ;;  %v12209_v49 = vld [vmem:[#allocation17_spill] sm:$0xff] }
 0x443   : > { %v1739_v60 = vsel %vm928_vm2, %v1724_v37, 0.0  ;;  %v1889_v58 = vadd.f32 %v1888_v2, %v1887_v6  ;;  %v453_v6 = vld [vmem:[%s11976_s5 + $0x38] sm:$0xff] }
 0x444   : > { %v1839_v23 = vpop.permute.xlu1 %1838  ;;  %v1740_v55 = vadd.f32 %v1739_v60, %v1738_v57  ;;  %v2010_v40 = vadd.f32 %v2008_v52, %v2006_v50  ;;  %v12207_v60 = vld [vmem:[#allocation13_spill] sm:$0xff]  ;;  %v12208_v57 = vld [vmem:[#allocation15_spill] sm:$0xff] }
 0x445   : > { %v1858_v26 = vmul.f32 %v1839_v23, %v12202_v34  ;;  %v2014_v27 = vmul.f32 %v2012_v18, %v1889_v58  ;;  %7395 = vmatmul.mubr.msk.f32.gmra.mxu0 %vm518_vm0, %v433_v44  ;;  %v12204_v23 = vmov 0.0  }
 0x446   : > { %v2005_v41 = vmul.f32 %v2004_v56, %v1740_v55  ;;  %7430 = vmatprep.mubr.msk.f32.mxu0 %vm7828_vm3, %v12204_v23 }
 0x447   : > { %v1873_v62 = vsel %vm928_vm2, %v1858_v26, 0.0  ;;  %v2016_v5 = vadd.f32 %v2014_v27, %v2010_v40  ;;  %v12214_v40 = vld [vmem:[#allocation19_spill] sm:$0xff] }
 0x448   : > { %v1874_v28 = vadd.f32 %v1873_v62, %v1872_v19  ;;  %v2009_v7 = vadd.f32 %v2008_v52, %v2005_v41  ;;  %v12210_v62 = vld [vmem:[#allocation16_spill] sm:$0xff] }
 0x449   : > { %v2020_v53 = vadd.f32 %v2018_v10, %v2016_v5 }
 0x44a   : > { %v2013_v0 = vmul.f32 %v2012_v18, %v1874_v28 }
 0x44b   : > { %v8449_v61 = vpop.f32.mrf.mxu1 }
 0x44c   : > { %12201 = vst [vmem:[#allocation22_spill] sm:$0xff] %v8449_v61  ;;  %v2015_v63 = vadd.f32 %v2013_v0, %v2009_v7 }
 0x44d   : > { %v7408_v13 = vpop.f32.mrf.mxu1 }
 0x44e   : > { %v2019_v12 = vadd.f32 %v2018_v10, %v2015_v63 }
 0x45b   : > { %v7390_v30 = vpop.f32.mrf.mxu0 }
 0x45d   : > { %v651_v34 = vpop.f32.mrf.mxu0 }
 0x45f   : > { %v7413_v8 = vpop.f32.mrf.mxu1 }
 0x460   : > { %v2024_v16 = vmul.f32 %v7413_v8, %v2022_v59  ;;  %v12216_v8 = vld [vmem:[#allocation18_spill] sm:$0xff] }
 0x461   : > { %v1994_v15 = vpop.f32.mrf.mxu1 }
 0x462   : > { %v2026_v17 = vadd.f32 %v2024_v16, %v2020_v53  ;;  %v2023_v32 = vmul.f32 %v2022_v59, %v1994_v15 }
 0x464   : > { %v2025_v42 = vadd.f32 %v2023_v32, %v2019_v12  ;;  %v2030_v1 = vadd.f32 %v2028_v4, %v2026_v17  ;;  %v12220_v12 = vld [vmem:[#allocation20_spill] sm:$0xff] }
 0x466   : > { %v2034_v43 = vsel %vm928_vm2, %v2030_v1, -inf  ;;  %v2029_v38 = vadd.f32 %v2028_v4, %v2025_v42  ;;  %v12219_v4 = vld [vmem:[#allocation29_spill] sm:$0xff] }
 0x467   : > { %2035 = vmax.xlane.f32.xlu0 %v2034_v43 }
 0x468   : > { %v2031_v14 = vsel %vm928_vm2, %v2029_v38, -inf }
 0x469   : > { %2032 = vmax.xlane.f32.xlu1 %v2031_v14 }
 0x47a   : > { %784 = vperm.xlu1 %7552, %v452_v39   ;;  %v443_v39 = vld [vmem:[%s11975_s4 + $0x48] sm:$0xff] }
 0x47d   : > { %712 = vperm.xlu0 %7551, %v440_v21  }
 0x47e   : > { %717 = vperm.xlu1 %7552, %v441_v54   ;;  %v444_v54 = vld [vmem:[%s11975_s4 + $0x50] sm:$0xff] }
 0x481   : > { %707 = vperm.xlu0 %7551, %v439_v11  }
 0x4f0   : > { %v2036_v36 = vpop.xlane.xlu0 %2035 }
 0x4f1   : > { %v2038_v25 = vsub.f32 %v2030_v1, %v2036_v36  ;;  %v12221_v1 = vld [vmem:[#allocation21_spill] sm:$0xff] }
 0x4f2   : > { %v2033_v35 = vpop.xlane.xlu1 %2032  ;;  %v455_v36 = vld [vmem:[%s11976_s5 + $0x48] sm:$0xff] }
 0x4f3   : > { %v2041_v37 = vmul.f32 1.442695, %v2038_v25  ;;  %v2037_v13 = vsub.f32 %v2029_v38, %v2033_v35  ;;  %v456_v25 = vld [vmem:[%s11976_s5 + $0x50] sm:$0xff] }
 0x4f5   : > { %7561 = vpow2.f32 %v2041_v37  ;;  %v2039_v46 = vmul.f32 1.442695, %v2037_v13 }
 0x4f6   : > { %v8510_v48 = vpop.permute.xlu1 %784 }
 0x4f7   : > { %7563 = vpow2.f32 %v2039_v46  ;;  %12206 = vst [vmem:[#allocation25_spill] sm:$0xff] %v8510_v48 }
 0x4f8   : > { %v8507_v31 = vpop.permute.xlu0 %712 }
 0x4f9   : > { %12205 = vst [vmem:[#allocation24_spill] sm:$0xff] %v8507_v31  ;;  %v746_v26 = vmul.f32 %v8507_v31, %v651_v34 }
 0x4fa   : > { %v8532_v19 = vpop.permute.xlu1 %717 }
 0x4fb   : > { %v8516_v33 = vadd.f32 %v8510_v48, %v746_v26  ;;  %12212 = vst [vmem:[#allocation36_spill] sm:$0xff] %v8532_v19  ;;  %v747_v28 = vmul.f32 %v7390_v30, %v8532_v19 }
 0x4fc   : > { %v8530_v55 = vpop.permute.xlu0 %707 }
 0x4fd   : > { %v2410_v22 = vrot.slane %v8516_v33, %v12207_v60  ;;  %v2421_v2 = vrot.slane %v8516_v33, %v12208_v57  ;;  %v2432_v56 = vrot.slane %v8516_v33, %v12209_v49  ;;  %v2443_v58 = vrot.slane %v8516_v33, %v12210_v62  ;;  %12211 = vst [vmem:[#allocation35_spill] sm:$0xff] %v8530_v55 }
 0x4fe   : > { %v2465_v5 = vrot.slane %v8516_v33, %v12214_v40  ;;  %v745_v17 = vmul.f32 %v12219_v4, %v8530_v55  ;;  %v2476_v32 = vrot.slane %v8516_v33, %v12220_v12  ;;  %v2454_v21 = vrot.slane %v8516_v33, %v12216_v8  ;;  %v8614_v4 = vld [vmem:[%s11977_s6 + $0x28] sm:$0xff] }
 0x4ff   : > { %v2487_v44 = vrot.slane %v8516_v33, %v12221_v1 }
 0x502   : > { %v7562_v24 = vpop.eup %7561 }
 0x503   : > { %v2046_v47 = vsel %vm928_vm2, %v7562_v24, 0.0 }
 0x504   : > { %v7564_v51 = vpop.eup %7563  ;;  %2047 = vadd.xlane.f32.xlu0 %v2046_v47 }
 0x505   : > { %v2043_v9 = vsel %vm928_vm2, %v7564_v51, 0.0 }
 0x506   : > { %2044 = vadd.xlane.f32.xlu1 %v2043_v9 }
 0x517   : > { %789 = vperm.xlu1 %7552, %v453_v6  }
 0x51a   : > { %779 = vperm.xlu0 %7551, %v451_v29  }
 0x51b   : > { %2416 = vbcast.lane.b32.xlu1 %v2410_v22, 264 }
 0x51f   : > { %2427 = vbcast.lane.b32.xlu1 %v2421_v2, 264 }
 0x523   : > { %2438 = vbcast.lane.b32.xlu1 %v2432_v56, 264 }
 0x538   : > { %2675 = vxpose.xlu0.b32.start.end [1/1] (short) (narrow) %v8516_v33, 16 }
 0x565   : > { %2449 = vbcast.lane.b32.xlu0 %v2443_v58, 264 }
 0x58d   : > { %v2048_v18 = vpop.xlane.xlu0 %2047 }
 0x58e   : > { %7565 = vrcp.f32 %v2048_v18 }
 0x58f   : > { %v2045_v50 = vpop.xlane.xlu1 %2044 }
 0x590   : > { %7567 = vrcp.f32 %v2045_v50 }
 0x593   : > { %v8535_v52 = vpop.permute.xlu1 %789 }
 0x594   : > { %12213 = vst [vmem:[#allocation37_spill] sm:$0xff] %v8535_v52  ;;  %v819_v41 = vadd.f32 %v8535_v52, %v747_v28 }
 0x595   : > { %v8551_v15 = vpop.permute.xlu0 %779 }
 0x596   : > { %v2577_v27 = vrot.slane %v819_v41, %v12210_v62  ;;  %v2544_v0 = vrot.slane %v819_v41, %v12207_v60  ;;  %v2555_v7 = vrot.slane %v819_v41, %v12208_v57  ;;  %v2588_v53 = vrot.slane %v819_v41, %v12216_v8  ;;  %12218 = vst [vmem:[#allocation40_spill] sm:$0xff] %v8551_v15 }
 0x597   : > { %v817_v42 = vadd.f32 %v8551_v15, %v745_v17  ;;  %v2621_v43 = vrot.slane %v819_v41, %v12221_v1  ;;  %v2566_v38 = vrot.slane %v819_v41, %v12209_v49  ;;  %v2610_v14 = vrot.slane %v819_v41, %v12220_v12  ;;  %v2417_v35 = vpop.permute.xlu1 %2416 }
 0x598   : > { %2579 = vbcast.lane.b32.xlu0 %v2577_v27, 256  ;;  %2550 = vbcast.lane.b32.xlu1 %v2544_v0, 264  ;;  %v2599_v45 = vrot.slane %v819_v41, %v12214_v40 }
 0x59b   : > { %v7566_v10 = vpop.eup %7565  ;;  %v2428_v37 = vpop.permute.xlu1 %2427 }
 0x59c   : > { %v8543_v59 = vmul.f32 %v7566_v10, %v7562_v24  ;;  %2467 = vbcast.lane.b32.xlu0 %v2465_v5, 256  ;;  %2561 = vbcast.lane.b32.xlu1 %v2555_v7, 264 }
 0x59d   : > { %v7568_v63 = vpop.eup %7567 }
 0x59e   : > { %12215 = vst [vmem:[#allocation38_spill] sm:$0xff] %v8543_v59  ;;  %7415 = vmatpush3.xpose.msk.msra.mxu1 %vm928_vm2, %v8543_v59  ;;  %v8549_v16 = vmul.f32 %v7568_v63, %v7564_v51  ;;  %v8608_v63 = vld [vmem:[%s11977_s6 + $0x8] sm:$0xff] }
 0x59f   : > { %7416 = vmatprep.subr.mxu1 %v12204_v23  ;;  %v2439_v13 = vpop.permute.xlu1 %2438 }
 0x5a0   : > { %12217 = vst [vmem:[#allocation39_spill] sm:$0xff] %v8549_v16  ;;  %2590 = vbcast.lane.b32.xlu0 %v2588_v53, 256  ;;  %2412 = vbcast.lane.b32.xlu1 %v2410_v22, 256  ;;  %v2500_v17 = vmul.f32 %v8614_v4, %v2439_v13  ;;  %v8657_v13 = vld [vmem:[%s11977_s6 + $0x20] sm:$0xff] }
 0x5a2   : > { %7417 = vmatpush3.xpose.msk.msra.mxu1 %vm928_vm2, %v8549_v16 }
 0x5a3   : > { %7421 = vmatprep.subr.mxu1 %v819_v41 }
 0x5a4   : > { %2478 = vbcast.lane.b32.xlu0 %v2476_v32, 256  ;;  %2423 = vbcast.lane.b32.xlu1 %v2421_v2, 256 }
 0x5a5   : > { %7419 = vmatmul.mubr.msk.f32.vlgmr.msra.gmra.mxu1 %vm928_vm2, %v817_v42 }
 0x5a6   : > { %7422 = vmatpush3.msra.mxu1 %v819_v41 }
 0x5a8   : > { %2627 = vbcast.lane.b32.xlu0 %v2621_v43, 264  ;;  %2572 = vbcast.lane.b32.xlu1 %v2566_v38, 264 }
 0x5ac   : > { %2612 = vbcast.lane.b32.xlu0 %v2610_v14, 256  ;;  %2434 = vbcast.lane.b32.xlu1 %v2432_v56, 256 }
 0x5b0   : > { %727 = vperm.xlu0 %7551, %v443_v39   ;;  %2460 = vbcast.lane.b32.xlu1 %v2454_v21, 264  ;;  %v2529_v39 = vsel %vm928_vm2, %v2500_v17, 0.0  ;;  %v8681_v17 = vld [vmem:[%s11978_s7 + $0x8] sm:$0xff] }
 0x5b4   : > { %v2691_v11 = vpop.trf.xlu0  ;;  %732 = vperm.xlu0 %7551, %v444_v54   ;;  %2546 = vbcast.lane.b32.xlu1 %v2544_v0, 256 }
 0x5b5   : > { %7423 = vmatprep.mubr.msk.f32.mxu1 %vm1125_vm1, %v2691_v11  ;;  %v8633_v11 = vld [vmem:[%s11978_s7 + $0x10] sm:$0xff] }
 0x5b8   : > { %v2692_v3 = vpop.trf.xlu0  ;;  %2557 = vbcast.lane.b32.xlu1 %v2555_v7, 256  ;;  %v8602_v7 = vld [vmem:[%s11977_s6 + $0x18] sm:$0xff] }
 0x5b9   : > { %7424 = vmatmul.mubr.msk.f32.vlgmr.msra.gmra.mxu1 %vm1125_vm1, %v2692_v3  ;;  %v2498_v10 = vmul.f32 %v8602_v7, %v2428_v37 }
 0x5bc   : > { %2583 = vbcast.lane.b32.xlu1 %v2577_v27, 264 }
 0x5c0   : > { %2445 = vbcast.lane.b32.xlu1 %v2443_v58, 256 }
 0x5c4   : > { %2471 = vbcast.lane.b32.xlu1 %v2465_v5, 264 }
 0x5c8   : > { %2568 = vbcast.lane.b32.xlu1 %v2566_v38, 256 }
 0x5cc   : > { %2594 = vbcast.lane.b32.xlu1 %v2588_v53, 264  ;;  %v2496_v53 = vmul.f32 %v8608_v63, %v2417_v35  ;;  %v8651_v35 = vld [vmem:[%s11977_s6] sm:$0xff] }
 0x5ce   : > { %v2526_v38 = vsel %vm928_vm2, %v2496_v53, 0.0  ;;  %v8675_v53 = vld [vmem:[%s11978_s7 + $0x30] sm:$0xff] }
 0x5cf   : > { %12222 = vst [vmem:[#allocation29_spill] sm:$0xff] %v8675_v53 }
 0x5d0   : > { %2456 = vbcast.lane.b32.xlu1 %v2454_v21, 256  ;;  %v8627_v21 = vld [vmem:[%s11977_s6 + $0x10] sm:$0xff] }
 0x5d4   : > { %2482 = vbcast.lane.b32.xlu1 %v2476_v32, 264  ;;  %v2527_v32 = vsel %vm928_vm2, %v2498_v10, 0.0 }
 0x5d7   : > { %v2450_v58 = vpop.permute.xlu0 %2449 }
 0x5d8   : > { %2605 = vbcast.lane.b32.xlu1 %v2599_v45, 264 }
 0x5dc   : > { %2493 = vbcast.lane.b32.xlu1 %v2487_v44, 264 }
 0x5e0   : > { %2616 = vbcast.lane.b32.xlu1 %v2610_v14, 264  ;;  %v2528_v14 = vadd.f32 %v2527_v32, %v2526_v38 }
 0x5e2   : > { %v2530_v10 = vadd.f32 %v2529_v39, %v2528_v14  ;;  %v8697_v39 = vld [vmem:[%s11977_s6 + $0x30] sm:$0xff] }
 0x5e4   : > { %2601 = vbcast.lane.b32.xlu1 %v2599_v45, 256  ;;  %v8639_v45 = vld [vmem:[%s11977_s6 + $0x38] sm:$0xff] }
 0x5e8   : > { %2489 = vbcast.lane.b32.xlu1 %v2487_v44, 256  ;;  %v2502_v44 = vmul.f32 %v8639_v45, %v2450_v58  ;;  %v8669_v58 = vld [vmem:[%s11978_s7 + $0x20] sm:$0xff] }
 0x5ec   : > { %2623 = vbcast.lane.b32.xlu1 %v2621_v43, 256 }
 0x5f0   : > { %799 = vperm.xlu1 %7552, %v455_v36   ;;  %v8645_v36 = vld [vmem:[%s11978_s7 + $0x18] sm:$0xff] }
 0x5f4   : > { %804 = vperm.xlu1 %7552, %v456_v25  }
 0x60a   : > { %v2551_v46 = vpop.permute.xlu1 %2550  ;;  %v2580_v50 = vpop.permute.xlu0 %2579 }
 0x60e   : > { %v2562_v24 = vpop.permute.xlu1 %2561  ;;  %v8591_v41 = vpop.permute.xlu0 %2467 }
 0x60f   : > { %v2632_v25 = vmul.f32 %v8645_v36, %v2562_v24 }
 0x611   : > { %v2661_v55 = vsel %vm928_vm2, %v2632_v25, 0.0 }
 0x612   : > { %v2413_v47 = vpop.permute.xlu1 %2412  ;;  %v8597_v5 = vpop.permute.xlu0 %2590 }
 0x613   : > { %v2495_v37 = vmul.f32 %v8651_v35, %v2413_v47 }
 0x615   : > { %v2511_v52 = vsel %vm928_vm2, %v2495_v37, 0.0 }
 0x616   : > { %v2424_v51 = vpop.permute.xlu1 %2423  ;;  %v8620_v43 = vpop.permute.xlu0 %2478 }
 0x617   : > { %v2497_v54 = vmul.f32 %v8627_v21, %v2424_v51 }
 0x619   : > { %v2512_v38 = vsel %vm928_vm2, %v2497_v54, 0.0  ;;  %v2531_v54 = vsel %vm928_vm2, %v2502_v44, 0.0 }
 0x61a   : > { %v2573_v9 = vpop.permute.xlu1 %2572  ;;  %v8685_v15 = vpop.permute.xlu0 %2627  ;;  %v2513_v37 = vadd.f32 %v2512_v38, %v2511_v52  ;;  %v8734_v52 = vld [vmem:[%s11978_s7 + $0x48] sm:$0xff] }
 0x61e   : > { %v2435_v30 = vpop.permute.xlu1 %2434 }
 0x61f   : > { %v2499_v51 = vmul.f32 %v8657_v13, %v2435_v30  ;;  %v2635_v30 = vmul.f32 %v8675_v53, %v2580_v50 }
 0x621   : > { %v2514_v19 = vsel %vm928_vm2, %v2499_v51, 0.0  ;;  %v2650_v25 = vsel %vm928_vm2, %v2635_v30, 0.0  ;;  %v8722_v51 = vld [vmem:[%s11977_s6 + $0x48] sm:$0xff] }
 0x622   : > { %v8583_v34 = vpop.permute.xlu1 %2460  ;;  %v2515_v38 = vadd.f32 %v2514_v19, %v2513_v37 }
 0x626   : > { %v2547_v26 = vpop.permute.xlu1 %2546 }
 0x62a   : > { %v2558_v6 = vpop.permute.xlu1 %2557 }
 0x62b   : > { %v2631_v3 = vmul.f32 %v8633_v11, %v2558_v6  ;;  %v8663_v6 = vld [vmem:[%s11978_s7] sm:$0xff] }
 0x62c   : > { %v2629_v24 = vmul.f32 %v8663_v6, %v2547_v26  ;;  %v2630_v26 = vmul.f32 %v8681_v17, %v2551_v46 }
 0x62d   : > { %v2646_v50 = vsel %vm928_vm2, %v2631_v3, 0.0 }
 0x62e   : > { %v2584_v33 = vpop.permute.xlu1 %2583  ;;  %v2645_v61 = vsel %vm928_vm2, %v2629_v24, 0.0  ;;  %v8726_v24 = vpop.f32.mrf.mxu0  ;;  %v2660_v31 = vsel %vm928_vm2, %v2630_v26, 0.0 }
 0x62f   : > { %v2662_v26 = vadd.f32 %v2661_v55, %v2660_v31  ;;  %v8757_v31 = vld [vmem:[%s11978_s7 + $0x58] sm:$0xff]  ;;  %v8764_v55 = vld [vmem:[%s11978_s7 + $0x40] sm:$0xff] }
 0x630   : > { %12225 = vst [vmem:[#allocation43_spill] sm:$0xff] %v8757_v31  ;;  %12226 = vst [vmem:[#allocation44_spill] sm:$0xff] %v8764_v55  ;;  %v2637_v19 = vmul.f32 %v8764_v55, %v8597_v5  ;;  %v8782_v5 = vld [vmem:[%s11978_s7 + $0x68] sm:$0xff] }
 0x632   : > { %v2446_v29 = vpop.permute.xlu1 %2445 }
 0x633   : > { %v2501_v46 = vmul.f32 %v8697_v39, %v2446_v29  ;;  %v8715_v29 = vld [vmem:[%s11977_s6 + $0x40] sm:$0xff] }
 0x634   : > { %12223 = vst [vmem:[#allocation41_spill] sm:$0xff] %v8715_v29 }
 0x636   : > { %v8585_v22 = vpop.permute.xlu1 %2471 }
 0x63a   : > { %v2569_v2 = vpop.permute.xlu1 %2568 }
 0x63b   : > { %v2633_v47 = vmul.f32 %v8669_v58, %v2569_v2  ;;  %v8690_v2 = vld [vmem:[%s11978_s7 + $0x28] sm:$0xff] }
 0x63c   : > { %v2634_v14 = vmul.f32 %v8690_v2, %v2573_v9  ;;  %v8708_v9 = vld [vmem:[%s11978_s7 + $0x38] sm:$0xff] }
 0x63d   : > { %v2636_v3 = vmul.f32 %v8708_v9, %v2584_v33  ;;  %v2648_v48 = vsel %vm928_vm2, %v2633_v47, 0.0  ;;  %v2504_v33 = vmul.f32 %v8722_v51, %v8583_v34  ;;  %v2647_v47 = vadd.f32 %v2646_v50, %v2645_v61  ;;  %v8741_v34 = vld [vmem:[%s11977_s6 + $0x50] sm:$0xff] }
 0x63e   : > { %v8587_v56 = vpop.permute.xlu1 %2594  ;;  %v2663_v16 = vsel %vm928_vm2, %v2634_v14, 0.0  ;;  %12224 = vst [vmem:[#allocation42_spill] sm:$0xff] %v8741_v34  ;;  %v2505_v61 = vmul.f32 %v8741_v34, %v8591_v41 }
 0x63f   : > { %v2638_v30 = vmul.f32 %v8734_v52, %v8587_v56  ;;  %v2649_v14 = vadd.f32 %v2648_v48, %v2647_v47  ;;  %v2665_v59 = vsel %vm928_vm2, %v2636_v3, 0.0  ;;  %v2506_v56 = vmul.f32 %v8749_v20, %v8585_v22  ;;  %v8769_v3 = vpop.f32.mrf.mxu0 }
 0x640   : > { %v2664_v41 = vadd.f32 %v2663_v16, %v2662_v26  ;;  %v2533_v22 = vsel %vm928_vm2, %v2504_v33, 0.0  ;;  %v8789_v33 = vld [vmem:[%s11978_s7 + $0x50] sm:$0xff] }
 0x641   : > { %v2667_v37 = vsel %vm928_vm2, %v2638_v30, 0.0  ;;  %v2532_v30 = vadd.f32 %v2531_v54, %v2530_v10 }
 0x642   : > { %v2457_v18 = vpop.permute.xlu1 %2456  ;;  %v2666_v26 = vadd.f32 %v2665_v59, %v2664_v41 }
 0x643   : > { %v2503_v44 = vmul.f32 %v8715_v29, %v2457_v18  ;;  %v2516_v18 = vsel %vm928_vm2, %v2501_v46, 0.0  ;;  %v2613_v46 = vpop.permute.xlu0 %2612  ;;  %v2535_v29 = vsel %vm928_vm2, %v2506_v56, 0.0 }
 0x645   : > { %v2518_v53 = vsel %vm928_vm2, %v2503_v44, 0.0  ;;  %v2517_v44 = vadd.f32 %v2516_v18, %v2515_v38  ;;  %v2651_v38 = vadd.f32 %v2650_v25, %v2649_v14  ;;  %v2534_v25 = vadd.f32 %v2533_v22, %v2532_v30 }
 0x646   : > { %v8589_v28 = vpop.permute.xlu1 %2482  ;;  %v2668_v14 = vadd.f32 %v2667_v37, %v2666_v26 }
 0x647   : > { %v2519_v55 = vadd.f32 %v2518_v53, %v2517_v44  ;;  %v8793_v34 = vpop.permute.xlu0 %727  ;;  %v2652_v53 = vsel %vm928_vm2, %v2637_v19, 0.0  ;;  %v8824_v19 = vld [vmem:[%s11977_s6 + $0x70] sm:$0xff]  ;;  %v2536_v22 = vadd.f32 %v2535_v29, %v2534_v25 }
 0x648   : > { %12227 = vst [vmem:[#allocation45_spill] sm:$0xff] %v8793_v34  ;;  %v2653_v26 = vadd.f32 %v2652_v53, %v2651_v38 }
 0x64a   : > { %v8593_v27 = vpop.permute.xlu1 %2605 }
 0x64b   : > { %v2640_v48 = vmul.f32 %v8757_v31, %v8593_v27  ;;  %v8775_v27 = vld [vmem:[%s11977_s6 + $0x68] sm:$0xff] }
 0x64c   : > { %v2508_v47 = vmul.f32 %v8775_v27, %v8589_v28  ;;  %v2520_v28 = vsel %vm928_vm2, %v2505_v61, 0.0  ;;  %v8816_v61 = vpop.f32.mrf.mxu0 }
 0x64d   : > { %v2669_v31 = vsel %vm928_vm2, %v2640_v48, 0.0  ;;  %12229 = vst [vmem:[#allocation47_spill] sm:$0xff] %v8816_v61  ;;  %v2521_v30 = vadd.f32 %v2520_v28, %v2519_v55 }
 0x64e   : > { %v8595_v0 = vpop.permute.xlu1 %2493  ;;  %v2537_v48 = vsel %vm928_vm2, %v2508_v47, 0.0  ;;  %v2670_v37 = vadd.f32 %v2669_v31, %v2668_v14  ;;  %v8832_v47 = vld [vmem:[%s11978_s7 + $0x78] sm:$0xff]  ;;  %v8846_v31 = vld [vmem:[%s11978_s7 + $0x70] sm:$0xff]  ;;  %v671_v38 = vpop.f32.mrf.mxu0 }
 0x64f   : > { %v2538_v28 = vadd.f32 %v2537_v48, %v2536_v22 }
 0x652   : > { %v8618_v42 = vpop.permute.xlu1 %2616 }
 0x653   : > { %v2642_v16 = vmul.f32 %v8782_v5, %v8618_v42  ;;  %v8802_v42 = vld [vmem:[%s11977_s6 + $0x78] sm:$0xff] }
 0x654   : > { %v2510_v59 = vmul.f32 %v8802_v42, %v8595_v0 }
 0x655   : > { %v2671_v0 = vsel %vm928_vm2, %v2642_v16, 0.0  ;;  %v2644_v16 = vmul.f32 %v8832_v47, %v8685_v15  ;;  %v749_v15 = vmul.f32 %v8726_v24, %v8793_v34 }
 0x656   : > { %v2602_v32 = vpop.permute.xlu1 %2601  ;;  %v2539_v29 = vsel %vm928_vm2, %v2510_v59, 0.0  ;;  %v2672_v53 = vadd.f32 %v2671_v0, %v2670_v37  ;;  %v8854_v59 = vpop.permute.xlu0 %732  ;;  %v2789_v0 = vstv %s8797_s12  ;;  %s7210_s12 = sld [smem:[#allocation4 + $0x102]] }
 0x657   : > { %v2639_v18 = vmul.f32 %v8789_v33, %v2602_v32  ;;  %v8812_v32 = vld [vmem:[%s11977_s6 + $0x60] sm:$0xff]  ;;  %v2673_v24 = vsel %vm928_vm2, %v2644_v16, 0.0 }
 0x658   : > { %v2507_v54 = vmul.f32 %v8812_v32, %v8620_v43  ;;  %v2674_v22 = vadd.f32 %v2673_v24, %v2672_v53 }
 0x659   : > { %v2654_v41 = vsel %vm928_vm2, %v2639_v18, 0.0  ;;  %v8839_v18 = vld [vmem:[%s11978_s7 + $0x60] sm:$0xff] }
 0x65a   : > { %v2490_v50 = vpop.permute.xlu1 %2489  ;;  %v2655_v25 = vadd.f32 %v2654_v41, %v2653_v26  ;;  %v750_v41 = vmul.f32 %v8854_v59, %v671_v38 }
 0x65b   : > { %v2509_v44 = vmul.f32 %v8824_v19, %v2490_v50  ;;  %v2641_v50 = vmul.f32 %v8839_v18, %v2613_v46  ;;  %v2522_v46 = vsel %vm928_vm2, %v2507_v54, 0.0 }
 0x65d   : > { %v2524_v14 = vsel %vm928_vm2, %v2509_v44, 0.0  ;;  %v2656_v48 = vsel %vm928_vm2, %v2641_v50, 0.0  ;;  %v2793_v50 = vstv %s8849_s30  ;;  %s7245_s30 = sld [smem:[#allocation2 + $0x2]] }
 0x65e   : > { %v2624_v56 = vpop.permute.xlu1 %2623  ;;  %v2657_v44 = vadd.f32 %v2656_v48, %v2655_v25 }
 0x65f   : > { %v2643_v55 = vmul.f32 %v8846_v31, %v2624_v56  ;;  %v2540_v56 = vadd.f32 %v2539_v29, %v2538_v28 }
 0x661   : > { %v2658_v54 = vsel %vm928_vm2, %v2643_v55, 0.0  ;;  %v2791_v29 = vmul.f32 %v2789_v0, %v2540_v56 }
 0x662   : > { %v2659_v16 = vadd.f32 %v2658_v54, %v2657_v44 }
 0x663   : > { %v2795_v38 = vadd.f32 %v2793_v50, %v2791_v29 }
 0x665   : > { %v8806_v10 = vpop.f32.mrf.mxu1 }
 0x666   : > { %12228 = vst [vmem:[#allocation46_spill] sm:$0xff] %v8806_v10  ;;  %v2523_v10 = vadd.f32 %v2522_v46, %v2521_v30  ;;  %v2797_v30 = vstv %s8827_s18  ;;  %v2803_v46 = vstv %s7208_s14  ;;  %s9019_s14 = sld [smem:[#allocation4 + $0x180]] }
 0x667   : > { %v7420_v43 = vpop.f32.mrf.mxu1  ;;  %v2799_v55 = vmul.f32 %v2797_v30, %v2674_v22  ;;  %s10691_s18 = sld [smem:[#allocation4 + $0x180]] }
 0x668   : > { %v2525_v37 = vadd.f32 %v2524_v14, %v2523_v10  ;;  %v2798_v10 = vmul.f32 %v2797_v30, %v2659_v16  ;;  %v2807_v14 = vstv %s7209_s15 }
 0x669   : > { %v2801_v53 = vadd.f32 %v2799_v55, %v2795_v38 }
 0x66a   : > { %v2790_v28 = vmul.f32 %v2789_v0, %v2525_v37  ;;  %v2813_v0 = vstv %s7210_s12  ;;  %s9997_s12 = sld [smem:[#allocation2 + $0x81]] }
 0x66b   : > { %v8857_v43 = vpop.permute.xlu1 %799  ;;  %v2805_v48 = vadd.f32 %v2803_v46, %v2801_v53 }
 0x66c   : > { %12230 = vst [vmem:[#allocation48_spill] sm:$0xff] %v8857_v43  ;;  %v8860_v61 = vadd.f32 %v8857_v43, %v749_v15  ;;  %v2794_v25 = vadd.f32 %v2793_v50, %v2790_v28  ;;  %v454_v50 = vld [vmem:[%s11976_s5 + $0x40] sm:$0xff] }
 0x66e   : > { %3460 = vxpose.xlu1.b32.start.end [1/1] (short) (narrow) %v8860_v61, 16  ;;  %v2800_v56 = vadd.f32 %v2798_v10, %v2794_v25  ;;  %v3206_v55 = vrot.slane %v8860_v61, %v12208_v57  ;;  %v3195_v38 = vrot.slane %v8860_v61, %v12207_v60  ;;  %v3239_v53 = vrot.slane %v8860_v61, %v12216_v8 }
 0x66f   : > { %v8869_v26 = vpop.permute.xlu1 %804  ;;  %v3217_v25 = vrot.slane %v8860_v61, %v12209_v49 }
 0x670   : > { %v8872_v15 = vadd.f32 %v8869_v26, %v750_v41  ;;  %v2804_v44 = vadd.f32 %v2803_v46, %v2800_v56  ;;  %v3228_v46 = vrot.slane %v8860_v61, %v12210_v62 }
 0x672   : > { %7433 = vmatprep.subr.mxu1 %v8872_v15  ;;  %v3340_v28 = vrot.slane %v8872_v15, %v12208_v57  ;;  %v3351_v10 = vrot.slane %v8872_v15, %v12209_v49  ;;  %v3362_v56 = vrot.slane %v8872_v15, %v12210_v62 }
 0x673   : > { %7434 = vmatpush3.msra.mxu1 %v8872_v15 }
 0x674   : > { %7438 = vmatprep.subr.mxu1 %v12204_v23 }
 0x679   : > { %v7425_v24 = vpop.f32.mrf.mxu1 }
 0x67a   : > { %v2809_v54 = vmul.f32 %v7425_v24, %v2807_v14  ;;  %v3250_v24 = vrot.slane %v8860_v61, %v12214_v40 }
 0x67b   : > { %v2779_v41 = vpop.f32.mrf.mxu1 }
 0x67c   : > { %v2811_v37 = vadd.f32 %v2809_v54, %v2805_v48  ;;  %v2808_v22 = vmul.f32 %v2807_v14, %v2779_v41  ;;  %v3329_v14 = vrot.slane %v8872_v15, %v12207_v60  ;;  %v3373_v48 = vrot.slane %v8872_v15, %v12216_v8  ;;  %v7228_v8 = vld [vmem:[%s7963_s28 + $0x38] sm:$0xff] }
 0x67d   : > { %v3261_v54 = vrot.slane %v8860_v61, %v12220_v12  ;;  %v3406_v41 = vrot.slane %v8872_v15, %v12221_v1 }
 0x67e   : > { %v2810_v43 = vadd.f32 %v2808_v22, %v2804_v44  ;;  %v2815_v34 = vadd.f32 %v2813_v0, %v2811_v37 }
 0x680   : > { %v2819_v30 = vsel %vm928_vm2, %v2815_v34, -inf  ;;  %v2814_v29 = vadd.f32 %v2813_v0, %v2810_v43  ;;  %v442_v43 = vld [vmem:[%s11975_s4 + $0x40] sm:$0xff]  ;;  %v3395_v0 = vrot.slane %v8872_v15, %v12220_v12 }
 0x681   : > { %2820 = vmax.xlane.f32.xlu0 %v2819_v30 }
 0x682   : > { %v2816_v16 = vsel %vm928_vm2, %v2814_v29, -inf }
 0x685   : > { %2817 = vmax.xlane.f32.xlu0 %v2816_v16 }
 0x690   : > { %794 = vperm.xlu1 %7552, %v454_v50  }
 0x694   : > { %3346 = vbcast.lane.b32.xlu1 %v3340_v28, 264 }
 0x698   : > { %3208 = vbcast.lane.b32.xlu1 %v3206_v55, 256 }
 0x69b   : > { %722 = vperm.xlu0 %7551, %v442_v43  }
 0x69c   : > { %3357 = vbcast.lane.b32.xlu1 %v3351_v10, 264 }
 0x69f   : > { %3201 = vbcast.lane.b32.xlu0 %v3195_v38, 264 }
 0x6a0   : > { %3245 = vbcast.lane.b32.xlu1 %v3239_v53, 264 }
 0x6a3   : > { %3212 = vbcast.lane.b32.xlu0 %v3206_v55, 264 }
 0x6a4   : > { %3342 = vbcast.lane.b32.xlu1 %v3340_v28, 256 }
 0x6a7   : > { %3223 = vbcast.lane.b32.xlu0 %v3217_v25, 264 }
 0x6a8   : > { %3230 = vbcast.lane.b32.xlu1 %v3228_v46, 256 }
 0x6ab   : > { %3335 = vbcast.lane.b32.xlu0 %v3329_v14, 264 }
 0x6ac   : > { %3353 = vbcast.lane.b32.xlu1 %v3351_v10, 256 }
 0x6af   : > { %3197 = vbcast.lane.b32.xlu0 %v3195_v38, 256 }
 0x6b0   : > { %3241 = vbcast.lane.b32.xlu1 %v3239_v53, 256 }
 0x6b3   : > { %3234 = vbcast.lane.b32.xlu0 %v3228_v46, 264 }
 0x6b4   : > { %3364 = vbcast.lane.b32.xlu1 %v3362_v56, 256 }
 0x6b8   : > { %3252 = vbcast.lane.b32.xlu1 %v3250_v24, 256 }
 0x6bc   : > { %3375 = vbcast.lane.b32.xlu1 %v3373_v48, 256 }
 0x6c0   : > { %3263 = vbcast.lane.b32.xlu1 %v3261_v54, 256 }
 0x6c4   : > { %3412 = vbcast.lane.b32.xlu1 %v3406_v41, 264 }
 0x6c8   : > { %3397 = vbcast.lane.b32.xlu1 %v3395_v0, 256 }
 0x6ea   : > { %v3476_v37 = vpop.trf.xlu1 }
 0x6eb   : > { %7435 = vmatprep.mubr.msk.f32.mxu1 %vm1125_vm1, %v3476_v37 }
 0x6ee   : > { %v3477_v44 = vpop.trf.xlu1 }
 0x6ef   : > { %7436 = vmatmul.mubr.msk.f32.vlgmr.msra.gmra.mxu1 %vm1125_vm1, %v3477_v44 }
 0x6f0   : > { %7442 = vmatprep.mubr.msk.f32.mxu1 %vm7828_vm3, %v12204_v23 }
 0x70a   : > { %v2821_v22 = vpop.xlane.xlu0 %2820 }
 0x70b   : > { %v2823_v30 = vsub.f32 %v2815_v34, %v2821_v22  ;;  %v3384_v34 = vrot.slane %v8872_v15, %v12214_v40  ;;  %v8924_v46 = vpop.permute.xlu1 %794 }
 0x70c   : > { %12231 = vst [vmem:[#allocation49_spill] sm:$0xff] %v8924_v46 }
 0x70d   : > { %v2826_v16 = vmul.f32 1.442695, %v2823_v30 }
 0x70e   : > { %v2818_v50 = vpop.xlane.xlu0 %2817 }
 0x70f   : > { %7569 = vpow2.f32 %v2826_v16  ;;  %v2822_v28 = vsub.f32 %v2814_v29, %v2818_v50  ;;  %v3272_v29 = vrot.slane %v8860_v61, %v12221_v1 }
 0x711   : > { %v2824_v55 = vmul.f32 1.442695, %v2822_v28 }
 0x713   : > { %7571 = vpow2.f32 %v2824_v55 }
 0x71c   : > { %v7570_v43 = vpop.eup %7569 }
 0x71d   : > { %v2831_v10 = vsel %vm928_vm2, %v7570_v43, 0.0 }
 0x71e   : > { %2832 = vadd.xlane.f32.xlu0 %v2831_v10 }
 0x720   : > { %v7572_v38 = vpop.eup %7571 }
 0x721   : > { %v2828_v53 = vsel %vm928_vm2, %v7572_v38, 0.0 }
 0x722   : > { %2829 = vadd.xlane.f32.xlu0 %v2828_v53 }
 0x738   : > { %3219 = vbcast.lane.b32.xlu0 %v3217_v25, 256  ;;  %v8926_v25 = vpop.permute.xlu0 %722 }
 0x739   : > { %12232 = vst [vmem:[#allocation50_spill] sm:$0xff] %v8926_v25  ;;  %v748_v12 = vmul.f32 %v8926_v25, %v8769_v3 }
 0x73b   : > { %v820_v3 = vadd.f32 %v8924_v46, %v748_v12  ;;  %v7226_v12 = vld [vmem:[%s7963_s28 + $0x28] sm:$0xff] }
 0x73c   : > { %3331 = vbcast.lane.b32.xlu0 %v3329_v14, 256  ;;  %v3347_v14 = vpop.permute.xlu1 %3346 }
 0x740   : > { %3368 = vbcast.lane.b32.xlu0 %v3362_v56, 264  ;;  %v3202_v56 = vpop.permute.xlu0 %3201 }
 0x744   : > { %3256 = vbcast.lane.b32.xlu0 %v3250_v24, 264  ;;  %v3209_v24 = vpop.permute.xlu1 %3208 }
 0x748   : > { %3379 = vbcast.lane.b32.xlu0 %v3373_v48, 264  ;;  %v3213_v48 = vpop.permute.xlu0 %3212 }
 0x74c   : > { %3267 = vbcast.lane.b32.xlu0 %v3261_v54, 264  ;;  %v8928_v54 = vpop.permute.xlu1 %3357  ;;  %v3224_v15 = vpop.permute.xlu0 %3223 }
 0x750   : > { %3390 = vbcast.lane.b32.xlu0 %v3384_v34, 264  ;;  %v3246_v37 = vpop.permute.xlu1 %3245  ;;  %v3336_v44 = vpop.permute.xlu0 %3335 }
 0x754   : > { %3278 = vbcast.lane.b32.xlu0 %v3272_v29, 264  ;;  %v8930_v22 = vpop.permute.xlu1 %3342  ;;  %v3198_v61 = vpop.permute.xlu0 %3197 }
 0x758   : > { %3401 = vbcast.lane.b32.xlu0 %v3395_v0, 264  ;;  %v8932_v0 = vpop.permute.xlu1 %3230  ;;  %v3235_v30 = vpop.permute.xlu0 %3234 }
 0x75c   : > { %3386 = vbcast.lane.b32.xlu0 %v3384_v34, 256  ;;  %v8934_v16 = vpop.permute.xlu1 %3353 }
 0x760   : > { %3274 = vbcast.lane.b32.xlu0 %v3272_v29, 256  ;;  %v8936_v28 = vpop.permute.xlu1 %3241 }
 0x764   : > { %3408 = vbcast.lane.b32.xlu0 %v3406_v41, 256  ;;  %v8938_v34 = vpop.permute.xlu1 %3364 }
 0x768   : > { %v8951_v62 = vpop.permute.xlu1 %3252 }
 0x7a7   : > { %v2833_v41 = vpop.xlane.xlu0 %2832 }
 0x7a8   : > { %7573 = vrcp.f32 %v2833_v41 }
 0x7ab   : > { %v2830_v50 = vpop.xlane.xlu0 %2829 }
 0x7ac   : > { %7575 = vrcp.f32 %v2830_v50  ;;  %v3283_v50 = vmul.f32 %v8602_v7, %v3213_v48  ;;  %v3287_v7 = vmul.f32 %v8639_v45, %v3235_v30  ;;  %v3417_v45 = vmul.f32 %v8645_v36, %v3347_v14 }
 0x7ad   : > { %v3282_v30 = vmul.f32 %v8627_v21, %v3209_v24  ;;  %v3419_v24 = vmul.f32 %v8690_v2, %v8928_v54  ;;  %v7650_v2 = vld [vmem:[%s11974_s3 + $0x8] sm:$0xff] }
 0x7ae   : > { %v3312_v25 = vsel %vm928_vm2, %v3283_v50, 0.0  ;;  %v3446_v14 = vsel %vm928_vm2, %v3417_v45, 0.0 }
 0x7af   : > { %v3220_v55 = vpop.permute.xlu0 %3219 }
 0x7b3   : > { %v3332_v10 = vpop.permute.xlu0 %3331 }
 0x7b4   : > { %v3414_v21 = vmul.f32 %v8663_v6, %v3332_v10 }
 0x7b5   : > { %v7574_v53 = vpop.eup %7573 }
 0x7b6   : > { %v8940_v29 = vmul.f32 %v7574_v53, %v7570_v43  ;;  %v3281_v53 = vmul.f32 %v8608_v63, %v3202_v56  ;;  %v3280_v56 = vmul.f32 %v8651_v35, %v3198_v61  ;;  %v3284_v35 = vmul.f32 %v8657_v13, %v3220_v55 }
 0x7b7   : > { %v3369_v1 = vpop.permute.xlu0 %3368  ;;  %v3297_v13 = vsel %vm928_vm2, %v3282_v30, 0.0 }
 0x7b8   : > { %12233 = vst [vmem:[#allocation51_spill] sm:$0xff] %v8940_v29  ;;  %7427 = vmatpush3.xpose.msk.msra.mxu0 %vm928_vm2, %v8940_v29  ;;  %v3285_v29 = vmul.f32 %v8614_v4, %v3224_v15  ;;  %v3415_v4 = vmul.f32 %v8681_v17, %v3336_v44  ;;  %v7649_v15 = vld [vmem:[%s11974_s3] sm:$0xff]  ;;  %v3316_v17 = vsel %vm928_vm2, %v3287_v7, 0.0  ;;  %v3289_v44 = vmul.f32 %v8722_v51, %v3246_v37 }
 0x7b9   : > { %v7576_v41 = vpop.eup %7575  ;;  %7428 = vmatprep.subr.mxu0 %v12204_v23  ;;  %v3296_v36 = vsel %vm928_vm2, %v3280_v56, 0.0  ;;  %v3416_v37 = vmul.f32 %v8633_v11, %v8930_v22  ;;  %v3299_v55 = vsel %vm928_vm2, %v3284_v35, 0.0  ;;  %v3421_v7 = vmul.f32 %v8708_v9, %v3369_v1  ;;  %v7651_v22 = vld [vmem:[%s11974_s3 + $0x10] sm:$0xff] }
 0x7ba   : > { %v8948_v40 = vmul.f32 %v7576_v41, %v7572_v38  ;;  %v7227_v38 = vld [vmem:[%s7963_s28 + $0x30] sm:$0xff]  ;;  %v3311_v41 = vsel %vm928_vm2, %v3281_v53, 0.0  ;;  %v3314_v63 = vsel %vm928_vm2, %v3285_v29, 0.0  ;;  %v8973_v53 = vpop.permute.xlu1 %3375  ;;  %v3286_v11 = vmul.f32 %v8697_v39, %v8932_v0 }
 0x7bb   : > { %v3257_v43 = vpop.permute.xlu0 %3256  ;;  %v3313_v50 = vadd.f32 %v3312_v25, %v3311_v41  ;;  %v3430_v1 = vsel %vm928_vm2, %v3414_v21, 0.0  ;;  %v3448_v41 = vsel %vm928_vm2, %v3419_v24, 0.0  ;;  %v3450_v56 = vsel %vm928_vm2, %v3421_v7, 0.0 }
 0x7bc   : > { %12234 = vst [vmem:[#allocation52_spill] sm:$0xff] %v8948_v40  ;;  %7429 = vmatpush3.xpose.msk.msra.mxu0 %vm928_vm2, %v8948_v40  ;;  %v3291_v25 = vmul.f32 %v8749_v20, %v3257_v43  ;;  %v3318_v20 = vsel %vm928_vm2, %v3289_v44, 0.0  ;;  %v3298_v43 = vadd.f32 %v3297_v13, %v3296_v36 }
 0x7bd   : > { %7445 = vmatprep.subr.mxu0 %v7228_v8  ;;  %v3315_v61 = vadd.f32 %v3314_v63, %v3313_v50  ;;  %v3418_v63 = vmul.f32 %v8669_v58, %v8934_v16  ;;  %v7652_v50 = vld [vmem:[%s11974_s3 + $0x18] sm:$0xff]  ;;  %v3301_v16 = vsel %vm928_vm2, %v3286_v11, 0.0 }
 0x7be   : > { %v3320_v9 = vsel %vm928_vm2, %v3291_v25, 0.0  ;;  %v3300_v39 = vadd.f32 %v3299_v55, %v3298_v43 }
 0x7bf   : > { %7431 = vmatmul.mubr.msk.f32.vlgmr.msra.gmra.mxu0 %vm928_vm2, %v820_v3  ;;  %v3380_v48 = vpop.permute.xlu0 %3379  ;;  %v3445_v3 = vsel %vm928_vm2, %v3415_v4, 0.0  ;;  %v3317_v51 = vadd.f32 %v3316_v17, %v3315_v61  ;;  %v3431_v4 = vsel %vm928_vm2, %v3416_v37, 0.0  ;;  %v12236_v17 = vld [vmem:[#allocation41_spill] sm:$0xff]  ;;  %v7653_v61 = vld [vmem:[%s11974_s3 + $0x20] sm:$0xff] }
 0x7c0   : > { %7446 = vmatpush3.msra.mxu0 %v7228_v8  ;;  %7453 = vmatprep.mubr.msk.f32.mxu0 %vm518_vm0, %v7649_v15  ;;  %v7225_v8 = vld [vmem:[%s7963_s28 + $0x20] sm:$0xff]  ;;  %v3447_v10 = vadd.f32 %v3446_v14, %v3445_v3  ;;  %v3432_v15 = vadd.f32 %v3431_v4, %v3430_v1  ;;  %v3288_v35 = vmul.f32 %v12236_v17, %v8936_v28  ;;  %v12237_v28 = vld [vmem:[#allocation29_spill] sm:$0xff]  ;;  %s9053_s28 = sld [smem:[#allocation4 + $0x181]] }
 0x7c1   : > { %7447 = vmatprep.subr.mxu0 %v7227_v38  ;;  %v3319_v0 = vadd.f32 %v3318_v20, %v3317_v51  ;;  %v3302_v36 = vadd.f32 %v3301_v16, %v3300_v39  ;;  %v3420_v14 = vmul.f32 %v12237_v28, %v8938_v34  ;;  %v7656_v39 = vld [vmem:[%s11974_s3 + $0x38] sm:$0xff] }
 0x7c2   : > { %7448 = vmatpush3.msra.mxu0 %v7227_v38  ;;  %v3264_v38 = vpop.permute.xlu1 %3263  ;;  %v3449_v45 = vadd.f32 %v3448_v41, %v3447_v10  ;;  %v3303_v34 = vsel %vm928_vm2, %v3288_v35, 0.0  ;;  %v3574_v10 = vstv %s9006_s27  ;;  %s10707_s27 = sld [smem:[#allocation4 + $0x181]] }
 0x7c3   : > { %7449 = vmatprep.subr.mxu0 %v7226_v12  ;;  %v3268_v29 = vpop.permute.xlu0 %3267  ;;  %v3321_v30 = vadd.f32 %v3320_v9, %v3319_v0  ;;  %v3435_v1 = vsel %vm928_vm2, %v3420_v14, 0.0 }
 0x7c4   : > { %7450 = vmatpush3.msra.mxu0 %v7226_v12  ;;  %v3293_v6 = vmul.f32 %v8775_v27, %v3268_v29  ;;  %v3423_v27 = vmul.f32 %v8734_v52, %v3380_v48  ;;  %v12235_v48 = vld [vmem:[#allocation43_spill] sm:$0xff]  ;;  %v3433_v29 = vsel %vm928_vm2, %v3418_v63, 0.0  ;;  %v3451_v21 = vadd.f32 %v3450_v56, %v3449_v45 }
 0x7c5   : > { %7451 = vmatprep.subr.mxu0 %v7225_v8  ;;  %v3434_v37 = vadd.f32 %v3433_v29, %v3432_v15 }
 0x7c6   : > { %7452 = vmatpush3.msra.mxu0 %v7225_v8  ;;  %v3322_v52 = vsel %vm928_vm2, %v3293_v6, 0.0  ;;  %v3452_v8 = vsel %vm928_vm2, %v3423_v27, 0.0  ;;  %v3413_v3 = vpop.permute.xlu1 %3412  ;;  %v7654_v6 = vld [vmem:[%s11974_s3 + $0x28] sm:$0xff] }
 0x7c7   : > { %7454 = vmatmul.mubr.msk.f32.vlgmr.msra.gmra.mxu0 %vm518_vm0, %v7650_v2  ;;  %v3391_v54 = vpop.permute.xlu0 %3390  ;;  %v3323_v25 = vadd.f32 %v3322_v52, %v3321_v30  ;;  %v3453_v55 = vadd.f32 %v3452_v8, %v3451_v21  ;;  %v7655_v2 = vld [vmem:[%s11974_s3 + $0x30] sm:$0xff]  ;;  %v3436_v0 = vadd.f32 %v3435_v1, %v3434_v37 }
 0x7c8   : > { %7456 = vmatprep.mubr.msk.f32.mxu0 %vm518_vm0, %v7651_v22  ;;  %v3425_v12 = vmul.f32 %v12235_v48, %v3391_v54  ;;  %v3304_v54 = vadd.f32 %v3303_v34, %v3302_v36  ;;  %v3292_v22 = vmul.f32 %v8812_v32, %v3264_v38  ;;  %v3578_v48 = vstv %s9019_s14  ;;  %v7658_v36 = vld [vmem:[%s11974_s3 + $0x50] sm:$0xff]  ;;  %s7246_s14 = sld [smem:[#allocation4 + $0x2]] }
 0x7c9   : > { %v3582_v32 = vstv %s9030_s16  ;;  %s9902_s16 = sld [smem:[#allocation2 + $0x82]] }
 0x7ca   : > { %v3454_v24 = vsel %vm928_vm2, %v3425_v12, 0.0  ;;  %v3398_v38 = vpop.permute.xlu1 %3397 }
 0x7cb   : > { %7457 = vmatmul.mubr.msk.f32.gmra.mxu0 %vm518_vm0, %v7652_v50  ;;  %v3279_v58 = vpop.permute.xlu0 %3278  ;;  %v3455_v11 = vadd.f32 %v3454_v24, %v3453_v55  ;;  %v7437_v50 = vpop.f32.mrf.mxu1  ;;  %v3598_v55 = vstv %s9071_s26  ;;  %s9975_s26 = sld [smem:[#allocation4 + $0x80]] }
 0x7cc   : > { %v3295_v44 = vmul.f32 %v8802_v42, %v3279_v58  ;;  %7459 = vmatprep.mubr.msk.f32.mxu0 %vm518_vm0, %v7653_v61  ;;  %v12238_v42 = vld [vmem:[#allocation42_spill] sm:$0xff]  ;;  %v3592_v58 = vstv %s9039_s19  ;;  %v3426_v61 = vmul.f32 %v8839_v18, %v3398_v38 }
 0x7cd   : > { %v3290_v13 = vmul.f32 %v12238_v42, %v8951_v62  ;;  %v3429_v62 = vmul.f32 %v8832_v47, %v3413_v3  ;;  %v12239_v47 = vld [vmem:[#allocation44_spill] sm:$0xff]  ;;  %v3588_v3 = vstv %s9053_s28  ;;  %v3594_v14 = vmul.f32 %v7437_v50, %v3592_v58  ;;  %v3564_v1 = vpop.f32.mrf.mxu1  ;;  %v12242_v50 = vld [vmem:[#allocation10_spill] sm:$0xff]  ;;  %s9387_s28 = sld [smem:[#allocation2]] }
 0x7ce   : > { %v3324_v51 = vsel %vm928_vm2, %v3295_v44, 0.0  ;;  %v3422_v27 = vmul.f32 %v12239_v47, %v8973_v53  ;;  %v12240_v53 = vld [vmem:[#allocation23_spill] sm:$0xff]  ;;  %v3307_v44 = vsel %vm928_vm2, %v3292_v22, 0.0 }
 0x7cf   : > { %v3325_v7 = vadd.f32 %v3324_v51, %v3323_v25  ;;  %7460 = vmatmul.mubr.msk.f32.gmra.mxu0 %vm518_vm0, %v7654_v6  ;;  %v3402_v20 = vpop.permute.xlu0 %3401  ;;  %v3305_v9 = vsel %vm928_vm2, %v3290_v13, 0.0  ;;  %v3458_v56 = vsel %vm928_vm2, %v3429_v62, 0.0  ;;  %v3441_v51 = vsel %vm928_vm2, %v3426_v61, 0.0 }
 0x7d0   : > { %v3427_v43 = vmul.f32 %v8782_v5, %v3402_v20  ;;  %7462 = vmatprep.mubr.msk.f32.mxu0 %vm518_vm0, %v7655_v2  ;;  %v3306_v15 = vadd.f32 %v3305_v9, %v3304_v54  ;;  %v3437_v45 = vsel %vm928_vm2, %v3422_v27, 0.0  ;;  %v3593_v27 = vmul.f32 %v3592_v58, %v3564_v1 }
 0x7d1   : > { %v3576_v41 = vmul.f32 %v3574_v10, %v3325_v7  ;;  %v3438_v16 = vadd.f32 %v3437_v45, %v3436_v0 }
 0x7d2   : > { %v3456_v5 = vsel %vm928_vm2, %v3427_v43, 0.0  ;;  %v3308_v25 = vadd.f32 %v3307_v44, %v3306_v15 }
 0x7d3   : > { %v3457_v63 = vadd.f32 %v3456_v5, %v3455_v11  ;;  %7463 = vmatmul.mubr.msk.f32.gmra.mxu0 %vm518_vm0, %v7656_v39  ;;  %v3387_v4 = vpop.permute.xlu0 %3386  ;;  %v3580_v35 = vadd.f32 %v3578_v48, %v3576_v41 }
 0x7d4   : > { %v3424_v52 = vmul.f32 %v8789_v33, %v3387_v4  ;;  %7465 = vmatprep.mubr.msk.f32.mxu0 %vm518_vm0, %v12240_v53  ;;  %v7657_v33 = vld [vmem:[%s11974_s3 + $0x48] sm:$0xff] }
 0x7d5   : > { %v3459_v12 = vadd.f32 %v3458_v56, %v3457_v63 }
 0x7d6   : > { %v3439_v30 = vsel %vm928_vm2, %v3424_v52, 0.0 }
 0x7d7   : > { %7466 = vmatmul.mubr.msk.f32.gmra.mxu0 %vm518_vm0, %v7657_v33  ;;  %v3275_v17 = vpop.permute.xlu0 %3274  ;;  %v3584_v8 = vmul.f32 %v3582_v32, %v3459_v12  ;;  %v3440_v21 = vadd.f32 %v3439_v30, %v3438_v16 }
 0x7d8   : > { %v3294_v29 = vmul.f32 %v8824_v19, %v3275_v17  ;;  %7468 = vmatprep.mubr.msk.f32.mxu0 %vm518_vm0, %v7658_v36  ;;  %v7659_v19 = vld [vmem:[%s11974_s3 + $0x58] sm:$0xff] }
 0x7d9   : > { %v3586_v28 = vadd.f32 %v3584_v8, %v3580_v35  ;;  %v3442_v20 = vadd.f32 %v3441_v51, %v3440_v21  ;;  %v445_v17 = vld [vmem:[%s11975_s4 + $0x58] sm:$0xff]  ;;  %v12244_v35 = vld [vmem:[#allocation12_spill] sm:$0xff] }
 0x7da   : > { %v3309_v42 = vsel %vm928_vm2, %v3294_v29, 0.0  ;;  %v457_v36 = vld [vmem:[%s11976_s5 + $0x58] sm:$0xff] }
 0x7db   : > { %v3310_v13 = vadd.f32 %v3309_v42, %v3308_v25  ;;  %v3590_v24 = vadd.f32 %v3588_v3, %v3586_v28  ;;  %7469 = vmatmul.mubr.msk.f32.gmra.mxu0 %vm518_vm0, %v7659_v19  ;;  %v3409_v18 = vpop.permute.xlu0 %3408  ;;  %v12249_v19 = vld [vmem:[#allocation16_spill] sm:$0xff] }
 0x7dc   : > { %v3428_v37 = vmul.f32 %v8846_v31, %v3409_v18 }
 0x7dd   : > { %v3575_v7 = vmul.f32 %v3574_v10, %v3310_v13  ;;  %v3596_v6 = vadd.f32 %v3594_v14, %v3590_v24 }
 0x7de   : > { %v3443_v34 = vsel %vm928_vm2, %v3428_v37, 0.0 }
 0x7df   : > { %v3444_v62 = vadd.f32 %v3443_v34, %v3442_v20  ;;  %v3600_v43 = vadd.f32 %v3598_v55, %v3596_v6  ;;  %v3579_v54 = vadd.f32 %v3578_v48, %v3575_v7  ;;  %v12253_v6 = vld [vmem:[#allocation20_spill] sm:$0xff]  ;;  %v12254_v34 = vld [vmem:[#allocation14_spill] sm:$0xff] }
 0x7e1   : > { %v3583_v2 = vmul.f32 %v3582_v32, %v3444_v62  ;;  %v3604_v11 = vsel %vm928_vm2, %v3600_v43, -inf }
 0x7e2   : > { %3605 = vmax.xlane.f32.xlu1 %v3604_v11 }
 0x7e3   : > { %v3585_v9 = vadd.f32 %v3583_v2, %v3579_v54 }
 0x7e5   : > { %v3589_v47 = vadd.f32 %v3588_v3, %v3585_v9 }
 0x7e7   : > { %v3595_v5 = vadd.f32 %v3593_v27, %v3589_v47  ;;  %v12255_v27 = vld [vmem:[#allocation21_spill] sm:$0xff] }
 0x7e9   : > { %v3599_v22 = vadd.f32 %v3598_v55, %v3595_v5  ;;  %v12252_v55 = vld [vmem:[#allocation11_spill] sm:$0xff] }
 0x7eb   : > { %v3601_v31 = vsel %vm928_vm2, %v3599_v22, -inf }
 0x7ec   : > { %3602 = vmax.xlane.f32.xlu0 %v3601_v31 }
 0x86b   : > { %v3606_v10 = vpop.xlane.xlu1 %3605 }
 0x86c   : > { %v3608_v41 = vsub.f32 %v3600_v43, %v3606_v10 }
 0x86e   : > { %v3611_v63 = vmul.f32 1.442695, %v3608_v41 }
 0x870   : > { %7577 = vpow2.f32 %v3611_v63 }
 0x875   : > { %v3603_v39 = vpop.xlane.xlu0 %3602 }
 0x876   : > { %v3607_v0 = vsub.f32 %v3599_v22, %v3603_v39  ;;  %v9178_v39 = vld [vmem:[%s11979_s8 + $0x8] sm:$0xff] }
 0x878   : > { %v3609_v4 = vmul.f32 1.442695, %v3607_v0  ;;  %v12257_v0 = vld [vmem:[#allocation32_spill] sm:$0xff] }
 0x87a   : > { %7579 = vpow2.f32 %v3609_v4  ;;  %v1258_v4 = vmul.f32 %v12257_v0, %v9178_v39 }
 0x87d   : > { %v9099_v56 = vpop.eup %7577 }
 0x87e   : > { %v3616_v52 = vsel %vm928_vm2, %v9099_v56, 0.0 }
 0x87f   : > { %v9103_v53 = vpop.f32.mrf.mxu0  ;;  %3617 = vadd.xlane.f32.xlu0 %v3616_v52  ;;  %v9186_v52 = vld [vmem:[%s11979_s8 + $0x18] sm:$0xff] }
 0x880   : > { %12241 = vst [vmem:[#allocation43_spill] sm:$0xff] %v9103_v53 }
 0x881   : > { %v7432_v48 = vpop.f32.mrf.mxu0 }
 0x887   : > { %v9105_v32 = vpop.eup %7579  ;;  %v7455_v38 = vpop.f32.mrf.mxu0 }
 0x888   : > { %v3613_v12 = vsel %vm928_vm2, %v9105_v32, 0.0  ;;  %v4108_v58 = vmul.f32 %v7455_v38, %v12242_v50  ;;  %v1276_v38 = vsel %vm928_vm2, %v1258_v4, 0.0 }
 0x889   : > { %v4048_v15 = vpop.f32.mrf.mxu0  ;;  %3614 = vadd.xlane.f32.xlu1 %v3613_v12  ;;  %v1260_v12 = vmul.f32 %v12257_v0, %v9186_v52 }
 0x88a   : > { %v9122_v8 = vadd.f32 %v4108_v58, %v12244_v35  ;;  %v4107_v7 = vmul.f32 %v4048_v15, %v12252_v55  ;;  %v12261_v58 = vld [vmem:[#allocation47_spill] sm:$0xff] }
 0x88b   : > { %v9109_v45 = vpop.f32.mrf.mxu0 }
 0x88c   : > { %v4268_v3 = vrot.slane %v9122_v8, %v12207_v60  ;;  %v4279_v28 = vrot.slane %v9122_v8, %v12208_v57  ;;  %v4290_v13 = vrot.slane %v9122_v8, %v12209_v49  ;;  %v4301_v18 = vrot.slane %v9122_v8, %v12249_v19 }
 0x88d   : > { %v9111_v30 = vpop.f32.mrf.mxu0  ;;  %v4334_v20 = vrot.slane %v9122_v8, %v12253_v6  ;;  %v4119_v62 = vadd.f32 %v4107_v7, %v12254_v34  ;;  %v4345_v5 = vrot.slane %v9122_v8, %v12255_v27 }
 0x88f   : > { %v9114_v16 = vpop.f32.mrf.mxu0  ;;  %v4134_v43 = vrot.slane %v4119_v62, %v12207_v60  ;;  %v4145_v2 = vrot.slane %v4119_v62, %v12208_v57  ;;  %v4156_v54 = vrot.slane %v4119_v62, %v12209_v49  ;;  %v4167_v11 = vrot.slane %v4119_v62, %v12249_v19 }
 0x890   : > { %12243 = vst [vmem:[#allocation41_spill] sm:$0xff] %v9114_v16  ;;  %v4200_v47 = vrot.slane %v4119_v62, %v12253_v6  ;;  %v4211_v22 = vrot.slane %v4119_v62, %v12255_v27 }
 0x891   : > { %v9116_v33 = vpop.f32.mrf.mxu0 }
 0x893   : > { %v9124_v44 = vpop.f32.mrf.mxu0 }
 0x894   : > { %12245 = vst [vmem:[#allocation29_spill] sm:$0xff] %v9124_v44 }
 0x895   : > { %v9126_v61 = vpop.f32.mrf.mxu0  ;;  %737 = vperm.xlu0 %7551, %v445_v17  }
 0x897   : > { %v9128_v29 = vpop.f32.mrf.mxu0 }
 0x899   : > { %v9135_v21 = vpop.f32.mrf.mxu0  ;;  %4274 = vbcast.lane.b32.xlu0 %v4268_v3, 264 }
 0x89a   : > { %12246 = vst [vmem:[#allocation42_spill] sm:$0xff] %v9135_v21  ;;  %809 = vperm.xlu1 %7552, %v457_v36  }
 0x89b   : > { %v9137_v25 = vpop.f32.mrf.mxu0 }
 0x89c   : > { %12247 = vst [vmem:[#allocation44_spill] sm:$0xff] %v9137_v25  ;;  %v9280_v25 = vld [vmem:[%s11977_s6] sm:$0xff] }
 0x89d   : > { %v4098_v14 = vpop.f32.mrf.mxu0  ;;  %4285 = vbcast.lane.b32.xlu0 %v4279_v28, 264  ;;  %12262 = vst [vmem:[#allocation32_spill] sm:$0xff] %v9280_v25 }
 0x89e   : > { %v4117_v42 = vmul.f32 %v4098_v14, %v8854_v59  ;;  %v12250_v59 = vld [vmem:[#allocation18_spill] sm:$0xff] }
 0x89f   : > { %v4312_v51 = vrot.slane %v9122_v8, %v12250_v59  ;;  %v4178_v9 = vrot.slane %v4119_v62, %v12250_v59 }
 0x8a0   : > { %v9145_v24 = vadd.f32 %v4117_v42, %v8869_v26  ;;  %v12251_v26 = vld [vmem:[#allocation19_spill] sm:$0xff] }
 0x8a1   : > { %4296 = vbcast.lane.b32.xlu0 %v4290_v13, 264  ;;  %v4323_v37 = vrot.slane %v9122_v8, %v12251_v26  ;;  %v4189_v1 = vrot.slane %v4119_v62, %v12251_v26 }
 0x8a2   : > { %12248 = vst [vmem:[#allocation23_spill] sm:$0xff] %v9145_v24  ;;  %7507 = vmatprep.subr.mxu0 %v9145_v24 }
 0x8a3   : > { %7508 = vmatpush3.msra.mxu0 %v9145_v24 }
 0x8a4   : > { %7512 = vmatprep.subr.mxu0 %v12204_v23 }
 0x8a5   : > { %4270 = vbcast.lane.b32.xlu0 %v4268_v3, 256  ;;  %v1282_v3 = vsel %vm928_vm2, %v1260_v12, 0.0  ;;  %v9241_v12 = vld [vmem:[%s11978_s7 + $0x18] sm:$0xff] }
 0x8a9   : > { %4281 = vbcast.lane.b32.xlu0 %v4279_v28, 256 }
 0x8ad   : > { %4307 = vbcast.lane.b32.xlu0 %v4301_v18, 264 }
 0x8b1   : > { %4292 = vbcast.lane.b32.xlu0 %v4290_v13, 256 }
 0x8b5   : > { %4318 = vbcast.lane.b32.xlu0 %v4312_v51, 264 }
 0x8b9   : > { %4329 = vbcast.lane.b32.xlu0 %v4323_v37, 264 }
 0x8bd   : > { %4340 = vbcast.lane.b32.xlu0 %v4334_v20, 264 }
 0x8c1   : > { %4325 = vbcast.lane.b32.xlu0 %v4323_v37, 256 }
 0x8c3   : > { %4399 = vxpose.xlu1.b32.start.end [1/1] (short) (narrow) %v4119_v62, 16 }
 0x8c5   : > { %4140 = vbcast.lane.b32.xlu0 %v4134_v43, 264 }
 0x8c9   : > { %4151 = vbcast.lane.b32.xlu0 %v4145_v2, 264 }
 0x8cd   : > { %4162 = vbcast.lane.b32.xlu0 %v4156_v54, 264 }
 0x8d1   : > { %4136 = vbcast.lane.b32.xlu0 %v4134_v43, 256 }
 0x8d5   : > { %4147 = vbcast.lane.b32.xlu0 %v4145_v2, 256 }
 0x8d9   : > { %4173 = vbcast.lane.b32.xlu0 %v4167_v11, 264 }
 0x8dd   : > { %4158 = vbcast.lane.b32.xlu0 %v4156_v54, 256 }
 0x8e1   : > { %4169 = vbcast.lane.b32.xlu0 %v4167_v11, 256 }
 0x8e5   : > { %4195 = vbcast.lane.b32.xlu0 %v4189_v1, 264  ;;  %4303 = vbcast.lane.b32.xlu1 %v4301_v18, 256 }
 0x8e9   : > { %4180 = vbcast.lane.b32.xlu0 %v4178_v9, 256  ;;  %4314 = vbcast.lane.b32.xlu1 %v4312_v51, 256 }
 0x8ed   : > { %4206 = vbcast.lane.b32.xlu0 %v4200_v47, 264  ;;  %4351 = vbcast.lane.b32.xlu1 %v4345_v5, 264 }
 0x8f1   : > { %4217 = vbcast.lane.b32.xlu0 %v4211_v22, 264  ;;  %4184 = vbcast.lane.b32.xlu1 %v4178_v9, 264 }
 0x8f5   : > { %4347 = vbcast.lane.b32.xlu0 %v4345_v5, 256  ;;  %4191 = vbcast.lane.b32.xlu1 %v4189_v1, 256 }
 0x8f9   : > { %4213 = vbcast.lane.b32.xlu0 %v4211_v22, 256  ;;  %4202 = vbcast.lane.b32.xlu1 %v4200_v47, 256 }
 0x8fd   : > { %4336 = vbcast.lane.b32.xlu1 %v4334_v20, 256 }
 0x908   : > { %v3618_v31 = vpop.xlane.xlu0 %3617 }
 0x909   : > { %7581 = vrcp.f32 %v3618_v31 }
 0x912   : > { %v3615_v10 = vpop.xlane.xlu1 %3614 }
 0x913   : > { %7583 = vrcp.f32 %v3615_v10 }
 0x916   : > { %v7582_v41 = vpop.eup %7581  ;;  %v9196_v50 = vpop.permute.xlu1 %809 }
 0x917   : > { %v9171_v63 = vmul.f32 %v7582_v41, %v9099_v56  ;;  %v9188_v56 = vpop.permute.xlu0 %737  ;;  %12260 = vst [vmem:[#allocation14_spill] sm:$0xff] %v9196_v50 }
 0x918   : > { %12258 = vst [vmem:[#allocation12_spill] sm:$0xff] %v9188_v56  ;;  %v751_v17 = vmul.f32 %v12261_v58, %v9188_v56  ;;  %v7668_v56 = vld [vmem:[%s11977_s6 + $0x20] sm:$0xff] }
 0x919   : > { %12256 = vst [vmem:[#allocation10_spill] sm:$0xff] %v9171_v63  ;;  %7439 = vmatpush3.xpose.msk.msra.mxu1 %vm928_vm2, %v9171_v63 }
 0x91a   : > { %7440 = vmatprep.subr.mxu1 %v12204_v23  ;;  %v823_v35 = vadd.f32 %v9196_v50, %v751_v17  ;;  %v9247_v17 = vld [vmem:[%s11977_s6 + $0x8] sm:$0xff] }
 0x91b   : > { %v4275_v28 = vpop.permute.xlu0 %4274 }
 0x91f   : > { %v4286_v14 = vpop.permute.xlu0 %4285 }
 0x920   : > { %v7584_v48 = vpop.eup %7583  ;;  %v4356_v58 = vmul.f32 %v9241_v12, %v4286_v14 }
 0x921   : > { %v9194_v15 = vmul.f32 %v7584_v48, %v9105_v32  ;;  %1277 = vadd.xlane.f32.xlu1 %v1276_v38  ;;  %v9235_v48 = vld [vmem:[%s11977_s6 + $0x18] sm:$0xff] }
 0x923   : > { %12259 = vst [vmem:[#allocation11_spill] sm:$0xff] %v9194_v15  ;;  %7441 = vmatpush3.xpose.msk.msra.mxu1 %vm928_vm2, %v9194_v15  ;;  %v4297_v42 = vpop.permute.xlu0 %4296 }
 0x924   : > { %7471 = vmatprep.subr.mxu1 %v9122_v8 }
 0x925   : > { %1283 = vadd.xlane.f32.xlu1 %v1282_v3  ;;  %v9253_v3 = vld [vmem:[%s11977_s6 + $0x28] sm:$0xff] }
 0x926   : > { %7443 = vmatmul.mubr.msk.f32.vlgmr.msra.gmra.mxu1 %vm928_vm2, %v823_v35 }
 0x927   : > { %7472 = vmatpush3.msra.mxu1 %v9122_v8  ;;  %v4271_v13 = vpop.permute.xlu0 %4270 }
 0x928   : > { %7476 = vmatprep.subr.mxu1 %v12204_v23 }
 0x92b   : > { %v4282_v18 = vpop.permute.xlu0 %4281 }
 0x92f   : > { %v9212_v51 = vpop.permute.xlu0 %4307 }
 0x933   : > { %v4293_v37 = vpop.permute.xlu0 %4292 }
 0x937   : > { %v9214_v8 = vpop.permute.xlu0 %4318 }
 0x93b   : > { %v9216_v55 = vpop.permute.xlu0 %4329 }
 0x93f   : > { %v4415_v32 = vpop.trf.xlu1  ;;  %v9218_v7 = vpop.permute.xlu0 %4340 }
 0x940   : > { %7473 = vmatprep.mubr.msk.f32.mxu1 %vm1125_vm1, %v4415_v32 }
 0x943   : > { %v4416_v36 = vpop.trf.xlu1  ;;  %v9220_v20 = vpop.permute.xlu0 %4325 }
 0x944   : > { %7474 = vmatmul.mubr.msk.f32.vlgmr.msra.gmra.mxu1 %vm1125_vm1, %v4416_v36  ;;  %v7664_v36 = vld [vmem:[%s11978_s7 + $0x8] sm:$0xff] }
 0x945   : > { %7480 = vmatprep.mubr.msk.f32.mxu1 %vm7828_vm3, %v12204_v23 }
 0x947   : > { %v4141_v34 = vpop.permute.xlu0 %4140 }
 0x948   : > { %v4220_v35 = vmul.f32 %v9247_v17, %v4141_v34  ;;  %v9265_v34 = vld [vmem:[%s11977_s6 + $0x10] sm:$0xff] }
 0x94b   : > { %v4152_v62 = vpop.permute.xlu0 %4151 }
 0x94c   : > { %v4222_v38 = vmul.f32 %v9235_v48, %v4152_v62  ;;  %v4354_v62 = vmul.f32 %v7664_v36, %v4275_v28  ;;  %v4385_v28 = vsel %vm928_vm2, %v4356_v58, 0.0  ;;  %v4250_v36 = vsel %vm928_vm2, %v4220_v35, 0.0 }
 0x94e   : > { %v4251_v46 = vsel %vm928_vm2, %v4222_v38, 0.0  ;;  %v4384_v35 = vsel %vm928_vm2, %v4354_v62, 0.0  ;;  %v9310_v62 = vld [vmem:[%s11977_s6 + $0x30] sm:$0xff] }
 0x94f   : > { %v4163_v43 = vpop.permute.xlu0 %4162  ;;  %v4252_v24 = vadd.f32 %v4251_v46, %v4250_v36  ;;  %v4386_v46 = vadd.f32 %v4385_v28, %v4384_v35  ;;  %v7673_v36 = vld [vmem:[%s11978_s7] sm:$0xff] }
 0x950   : > { %v4224_v32 = vmul.f32 %v9253_v3, %v4163_v43  ;;  %v9271_v43 = vld [vmem:[%s11977_s6 + $0x38] sm:$0xff]  ;;  %v4353_v15 = vmul.f32 %v7673_v36, %v4271_v13  ;;  %v9332_v13 = vld [vmem:[%s11977_s6 + $0x40] sm:$0xff] }
 0x951   : > { %12264 = vst [vmem:[#allocation53_spill] sm:$0xff] %v9332_v13 }
 0x952   : > { %v4253_v38 = vsel %vm928_vm2, %v4224_v32, 0.0  ;;  %v9296_v32 = vld [vmem:[%s11978_s7 + $0x28] sm:$0xff] }
 0x953   : > { %v4137_v2 = vpop.permute.xlu0 %4136 }
 0x957   : > { %v4148_v54 = vpop.permute.xlu0 %4147  ;;  %v9222_v47 = vpop.permute.xlu1 %4303 }
 0x958   : > { %v4221_v21 = vmul.f32 %v9265_v34, %v4148_v54  ;;  %v4219_v54 = vmul.f32 %v9280_v25, %v4137_v2  ;;  %v4358_v2 = vmul.f32 %v9296_v32, %v4297_v42 }
 0x95a   : > { %v4236_v44 = vsel %vm928_vm2, %v4221_v21, 0.0  ;;  %v9321_v21 = vld [vmem:[%s11978_s7 + $0x20] sm:$0xff]  ;;  %v4387_v25 = vsel %vm928_vm2, %v4358_v2, 0.0 }
 0x95b   : > { %v4174_v11 = vpop.permute.xlu0 %4173  ;;  %v9226_v22 = vpop.permute.xlu1 %4314 }
 0x95c   : > { %v4226_v53 = vmul.f32 %v9271_v43, %v4174_v11  ;;  %v9289_v11 = vld [vmem:[%s11977_s6 + $0x48] sm:$0xff] }
 0x95f   : > { %v4159_v1 = vpop.permute.xlu0 %4158  ;;  %v9228_v10 = vpop.permute.xlu1 %4351 }
 0x960   : > { %v4223_v16 = vmul.f32 %v7668_v56, %v4159_v1  ;;  %v9302_v56 = vld [vmem:[%s11978_s7 + $0x10] sm:$0xff] }
 0x961   : > { %v4355_v1 = vmul.f32 %v9302_v56, %v4282_v18  ;;  %v4254_v18 = vadd.f32 %v4253_v38, %v4252_v24  ;;  %v9339_v24 = vld [vmem:[%s11978_s7 + $0x38] sm:$0xff] }
 0x962   : > { %12265 = vst [vmem:[#allocation54_spill] sm:$0xff] %v9339_v24 }
 0x963   : > { %v4170_v9 = vpop.permute.xlu0 %4169  ;;  %v4185_v4 = vpop.permute.xlu1 %4184 }
 0x964   : > { %v4228_v58 = vmul.f32 %v9289_v11, %v4185_v4  ;;  %v4255_v4 = vsel %vm928_vm2, %v4226_v53, 0.0  ;;  %v4225_v63 = vmul.f32 %v9310_v62, %v4170_v9  ;;  %v4357_v53 = vmul.f32 %v9321_v21, %v4293_v37 }
 0x965   : > { %v4235_v9 = vsel %vm928_vm2, %v4219_v54, 0.0  ;;  %v4256_v38 = vadd.f32 %v4255_v4, %v4254_v18 }
 0x966   : > { %v4257_v28 = vsel %vm928_vm2, %v4228_v58, 0.0  ;;  %v4237_v37 = vadd.f32 %v4236_v44, %v4235_v9  ;;  %v4370_v58 = vsel %vm928_vm2, %v4355_v1, 0.0  ;;  %v4372_v1 = vsel %vm928_vm2, %v4357_v53, 0.0 }
 0x967   : > { %v9224_v5 = vpop.permute.xlu0 %4195  ;;  %v4192_v50 = vpop.permute.xlu1 %4191  ;;  %v4258_v18 = vadd.f32 %v4257_v28, %v4256_v38  ;;  %v9383_v28 = vld [vmem:[%s11978_s7 + $0x48] sm:$0xff] }
 0x968   : > { %12269 = vst [vmem:[#allocation58_spill] sm:$0xff] %v9383_v28 }
 0x96b   : > { %v4181_v31 = vpop.permute.xlu0 %4180  ;;  %v4203_v54 = vpop.permute.xlu1 %4202 }
 0x96c   : > { %v4227_v35 = vmul.f32 %v9332_v13, %v4181_v31  ;;  %v9347_v31 = vld [vmem:[%s11978_s7 + $0x30] sm:$0xff]  ;;  %v9355_v13 = vld [vmem:[%s11977_s6 + $0x58] sm:$0xff] }
 0x96d   : > { %12266 = vst [vmem:[#allocation55_spill] sm:$0xff] %v9347_v31  ;;  %v4359_v2 = vmul.f32 %v9347_v31, %v9222_v47  ;;  %v4230_v44 = vmul.f32 %v9355_v13, %v9224_v5  ;;  %v7679_v47 = vld [vmem:[%s11978_s7 + $0x40] sm:$0xff] }
 0x96e   : > { %v4242_v9 = vsel %vm928_vm2, %v4227_v35, 0.0  ;;  %v4362_v35 = vmul.f32 %v9383_v28, %v9214_v8 }
 0x96f   : > { %v9230_v41 = vpop.permute.xlu0 %4206  ;;  %v4374_v38 = vsel %vm928_vm2, %v4359_v2, 0.0  ;;  %v4337_v28 = vpop.permute.xlu1 %4336 }
 0x973   : > { %v9259_v14 = vpop.permute.xlu0 %4217 }
 0x977   : > { %v9324_v40 = vpop.permute.xlu0 %4347 }
 0x9e6   : > { %v9313_v42 = vpop.f32.mrf.mxu1 }
 0x9e7   : > { %12263 = vst [vmem:[#allocation47_spill] sm:$0xff] %v9313_v42  ;;  %v4238_v42 = vsel %vm928_vm2, %v4223_v16, 0.0  ;;  %v4360_v16 = vmul.f32 %v9339_v24, %v9212_v51  ;;  %v4369_v51 = vsel %vm928_vm2, %v4353_v15, 0.0  ;;  %v9369_v24 = vld [vmem:[%s11977_s6 + $0x50] sm:$0xff]  ;;  %v9375_v15 = vld [vmem:[%s11977_s6 + $0x68] sm:$0xff] }
 0x9e8   : > { %v7444_v36 = vpop.f32.mrf.mxu1  ;;  %v4239_v4 = vadd.f32 %v4238_v42, %v4237_v37  ;;  %12267 = vst [vmem:[#allocation56_spill] sm:$0xff] %v9369_v24  ;;  %v4229_v5 = vmul.f32 %v9369_v24, %v4192_v50  ;;  %12268 = vst [vmem:[#allocation57_spill] sm:$0xff] %v9375_v15  ;;  %v4232_v42 = vmul.f32 %v9375_v15, %v9230_v41  ;;  %v4214_v37 = vpop.permute.xlu0 %4213  ;;  %v7683_v41 = vld [vmem:[%s11977_s6 + $0x60] sm:$0xff] }
 0x9e9   : > { %v4240_v36 = vsel %vm928_vm2, %v4225_v63, 0.0  ;;  %v4361_v63 = vmul.f32 %v7679_v47, %v9226_v22  ;;  %v4371_v53 = vadd.f32 %v4370_v58, %v4369_v51  ;;  %v4389_v22 = vsel %vm928_vm2, %v4360_v16, 0.0  ;;  %v7684_v58 = vld [vmem:[%s11977_s6 + $0x78] sm:$0xff] }
 0x9ea   : > { %v4241_v50 = vadd.f32 %v4240_v36, %v4239_v4  ;;  %v4259_v47 = vsel %vm928_vm2, %v4230_v44, 0.0  ;;  %v4231_v16 = vmul.f32 %v7683_v41, %v4203_v54  ;;  %v4234_v51 = vmul.f32 %v7684_v58, %v9259_v14  ;;  %v9401_v36 = vld [vmem:[%s11978_s7 + $0x58] sm:$0xff]  ;;  %v7686_v14 = vld [vmem:[%s11977_s6 + $0x70] sm:$0xff] }
 0x9eb   : > { %v4373_v8 = vadd.f32 %v4372_v1, %v4371_v53  ;;  %12270 = vst [vmem:[#allocation59_spill] sm:$0xff] %v9401_v36  ;;  %v4364_v2 = vmul.f32 %v9401_v36, %v9216_v55  ;;  %v4260_v4 = vadd.f32 %v4259_v47, %v4258_v18  ;;  %v4376_v54 = vsel %vm928_vm2, %v4361_v63, 0.0  ;;  %v7687_v55 = vld [vmem:[%s11978_s7 + $0x68] sm:$0xff]  ;;  %v7688_v63 = vld [vmem:[%s11978_s7 + $0x50] sm:$0xff] }
 0x9ec   : > { %v4243_v44 = vadd.f32 %v4242_v9, %v4241_v50  ;;  %v4244_v41 = vsel %vm928_vm2, %v4229_v5, 0.0  ;;  %v4261_v24 = vsel %vm928_vm2, %v4232_v42, 0.0  ;;  %v4233_v1 = vmul.f32 %v7686_v14, %v4214_v37 }
 0x9ed   : > { %v4388_v53 = vadd.f32 %v4387_v25, %v4386_v46  ;;  %v4391_v58 = vsel %vm928_vm2, %v4362_v35, 0.0  ;;  %v4366_v18 = vmul.f32 %v7687_v55, %v9218_v7  ;;  %v4375_v9 = vadd.f32 %v4374_v38, %v4373_v8  ;;  %v7689_v46 = vld [vmem:[%s11978_s7 + $0x60] sm:$0xff] }
 0x9ee   : > { %v4363_v5 = vmul.f32 %v7688_v63, %v9220_v20  ;;  %v4246_v42 = vsel %vm928_vm2, %v4231_v16, 0.0  ;;  %v4263_v25 = vsel %vm928_vm2, %v4234_v51, 0.0  ;;  %v4365_v35 = vmul.f32 %v7689_v46, %v4337_v28  ;;  %v9433_v20 = vld [vmem:[%s11978_s7 + $0x78] sm:$0xff] }
 0x9ef   : > { %v4390_v7 = vadd.f32 %v4389_v22, %v4388_v53  ;;  %v4377_v50 = vadd.f32 %v4376_v54, %v4375_v9  ;;  %v4245_v37 = vadd.f32 %v4244_v41, %v4243_v44  ;;  %v4262_v38 = vadd.f32 %v4261_v24, %v4260_v4  ;;  %12271 = vst [vmem:[#allocation60_spill] sm:$0xff] %v9433_v20  ;;  %v7691_v54 = vld [vmem:[%s11978_s7 + $0x70] sm:$0xff] }
 0x9f0   : > { %v4393_v47 = vsel %vm928_vm2, %v4364_v2, 0.0  ;;  %v4368_v16 = vmul.f32 %v9433_v20, %v9228_v10  ;;  %v4248_v28 = vsel %vm928_vm2, %v4233_v1, 0.0  ;;  %v4513_v22 = vstv %s9387_s28  ;;  %s7244_s28 = sld [smem:[#allocation4 + $0x1]] }
 0x9f1   : > { %v4392_v51 = vadd.f32 %v4391_v58, %v4390_v7  ;;  %v4247_v8 = vadd.f32 %v4246_v42, %v4245_v37  ;;  %v4264_v44 = vadd.f32 %v4263_v25, %v4262_v38  ;;  %v4395_v24 = vsel %vm928_vm2, %v4366_v18, 0.0 }
 0x9f2   : > { %v4378_v2 = vsel %vm928_vm2, %v4363_v5, 0.0  ;;  %v4380_v4 = vsel %vm928_vm2, %v4365_v35, 0.0  ;;  %v4367_v10 = vmul.f32 %v7691_v54, %v9324_v40  ;;  %v4397_v53 = vsel %vm928_vm2, %v4368_v16, 0.0 }
 0x9f3   : > { %v4394_v41 = vadd.f32 %v4393_v47, %v4392_v51  ;;  %v4379_v14 = vadd.f32 %v4378_v2, %v4377_v50  ;;  %v4249_v1 = vadd.f32 %v4248_v28, %v4247_v8  ;;  %v4515_v55 = vmul.f32 %v4513_v22, %v4264_v44 }
 0x9f4   : > { %v4382_v18 = vsel %vm928_vm2, %v4367_v10, 0.0  ;;  %v4517_v63 = vstv %s9425_s22  ;;  %v4521_v25 = vstv %s9428_s23  ;;  %v4531_v47 = vstv %s7245_s30  ;;  %s10039_s23 = sld [smem:[#allocation4 + $0x82]] }
 0x9f5   : > { %v4396_v58 = vadd.f32 %v4395_v24, %v4394_v41  ;;  %v4381_v9 = vadd.f32 %v4380_v4, %v4379_v14  ;;  %v4514_v42 = vmul.f32 %v4513_v22, %v4249_v1  ;;  %v4519_v35 = vadd.f32 %v4517_v63, %v4515_v55  ;;  %v12273_v55 = vld [vmem:[#allocation27_spill] sm:$0xff]  ;;  %s10696_s22 = sld [smem:[#allocation2 + $0x181]] }
 0x9f6   : > { %v4527_v38 = vstv %s7244_s28  ;;  %v4537_v24 = vstv %s7246_s14  ;;  %s11176_s28 = sld [smem:[#allocation2 + $0x102]] }
 0x9f7   : > { %v4398_v5 = vadd.f32 %v4397_v53, %v4396_v58  ;;  %v4383_v46 = vadd.f32 %v4382_v18, %v4381_v9  ;;  %v4518_v7 = vadd.f32 %v4517_v63, %v4514_v42  ;;  %v12272_v53 = vld [vmem:[#allocation26_spill] sm:$0xff]  ;;  %v9461_v18 = vld [vmem:[%s11979_s8] sm:$0xff]  ;;  %v12274_v63 = vld [vmem:[#allocation33_spill] sm:$0xff]  ;;  %s11223_s30 = sld [smem:[#allocation4 + $0x102]] }
 0x9f8   : > { %v4110_v58 = vmul.f32 %v9109_v45, %v12272_v53  ;;  %v9468_v42 = vld [vmem:[%s11979_s8 + $0x10] sm:$0xff] }
 0x9f9   : > { %v4523_v40 = vmul.f32 %v4521_v25, %v4398_v5  ;;  %v4522_v50 = vmul.f32 %v4521_v25, %v4383_v46  ;;  %v1257_v5 = vmul.f32 %v12274_v63, %v9461_v18  ;;  %v1259_v25 = vmul.f32 %v12274_v63, %v9468_v42  ;;  %v9476_v46 = vld [vmem:[%s11979_s8 + $0x20] sm:$0xff] }
 0x9fa   : > { %v9455_v9 = vadd.f32 %v4110_v58, %v12273_v55  ;;  %v9517_v58 = vpop.xlane.xlu1 %1277 }
 0x9fb   : > { %v4525_v37 = vadd.f32 %v4523_v40, %v4519_v35  ;;  %v4524_v16 = vadd.f32 %v4522_v50, %v4518_v7  ;;  %v1273_v45 = vsel %vm928_vm2, %v1257_v5, 0.0  ;;  %v1279_v35 = vsel %vm928_vm2, %v1259_v25, 0.0  ;;  %v9484_v7 = vld [vmem:[%s11979_s8 + $0x28] sm:$0xff]  ;;  %v12275_v5 = vld [vmem:[#allocation38_spill] sm:$0xff] }
 0x9fc   : > { %v1261_v40 = vmul.f32 %v12274_v63, %v9476_v46 }
 0x9fd   : > { %v4529_v51 = vadd.f32 %v4527_v38, %v4525_v37  ;;  %v4528_v4 = vadd.f32 %v4527_v38, %v4524_v16  ;;  %v1262_v37 = vmul.f32 %v12257_v0, %v9484_v7  ;;  %v9492_v38 = vld [vmem:[%s11979_s8 + $0x30] sm:$0xff] }
 0x9fe   : > { %v1285_v50 = vsel %vm928_vm2, %v1261_v40, 0.0  ;;  %v1263_v16 = vmul.f32 %v12274_v63, %v9492_v38 }
 0xa04   : > { %v7475_v28 = vpop.f32.mrf.mxu1 }
 0xa05   : > { %v4533_v8 = vmul.f32 %v7475_v28, %v4531_v47  ;;  %v498_v28 = vld [vmem:[%s11979_s8 + $0x40] sm:$0xff] }
 0xa06   : > { %v4503_v44 = vpop.f32.mrf.mxu1 }
 0xa07   : > { %v4535_v2 = vadd.f32 %v4533_v8, %v4529_v51  ;;  %v4532_v54 = vmul.f32 %v4531_v47, %v4503_v44  ;;  %v1288_v47 = vsel %vm928_vm2, %v1262_v37, 0.0  ;;  %v1291_v51 = vsel %vm928_vm2, %v1263_v16, 0.0  ;;  %v500_v44 = vld [vmem:[%s11979_s8 + $0x50] sm:$0xff] }
 0xa08   : > { %v1265_v8 = vmul.f32 %v12274_v63, %v498_v28 }
 0xa09   : > { %v4534_v22 = vadd.f32 %v4532_v54, %v4528_v4  ;;  %v4539_v10 = vadd.f32 %v4537_v24, %v4535_v2  ;;  %v1267_v2 = vmul.f32 %v12274_v63, %v500_v44  ;;  %v502_v4 = vld [vmem:[%s11979_s8 + $0x60] sm:$0xff] }
 0xa0b   : > { %v4543_v41 = vsel %vm928_vm2, %v4539_v10, -inf  ;;  %v4538_v14 = vadd.f32 %v4537_v24, %v4534_v22  ;;  %v1297_v24 = vsel %vm928_vm2, %v1265_v8, 0.0  ;;  %v1303_v54 = vsel %vm928_vm2, %v1267_v2, 0.0 }
 0xa0c   : > { %4544 = vmax.xlane.f32.xlu1 %v4543_v41  ;;  %v1269_v22 = vmul.f32 %v12274_v63, %v502_v4  ;;  %v504_v41 = vld [vmem:[%s11979_s8 + $0x70] sm:$0xff] }
 0xa0d   : > { %v4540_v1 = vsel %vm928_vm2, %v4538_v14, -inf  ;;  %v1271_v53 = vmul.f32 %v12274_v63, %v504_v41 }
 0xa0e   : > { %4541 = vmax.xlane.f32.xlu0 %v4540_v1  ;;  %v1309_v1 = vsel %vm928_vm2, %v1269_v22, 0.0 }
 0xa0f   : > { %v1315_v55 = vsel %vm928_vm2, %v1271_v53, 0.0 }
 0xa3b   : > { %5136 = vxpose.xlu0.b32.start.end [1/1] (short) (narrow) %v9455_v9, 16 }
 0xa6c   : > { %1274 = vadd.xlane.f32.xlu0 %v1273_v45  ;;  %v2054_v45 = vmul.f32 %v12275_v5, %v9178_v39 }
 0xa6e   : > { %v2072_v25 = vsel %vm928_vm2, %v2054_v45, 0.0 }
 0xa70   : > { %1280 = vadd.xlane.f32.xlu0 %v1279_v35  ;;  %v12276_v35 = vld [vmem:[#allocation39_spill] sm:$0xff] }
 0xa71   : > { %v2061_v40 = vmul.f32 %v12276_v35, %v498_v28  ;;  %v2063_v63 = vmul.f32 %v12276_v35, %v500_v44  ;;  %v2055_v31 = vmul.f32 %v12276_v35, %v9468_v42 }
 0xa73   : > { %v2093_v37 = vsel %vm928_vm2, %v2061_v40, 0.0  ;;  %v2099_v8 = vsel %vm928_vm2, %v2063_v63, 0.0 }
 0xa74   : > { %1286 = vadd.xlane.f32.xlu0 %v1285_v50  ;;  %v9524_v50 = vpop.xlane.xlu1 %1283 }
 0xa78   : > { %1289 = vadd.xlane.f32.xlu0 %v1288_v47 }
 0xa7c   : > { %1292 = vadd.xlane.f32.xlu0 %v1291_v51 }
 0xa80   : > { %1298 = vadd.xlane.f32.xlu0 %v1297_v24  ;;  %v2065_v24 = vmul.f32 %v12276_v35, %v502_v4 }
 0xa82   : > { %v2105_v22 = vsel %vm928_vm2, %v2065_v24, 0.0 }
 0xa84   : > { %1304 = vadd.xlane.f32.xlu0 %v1303_v54 }
 0xa88   : > { %1310 = vadd.xlane.f32.xlu0 %v1309_v1  ;;  %v2067_v1 = vmul.f32 %v12276_v35, %v504_v41  ;;  %v506_v41 = vld [vmem:[%s11980_s9] sm:$0xff] }
 0xa8a   : > { %v2111_v44 = vsel %vm928_vm2, %v2067_v1, 0.0 }
 0xa8c   : > { %1316 = vadd.xlane.f32.xlu0 %v1315_v55  ;;  %v12277_v55 = vld [vmem:[#allocation24_spill] sm:$0xff] }
 0xa8d   : > { %v4113_v45 = vmul.f32 %v9126_v61, %v12277_v55  ;;  %v9563_v61 = vld [vmem:[%s11979_s8 + $0x38] sm:$0xff]  ;;  %v9592_v55 = vld [vmem:[%s11979_s8 + $0x68] sm:$0xff] }
 0xa90   : > { %2073 = vadd.xlane.f32.xlu0 %v2072_v25  ;;  %v12278_v25 = vld [vmem:[#allocation25_spill] sm:$0xff] }
 0xa91   : > { %v9547_v40 = vadd.f32 %v4113_v45, %v12278_v25 }
 0xa93   : > { %12279 = vst [vmem:[#allocation26_spill] sm:$0xff] %v9547_v40 }
 0xa94   : > { %2094 = vadd.xlane.f32.xlu0 %v2093_v37 }
 0xa95   : > { %v4545_v47 = vpop.xlane.xlu1 %4544 }
 0xa96   : > { %v4547_v16 = vsub.f32 %v4539_v10, %v4545_v47 }
 0xa97   : > { %v4542_v51 = vpop.xlane.xlu0 %4541 }
 0xa98   : > { %v4550_v2 = vmul.f32 1.442695, %v4547_v16  ;;  %v4546_v54 = vsub.f32 %v4538_v14, %v4542_v51  ;;  %2100 = vadd.xlane.f32.xlu0 %v2099_v8 }
 0xa9a   : > { %7585 = vpow2.f32 %v4550_v2  ;;  %v4548_v28 = vmul.f32 1.442695, %v4546_v54  ;;  %v1264_v2 = vmul.f32 %v12257_v0, %v9563_v61  ;;  %v9572_v54 = vld [vmem:[%s11979_s8 + $0x48] sm:$0xff] }
 0xa9b   : > { %v1266_v1 = vmul.f32 %v12257_v0, %v9572_v54 }
 0xa9c   : > { %7587 = vpow2.f32 %v4548_v28  ;;  %2106 = vadd.xlane.f32.xlu0 %v2105_v22  ;;  %v1294_v22 = vsel %vm928_vm2, %v1264_v2, 0.0  ;;  %v1270_v2 = vmul.f32 %v12257_v0, %v9592_v55 }
 0xaa0   : > { %2112 = vadd.xlane.f32.xlu0 %v2111_v44  ;;  %v9582_v44 = vld [vmem:[%s11979_s8 + $0x58] sm:$0xff] }
 0xaa7   : > { %v9533_v10 = vpop.eup %7585 }
 0xaa8   : > { %v4555_v53 = vsel %vm928_vm2, %v9533_v10, 0.0 }
 0xaa9   : > { %v9537_v4 = vpop.eup %7587  ;;  %4556 = vadd.xlane.f32.xlu1 %v4555_v53 }
 0xaaa   : > { %v4552_v14 = vsel %vm928_vm2, %v9537_v4, 0.0 }
 0xaad   : > { %4553 = vadd.xlane.f32.xlu1 %v4552_v14  ;;  %v1300_v14 = vsel %vm928_vm2, %v1266_v1, 0.0 }
 0xab6   : > { %1323 = vperm.xlu0 %7551, %v506_v41   ;;  %v1268_v41 = vmul.f32 %v12257_v0, %v9582_v44 }
 0xab7   : > { %v9550_v37 = vpop.trf.xlu0 }
 0xab8   : > { %v1306_v25 = vsel %vm928_vm2, %v1268_v41, 0.0 }
 0xabb   : > { %v9552_v63 = vpop.trf.xlu0 }
 0xae0   : > { %5872 = vxpose.xlu1.b32.start.end [1/1] (short) (narrow) %v9547_v40, 16 }
 0xaf5   : > { %v9554_v47 = vpop.xlane.xlu0 %1274 }
 0xaf9   : > { %v1281_v16 = vpop.xlane.xlu0 %1280 }
 0xafd   : > { %v9556_v51 = vpop.xlane.xlu0 %1286 }
 0xb01   : > { %v9558_v8 = vpop.xlane.xlu0 %1289 }
 0xb05   : > { %v9565_v24 = vpop.xlane.xlu0 %1292 }
 0xb09   : > { %v9574_v28 = vpop.xlane.xlu0 %1298 }
 0xb0b   : > { %1295 = vadd.xlane.f32.xlu1 %v1294_v22  ;;  %v9600_v22 = vld [vmem:[%s11979_s8 + $0x78] sm:$0xff] }
 0xb0c   : > { %v1272_v40 = vmul.f32 %v12257_v0, %v9600_v22  ;;  %v2075_v0 = vsel %vm928_vm2, %v2055_v31, 0.0 }
 0xb0d   : > { %v9584_v53 = vpop.xlane.xlu0 %1304 }
 0xb0e   : > { %v1318_v41 = vsel %vm928_vm2, %v1272_v40, 0.0 }
 0xb0f   : > { %1301 = vadd.xlane.f32.xlu1 %v1300_v14  ;;  %v1312_v14 = vsel %vm928_vm2, %v1270_v2, 0.0 }
 0xb11   : > { %v1311_v45 = vpop.xlane.xlu0 %1310 }
 0xb13   : > { %1307 = vadd.xlane.f32.xlu1 %v1306_v25  ;;  %v2053_v25 = vmul.f32 %v12276_v35, %v9461_v18  ;;  %v2057_v18 = vmul.f32 %v12276_v35, %v9476_v46 }
 0xb15   : > { %v9602_v1 = vpop.xlane.xlu0 %1316  ;;  %v2069_v15 = vsel %vm928_vm2, %v2053_v25, 0.0  ;;  %v2081_v25 = vsel %vm928_vm2, %v2057_v18, 0.0  ;;  %v2060_v18 = vmul.f32 %v12275_v5, %v9563_v61 }
 0xb17   : > { %1313 = vadd.xlane.f32.xlu1 %v1312_v14  ;;  %v2056_v14 = vmul.f32 %v12275_v5, %v9186_v52 }
 0xb19   : > { %v9607_v20 = vpop.xlane.xlu0 %2073  ;;  %v2078_v40 = vsel %vm928_vm2, %v2056_v14, 0.0 }
 0xb1b   : > { %1319 = vadd.xlane.f32.xlu1 %v1318_v41 }
 0xb1d   : > { %v9612_v36 = vpop.xlane.xlu0 %2094 }
 0xb1e   : > { %12280 = vst [vmem:[#allocation27_spill] sm:$0xff] %v9612_v36 }
 0xb1f   : > { %2070 = vadd.xlane.f32.xlu1 %v2069_v15  ;;  %v2058_v15 = vmul.f32 %v12275_v5, %v9484_v7 }
 0xb21   : > { %v9617_v2 = vpop.xlane.xlu0 %2100  ;;  %v2084_v31 = vsel %vm928_vm2, %v2058_v15, 0.0  ;;  %v2090_v15 = vsel %vm928_vm2, %v2060_v18, 0.0 }
 0xb22   : > { %12281 = vst [vmem:[#allocation33_spill] sm:$0xff] %v9617_v2 }
 0xb23   : > { %2076 = vadd.xlane.f32.xlu1 %v2075_v0  ;;  %v2059_v0 = vmul.f32 %v12276_v35, %v9492_v38 }
 0xb25   : > { %v9625_v41 = vpop.xlane.xlu0 %2106 }
 0xb26   : > { %12282 = vst [vmem:[#allocation38_spill] sm:$0xff] %v9625_v41  ;;  %v2087_v41 = vsel %vm928_vm2, %v2059_v0, 0.0 }
 0xb27   : > { %2079 = vadd.xlane.f32.xlu1 %v2078_v40 }
 0xb29   : > { %v9630_v42 = vpop.xlane.xlu0 %2112 }
 0xb2a   : > { %12283 = vst [vmem:[#allocation39_spill] sm:$0xff] %v9630_v42 }
 0xb2b   : > { %2082 = vadd.xlane.f32.xlu1 %v2081_v25 }
 0xb2f   : > { %2085 = vadd.xlane.f32.xlu1 %v2084_v31  ;;  %v2062_v31 = vmul.f32 %v12275_v5, %v9572_v54 }
 0xb31   : > { %v9635_v14 = vpop.permute.xlu0 %1323 }
 0xb32   : > { %v4557_v46 = vpop.xlane.xlu1 %4556  ;;  %v9640_v40 = vrot.slane %v9635_v14, %v12208_v57  ;;  %v9647_v38 = vrot.slane %v9635_v14, %v12253_v6 }
 0xb33   : > { %7589 = vrcp.f32 %v4557_v46  ;;  %2088 = vadd.xlane.f32.xlu1 %v2087_v41  ;;  %v2096_v41 = vsel %vm928_vm2, %v2062_v31, 0.0  ;;  %v507_v46 = vld [vmem:[%s11980_s9 + $0x8] sm:$0xff]  ;;  %v12287_v31 = vld [vmem:[#allocation31_spill] sm:$0xff] }
 0xb34   : > { %12284 = vst [vmem:[#allocation24_spill] sm:$0xff] %v9640_v40  ;;  %v1367_v25 = vmul.f32 %v9640_v40, %v1281_v16  ;;  %12285 = vst [vmem:[#allocation25_spill] sm:$0xff] %v9647_v38  ;;  %v1377_v0 = vmul.f32 %v9647_v38, %v1311_v45  ;;  %v2064_v16 = vmul.f32 %v12275_v5, %v9582_v44 }
 0xb35   : > { %v2066_v45 = vmul.f32 %v12275_v5, %v9592_v55 }
 0xb36   : > { %v4554_v35 = vpop.xlane.xlu1 %4553  ;;  %1404 = vperm.xlu0 %7551, %v1367_v25   ;;  %v12286_v25 = vld [vmem:[#allocation30_spill] sm:$0xff] }
 0xb37   : > { %7591 = vrcp.f32 %v4554_v35  ;;  %2091 = vadd.xlane.f32.xlu1 %v2090_v15  ;;  %v4111_v18 = vmul.f32 %v9116_v33, %v12286_v25  ;;  %v2102_v35 = vsel %vm928_vm2, %v2064_v16, 0.0  ;;  %v2108_v33 = vsel %vm928_vm2, %v2066_v45, 0.0  ;;  %v12289_v25 = vld [vmem:[#allocation28_spill] sm:$0xff] }
 0xb38   : > { %v2068_v16 = vmul.f32 %v12275_v5, %v9600_v22  ;;  %v12291_v5 = vld [vmem:[#allocation34_spill] sm:$0xff] }
 0xb3a   : > { %1434 = vperm.xlu0 %7551, %v1377_v0   ;;  %v9665_v0 = vadd.f32 %v4111_v18, %v12287_v31  ;;  %v4109_v18 = vmul.f32 %v9111_v30, %v12289_v25  ;;  %v2114_v45 = vsel %vm928_vm2, %v2068_v16, 0.0  ;;  %v9695_v30 = vrot.slane %v9455_v9, %v12208_v57 }
 0xb3b   : > { %2097 = vadd.xlane.f32.xlu1 %v2096_v41  ;;  %v9669_v41 = vrot.slane %v9455_v9, %v12209_v49  ;;  %v4915_v31 = vrot.slane %v9455_v9, %v12250_v59  ;;  %v9728_v25 = vrot.slane %v9635_v14, %v12209_v49 }
 0xb3d   : > { %12293 = vst [vmem:[#allocation34_spill] sm:$0xff] %v9728_v25 }
 0xb3e   : > { %2119 = vperm.xlu0 %7551, %v507_v46  }
 0xb3f   : > { %2103 = vadd.xlane.f32.xlu1 %v2102_v35 }
 0xb40   : > { %v7590_v15 = vpop.eup %7589 }
 0xb41   : > { %v9672_v42 = vmul.f32 %v7590_v15, %v9533_v10  ;;  %v5016_v10 = vrot.slane %v9665_v0, %v12208_v57  ;;  %v4121_v15 = vadd.f32 %v4109_v18, %v12291_v5  ;;  %v5038_v18 = vrot.slane %v9665_v0, %v12249_v19 }
 0xb42   : > { %4899 = vbcast.lane.b32.xlu0 %v9669_v41, 264  ;;  %v9750_v5 = vrot.slane %v9665_v0, %v12255_v27 }
 0xb43   : > { %12288 = vst [vmem:[#allocation30_spill] sm:$0xff] %v9672_v42  ;;  %7477 = vmatpush3.xpose.msk.msra.mxu1 %vm928_vm2, %v9672_v42  ;;  %2109 = vadd.xlane.f32.xlu1 %v2108_v33  ;;  %v9713_v33 = vrot.slane %v9635_v14, %v12207_v60 }
 0xb44   : > { %v7592_v46 = vpop.eup %7591  ;;  %7478 = vmatprep.subr.mxu1 %v12204_v23 }
 0xb45   : > { %v9686_v35 = vmul.f32 %v7592_v46, %v9537_v4  ;;  %v5027_v4 = vrot.slane %v9665_v0, %v12209_v49  ;;  %12292 = vst [vmem:[#allocation28_spill] sm:$0xff] %v9713_v33  ;;  %v1366_v16 = vmul.f32 %v9713_v33, %v9517_v58  ;;  %v1368_v46 = vmul.f32 %v9640_v40, %v9524_v50 }
 0xb46   : > { %5022 = vbcast.lane.b32.xlu0 %v5016_v10, 264  ;;  %v1370_v58 = vmul.f32 %v9728_v25, %v9558_v8  ;;  %v9738_v50 = vrot.slane %v9635_v14, %v12249_v19  ;;  %v4937_v8 = vrot.slane %v9455_v9, %v12253_v6 }
 0xb47   : > { %12290 = vst [vmem:[#allocation31_spill] sm:$0xff] %v9686_v35  ;;  %2115 = vadd.xlane.f32.xlu1 %v2114_v45  ;;  %7479 = vmatpush3.xpose.msk.msra.mxu1 %vm928_vm2, %v9686_v35  ;;  %v5049_v45 = vrot.slane %v9665_v0, %v12250_v59 }
 0xb48   : > { %7483 = vmatprep.subr.mxu1 %v9665_v0  ;;  %12294 = vst [vmem:[#allocation61_spill] sm:$0xff] %v9738_v50 }
 0xb4a   : > { %7481 = vmatmul.mubr.msk.f32.vlgmr.msra.gmra.mxu1 %vm928_vm2, %v4121_v15  ;;  %4884 = vbcast.lane.b32.xlu0 %v9695_v30, 256  ;;  %v5071_v15 = vrot.slane %v9665_v0, %v12253_v6 }
 0xb4b   : > { %7484 = vmatpush3.msra.mxu1 %v9665_v0  ;;  %7485 = vmatprep.mubr.msk.f32.mxu1 %vm1125_vm1, %v9550_v37  ;;  %v1365_v37 = vmul.f32 %v9713_v33, %v9554_v47  ;;  %v1369_v47 = vmul.f32 %v9728_v25, %v9556_v51  ;;  %v1371_v51 = vmul.f32 %v9738_v50, %v9565_v24 }
 0xb4c   : > { %7488 = vmatprep.subr.mxu1 %v12204_v23 }
 0xb4e   : > { %7486 = vmatmul.mubr.msk.f32.vlgmr.msra.gmra.mxu1 %vm1125_vm1, %v9552_v63  ;;  %5033 = vbcast.lane.b32.xlu0 %v5027_v4, 264  ;;  %v9719_v63 = vrot.slane %v9455_v9, %v12249_v19 }
 0xb4f   : > { %7492 = vmatprep.mubr.msk.f32.mxu1 %vm7828_vm3, %v12204_v23 }
 0xb52   : > { %4921 = vbcast.lane.b32.xlu0 %v4915_v31, 264 }
 0xb56   : > { %5018 = vbcast.lane.b32.xlu0 %v5016_v10, 256  ;;  %v4926_v10 = vrot.slane %v9455_v9, %v12251_v26 }
 0xb58   : > { %1398 = vperm.xlu1 %7552, %v1365_v37  }
 0xb5a   : > { %4906 = vbcast.lane.b32.xlu0 %v9719_v63, 256 }
 0xb5c   : > { %1401 = vperm.xlu1 %7552, %v1366_v16   ;;  %v9755_v24 = vpop.trf.xlu1 }
 0xb5d   : > { %12295 = vst [vmem:[#allocation62_spill] sm:$0xff] %v9755_v24 }
 0xb5e   : > { %5029 = vbcast.lane.b32.xlu0 %v5027_v4, 256 }
 0xb60   : > { %1407 = vperm.xlu1 %7552, %v1368_v46   ;;  %v9757_v4 = vpop.trf.xlu1 }
 0xb61   : > { %12296 = vst [vmem:[#allocation63_spill] sm:$0xff] %v9757_v4 }
 0xb62   : > { %4917 = vbcast.lane.b32.xlu0 %v4915_v31, 256  ;;  %v12297_v31 = vld [vmem:[#allocation45_spill] sm:$0xff] }
 0xb63   : > { %v4116_v37 = vmul.f32 %v9128_v29, %v12297_v31  ;;  %v9775_v31 = vrot.slane %v9635_v14, %v12251_v26 }
 0xb64   : > { %1410 = vperm.xlu1 %7552, %v1369_v47   ;;  %v9764_v47 = vrot.slane %v9635_v14, %v12250_v59 }
 0xb65   : > { %12301 = vst [vmem:[#allocation64_spill] sm:$0xff] %v9775_v31 }
 0xb66   : > { %5040 = vbcast.lane.b32.xlu0 %v5038_v18, 256  ;;  %12298 = vst [vmem:[#allocation45_spill] sm:$0xff] %v9764_v47  ;;  %v1373_v40 = vmul.f32 %v9764_v47, %v9574_v28 }
 0xb68   : > { %1413 = vperm.xlu1 %7552, %v1370_v58   ;;  %v12299_v58 = vld [vmem:[#allocation48_spill] sm:$0xff] }
 0xb6a   : > { %4928 = vbcast.lane.b32.xlu0 %v4926_v10, 256 }
 0xb6c   : > { %1416 = vperm.xlu1 %7552, %v1371_v51   ;;  %v9767_v51 = vadd.f32 %v4116_v37, %v12299_v58  ;;  %v1375_v37 = vmul.f32 %v9775_v31, %v9584_v53 }
 0xb6e   : > { %5051 = vbcast.lane.b32.xlu0 %v5049_v45, 256  ;;  %12300 = vst [vmem:[#allocation48_spill] sm:$0xff] %v9767_v51 }
 0xb72   : > { %4939 = vbcast.lane.b32.xlu0 %v4937_v8, 256 }
 0xb76   : > { %5088 = vbcast.lane.b32.xlu0 %v9750_v5, 264 }
 0xb7a   : > { %5073 = vbcast.lane.b32.xlu0 %v5071_v15, 256 }
 0xb94   : > { %v1296_v16 = vpop.xlane.xlu1 %1295 }
 0xb95   : > { %v1372_v46 = vmul.f32 %v9738_v50, %v1296_v16 }
 0xb97   : > { %1419 = vperm.xlu1 %7552, %v1372_v46  }
 0xb98   : > { %v1302_v25 = vpop.xlane.xlu1 %1301  ;;  %6608 = vxpose.xlu0.b32.start.end [1/1] (short) (narrow) %v9767_v51, 16 }
 0xb99   : > { %v1374_v29 = vmul.f32 %v9764_v47, %v1302_v25 }
 0xb9b   : > { %1422 = vperm.xlu1 %7552, %v1373_v40   ;;  %v9783_v40 = vrot.slane %v9635_v14, %v12255_v27  ;;  %v5005_v14 = vrot.slane %v9665_v0, %v12207_v60 }
 0xb9c   : > { %v1308_v33 = vpop.xlane.xlu1 %1307 }
 0xb9d   : > { %v1376_v46 = vmul.f32 %v9775_v31, %v1308_v33  ;;  %12302 = vst [vmem:[#allocation65_spill] sm:$0xff] %v9783_v40  ;;  %v1379_v25 = vmul.f32 %v9783_v40, %v9602_v1  ;;  %v4871_v33 = vrot.slane %v9455_v9, %v12207_v60 }
 0xb9f   : > { %1425 = vperm.xlu1 %7552, %v1374_v29  }
 0xba0   : > { %v1314_v16 = vpop.xlane.xlu1 %1313 }
 0xba1   : > { %v1378_v28 = vmul.f32 %v9647_v38, %v1314_v16 }
 0xba3   : > { %1428 = vperm.xlu1 %7552, %v1375_v37  }
 0xba4   : > { %v1320_v58 = vpop.xlane.xlu1 %1319 }
 0xba5   : > { %v1380_v53 = vmul.f32 %v9783_v40, %v1320_v58 }
 0xba7   : > { %1431 = vperm.xlu1 %7552, %v1376_v46  }
 0xba8   : > { %v9787_v29 = vpop.xlane.xlu1 %2070 }
 0xba9   : > { %12303 = vst [vmem:[#allocation66_spill] sm:$0xff] %v9787_v29 }
 0xbab   : > { %1437 = vperm.xlu1 %7552, %v1378_v28  }
 0xbac   : > { %v9790_v37 = vpop.xlane.xlu1 %2076 }
 0xbad   : > { %12304 = vst [vmem:[#allocation67_spill] sm:$0xff] %v9790_v37 }
 0xbaf   : > { %1440 = vperm.xlu1 %7552, %v1379_v25  }
 0xbb0   : > { %v2080_v16 = vpop.xlane.xlu1 %2079 }
 0xbb3   : > { %1443 = vperm.xlu1 %7552, %v1380_v53   ;;  %v5060_v53 = vrot.slane %v9665_v0, %v12251_v26 }
 0xbb4   : > { %v9797_v1 = vpop.xlane.xlu1 %2082 }
 0xbb5   : > { %12305 = vst [vmem:[#allocation68_spill] sm:$0xff] %v9797_v1 }
 0xbb7   : > { %4877 = vbcast.lane.b32.xlu1 %v4871_v33, 264 }
 0xbb8   : > { %v2086_v46 = vpop.xlane.xlu1 %2085 }
 0xbbb   : > { %4888 = vbcast.lane.b32.xlu1 %v9695_v30, 264 }
 0xbbc   : > { %v9801_v58 = vpop.xlane.xlu1 %2088 }
 0xbbd   : > { %12306 = vst [vmem:[#allocation69_spill] sm:$0xff] %v9801_v58 }
 0xbbf   : > { %5011 = vbcast.lane.b32.xlu1 %v5005_v14, 264 }
 0xbc0   : > { %v2092_v28 = vpop.xlane.xlu1 %2091 }
 0xbc3   : > { %4873 = vbcast.lane.b32.xlu1 %v4871_v33, 256 }
 0xbc4   : > { %v2098_v25 = vpop.xlane.xlu1 %2097 }
 0xbc7   : > { %4910 = vbcast.lane.b32.xlu1 %v9719_v63, 264  ;;  %v9811_v63 = vpop.permute.xlu0 %1404 }
 0xbc8   : > { %v9803_v30 = vpop.xlane.xlu1 %2103 }
 0xbcb   : > { %4895 = vbcast.lane.b32.xlu1 %v9669_v41, 256  ;;  %v4948_v41 = vrot.slane %v9455_v9, %v12255_v27  ;;  %v510_v9 = vld [vmem:[%s11981_s10] sm:$0xff] }
 0xbcc   : > { %v9807_v33 = vpop.xlane.xlu1 %2109 }
 0xbcf   : > { %5007 = vbcast.lane.b32.xlu1 %v5005_v14, 256 }
 0xbd0   : > { %v9813_v14 = vpop.xlane.xlu1 %2115 }
 0xbd1   : > { %12307 = vst [vmem:[#allocation70_spill] sm:$0xff] %v9813_v14 }
 0xbd3   : > { %5044 = vbcast.lane.b32.xlu1 %v5038_v18, 264  ;;  %v9815_v18 = vpop.permute.xlu0 %1434 }
 0xbd7   : > { %4932 = vbcast.lane.b32.xlu1 %v4926_v10, 264  ;;  %v9817_v10 = vpop.permute.xlu1 %1398 }
 0xbdb   : > { %5055 = vbcast.lane.b32.xlu1 %v5049_v45, 264  ;;  %v9819_v45 = vpop.permute.xlu0 %2119  ;;  %v9821_v0 = vpop.permute.xlu1 %1401 }
 0xbdc   : > { %v9842_v40 = vrot.slane %v9819_v45, %v12209_v49  ;;  %v9849_v31 = vrot.slane %v9819_v45, %v12249_v19  ;;  %v12314_v19 = vld [vmem:[#allocation51_spill] sm:$0xff] }
 0xbdd   : > { %v2839_v49 = vmul.f32 %v12314_v19, %v9178_v39  ;;  %v2843_v58 = vmul.f32 %v12314_v19, %v9484_v7  ;;  %v2845_v39 = vmul.f32 %v12314_v19, %v9563_v61 }
 0xbde   : > { %12310 = vst [vmem:[#allocation73_spill] sm:$0xff] %v9842_v40  ;;  %12311 = vst [vmem:[#allocation74_spill] sm:$0xff] %v9849_v31 }
 0xbdf   : > { %4943 = vbcast.lane.b32.xlu1 %v4937_v8, 264  ;;  %v9829_v8 = vrot.slane %v9819_v45, %v12207_v60  ;;  %v2857_v2 = vsel %vm928_vm2, %v2839_v49, 0.0 }
 0xbe1   : > { %12308 = vst [vmem:[#allocation71_spill] sm:$0xff] %v9829_v8 }
 0xbe3   : > { %5066 = vbcast.lane.b32.xlu1 %v5060_v53, 264 }
 0xbe7   : > { %4954 = vbcast.lane.b32.xlu1 %v4948_v41, 264 }
 0xbeb   : > { %5077 = vbcast.lane.b32.xlu1 %v5071_v15, 264  ;;  %v9831_v15 = vpop.permute.xlu1 %1407 }
 0xbef   : > { %5062 = vbcast.lane.b32.xlu1 %v5060_v53, 256  ;;  %v2162_v53 = vmul.f32 %v9829_v8, %v9607_v20  ;;  %v9844_v38 = vpop.permute.xlu1 %1410 }
 0xbf3   : > { %4950 = vbcast.lane.b32.xlu1 %v4948_v41, 256  ;;  %v9837_v41 = vrot.slane %v9819_v45, %v12208_v57  ;;  %v9851_v20 = vpop.permute.xlu1 %1413 }
 0xbf5   : > { %12309 = vst [vmem:[#allocation72_spill] sm:$0xff] %v9837_v41 }
 0xbf7   : > { %5084 = vbcast.lane.b32.xlu1 %v9750_v5, 256  ;;  %v2164_v5 = vmul.f32 %v9837_v41, %v2080_v16  ;;  %v9858_v16 = vrot.slane %v9819_v45, %v12250_v59  ;;  %v2869_v41 = vsel %vm928_vm2, %v2843_v58, 0.0 }
 0xbf9   : > { %12313 = vst [vmem:[#allocation76_spill] sm:$0xff] %v9858_v16 }
 0xbfb   : > { %1617 = vperm.xlu1 %7552, %v510_v9   ;;  %v2166_v9 = vmul.f32 %v9842_v40, %v2086_v46  ;;  %v9861_v46 = vpop.permute.xlu1 %1416 }
 0xbff   : > { %2197 = vperm.xlu1 %7552, %v2162_v53   ;;  %v2168_v53 = vmul.f32 %v9849_v31, %v2092_v28 }
 0xc03   : > { %2203 = vperm.xlu1 %7552, %v2164_v5   ;;  %v2170_v5 = vmul.f32 %v9858_v16, %v2098_v25  ;;  %v2841_v16 = vmul.f32 %v12314_v19, %v9186_v52  ;;  %v2875_v52 = vsel %vm928_vm2, %v2845_v39, 0.0 }
 0xc05   : > { %v2863_v31 = vsel %vm928_vm2, %v2841_v16, 0.0 }
 0xc07   : > { %2209 = vperm.xlu1 %7552, %v2166_v9   ;;  %v4900_v9 = vpop.permute.xlu0 %4899 }
 0xc0a   : > { %v9854_v47 = vpop.f32.mrf.mxu1 }
 0xc0b   : > { %12312 = vst [vmem:[#allocation75_spill] sm:$0xff] %v9854_v47  ;;  %2215 = vperm.xlu1 %7552, %v2168_v53   ;;  %v5023_v4 = vpop.permute.xlu0 %5022 }
 0xc0c   : > { %v7482_v50 = vpop.f32.mrf.mxu1 }
 0xc0f   : > { %2221 = vperm.xlu1 %7552, %v2170_v5   ;;  %v4885_v24 = vpop.permute.xlu0 %4884 }
 0xc12   : > { %v9863_v35 = vpop.permute.xlu1 %1419 }
 0xc13   : > { %v5034_v53 = vpop.permute.xlu0 %5033 }
 0xc16   : > { %v9865_v42 = vpop.permute.xlu1 %1422 }
 0xc17   : > { %v4922_v59 = vpop.permute.xlu0 %4921 }
 0xc1a   : > { %v9867_v28 = vpop.permute.xlu1 %1425 }
 0xc1b   : > { %v5019_v57 = vpop.permute.xlu0 %5018 }
 0xc1e   : > { %v9869_v47 = vpop.permute.xlu1 %1428 }
 0xc1f   : > { %v4907_v40 = vpop.permute.xlu0 %4906 }
 0xc22   : > { %v9871_v51 = vpop.permute.xlu1 %1431 }
 0xc23   : > { %v5030_v49 = vpop.permute.xlu0 %5029 }
 0xc26   : > { %v9873_v50 = vpop.permute.xlu1 %1437 }
 0xc27   : > { %v4918_v8 = vpop.permute.xlu0 %4917 }
 0xc2a   : > { %v9875_v25 = vpop.permute.xlu1 %1440 }
 0xc2b   : > { %v5041_v39 = vpop.permute.xlu0 %5040 }
 0xc2e   : > { %v9877_v5 = vpop.permute.xlu1 %1443 }
 0xc32   : > { %v4878_v60 = vpop.permute.xlu1 %4877 }
 0xc33   : > { %2858 = vadd.xlane.f32.xlu1 %v2857_v2  ;;  %v2847_v2 = vmul.f32 %v12314_v19, %v9572_v54 }
 0xc35   : > { %v2881_v7 = vsel %vm928_vm2, %v2847_v2, 0.0 }
 0xc36   : > { %v4889_v36 = vpop.permute.xlu1 %4888 }
 0xc37   : > { %2864 = vadd.xlane.f32.xlu1 %v2863_v31  ;;  %v2849_v31 = vmul.f32 %v12314_v19, %v9582_v44 }
 0xc39   : > { %v2887_v61 = vsel %vm928_vm2, %v2849_v31, 0.0  ;;  %v4959_v31 = vmul.f32 %v9235_v48, %v4889_v36  ;;  %v4965_v48 = vmul.f32 %v9289_v11, %v4922_v59  ;;  %v5092_v36 = vmul.f32 %v9302_v56, %v5019_v57  ;;  %v12316_v59 = vld [vmem:[#allocation9_spill] sm:$0xff] }
 0xc3a   : > { %v5012_v1 = vpop.permute.xlu1 %5011  ;;  %v1455_v57 = vrot.slane %v9821_v0, %v12316_v59 }
 0xc3b   : > { %2870 = vadd.xlane.f32.xlu1 %v2869_v41  ;;  %v2851_v41 = vmul.f32 %v12314_v19, %v9592_v55  ;;  %v4957_v55 = vmul.f32 %v9247_v17, %v4878_v60  ;;  %v5268_v60 = vstv %s9902_s16  ;;  %v4962_v17 = vmul.f32 %v9310_v62, %v4907_v40  ;;  %v7692_v40 = vld [vmem:[%s11978_s7 + $0x8] sm:$0xff]  ;;  %s10748_s16 = sld [smem:[#allocation4 + $0x182]] }
 0xc3d   : > { %v2893_v54 = vsel %vm928_vm2, %v2851_v41, 0.0  ;;  %v5093_v41 = vmul.f32 %v9241_v12, %v5023_v4 }
 0xc3e   : > { %v4874_v37 = vpop.permute.xlu1 %4873 }
 0xc3f   : > { %2876 = vadd.xlane.f32.xlu1 %v2875_v52  ;;  %v2853_v52 = vmul.f32 %v12314_v19, %v9600_v22  ;;  %v4958_v19 = vmul.f32 %v9265_v34, %v4885_v24  ;;  %v5095_v22 = vmul.f32 %v9296_v32, %v5034_v53  ;;  %v4987_v34 = vsel %vm928_vm2, %v4957_v55, 0.0 }
 0xc40   : > { %v5122_v4 = vsel %vm928_vm2, %v5093_v41, 0.0  ;;  %v4977_v55 = vsel %vm928_vm2, %v4962_v17, 0.0 }
 0xc41   : > { %v2899_v2 = vsel %vm928_vm2, %v2853_v52, 0.0  ;;  %v12315_v52 = vld [vmem:[#allocation8_spill] sm:$0xff]  ;;  %v5124_v62 = vsel %vm928_vm2, %v5095_v22, 0.0  ;;  %v12318_v22 = vld [vmem:[#allocation53_spill] sm:$0xff] }
 0xc42   : > { %v4911_v16 = vpop.permute.xlu1 %4910  ;;  %v1461_v27 = vrot.slane %v9811_v63, %v12315_v52  ;;  %v1506_v12 = vrot.slane %v9815_v18, %v12315_v52  ;;  %v4973_v63 = vsel %vm928_vm2, %v4958_v19, 0.0  ;;  %v1450_v0 = vrot.slane %v9817_v10, %v12315_v52 }
 0xc43   : > { %2882 = vadd.xlane.f32.xlu1 %v2881_v7  ;;  %v9905_v7 = vpop.permute.xlu0 %4928  ;;  %v4963_v32 = vmul.f32 %v9271_v43, %v4911_v16  ;;  %v12317_v43 = vld [vmem:[#allocation32_spill] sm:$0xff]  ;;  %v4994_v16 = vsel %vm928_vm2, %v4965_v48, 0.0  ;;  %v1474_v10 = vrot.slane %v9851_v20, %v12316_v59  ;;  %v12319_v20 = vld [vmem:[#allocation55_spill] sm:$0xff]  ;;  %v5264_v18 = vstv %s10016_s21  ;;  %s11151_s21 = sld [smem:[#allocation2 + $0x101]] }
 0xc44   : > { %v4956_v53 = vmul.f32 %v12317_v43, %v4874_v37  ;;  %v7693_v37 = vld [vmem:[%s11977_s6 + $0x20] sm:$0xff]  ;;  %v1457_v19 = vsel %vm1456_vm4, %v1455_v57, %v1450_v0 }
 0xc45   : > { %v4992_v41 = vsel %vm928_vm2, %v4963_v32, 0.0 }
 0xc46   : > { %v4896_v58 = vpop.permute.xlu1 %4895 }
 0xc47   : > { %2888 = vadd.xlane.f32.xlu1 %v2887_v61  ;;  %v4961_v61 = vmul.f32 %v9253_v3, %v4900_v9  ;;  %v9922_v3 = vpop.permute.xlu0 %5051  ;;  %v5091_v9 = vmul.f32 %v7692_v40, %v5012_v1  ;;  %v4960_v1 = vmul.f32 %v7693_v37, %v4896_v58  ;;  %v12323_v37 = vld [vmem:[#allocation58_spill] sm:$0xff] }
 0xc49   : > { %v4990_v24 = vsel %vm928_vm2, %v4961_v61, 0.0  ;;  %v5094_v61 = vmul.f32 %v9321_v21, %v5030_v49  ;;  %v5121_v17 = vsel %vm928_vm2, %v5091_v9, 0.0  ;;  %v4972_v21 = vsel %vm928_vm2, %v4956_v53, 0.0  ;;  %v7694_v49 = vld [vmem:[%s11978_s7] sm:$0xff]  ;;  %v12320_v9 = vld [vmem:[#allocation54_spill] sm:$0xff]  ;;  %v12321_v53 = vld [vmem:[#allocation57_spill] sm:$0xff] }
 0xc4a   : > { %v5008_v29 = vpop.permute.xlu1 %5007  ;;  %v4975_v40 = vsel %vm928_vm2, %v4960_v1, 0.0 }
 0xc4b   : > { %2894 = vadd.xlane.f32.xlu1 %v2893_v54  ;;  %v4988_v54 = vsel %vm928_vm2, %v4959_v31, 0.0  ;;  %v1465_v31 = vrot.slane %v9831_v15, %v12316_v59 }
 0xc4c   : > { %v4989_v11 = vadd.f32 %v4988_v54, %v4987_v34  ;;  %v4964_v54 = vmul.f32 %v12318_v22, %v4918_v8  ;;  %v5090_v34 = vmul.f32 %v7694_v49, %v5008_v29  ;;  %v1470_v8 = vrot.slane %v9844_v38, %v12315_v52 }
 0xc4d   : > { %v1466_v32 = vsel %vm1456_vm4, %v1465_v31, %v1461_v27  ;;  %v12322_v27 = vld [vmem:[#allocation56_spill] sm:$0xff]  ;;  %v4974_v38 = vadd.f32 %v4973_v63, %v4972_v21 }
 0xc4e   : > { %v5045_v44 = vpop.permute.xlu1 %5044  ;;  %v4991_v48 = vadd.f32 %v4990_v24, %v4989_v11  ;;  %v5096_v24 = vmul.f32 %v12319_v20, %v5041_v39  ;;  %v5109_v11 = vsel %vm928_vm2, %v5094_v61, 0.0  ;;  %v4966_v29 = vmul.f32 %v12322_v27, %v9905_v7 }
 0xc4f   : > { %2900 = vadd.xlane.f32.xlu1 %v2899_v2  ;;  %v5107_v2 = vsel %vm928_vm2, %v5092_v36, 0.0  ;;  %v4940_v36 = vpop.permute.xlu0 %4939  ;;  %v5097_v43 = vmul.f32 %v12320_v9, %v5045_v44  ;;  %v1522_v39 = vsel %vm1521_vm5, %v1466_v32, %v1457_v19  ;;  %v5106_v61 = vsel %vm928_vm2, %v5090_v34, 0.0  ;;  %v7696_v32 = vld [vmem:[%s11977_s6 + $0x60] sm:$0xff] }
 0xc50   : > { %v4993_v57 = vadd.f32 %v4992_v41, %v4991_v48  ;;  %v4979_v1 = vsel %vm928_vm2, %v4964_v54, 0.0  ;;  %v5111_v22 = vsel %vm928_vm2, %v5096_v24, 0.0  ;;  %v5108_v21 = vadd.f32 %v5107_v2, %v5106_v61  ;;  %v12325_v24 = vld [vmem:[#allocation60_spill] sm:$0xff] }
 0xc51   : > { %v5126_v63 = vsel %vm928_vm2, %v5097_v43, 0.0  ;;  %v1483_v43 = vrot.slane %v9863_v35, %v12316_v59  ;;  %v5254_v35 = vstv %s9975_s26  ;;  %s11144_s26 = sld [smem:[#allocation4 + $0x100]] }
 0xc52   : > { %v4933_v14 = vpop.permute.xlu1 %4932  ;;  %v4995_v48 = vadd.f32 %v4994_v16, %v4993_v57  ;;  %v7695_v16 = vld [vmem:[%s11978_s7 + $0x40] sm:$0xff]  ;;  %v5110_v27 = vadd.f32 %v5109_v11, %v5108_v21  ;;  %v1492_v11 = vrot.slane %v9867_v28, %v12316_v59  ;;  %v1497_v21 = vrot.slane %v9869_v47, %v12315_v52 }
 0xc53   : > { %v4967_v58 = vmul.f32 %v9355_v13, %v4933_v14  ;;  %v1475_v13 = vsel %vm1456_vm4, %v1474_v10, %v1470_v8  ;;  %v5123_v14 = vadd.f32 %v5122_v4, %v5121_v17  ;;  %v4976_v10 = vadd.f32 %v4975_v40, %v4974_v38  ;;  %v5089_v4 = vpop.permute.xlu0 %5088 }
 0xc54   : > { %v9980_v7 = vsel %vm1523_vm6, %v1475_v13, %v1522_v39  ;;  %v4968_v8 = vmul.f32 %v7696_v32, %v4940_v36  ;;  %v5105_v57 = vmul.f32 %v12325_v24, %v5089_v4  ;;  %v1479_v13 = vrot.slane %v9861_v46, %v12315_v52  ;;  %v10013_v39 = vld [vmem:[%s11978_s7 + $0x68] sm:$0xff] }
 0xc55   : > { %v4996_v41 = vsel %vm928_vm2, %v4967_v58, 0.0  ;;  %v5125_v49 = vadd.f32 %v5124_v62, %v5123_v14  ;;  %v5098_v58 = vmul.f32 %v7695_v16, %v9922_v3  ;;  %v7697_v62 = vld [vmem:[%s11977_s6 + $0x78] sm:$0xff]  ;;  %v4978_v40 = vadd.f32 %v4977_v55, %v4976_v10 }
 0xc56   : > { %v5056_v56 = vpop.permute.xlu1 %5055  ;;  %v4997_v54 = vadd.f32 %v4996_v41, %v4995_v48  ;;  %v5134_v46 = vsel %vm928_vm2, %v5105_v57, 0.0  ;;  %v1484_v10 = vsel %vm1456_vm4, %v1483_v43, %v1479_v13  ;;  %v1488_v48 = vrot.slane %v9865_v42, %v12315_v52  ;;  %v7487_v57 = vpop.f32.mrf.mxu1 }
 0xc57   : > { %v5099_v44 = vmul.f32 %v12323_v37, %v5056_v56  ;;  %v4981_v56 = vsel %vm928_vm2, %v4966_v29, 0.0  ;;  %v5127_v3 = vadd.f32 %v5126_v63, %v5125_v49  ;;  %v5113_v38 = vsel %vm928_vm2, %v5098_v58, 0.0 }
 0xc58   : > { %v4980_v41 = vadd.f32 %v4979_v1, %v4978_v40  ;;  %v1501_v4 = vrot.slane %v9871_v51, %v12316_v59  ;;  %v5112_v1 = vadd.f32 %v5111_v22, %v5110_v27  ;;  %v1519_v42 = vrot.slane %v9877_v5, %v12316_v59  ;;  %v7699_v51 = vld [vmem:[%s11978_s7 + $0x50] sm:$0xff] }
 0xc59   : > { %v5128_v20 = vsel %vm928_vm2, %v5099_v44, 0.0  ;;  %v5074_v44 = vpop.permute.xlu0 %5073  ;;  %v1526_v5 = vsel %vm1525_vm7, %v1484_v10, %v9980_v7  ;;  %v1515_v32 = vrot.slane %v9875_v25, %v12315_v52  ;;  %v7701_v25 = vld [vmem:[%s11977_s6 + $0x70] sm:$0xff]  ;;  %v5270_v27 = vmul.f32 %v7487_v57, %v5268_v60 }
 0xc5a   : > { %v4944_v15 = vpop.permute.xlu1 %4943  ;;  %v5129_v29 = vadd.f32 %v5128_v20, %v5127_v3  ;;  %v4982_v16 = vadd.f32 %v4981_v56, %v4980_v41  ;;  %v1502_v58 = vsel %vm1456_vm4, %v1501_v4, %v1497_v21 }
 0xc5b   : > { %v4969_v0 = vmul.f32 %v12321_v53, %v4944_v15  ;;  %v12324_v15 = vld [vmem:[#allocation59_spill] sm:$0xff]  ;;  %v5250_v53 = vstv %s9966_s24  ;;  %v1520_v40 = vsel %vm1456_vm4, %v1519_v42, %v1515_v32  ;;  %v10098_v42 = vld [vmem:[%s11979_s8] sm:$0xff] }
 0xc5d   : > { %v4998_v19 = vsel %vm928_vm2, %v4969_v0, 0.0 }
 0xc5e   : > { %v5067_v31 = vpop.permute.xlu1 %5066  ;;  %v4999_v9 = vadd.f32 %v4998_v19, %v4997_v54  ;;  %v1510_v19 = vrot.slane %v9873_v50, %v12316_v59  ;;  %v5258_v54 = vstv %s9997_s12  ;;  %v7700_v50 = vld [vmem:[%s11978_s7 + $0x60] sm:$0xff] }
 0xc5f   : > { %v5101_v17 = vmul.f32 %v12324_v15, %v5067_v31  ;;  %v4983_v31 = vsel %vm928_vm2, %v4968_v8, 0.0  ;;  %v5102_v22 = vmul.f32 %v7700_v50, %v5074_v44  ;;  %v5240_v50 = vpop.f32.mrf.mxu1 }
 0xc60   : > { %v1511_v20 = vsel %vm1456_vm4, %v1510_v19, %v1506_v12  ;;  %v4984_v43 = vadd.f32 %v4983_v31, %v4982_v16  ;;  %v7702_v31 = vld [vmem:[%s11978_s7 + $0x70] sm:$0xff] }
 0xc61   : > { %v5130_v36 = vsel %vm928_vm2, %v5101_v17, 0.0 }
 0xc62   : > { %v4955_v34 = vpop.permute.xlu1 %4954  ;;  %v5131_v37 = vadd.f32 %v5130_v36, %v5129_v29 }
 0xc63   : > { %v4971_v2 = vmul.f32 %v7697_v62, %v4955_v34  ;;  %v1493_v34 = vsel %vm1456_vm4, %v1492_v11, %v1488_v48  ;;  %v5274_v11 = vstv %s10039_s23  ;;  %v12326_v48 = vld [vmem:[#allocation22_spill] sm:$0xff]  ;;  %s10700_s23 = sld [smem:[#allocation2 + $0x182]] }
 0xc64   : > { %v1528_v7 = vsel %vm1527_vm8, %v1493_v34, %v1526_v5 }
 0xc65   : > { %v5000_v0 = vsel %vm928_vm2, %v4971_v2, 0.0  ;;  %v5114_v2 = vadd.f32 %v5113_v38, %v5112_v1  ;;  %v1530_v12 = vsel %vm1529_vm9, %v1502_v58, %v1528_v7  ;;  %v10141_v7 = vld [vmem:[%s11979_s8 + $0x40] sm:$0xff] }
 0xc66   : > { %v5001_v14 = vadd.f32 %v5000_v0, %v4999_v9  ;;  %v5078_v55 = vpop.permute.xlu1 %5077  ;;  %v1532_v0 = vsel %vm1531_vm10, %v1511_v20, %v1530_v12  ;;  %v10152_v12 = vrot.slane %v9819_v45, %v12251_v26 }
 0xc67   : > { %v5103_v61 = vmul.f32 %v10013_v39, %v5078_v55  ;;  %v1534_v55 = vsel %vm1533_vm11, %v1520_v40, %v1532_v0 }
 0xc68   : > { %v5252_v15 = vmul.f32 %v5250_v53, %v5001_v14  ;;  %v1612_v4 = vadd.f32 %v12326_v48, %v1534_v55  ;;  %12329 = vst [vmem:[#allocation32_spill] sm:$0xff] %v10152_v12  ;;  %v2172_v0 = vmul.f32 %v10152_v12, %v9803_v30 }
 0xc69   : > { %v5132_v63 = vsel %vm928_vm2, %v5103_v61, 0.0  ;;  %v5117_v61 = vsel %vm928_vm2, %v5102_v22, 0.0 }
 0xc6a   : > { %v5133_v28 = vadd.f32 %v5132_v63, %v5131_v37  ;;  %v5063_v17 = vpop.permute.xlu1 %5062  ;;  %v5256_v62 = vadd.f32 %v5254_v35, %v5252_v15 }
 0xc6b   : > { %v5100_v49 = vmul.f32 %v7699_v51, %v5063_v17  ;;  %v12328_v51 = vld [vmem:[#allocation52_spill] sm:$0xff] }
 0xc6c   : > { %v5135_v47 = vadd.f32 %v5134_v46, %v5133_v28  ;;  %v2846_v40 = vmul.f32 %v10141_v7, %v12328_v51 }
 0xc6d   : > { %v5115_v8 = vsel %vm928_vm2, %v5100_v49, 0.0  ;;  %v2838_v49 = vmul.f32 %v10098_v42, %v12328_v51 }
 0xc6e   : > { %v4951_v56 = vpop.permute.xlu1 %4950  ;;  %v5260_v24 = vmul.f32 %v5258_v54, %v5135_v47  ;;  %v5116_v9 = vadd.f32 %v5115_v8, %v5114_v2  ;;  %v10111_v47 = vld [vmem:[%s11979_s8 + $0x10] sm:$0xff] }
 0xc6f   : > { %v4970_v3 = vmul.f32 %v7701_v25, %v4951_v56  ;;  %v2840_v16 = vmul.f32 %v10111_v47, %v12328_v51  ;;  %v10133_v56 = vld [vmem:[%s11979_s8 + $0x30] sm:$0xff]  ;;  %v2878_v25 = vsel %vm928_vm2, %v2846_v40, 0.0  ;;  %v10212_v40 = vld [vmem:[%s11979_s8 + $0x18] sm:$0xff] }
 0xc70   : > { %v5262_v36 = vadd.f32 %v5260_v24, %v5256_v62  ;;  %v5118_v37 = vadd.f32 %v5117_v61, %v5116_v9  ;;  %v2844_v24 = vmul.f32 %v10133_v56, %v12328_v51 }
 0xc71   : > { %v4985_v13 = vsel %vm928_vm2, %v4970_v3, 0.0  ;;  %v2860_v32 = vsel %vm928_vm2, %v2840_v16, 0.0  ;;  %v7708_v3 = vld [vmem:[%s11979_s8 + $0x50] sm:$0xff] }
 0xc72   : > { %v4986_v29 = vadd.f32 %v4985_v13, %v4984_v43  ;;  %v5085_v14 = vpop.permute.xlu1 %5084  ;;  %v5266_v38 = vadd.f32 %v5264_v18, %v5262_v36  ;;  %v2872_v57 = vsel %vm928_vm2, %v2844_v24, 0.0  ;;  %v7709_v43 = vld [vmem:[%s11979_s8 + $0x60] sm:$0xff]  ;;  %v10163_v13 = vrot.slane %v9819_v45, %v12253_v6  ;;  %v508_v16 = vld [vmem:[%s11980_s9 + $0x10] sm:$0xff] }
 0xc73   : > { %v5104_v46 = vmul.f32 %v7702_v31, %v5085_v14  ;;  %v2850_v36 = vmul.f32 %v7709_v43, %v12328_v51  ;;  %v12333_v31 = vld [vmem:[#allocation70_spill] sm:$0xff] }
 0xc74   : > { %v5251_v41 = vmul.f32 %v5250_v53, %v4986_v29  ;;  %v5272_v44 = vadd.f32 %v5270_v27, %v5266_v38  ;;  %v6624_v53 = vpop.trf.xlu0  ;;  %12330 = vst [vmem:[#allocation53_spill] sm:$0xff] %v10163_v13  ;;  %v7710_v29 = vld [vmem:[%s11979_s8 + $0x70] sm:$0xff]  ;;  %v2174_v55 = vmul.f32 %v10163_v13, %v9807_v33  ;;  %v12331_v38 = vld [vmem:[#allocation21_spill] sm:$0xff]  ;;  %v12338_v33 = vld [vmem:[#allocation68_spill] sm:$0xff] }
 0xc75   : > { %v5119_v10 = vsel %vm928_vm2, %v5104_v46, 0.0  ;;  %7509 = vmatprep.mubr.msk.f32.mxu0 %vm1125_vm1, %v6624_v53  ;;  %v2890_v27 = vsel %vm928_vm2, %v2850_v36, 0.0  ;;  %v2852_v14 = vmul.f32 %v7710_v29, %v12328_v51  ;;  %v10174_v30 = vrot.slane %v9819_v45, %v12331_v38  ;;  %v12341_v53 = vld [vmem:[#allocation74_spill] sm:$0xff]  ;;  %v7713_v36 = vld [vmem:[%s11979_s8 + $0x38] sm:$0xff] }
 0xc76   : > { %v5120_v63 = vadd.f32 %v5119_v10, %v5118_v37  ;;  %v10085_v19 = vpop.permute.xlu1 %1617  ;;  %v10087_v15 = vadd.f32 %v5274_v11, %v5272_v44  ;;  %v5255_v1 = vadd.f32 %v5254_v35, %v5251_v41  ;;  %v5269_v35 = vmul.f32 %v5268_v60, %v5240_v50  ;;  %v10123_v60 = vld [vmem:[%s11979_s8 + $0x20] sm:$0xff]  ;;  %v12335_v41 = vld [vmem:[#allocation71_spill] sm:$0xff]  ;;  %v12345_v50 = vld [vmem:[#allocation38_spill] sm:$0xff] }
 0xc77   : > { %12327 = vst [vmem:[#allocation51_spill] sm:$0xff] %v10085_v19  ;;  %v1620_v28 = vadd.f32 %v10085_v19, %v1612_v4  ;;  %v2842_v20 = vmul.f32 %v10123_v60, %v12328_v51  ;;  %12332 = vst [vmem:[#allocation55_spill] sm:$0xff] %v10174_v30  ;;  %v2896_v61 = vsel %vm928_vm2, %v2852_v14, 0.0  ;;  %v2176_v46 = vmul.f32 %v10174_v30, %v12333_v31  ;;  %v12336_v44 = vld [vmem:[#allocation67_spill] sm:$0xff]  ;;  %v12337_v10 = vld [vmem:[#allocation72_spill] sm:$0xff] }
 0xc78   : > { %v5259_v17 = vmul.f32 %v5258_v54, %v5120_v63  ;;  %v5280_v21 = vsel %vm928_vm2, %v10087_v15, -inf  ;;  %v6625_v34 = vpop.trf.xlu0  ;;  %v2854_v54 = vsel %vm928_vm2, %v2838_v49, 0.0  ;;  %v2163_v48 = vmul.f32 %v12337_v10, %v12336_v44  ;;  %v12339_v4 = vld [vmem:[#allocation73_spill] sm:$0xff]  ;;  %v12400_v10 = vld [vmem:[#allocation40_spill] sm:$0xff] }
 0xc79   : > { %1621 = vst.msk [vmem:[%s10083_s20] sm:$0xff] %vm928_vm2, %v1620_v28  ;;  %5281 = vmax.xlane.f32.xlu0 %v5280_v21  ;;  %7510 = vmatmul.mubr.msk.f32.vlgmr.msra.gmra.mxu0 %vm1125_vm1, %v6625_v34  ;;  %v2866_v2 = vsel %vm928_vm2, %v2842_v20, 0.0  ;;  %v2165_v45 = vmul.f32 %v12339_v4, %v12338_v33  ;;  %v12340_v63 = vld [vmem:[#allocation69_spill] sm:$0xff]  ;;  %v12346_v34 = vld [vmem:[#allocation39_spill] sm:$0xff] }
 0xc7a   : > { %v5261_v22 = vadd.f32 %v5259_v17, %v5255_v1  ;;  %7516 = vmatprep.mubr.msk.f32.mxu0 %vm7828_vm3, %v12204_v23  ;;  %v2167_v28 = vmul.f32 %v12341_v53, %v12340_v63  ;;  %v12342_v1 = vld [vmem:[#allocation27_spill] sm:$0xff]  ;;  %v12343_v17 = vld [vmem:[#allocation76_spill] sm:$0xff] }
 0xc7b   : > { %v2169_v21 = vmul.f32 %v12343_v17, %v12342_v1 }
 0xc7c   : > { %v5265_v5 = vadd.f32 %v5264_v18, %v5261_v22  ;;  %v2848_v18 = vmul.f32 %v7708_v3, %v12328_v51  ;;  %v12344_v51 = vld [vmem:[#allocation33_spill] sm:$0xff]  ;;  %v2173_v22 = vmul.f32 %v10163_v13, %v12345_v50 }
 0xc7d   : > { %2855 = vadd.xlane.f32.xlu0 %v2854_v54  ;;  %v2171_v49 = vmul.f32 %v10152_v12, %v12344_v51  ;;  %v511_v54 = vld [vmem:[%s11981_s10 + $0x8] sm:$0xff] }
 0xc7e   : > { %v5271_v58 = vadd.f32 %v5269_v35, %v5265_v5  ;;  %v2884_v9 = vsel %vm928_vm2, %v2848_v18, 0.0  ;;  %v2175_v35 = vmul.f32 %v10174_v30, %v12346_v34  ;;  %v10201_v5 = vpop.permute.xlu1 %2197  ;;  %v7712_v18 = vld [vmem:[%s11979_s8 + $0x28] sm:$0xff] }
 0xc80   : > { %v10118_v8 = vadd.f32 %v5274_v11, %v5271_v58  ;;  %v12334_v11 = vld [vmem:[#allocation66_spill] sm:$0xff]  ;;  %v12347_v58 = vld [vmem:[#allocation11_spill] sm:$0xff] }
 0xc81   : > { %2861 = vadd.xlane.f32.xlu0 %v2860_v32  ;;  %v2161_v37 = vmul.f32 %v12335_v41, %v12334_v11  ;;  %v3623_v32 = vmul.f32 %v10098_v42, %v12347_v58 }
 0xc82   : > { %v5277_v62 = vsel %vm928_vm2, %v10118_v8, -inf  ;;  %v2204_v20 = vpop.permute.xlu1 %2203 }
 0xc83   : > { %5278 = vmax.xlane.f32.xlu1 %v5277_v62  ;;  %v3639_v62 = vsel %vm928_vm2, %v3623_v32, 0.0 }
 0xc85   : > { %2867 = vadd.xlane.f32.xlu0 %v2866_v2  ;;  %v3625_v2 = vmul.f32 %v10111_v47, %v12347_v58 }
 0xc86   : > { %v2210_v24 = vpop.permute.xlu1 %2209 }
 0xc89   : > { %2873 = vadd.xlane.f32.xlu0 %v2872_v57  ;;  %v3645_v57 = vsel %vm928_vm2, %v3625_v2, 0.0 }
 0xc8d   : > { %2879 = vadd.xlane.f32.xlu0 %v2878_v25  ;;  %v12348_v25 = vld [vmem:[#allocation10_spill] sm:$0xff] }
 0xc8e   : > { %v3626_v3 = vmul.f32 %v10212_v40, %v12348_v25  ;;  %v3628_v47 = vmul.f32 %v7712_v18, %v12348_v25 }
 0xc90   : > { %v3648_v42 = vsel %vm928_vm2, %v3626_v3, 0.0  ;;  %v3654_v43 = vsel %vm928_vm2, %v3628_v47, 0.0 }
 0xc91   : > { %2885 = vadd.xlane.f32.xlu0 %v2884_v9  ;;  %v2216_v9 = vpop.permute.xlu1 %2215 }
 0xc94   : > { %2227 = vperm.xlu1 %7552, %v2172_v0   ;;  %v3630_v0 = vmul.f32 %v7713_v36, %v12348_v25 }
 0xc95   : > { %2891 = vadd.xlane.f32.xlu0 %v2890_v27  ;;  %v2222_v27 = vpop.permute.xlu1 %2221 }
 0xc96   : > { %v3660_v29 = vsel %vm928_vm2, %v3630_v0, 0.0  ;;  %v2248_v0 = vrot.slane %v10201_v5, %v12316_v59  ;;  %v2284_v19 = vrot.slane %v2222_v27, %v12316_v59 }
 0xc98   : > { %2233 = vperm.xlu1 %7552, %v2174_v55  }
 0xc99   : > { %2897 = vadd.xlane.f32.xlu0 %v2896_v61 }
 0xc9c   : > { %2239 = vperm.xlu1 %7552, %v2176_v46  }
 0xcaf   : > { %2194 = vperm.xlu0 %7551, %v2161_v37  }
 0xcb3   : > { %2200 = vperm.xlu0 %7551, %v2163_v48  }
 0xcb7   : > { %2206 = vperm.xlu0 %7551, %v2165_v45  }
 0xcbb   : > { %2212 = vperm.xlu0 %7551, %v2167_v28  }
 0xcbc   : > { %v10229_v55 = vpop.xlane.xlu1 %2858 }
 0xcbf   : > { %2218 = vperm.xlu0 %7551, %v2169_v21  }
 0xcc0   : > { %v10233_v31 = vpop.xlane.xlu1 %2864 }
 0xcc3   : > { %2224 = vperm.xlu0 %7551, %v2171_v49  }
 0xcc4   : > { %v10239_v37 = vpop.xlane.xlu1 %2870 }
 0xcc7   : > { %2230 = vperm.xlu0 %7551, %v2173_v22  }
 0xcc8   : > { %v10243_v48 = vpop.xlane.xlu1 %2876 }
 0xccb   : > { %2236 = vperm.xlu0 %7551, %v2175_v35  }
 0xccc   : > { %v10249_v63 = vpop.xlane.xlu1 %2882 }
 0xccf   : > { %2402 = vperm.xlu0 %7551, %v511_v54  }
 0xcd0   : > { %v10253_v1 = vpop.xlane.xlu1 %2888 }
 0xcd3   : > { %2904 = vperm.xlu0 %7551, %v508_v16  }
 0xcd4   : > { %v10257_v51 = vpop.xlane.xlu1 %2894 }
 0xcd8   : > { %v10259_v50 = vpop.xlane.xlu1 %2900 }
 0xcf2   : > { %3640 = vadd.xlane.f32.xlu0 %v3639_v62 }
 0xcf6   : > { %3646 = vadd.xlane.f32.xlu0 %v3645_v57 }
 0xcfa   : > { %3649 = vadd.xlane.f32.xlu0 %v3648_v42  ;;  %v2257_v42 = vrot.slane %v2204_v20, %v12316_v59 }
 0xcfe   : > { %3655 = vadd.xlane.f32.xlu0 %v3654_v43  ;;  %v2266_v43 = vrot.slane %v2210_v24, %v12316_v59 }
 0xd02   : > { %3661 = vadd.xlane.f32.xlu0 %v3660_v29  ;;  %v10227_v14 = vpop.xlane.xlu0 %5281  ;;  %v2275_v29 = vrot.slane %v2216_v9, %v12316_v59 }
 0xd06   : > { %v10231_v61 = vpop.xlane.xlu0 %2855 }
 0xd0a   : > { %v10235_v46 = vpop.xlane.xlu0 %2861 }
 0xd0c   : > { %v10261_v34 = vpop.xlane.xlu1 %5278 }
 0xd0e   : > { %v10237_v11 = vpop.xlane.xlu0 %2867 }
 0xd10   : > { %v2228_v16 = vpop.permute.xlu1 %2227 }
 0xd12   : > { %v10241_v44 = vpop.xlane.xlu0 %2873 }
 0xd14   : > { %v2234_v2 = vpop.permute.xlu1 %2233 }
 0xd15   : > { %v2302_v5 = vrot.slane %v2234_v2, %v12316_v59 }
 0xd16   : > { %v10245_v33 = vpop.xlane.xlu0 %2879 }
 0xd17   : > { %12349 = vst [vmem:[#allocation54_spill] sm:$0xff] %v10245_v33 }
 0xd18   : > { %v2240_v9 = vpop.permute.xlu1 %2239 }
 0xd1a   : > { %v10247_v45 = vpop.xlane.xlu0 %2885 }
 0xd1b   : > { %12350 = vst [vmem:[#allocation57_spill] sm:$0xff] %v10247_v45 }
 0xd1e   : > { %v10251_v28 = vpop.xlane.xlu0 %2891 }
 0xd1f   : > { %12351 = vst [vmem:[#allocation56_spill] sm:$0xff] %v10251_v28 }
 0xd22   : > { %v10255_v21 = vpop.xlane.xlu0 %2897 }
 0xd23   : > { %12352 = vst [vmem:[#allocation58_spill] sm:$0xff] %v10255_v21 }
 0xd2a   : > { %v2195_v49 = vpop.permute.xlu0 %2194 }
 0xd2b   : > { %v2244_v18 = vrot.slane %v2195_v49, %v12315_v52 }
 0xd2d   : > { %v2249_v24 = vsel %vm1456_vm4, %v2248_v0, %v2244_v18 }
 0xd2e   : > { %v2201_v22 = vpop.permute.xlu0 %2200 }
 0xd2f   : > { %v2253_v62 = vrot.slane %v2201_v22, %v12315_v52 }
 0xd31   : > { %v2258_v22 = vsel %vm1456_vm4, %v2257_v42, %v2253_v62 }
 0xd32   : > { %v2207_v35 = vpop.permute.xlu0 %2206  ;;  %v2313_v62 = vsel %vm1521_vm5, %v2258_v22, %v2249_v24 }
 0xd33   : > { %v2262_v57 = vrot.slane %v2207_v35, %v12315_v52 }
 0xd35   : > { %v2267_v20 = vsel %vm1456_vm4, %v2266_v43, %v2262_v57 }
 0xd36   : > { %v2213_v54 = vpop.permute.xlu0 %2212  ;;  %v2314_v27 = vsel %vm1523_vm6, %v2267_v20, %v2313_v62 }
 0xd37   : > { %v2271_v47 = vrot.slane %v2213_v54, %v12315_v52  ;;  %v2293_v54 = vrot.slane %v2228_v16, %v12316_v59 }
 0xd3a   : > { %v2219_v32 = vpop.permute.xlu0 %2218 }
 0xd3b   : > { %v2280_v36 = vrot.slane %v2219_v32, %v12315_v52  ;;  %v2276_v32 = vsel %vm1456_vm4, %v2275_v29, %v2271_v47  ;;  %v2311_v47 = vrot.slane %v2240_v9, %v12316_v59  ;;  %v12357_v9 = vld [vmem:[#allocation15_spill] sm:$0xff] }
 0xd3c   : > { %v2315_v16 = vsel %vm1525_vm7, %v2276_v32, %v2314_v27 }
 0xd3e   : > { %v2225_v3 = vpop.permute.xlu0 %2224 }
 0xd3f   : > { %v2289_v35 = vrot.slane %v2225_v3, %v12315_v52  ;;  %v2285_v3 = vsel %vm1456_vm4, %v2284_v19, %v2280_v36 }
 0xd40   : > { %v2316_v43 = vsel %vm1527_vm8, %v2285_v3, %v2315_v16  ;;  %v12359_v3 = vld [vmem:[#allocation17_spill] sm:$0xff] }
 0xd41   : > { %v2294_v57 = vsel %vm1456_vm4, %v2293_v54, %v2289_v35  ;;  %v12354_v35 = vld [vmem:[#allocation46_spill] sm:$0xff]  ;;  %v12355_v54 = vld [vmem:[#allocation13_spill] sm:$0xff] }
 0xd42   : > { %v2231_v49 = vpop.permute.xlu0 %2230  ;;  %v2317_v0 = vsel %vm1529_vm9, %v2294_v57, %v2316_v43 }
 0xd43   : > { %v2298_v30 = vrot.slane %v2231_v49, %v12315_v52 }
 0xd45   : > { %v2303_v42 = vsel %vm1456_vm4, %v2302_v5, %v2298_v30 }
 0xd46   : > { %v2237_v18 = vpop.permute.xlu0 %2236  ;;  %v2318_v19 = vsel %vm1531_vm10, %v2303_v42, %v2317_v0  ;;  %v12361_v42 = vld [vmem:[#allocation16_spill] sm:$0xff] }
 0xd47   : > { %v2307_v2 = vrot.slane %v2237_v18, %v12315_v52 }
 0xd49   : > { %v2312_v36 = vsel %vm1456_vm4, %v2311_v47, %v2307_v2 }
 0xd4a   : > { %v10294_v29 = vpop.permute.xlu0 %2402  ;;  %v2319_v22 = vsel %vm1533_vm11, %v2312_v36, %v2318_v19  ;;  %v12368_v19 = vld [vmem:[#allocation26_spill] sm:$0xff] }
 0xd4b   : > { %12353 = vst [vmem:[#allocation59_spill] sm:$0xff] %v10294_v29  ;;  %v2397_v20 = vadd.f32 %v12354_v35, %v2319_v22  ;;  %v5607_v36 = vrot.slane %v12368_v19, %v12355_v54  ;;  %v5284_v35 = vsub.f32 %v10087_v15, %v10227_v14 }
 0xd4d   : > { %v2405_v30 = vadd.f32 %v10294_v29, %v2397_v20  ;;  %v10352_v20 = vld [vmem:[%s11979_s8 + $0x8] sm:$0xff] }
 0xd4e   : > { %v2905_v49 = vpop.permute.xlu0 %2904 }
 0xd4f   : > { %2406 = vst.msk [vmem:[%s10083_s20 + $0x8] sm:$0xff] %vm928_vm2, %v2405_v30  ;;  %v10302_v24 = vrot.slane %v2905_v49, %v12355_v54  ;;  %v10309_v62 = vrot.slane %v2905_v49, %v12357_v9  ;;  %v10312_v27 = vrot.slane %v2905_v49, %v12359_v3  ;;  %v10319_v18 = vrot.slane %v2905_v49, %v12361_v42 }
 0xd50   : > { %v10334_v2 = vrot.slane %v2905_v49, %v12253_v6  ;;  %v10339_v0 = vrot.slane %v2905_v49, %v12331_v38  ;;  %v5283_v30 = vsub.f32 %v10118_v8, %v10261_v34  ;;  %v3631_v8 = vmul.f32 %v10141_v7, %v12347_v58  ;;  %v12370_v7 = vld [vmem:[#allocation36_spill] sm:$0xff] }
 0xd51   : > { %12356 = vst [vmem:[#allocation60_spill] sm:$0xff] %v10302_v24  ;;  %v2946_v32 = vmul.f32 %v10302_v24, %v10231_v61  ;;  %v2947_v5 = vmul.f32 %v10302_v24, %v10229_v55  ;;  %12358 = vst [vmem:[#allocation22_spill] sm:$0xff] %v10309_v62  ;;  %v2948_v57 = vmul.f32 %v10309_v62, %v10235_v46  ;;  %v12363_v61 = vld [vmem:[#allocation18_spill] sm:$0xff] }
 0xd52   : > { %12360 = vst [vmem:[#allocation52_spill] sm:$0xff] %v10312_v27  ;;  %v2951_v16 = vmul.f32 %v10312_v27, %v10239_v37  ;;  %12362 = vst [vmem:[#allocation70_spill] sm:$0xff] %v10319_v18  ;;  %v2953_v55 = vmul.f32 %v10319_v18, %v10243_v48  ;;  %v10324_v47 = vrot.slane %v2905_v49, %v12363_v61  ;;  %v5285_v15 = vmul.f32 1.442695, %v5283_v30 }
 0xd53   : > { %2979 = vperm.xlu0 %7551, %v2946_v32   ;;  %2982 = vperm.xlu1 %7552, %v2947_v5   ;;  %v10329_v46 = vrot.slane %v2905_v49, %v12251_v26  ;;  %12366 = vst [vmem:[#allocation68_spill] sm:$0xff] %v10334_v2  ;;  %v2959_v48 = vmul.f32 %v10334_v2, %v10257_v51  ;;  %12367 = vst [vmem:[#allocation69_spill] sm:$0xff] %v10339_v0  ;;  %v5287_v51 = vmul.f32 1.442695, %v5284_v35  ;;  %v12372_v35 = vld [vmem:[#allocation37_spill] sm:$0xff] }
 0xd54   : > { %12364 = vst [vmem:[#allocation66_spill] sm:$0xff] %v10324_v47  ;;  %v2955_v43 = vmul.f32 %v10324_v47, %v10249_v63  ;;  %v2961_v63 = vmul.f32 %v10339_v0, %v10259_v50  ;;  %v3624_v50 = vmul.f32 %v10352_v20, %v12348_v25  ;;  %v3627_v32 = vmul.f32 %v10123_v60, %v12347_v58 }
 0xd55   : > { %12365 = vst [vmem:[#allocation67_spill] sm:$0xff] %v10329_v46  ;;  %v2957_v37 = vmul.f32 %v10329_v46, %v10253_v1  ;;  %v12369_v1 = vld [vmem:[#allocation48_spill] sm:$0xff]  ;;  %7593 = vpow2.f32 %v5287_v51  ;;  %v3629_v5 = vmul.f32 %v10133_v56, %v12347_v58  ;;  %v3663_v34 = vsel %vm928_vm2, %v3631_v8, 0.0 }
 0xd56   : > { %v6354_v22 = vrot.slane %v12369_v1, %v12357_v9  ;;  %v3642_v49 = vsel %vm928_vm2, %v3624_v50, 0.0  ;;  %v3651_v14 = vsel %vm928_vm2, %v3627_v32, 0.0  ;;  %7595 = vpow2.f32 %v5285_v15  ;;  %v12373_v32 = vld [vmem:[#allocation23_spill] sm:$0xff] }
 0xd57   : > { %2985 = vperm.xlu1 %7552, %v2948_v57   ;;  %2994 = vperm.xlu0 %7551, %v2951_v16   ;;  %v3657_v57 = vsel %vm928_vm2, %v3629_v5, 0.0  ;;  %v2952_v50 = vmul.f32 %v10319_v18, %v10241_v44  ;;  %v5618_v30 = vrot.slane %v12368_v19, %v12357_v9  ;;  %v5629_v44 = vrot.slane %v12368_v19, %v12359_v3 }
 0xd58   : > { %v6488_v15 = vrot.slane %v12373_v32, %v12357_v9  ;;  %v6477_v5 = vrot.slane %v12373_v32, %v12355_v54  ;;  %v5640_v8 = vrot.slane %v12368_v19, %v12361_v42  ;;  %v6420_v18 = vrot.slane %v12369_v1, %v12331_v38 }
 0xd5b   : > { %3000 = vperm.xlu0 %7551, %v2953_v55  }
 0xd5f   : > { %3006 = vperm.xlu0 %7551, %v2955_v43   ;;  %v2949_v43 = vmul.f32 %v10309_v62, %v10233_v31 }
 0xd62   : > { %v10368_v16 = vpop.eup %7593 }
 0xd63   : > { %3012 = vperm.xlu0 %7551, %v2957_v37   ;;  %v5292_v60 = vsel %vm928_vm2, %v10368_v16, 0.0  ;;  %v10372_v55 = vpop.eup %7595  ;;  %v12371_v37 = vld [vmem:[#allocation29_spill] sm:$0xff] }
 0xd64   : > { %v5289_v56 = vsel %vm928_vm2, %v10372_v55, 0.0 }
 0xd67   : > { %3018 = vperm.xlu0 %7551, %v2959_v48   ;;  %v4114_v48 = vmul.f32 %v12371_v37, %v12370_v7  ;;  %v6510_v7 = vrot.slane %v12373_v32, %v12361_v42  ;;  %v6387_v37 = vrot.slane %v12369_v1, %v12363_v61 }
 0xd69   : > { %v10383_v51 = vadd.f32 %v4114_v48, %v12372_v35  ;;  %v5662_v48 = vrot.slane %v12368_v19, %v12251_v26 }
 0xd6b   : > { %3024 = vperm.xlu0 %7551, %v2961_v63   ;;  %v2950_v63 = vmul.f32 %v10312_v27, %v10237_v11  ;;  %v5741_v31 = vrot.slane %v10383_v51, %v12355_v54  ;;  %v6365_v11 = vrot.slane %v12369_v1, %v12359_v3  ;;  %v5785_v35 = vrot.slane %v10383_v51, %v12363_v61 }
 0xd6f   : > { %5613 = vbcast.lane.b32.xlu0 %v5607_v36, 264 }
 0xd73   : > { %6360 = vbcast.lane.b32.xlu0 %v6354_v22, 264 }
 0xd7b   : > { %3643 = vadd.xlane.f32.xlu1 %v3642_v49  ;;  %v6343_v49 = vrot.slane %v12369_v1, %v12355_v54 }
 0xd7f   : > { %3652 = vadd.xlane.f32.xlu1 %v3651_v14  ;;  %v5752_v14 = vrot.slane %v10383_v51, %v12357_v9 }
 0xd83   : > { %3658 = vadd.xlane.f32.xlu1 %v3657_v57  ;;  %v5763_v57 = vrot.slane %v10383_v51, %v12359_v3 }
 0xd87   : > { %3664 = vadd.xlane.f32.xlu1 %v3663_v34  ;;  %v6499_v34 = vrot.slane %v12373_v32, %v12359_v3 }
 0xd8b   : > { %5293 = vadd.xlane.f32.xlu1 %v5292_v60  ;;  %v5651_v60 = vrot.slane %v12368_v19, %v12363_v61 }
 0xd92   : > { %5290 = vadd.xlane.f32.xlu0 %v5289_v56  ;;  %v6376_v56 = vrot.slane %v12369_v1, %v12361_v42 }
 0xd9c   : > { %2988 = vperm.xlu1 %7552, %v2949_v43   ;;  %v5774_v43 = vrot.slane %v10383_v51, %v12361_v42 }
 0xda0   : > { %2991 = vperm.xlu1 %7552, %v2950_v63  }
 0xda4   : > { %2997 = vperm.xlu1 %7552, %v2952_v50  }
 0xda8   : > { %5624 = vbcast.lane.b32.xlu1 %v5618_v30, 264  ;;  %5747 = vbcast.lane.b32.xlu0 %v5741_v31, 264 }
 0xdac   : > { %6349 = vbcast.lane.b32.xlu1 %v6343_v49, 264  ;;  %6371 = vbcast.lane.b32.xlu0 %v6365_v11, 264 }
 0xdb0   : > { %5635 = vbcast.lane.b32.xlu1 %v5629_v44, 264  ;;  %6494 = vbcast.lane.b32.xlu0 %v6488_v15, 264 }
 0xdb4   : > { %5758 = vbcast.lane.b32.xlu1 %v5752_v14, 264  ;;  %5620 = vbcast.lane.b32.xlu0 %v5618_v30, 256  ;;  %v6398_v30 = vrot.slane %v12369_v1, %v12251_v26 }
 0xdb8   : > { %6483 = vbcast.lane.b32.xlu1 %v6477_v5, 264  ;;  %5769 = vbcast.lane.b32.xlu0 %v5763_v57, 264 }
 0xdbc   : > { %5609 = vbcast.lane.b32.xlu1 %v5607_v36, 256  ;;  %6356 = vbcast.lane.b32.xlu0 %v6354_v22, 256  ;;  %v10413_v36 = vpop.xlane.xlu0 %3640 }
 0xdbd   : > { %12374 = vst [vmem:[#allocation27_spill] sm:$0xff] %v10413_v36 }
 0xdc0   : > { %5646 = vbcast.lane.b32.xlu1 %v5640_v8, 264  ;;  %6505 = vbcast.lane.b32.xlu0 %v6499_v34, 264  ;;  %v10415_v22 = vpop.xlane.xlu0 %3646 }
 0xdc1   : > { %12375 = vst [vmem:[#allocation33_spill] sm:$0xff] %v10415_v22 }
 0xdc4   : > { %6345 = vbcast.lane.b32.xlu1 %v6343_v49, 256  ;;  %5657 = vbcast.lane.b32.xlu0 %v5651_v60, 264  ;;  %v10425_v63 = vpop.xlane.xlu0 %3649 }
 0xdc5   : > { %12376 = vst [vmem:[#allocation38_spill] sm:$0xff] %v10425_v63 }
 0xdc8   : > { %6382 = vbcast.lane.b32.xlu1 %v6376_v56, 264  ;;  %5754 = vbcast.lane.b32.xlu0 %v5752_v14, 256  ;;  %v10429_v50 = vpop.xlane.xlu0 %3655 }
 0xdc9   : > { %12377 = vst [vmem:[#allocation39_spill] sm:$0xff] %v10429_v50 }
 0xdcc   : > { %5631 = vbcast.lane.b32.xlu1 %v5629_v44, 256  ;;  %6367 = vbcast.lane.b32.xlu0 %v6365_v11, 256  ;;  %v10435_v49 = vpop.xlane.xlu0 %3661  ;;  %v5673_v11 = vrot.slane %v12368_v19, %v12253_v6 }
 0xdcd   : > { %12378 = vst [vmem:[#allocation11_spill] sm:$0xff] %v10435_v49 }
 0xdce   : > { %v10455_v29 = vpop.permute.xlu1 %2982 }
 0xdcf   : > { %12383 = vst [vmem:[#allocation36_spill] sm:$0xff] %v10455_v29 }
 0xdd0   : > { %5743 = vbcast.lane.b32.xlu1 %v5741_v31, 256  ;;  %6479 = vbcast.lane.b32.xlu0 %v6477_v5, 256  ;;  %v6521_v31 = vrot.slane %v12373_v32, %v12363_v61  ;;  %v10439_v44 = vpop.permute.xlu0 %2979  ;;  %v6409_v5 = vrot.slane %v12369_v1, %v12253_v6 }
 0xdd1   : > { %12379 = vst [vmem:[#allocation10_spill] sm:$0xff] %v10439_v44 }
 0xdd4   : > { %5780 = vbcast.lane.b32.xlu1 %v5774_v43, 264  ;;  %6516 = vbcast.lane.b32.xlu0 %v6510_v7, 264  ;;  %v10443_v14 = vpop.permute.xlu0 %2994 }
 0xdd5   : > { %12380 = vst [vmem:[#allocation46_spill] sm:$0xff] %v10443_v14 }
 0xdd8   : > { %6393 = vbcast.lane.b32.xlu1 %v6387_v37, 264  ;;  %5668 = vbcast.lane.b32.xlu0 %v5662_v48, 264 }
 0xddc   : > { %6490 = vbcast.lane.b32.xlu1 %v6488_v15, 256  ;;  %5791 = vbcast.lane.b32.xlu0 %v5785_v35, 264  ;;  %v5796_v15 = vrot.slane %v10383_v51, %v12251_v26 }
 0xde0   : > { %5642 = vbcast.lane.b32.xlu1 %v5640_v8, 256  ;;  %6404 = vbcast.lane.b32.xlu0 %v6398_v30, 264  ;;  %v10449_v8 = vpop.permute.xlu0 %3000 }
 0xde1   : > { %12381 = vst [vmem:[#allocation26_spill] sm:$0xff] %v10449_v8 }
 0xde4   : > { %5765 = vbcast.lane.b32.xlu1 %v5763_v57, 256  ;;  %6527 = vbcast.lane.b32.xlu0 %v6521_v31, 264  ;;  %v6532_v57 = vrot.slane %v12373_v32, %v12251_v26 }
 0xde8   : > { %6378 = vbcast.lane.b32.xlu1 %v6376_v56, 256  ;;  %5679 = vbcast.lane.b32.xlu0 %v5673_v11, 264  ;;  %v5684_v56 = vrot.slane %v12368_v19, %v12331_v38  ;;  %v6543_v19 = vrot.slane %v12373_v32, %v12253_v6 }
 0xdec   : > { %6501 = vbcast.lane.b32.xlu1 %v6499_v34, 256  ;;  %5802 = vbcast.lane.b32.xlu0 %v5796_v15, 264  ;;  %v10453_v34 = vpop.permute.xlu0 %3006 }
 0xded   : > { %12382 = vst [vmem:[#allocation48_spill] sm:$0xff] %v10453_v34 }
 0xdf0   : > { %5653 = vbcast.lane.b32.xlu1 %v5651_v60, 256  ;;  %6415 = vbcast.lane.b32.xlu0 %v6409_v5, 264  ;;  %v5807_v60 = vrot.slane %v10383_v51, %v12253_v6  ;;  %v10461_v27 = vpop.permute.xlu0 %3012 }
 0xdf1   : > { %12384 = vst [vmem:[#allocation29_spill] sm:$0xff] %v10461_v27 }
 0xdf4   : > { %5776 = vbcast.lane.b32.xlu1 %v5774_v43, 256  ;;  %6538 = vbcast.lane.b32.xlu0 %v6532_v57, 264  ;;  %v10463_v43 = vpop.permute.xlu1 %2985  ;;  %v10469_v62 = vpop.permute.xlu0 %3018 }
 0xdf5   : > { %12385 = vst [vmem:[#allocation37_spill] sm:$0xff] %v10463_v43  ;;  %12387 = vst [vmem:[#allocation77_spill] sm:$0xff] %v10469_v62  ;;  %v10578_v43 = vld [vmem:[%s11977_s6 + $0x8] sm:$0xff] }
 0xdf6   : > { %12412 = vst [vmem:[#allocation92_spill] sm:$0xff] %v10578_v43 }
 0xdf8   : > { %6389 = vbcast.lane.b32.xlu1 %v6387_v37, 256  ;;  %5690 = vbcast.lane.b32.xlu0 %v5684_v56, 264  ;;  %v10473_v1 = vpop.permute.xlu0 %3024 }
 0xdf9   : > { %12389 = vst [vmem:[#allocation79_spill] sm:$0xff] %v10473_v1 }
 0xdfc   : > { %6512 = vbcast.lane.b32.xlu1 %v6510_v7, 256  ;;  %5813 = vbcast.lane.b32.xlu0 %v5807_v60, 264  ;;  %v10481_v13 = vpop.permute.xlu0 %5613 }
 0xe00   : > { %5664 = vbcast.lane.b32.xlu1 %v5662_v48, 256  ;;  %6426 = vbcast.lane.b32.xlu0 %v6420_v18, 264  ;;  %v6554_v48 = vrot.slane %v12373_v32, %v12331_v38 }
 0xe04   : > { %5787 = vbcast.lane.b32.xlu1 %v5785_v35, 256  ;;  %6549 = vbcast.lane.b32.xlu0 %v6543_v19, 264  ;;  %v10467_v37 = vpop.xlane.xlu1 %3643 }
 0xe05   : > { %12386 = vst [vmem:[#allocation23_spill] sm:$0xff] %v10467_v37 }
 0xe08   : > { %6400 = vbcast.lane.b32.xlu1 %v6398_v30, 256  ;;  %5798 = vbcast.lane.b32.xlu0 %v5796_v15, 256  ;;  %v10471_v7 = vpop.xlane.xlu1 %3652  ;;  %v5818_v30 = vrot.slane %v10383_v51, %v12331_v38 }
 0xe09   : > { %12388 = vst [vmem:[#allocation78_spill] sm:$0xff] %v10471_v7 }
 0xe0c   : > { %6523 = vbcast.lane.b32.xlu1 %v6521_v31, 256  ;;  %6411 = vbcast.lane.b32.xlu0 %v6409_v5, 256  ;;  %v10475_v24 = vpop.xlane.xlu1 %3658  ;;  %v10485_v31 = vpop.permute.xlu0 %6360 }
 0xe0d   : > { %12390 = vst [vmem:[#allocation80_spill] sm:$0xff] %v10475_v24 }
 0xe10   : > { %5675 = vbcast.lane.b32.xlu1 %v5673_v11, 256  ;;  %6560 = vbcast.lane.b32.xlu0 %v6554_v48, 264  ;;  %v10479_v35 = vpop.xlane.xlu1 %3664 }
 0xe11   : > { %12391 = vst [vmem:[#allocation81_spill] sm:$0xff] %v10479_v35 }
 0xe14   : > { %5824 = vbcast.lane.b32.xlu1 %v5818_v30, 264  ;;  %5809 = vbcast.lane.b32.xlu0 %v5807_v60, 256  ;;  %v5294_v15 = vpop.xlane.xlu1 %5293 }
 0xe15   : > { %7597 = vrcp.f32 %v5294_v15 }
 0xe18   : > { %6534 = vbcast.lane.b32.xlu1 %v6532_v57, 256  ;;  %6545 = vbcast.lane.b32.xlu0 %v6543_v19, 256  ;;  %v10487_v5 = vpop.permute.xlu1 %2988 }
 0xe19   : > { %12392 = vst [vmem:[#allocation82_spill] sm:$0xff] %v10487_v5 }
 0xe1b   : > { %v5291_v32 = vpop.xlane.xlu0 %5290 }
 0xe1c   : > { %7599 = vrcp.f32 %v5291_v32  ;;  %5686 = vbcast.lane.b32.xlu1 %v5684_v56, 256  ;;  %6556 = vbcast.lane.b32.xlu0 %v6554_v48, 256  ;;  %v10489_v11 = vpop.permute.xlu1 %2991  ;;  %v12396_v48 = vld [vmem:[#allocation35_spill] sm:$0xff]  ;;  %v12397_v32 = vld [vmem:[#allocation41_spill] sm:$0xff] }
 0xe1d   : > { %12393 = vst [vmem:[#allocation83_spill] sm:$0xff] %v10489_v11  ;;  %v4112_v4 = vmul.f32 %v12397_v32, %v12396_v48  ;;  %v12402_v48 = vld [vmem:[#allocation62_spill] sm:$0xff]  ;;  %v12404_v32 = vld [vmem:[#allocation63_spill] sm:$0xff] }
 0xe1e   : > { %v10586_v11 = vld [vmem:[%s11977_s6 + $0x18] sm:$0xff] }
 0xe1f   : > { %v10491_v12 = vpop.permute.xlu0 %5747  ;;  %v4124_v41 = vadd.f32 %v4112_v4, %v12400_v10  ;;  %v6431_v52 = vmul.f32 %v10586_v11, %v10485_v31  ;;  %v10606_v31 = vld [vmem:[%s11977_s6 + $0x38] sm:$0xff] }
 0xe20   : > { %12394 = vst [vmem:[#allocation84_spill] sm:$0xff] %v10491_v12  ;;  %6422 = vbcast.lane.b32.xlu1 %v6420_v18, 256  ;;  %v10493_v17 = vpop.permute.xlu1 %2997  ;;  %12416 = vst [vmem:[#allocation96_spill] sm:$0xff] %v10606_v31 }
 0xe21   : > { %12395 = vst [vmem:[#allocation85_spill] sm:$0xff] %v10493_v17  ;;  %v6460_v21 = vsel %vm928_vm2, %v6431_v52, 0.0  ;;  %v10614_v52 = vld [vmem:[%s11978_s7 + $0x8] sm:$0xff] }
 0xe22   : > { %v7598_v60 = vpop.eup %7597  ;;  %12417 = vst [vmem:[#allocation97_spill] sm:$0xff] %v10614_v52 }
 0xe23   : > { %v10496_v15 = vmul.f32 %v7598_v60, %v10368_v16  ;;  %v10498_v53 = vpop.permute.xlu0 %6371 }
 0xe24   : > { %5820 = vbcast.lane.b32.xlu1 %v5818_v30, 256  ;;  %v10500_v57 = vpop.permute.xlu1 %5624 }
 0xe25   : > { %7489 = vmatpush3.xpose.msk.msra.mxu1 %vm928_vm2, %v10496_v15 }
 0xe26   : > { %7490 = vmatprep.subr.mxu1 %v12204_v23 }
 0xe27   : > { %v10505_v56 = vpop.permute.xlu0 %6494 }
 0xe28   : > { %v6350_v19 = vpop.permute.xlu1 %6349 }
 0xe29   : > { %v7600_v18 = vpop.eup %7599  ;;  %v6429_v29 = vmul.f32 %v10578_v43, %v6350_v19  ;;  %v10599_v19 = vld [vmem:[%s11977_s6 + $0x28] sm:$0xff] }
 0xe2a   : > { %v10510_v16 = vmul.f32 %v7600_v18, %v10372_v55  ;;  %12415 = vst [vmem:[#allocation95_spill] sm:$0xff] %v10599_v19  ;;  %v6433_v2 = vmul.f32 %v10599_v19, %v10498_v53  ;;  %v10620_v53 = vld [vmem:[%s11977_s6 + $0x48] sm:$0xff] }
 0xe2b   : > { %v10512_v60 = vpop.permute.xlu0 %5620  ;;  %v6459_v59 = vsel %vm928_vm2, %v6429_v29, 0.0  ;;  %12418 = vst [vmem:[#allocation98_spill] sm:$0xff] %v10620_v53 }
 0xe2c   : > { %12398 = vst [vmem:[#allocation35_spill] sm:$0xff] %v10510_v16  ;;  %7491 = vmatpush3.xpose.msk.msra.mxu1 %vm928_vm2, %v10510_v16  ;;  %v10516_v30 = vpop.permute.xlu1 %5635  ;;  %v6461_v46 = vadd.f32 %v6460_v21, %v6459_v59  ;;  %v10627_v59 = vld [vmem:[%s11978_s7 + $0x18] sm:$0xff] }
 0xe2d   : > { %12399 = vst [vmem:[#allocation41_spill] sm:$0xff] %v10516_v30  ;;  %7495 = vmatprep.subr.mxu1 %v10383_v51  ;;  %12419 = vst [vmem:[#allocation99_spill] sm:$0xff] %v10627_v59  ;;  %v6565_v21 = vmul.f32 %v10627_v59, %v10505_v56  ;;  %v10645_v56 = vld [vmem:[%s11977_s6 + $0x58] sm:$0xff]  ;;  %v12435_v59 = vstv %s10691_s18 }
 0xe2e   : > { %12421 = vst [vmem:[#allocation101_spill] sm:$0xff] %v10645_v56 }
 0xe2f   : > { %v10520_v35 = vpop.permute.xlu0 %5769  ;;  %7493 = vmatmul.mubr.msk.f32.vlgmr.msra.gmra.mxu1 %vm928_vm2, %v4124_v41 }
 0xe30   : > { %12401 = vst [vmem:[#allocation40_spill] sm:$0xff] %v10520_v35  ;;  %7496 = vmatpush3.msra.mxu1 %v10383_v51  ;;  %7497 = vmatprep.mubr.msk.f32.mxu1 %vm1125_vm1, %v12402_v48  ;;  %v10526_v55 = vpop.permute.xlu1 %5758 }
 0xe31   : > { %12403 = vst [vmem:[#allocation62_spill] sm:$0xff] %v10526_v55  ;;  %7500 = vmatprep.subr.mxu1 %v12204_v23 }
 0xe33   : > { %v10529_v18 = vpop.permute.xlu0 %6356  ;;  %7498 = vmatmul.mubr.msk.f32.vlgmr.msra.gmra.mxu1 %vm1125_vm1, %v12404_v32 }
 0xe34   : > { %v6484_v10 = vpop.permute.xlu1 %6483  ;;  %7504 = vmatprep.mubr.msk.f32.mxu1 %vm7828_vm3, %v12204_v23 }
 0xe35   : > { %v6563_v45 = vmul.f32 %v10614_v52, %v6484_v10  ;;  %v12438_v52 = vstv %s10748_s16 }
 0xe37   : > { %v6506_v4 = vpop.permute.xlu0 %6505 }
 0xe38   : > { %v10535_v41 = vpop.permute.xlu1 %5609 }
 0xe3b   : > { %v10537_v51 = vpop.permute.xlu0 %5657 }
 0xe3c   : > { %12405 = vst [vmem:[#allocation63_spill] sm:$0xff] %v10537_v51  ;;  %v10539_v24 = vpop.permute.xlu1 %5646 }
 0xe3d   : > { %12406 = vst [vmem:[#allocation86_spill] sm:$0xff] %v10539_v24 }
 0xe3f   : > { %v10541_v48 = vpop.permute.xlu0 %5754 }
 0xe40   : > { %v10543_v50 = vpop.permute.xlu1 %6345 }
 0xe43   : > { %v10545_v6 = vpop.permute.xlu0 %6367 }
 0xe44   : > { %v6383_v7 = vpop.permute.xlu1 %6382 }
 0xe45   : > { %v6435_v28 = vmul.f32 %v10606_v31, %v6383_v7  ;;  %v6462_v7 = vsel %vm928_vm2, %v6433_v2, 0.0 }
 0xe47   : > { %v10547_v26 = vpop.permute.xlu0 %6479  ;;  %v6464_v10 = vsel %vm928_vm2, %v6435_v28, 0.0 }
 0xe48   : > { %v10549_v32 = vpop.permute.xlu1 %5631 }
 0xe4b   : > { %v6517_v63 = vpop.permute.xlu0 %6516 }
 0xe4c   : > { %v10551_v3 = vpop.permute.xlu1 %5743 }
 0xe4f   : > { %v10553_v38 = vpop.permute.xlu0 %5668 }
 0xe50   : > { %12407 = vst [vmem:[#allocation87_spill] sm:$0xff] %v10553_v38  ;;  %v10555_v61 = vpop.permute.xlu1 %5780 }
 0xe51   : > { %12408 = vst [vmem:[#allocation88_spill] sm:$0xff] %v10555_v61 }
 0xe53   : > { %v10557_v49 = vpop.permute.xlu0 %5791 }
 0xe54   : > { %12409 = vst [vmem:[#allocation89_spill] sm:$0xff] %v10557_v49  ;;  %v6394_v22 = vpop.permute.xlu1 %6393 }
 0xe55   : > { %v6437_v47 = vmul.f32 %v10620_v53, %v6394_v22  ;;  %v10638_v22 = vld [vmem:[%s11978_s7 + $0x28] sm:$0xff] }
 0xe56   : > { %12420 = vst [vmem:[#allocation100_spill] sm:$0xff] %v10638_v22  ;;  %v6567_v2 = vmul.f32 %v10638_v22, %v6506_v4  ;;  %v7511_v22 = vpop.f32.mrf.mxu0 }
 0xe57   : > { %v6405_v42 = vpop.permute.xlu0 %6404 }
 0xe58   : > { %v10559_v9 = vpop.permute.xlu1 %6490  ;;  %v6439_v28 = vmul.f32 %v10645_v56, %v6405_v42  ;;  %v10668_v56 = vld [vmem:[%s11978_s7 + $0x48] sm:$0xff] }
 0xe59   : > { %12424 = vst [vmem:[#allocation104_spill] sm:$0xff] %v10668_v56 }
 0xe5b   : > { %v6528_v36 = vpop.permute.xlu0 %6527 }
 0xe5c   : > { %v10561_v37 = vpop.permute.xlu1 %5642 }
 0xe5f   : > { %v10563_v54 = vpop.permute.xlu0 %5679 }
 0xe60   : > { %12410 = vst [vmem:[#allocation90_spill] sm:$0xff] %v10563_v54  ;;  %v10565_v1 = vpop.permute.xlu1 %5765  ;;  %v6466_v54 = vsel %vm928_vm2, %v6437_v47, 0.0  ;;  %v10658_v47 = vld [vmem:[%s11977_s6 + $0x68] sm:$0xff] }
 0xe61   : > { %12423 = vst [vmem:[#allocation103_spill] sm:$0xff] %v10658_v47 }
 0xe63   : > { %v10567_v62 = vpop.permute.xlu0 %5802 }
 0xe64   : > { %12411 = vst [vmem:[#allocation91_spill] sm:$0xff] %v10567_v62  ;;  %v10569_v27 = vpop.permute.xlu1 %6378  ;;  %v6593_v62 = vsel %vm928_vm2, %v6563_v45, 0.0  ;;  %v6594_v45 = vsel %vm928_vm2, %v6565_v21, 0.0  ;;  %v6596_v21 = vsel %vm928_vm2, %v6567_v2, 0.0 }
 0xe65   : > { %v6595_v42 = vadd.f32 %v6594_v45, %v6593_v62 }
 0xe67   : > { %v6416_v34 = vpop.permute.xlu0 %6415 }
 0xe68   : > { %v10571_v8 = vpop.permute.xlu1 %6501  ;;  %v6441_v38 = vmul.f32 %v10658_v47, %v6416_v34  ;;  %v10676_v34 = vld [vmem:[%s11977_s6 + $0x78] sm:$0xff]  ;;  %v6597_v47 = vadd.f32 %v6596_v21, %v6595_v42 }
 0xe69   : > { %12425 = vst [vmem:[#allocation105_spill] sm:$0xff] %v10676_v34 }
 0xe6a   : > { %v6470_v2 = vsel %vm928_vm2, %v6441_v38, 0.0 }
 0xe6b   : > { %v6539_v14 = vpop.permute.xlu0 %6538 }
 0xe6c   : > { %v10573_v17 = vpop.permute.xlu1 %5653 }
 0xe6f   : > { %v10581_v44 = vpop.permute.xlu0 %5690 }
 0xe70   : > { %12413 = vst [vmem:[#allocation93_spill] sm:$0xff] %v10581_v44  ;;  %v10590_v5 = vpop.permute.xlu1 %5776  ;;  %v6463_v44 = vadd.f32 %v6462_v7, %v6461_v46  ;;  %v10652_v7 = vld [vmem:[%s11978_s7 + $0x38] sm:$0xff] }
 0xe71   : > { %12422 = vst [vmem:[#allocation102_spill] sm:$0xff] %v10652_v7  ;;  %v6569_v4 = vmul.f32 %v10652_v7, %v6517_v63  ;;  %v6571_v63 = vmul.f32 %v10668_v56, %v6528_v36 }
 0xe72   : > { %v6465_v49 = vadd.f32 %v6464_v10, %v6463_v44  ;;  %v6468_v10 = vsel %vm928_vm2, %v6439_v28, 0.0  ;;  %v10686_v28 = vld [vmem:[%s11978_s7 + $0x58] sm:$0xff] }
 0xe73   : > { %v10593_v0 = vpop.permute.xlu0 %5813  ;;  %12426 = vst [vmem:[#allocation106_spill] sm:$0xff] %v10686_v28  ;;  %v6573_v36 = vmul.f32 %v10686_v28, %v6539_v14 }
 0xe74   : > { %12414 = vst [vmem:[#allocation94_spill] sm:$0xff] %v10593_v0  ;;  %v10609_v29 = vpop.permute.xlu1 %6389  ;;  %v6467_v44 = vadd.f32 %v6466_v54, %v6465_v49  ;;  %v6598_v49 = vsel %vm928_vm2, %v6569_v4, 0.0 }
 0xe75   : > { %v6602_v14 = vsel %vm928_vm2, %v6573_v36, 0.0 }
 0xe76   : > { %v6469_v56 = vadd.f32 %v6468_v10, %v6467_v44  ;;  %v12151_v10 = vstv %s10671_s25 }
 0xe77   : > { %v6427_v33 = vpop.permute.xlu0 %6426 }
 0xe78   : > { %v10632_v0 = vpop.permute.xlu1 %6512  ;;  %v6443_v54 = vmul.f32 %v10676_v34, %v6427_v33  ;;  %v6600_v33 = vsel %vm928_vm2, %v6571_v63, 0.0  ;;  %v6599_v34 = vadd.f32 %v6598_v49, %v6597_v47  ;;  %v6471_v51 = vadd.f32 %v6470_v2, %v6469_v56  ;;  %v10725_v49 = vld [vmem:[%s11978_s7 + $0x10] sm:$0xff] }
 0xe79   : > { %v6564_v2 = vmul.f32 %v10725_v49, %v10559_v9 }
 0xe7a   : > { %v6472_v4 = vsel %vm928_vm2, %v6443_v54, 0.0  ;;  %v6601_v44 = vadd.f32 %v6600_v33, %v6599_v34 }
 0xe7b   : > { %v6550_v46 = vpop.permute.xlu0 %6549  ;;  %v6473_v21 = vadd.f32 %v6472_v4, %v6471_v51  ;;  %v10719_v51 = vld [vmem:[%s11978_s7 + $0x78] sm:$0xff]  ;;  %v10735_v4 = vld [vmem:[%s11977_s6 + $0x10] sm:$0xff] }
 0xe7c   : > { %v10661_v53 = vpop.permute.xlu1 %5664  ;;  %v6575_v38 = vmul.f32 %v10013_v39, %v6550_v46  ;;  %v6603_v39 = vadd.f32 %v6602_v14, %v6601_v44  ;;  %v10712_v46 = vld [vmem:[%s11977_s6] sm:$0xff]  ;;  %12427 = vst [vmem:[#allocation107_spill] sm:$0xff] %v10719_v51 }
 0xe7d   : > { %v6428_v47 = vmul.f32 %v10712_v46, %v10543_v50  ;;  %v6724_v50 = vmul.f32 %v12151_v10, %v6473_v21  ;;  %v10742_v14 = vld [vmem:[%s11978_s7] sm:$0xff] }
 0xe7e   : > { %v6604_v63 = vsel %vm928_vm2, %v6575_v38, 0.0  ;;  %v6430_v38 = vmul.f32 %v10735_v4, %v10529_v18  ;;  %v6562_v9 = vmul.f32 %v10742_v14, %v10547_v26  ;;  %v10762_v26 = vld [vmem:[%s11977_s6 + $0x20] sm:$0xff] }
 0xe7f   : > { %v10679_v62 = vpop.permute.xlu0 %5798  ;;  %v6605_v33 = vadd.f32 %v6604_v63, %v6603_v39  ;;  %v10753_v63 = vld [vmem:[%s11978_s7 + $0x20] sm:$0xff]  ;;  %v6444_v10 = vsel %vm928_vm2, %v6428_v47, 0.0  ;;  %v10776_v47 = vld [vmem:[%s11978_s7 + $0x30] sm:$0xff] }
 0xe80   : > { %v10689_v45 = vpop.permute.xlu1 %5787  ;;  %v6566_v18 = vmul.f32 %v10753_v63, %v10571_v8  ;;  %v12428_v8 = vstv %s10691_s18  ;;  %v6578_v7 = vsel %vm928_vm2, %v6562_v9, 0.0 }
 0xe83   : > { %v10698_v16 = vpop.permute.xlu0 %6411 }
 0xe84   : > { %v10703_v42 = vpop.permute.xlu1 %6400 }
 0xe87   : > { %v6561_v56 = vpop.permute.xlu0 %6560 }
 0xe88   : > { %v6577_v34 = vmul.f32 %v10719_v51, %v6561_v56  ;;  %v6524_v54 = vpop.permute.xlu1 %6523  ;;  %v6579_v51 = vsel %vm928_vm2, %v6564_v2, 0.0  ;;  %v12429_v56 = vstv %s10696_s22  ;;  %v10788_v2 = vld [vmem:[%s11977_s6 + $0x30] sm:$0xff] }
 0xe89   : > { %v6580_v35 = vadd.f32 %v6579_v51, %v6578_v7  ;;  %v12158_v7 = vstv %s10748_s16  ;;  %s11136_s16 = sld [smem:[#allocation2 + $0x100]] }
 0xe8a   : > { %v6606_v21 = vsel %vm928_vm2, %v6577_v34, 0.0  ;;  %v6432_v34 = vmul.f32 %v10762_v26, %v10545_v6  ;;  %v6445_v6 = vsel %vm928_vm2, %v6430_v38, 0.0  ;;  %v10796_v38 = vld [vmem:[%s11978_s7 + $0x40] sm:$0xff] }
 0xe8b   : > { %v6607_v39 = vadd.f32 %v6606_v21, %v6605_v33  ;;  %v10766_v44 = vpop.permute.xlu0 %5809  ;;  %v6728_v33 = vadd.f32 %v12428_v8, %v6724_v50  ;;  %v6568_v21 = vmul.f32 %v10776_v47, %v10632_v0  ;;  %v6434_v50 = vmul.f32 %v10788_v2, %v10569_v27  ;;  %v10807_v27 = vld [vmem:[%s11977_s6 + $0x40] sm:$0xff] }
 0xe8c   : > { %v10768_v36 = vpop.permute.xlu1 %5675  ;;  %v6581_v0 = vsel %vm928_vm2, %v6566_v18, 0.0  ;;  %v6570_v9 = vmul.f32 %v10796_v38, %v6524_v54  ;;  %v6446_v61 = vadd.f32 %v6445_v6, %v6444_v10  ;;  %v6447_v24 = vsel %vm928_vm2, %v6432_v34, 0.0  ;;  %v10819_v34 = vld [vmem:[%s11977_s6 + $0x50] sm:$0xff] }
 0xe8d   : > { %v6732_v28 = vmul.f32 %v12429_v56, %v6607_v39  ;;  %v12430_v39 = vstv %s10700_s23  ;;  %v6583_v18 = vsel %vm928_vm2, %v6568_v21, 0.0  ;;  %v6449_v51 = vsel %vm928_vm2, %v6434_v50, 0.0  ;;  %v10828_v50 = vld [vmem:[%s11978_s7 + $0x50] sm:$0xff] }
 0xe8e   : > { %v6742_v56 = vmul.f32 %v7511_v22, %v12430_v39  ;;  %v6582_v22 = vadd.f32 %v6581_v0, %v6580_v35  ;;  %v6438_v6 = vmul.f32 %v10819_v34, %v10703_v42  ;;  %v6448_v21 = vadd.f32 %v6447_v24, %v6446_v61  ;;  %v10838_v24 = vld [vmem:[%s11979_s8 + $0x48] sm:$0xff] }
 0xe8f   : > { %v6734_v8 = vadd.f32 %v6732_v28, %v6728_v33  ;;  %v6436_v28 = vmul.f32 %v10807_v27, %v10609_v29  ;;  %v12432_v33 = vstv %s10707_s27  ;;  %v6546_v10 = vpop.permute.xlu0 %6545  ;;  %v6585_v29 = vsel %vm928_vm2, %v6570_v9, 0.0 }
 0xe90   : > { %v10801_v31 = vpop.permute.xlu1 %5824  ;;  %v3632_v61 = vmul.f32 %v10838_v24, %v12348_v25  ;;  %v6453_v9 = vsel %vm928_vm2, %v6438_v6, 0.0  ;;  %v10857_v6 = vld [vmem:[%s11977_s6 + $0x60] sm:$0xff] }
 0xe91   : > { %12431 = vst [vmem:[#allocation108_spill] sm:$0xff] %v10801_v31  ;;  %v6738_v54 = vadd.f32 %v12432_v33, %v6734_v8  ;;  %v6584_v31 = vadd.f32 %v6583_v18, %v6582_v22  ;;  %v6451_v35 = vsel %vm928_vm2, %v6436_v28, 0.0  ;;  %v6450_v33 = vadd.f32 %v6449_v51, %v6448_v21  ;;  %v10865_v21 = vld [vmem:[%s11978_s7 + $0x70] sm:$0xff] }
 0xe93   : > { %v6744_v39 = vadd.f32 %v6742_v56, %v6738_v54  ;;  %v6586_v42 = vadd.f32 %v6585_v29, %v6584_v31  ;;  %v10846_v56 = vld [vmem:[%s11978_s7 + $0x60] sm:$0xff]  ;;  %v6452_v18 = vadd.f32 %v6451_v35, %v6450_v33  ;;  %v6557_v54 = vpop.permute.xlu0 %6556  ;;  %v6440_v29 = vmul.f32 %v10857_v6, %v10698_v16  ;;  %v10872_v33 = vld [vmem:[%s11979_s8 + $0x58] sm:$0xff] }
 0xe94   : > { %v6535_v19 = vpop.permute.xlu1 %6534  ;;  %v6576_v35 = vmul.f32 %v10865_v21, %v6557_v54  ;;  %v3634_v16 = vmul.f32 %v10872_v33, %v12348_v25 }
 0xe95   : > { %v6572_v0 = vmul.f32 %v10828_v50, %v6535_v19  ;;  %v10833_v8 = vadd.f32 %v12158_v7, %v6744_v39  ;;  %v6574_v19 = vmul.f32 %v10846_v56, %v6546_v10  ;;  %v6454_v10 = vadd.f32 %v6453_v9, %v6452_v18 }
 0xe96   : > { %v6591_v18 = vsel %vm928_vm2, %v6576_v35, 0.0 }
 0xe97   : > { %v6587_v28 = vsel %vm928_vm2, %v6572_v0, 0.0  ;;  %v6752_v31 = vsel %vm928_vm2, %v10833_v8, -inf  ;;  %v6589_v39 = vsel %vm928_vm2, %v6574_v19, 0.0  ;;  %v3666_v0 = vsel %vm928_vm2, %v3632_v61, 0.0 }
 0xe98   : > { %v6588_v22 = vadd.f32 %v6587_v28, %v6586_v42  ;;  %6753 = vmax.xlane.f32.xlu0 %v6752_v31  ;;  %v10852_v51 = vpop.permute.xlu1 %5686  ;;  %v6455_v19 = vsel %vm928_vm2, %v6440_v29, 0.0  ;;  %v10880_v28 = vld [vmem:[%s11977_s6 + $0x70] sm:$0xff]  ;;  %v10889_v29 = vld [vmem:[%s11979_s8 + $0x68] sm:$0xff] }
 0xe99   : > { %v6456_v31 = vadd.f32 %v6455_v19, %v6454_v10  ;;  %v12433_v10 = vstv %s10671_s25 }
 0xe9a   : > { %v6590_v42 = vadd.f32 %v6589_v39, %v6588_v22  ;;  %v3672_v22 = vsel %vm928_vm2, %v3634_v16, 0.0  ;;  %v3636_v39 = vmul.f32 %v10889_v29, %v12348_v25  ;;  %v10899_v16 = vld [vmem:[%s11979_s8 + $0x78] sm:$0xff] }
 0xe9b   : > { %v3638_v19 = vmul.f32 %v10899_v16, %v12348_v25  ;;  %v10918_v25 = vld [vmem:[%s11979_s8 + $0x50] sm:$0xff] }
 0xe9c   : > { %3667 = vadd.xlane.f32.xlu0 %v3666_v0  ;;  %v6423_v9 = vpop.permute.xlu1 %6422  ;;  %v6592_v0 = vadd.f32 %v6591_v18, %v6590_v42  ;;  %v6712_v42 = vpop.f32.mrf.mxu0 }
 0xe9d   : > { %v6442_v61 = vmul.f32 %v10880_v28, %v6423_v9  ;;  %v3678_v9 = vsel %vm928_vm2, %v3636_v39, 0.0  ;;  %v3684_v18 = vsel %vm928_vm2, %v3638_v19, 0.0  ;;  %v12439_v19 = vld [vmem:[#allocation30_spill] sm:$0xff] }
 0xe9f   : > { %v6457_v54 = vsel %vm928_vm2, %v6442_v61, 0.0  ;;  %v12434_v61 = vstv %s10696_s22 }
 0xea0   : > { %v6458_v7 = vadd.f32 %v6457_v54, %v6456_v31  ;;  %3673 = vadd.xlane.f32.xlu0 %v3672_v22  ;;  %v6731_v30 = vmul.f32 %v12434_v61, %v6592_v0  ;;  %v12437_v22 = vstv %s10707_s27  ;;  %v4563_v61 = vmul.f32 %v10352_v20, %v12439_v19 }
 0xea2   : > { %v6723_v35 = vmul.f32 %v12433_v10, %v6458_v7  ;;  %v12436_v7 = vstv %s10700_s23 }
 0xea3   : > { %v6741_v54 = vmul.f32 %v12436_v7, %v6712_v42  ;;  %v4581_v42 = vsel %vm928_vm2, %v4563_v61, 0.0 }
 0xea4   : > { %v6727_v55 = vadd.f32 %v12435_v59, %v6723_v35  ;;  %3679 = vadd.xlane.f32.xlu0 %v3678_v9  ;;  %v10926_v59 = vld [vmem:[%s11979_s8 + $0x60] sm:$0xff]  ;;  %v10934_v35 = vld [vmem:[%s11979_s8 + $0x70] sm:$0xff] }
 0xea6   : > { %v6733_v31 = vadd.f32 %v6731_v30, %v6727_v55  ;;  %v3633_v30 = vmul.f32 %v10918_v25, %v12347_v58 }
 0xea8   : > { %3685 = vadd.xlane.f32.xlu0 %v3684_v18  ;;  %v6737_v39 = vadd.f32 %v12437_v22, %v6733_v31  ;;  %v3669_v55 = vsel %vm928_vm2, %v3633_v30, 0.0 }
 0xeaa   : > { %v6743_v10 = vadd.f32 %v6741_v54, %v6737_v39 }
 0xeac   : > { %v6747_v12 = vadd.f32 %v12438_v52, %v6743_v10  ;;  %v3635_v52 = vmul.f32 %v10926_v59, %v12347_v58 }
 0xeae   : > { %v6749_v43 = vsel %vm928_vm2, %v6747_v12, -inf  ;;  %v3675_v0 = vsel %vm928_vm2, %v3635_v52, 0.0 }
 0xeaf   : > { %6750 = vmax.xlane.f32.xlu1 %v6749_v43  ;;  %v3637_v43 = vmul.f32 %v10934_v35, %v12347_v58  ;;  %v10945_v58 = vpop.permute.xlu1 %5820 }
 0xeb1   : > { %v3681_v9 = vsel %vm928_vm2, %v3637_v43, 0.0 }
 0xeb3   : > { %3670 = vadd.xlane.f32.xlu1 %v3669_v55 }
 0xeb7   : > { %3676 = vadd.xlane.f32.xlu1 %v3675_v0 }
 0xebb   : > { %3682 = vadd.xlane.f32.xlu1 %v3681_v9  ;;  %v10952_v9 = vld [vmem:[%s11979_s8] sm:$0xff] }
 0xebf   : > { %4582 = vadd.xlane.f32.xlu1 %v4581_v42 }
 0xeef   : > { %v10942_v31 = vpop.f32.mrf.mxu1 }
 0xef0   : > { %12440 = vst [vmem:[#allocation30_spill] sm:$0xff] %v10942_v31 }
 0xef1   : > { %v7494_v18 = vpop.f32.mrf.mxu1 }
 0xf21   : > { %v6754_v7 = vpop.xlane.xlu0 %6753 }
 0xf22   : > { %v6756_v54 = vsub.f32 %v10833_v8, %v6754_v7  ;;  %v12441_v8 = vld [vmem:[#allocation31_spill] sm:$0xff] }
 0xf23   : > { %v4562_v61 = vmul.f32 %v10952_v9, %v12441_v8 }
 0xf24   : > { %v6759_v22 = vmul.f32 1.442695, %v6756_v54  ;;  %v4565_v54 = vmul.f32 %v10212_v40, %v12439_v19 }
 0xf25   : > { %v4578_v42 = vsel %vm928_vm2, %v4562_v61, 0.0 }
 0xf26   : > { %7601 = vpow2.f32 %v6759_v22  ;;  %v4587_v22 = vsel %vm928_vm2, %v4565_v54, 0.0 }
 0xf33   : > { %v7602_v39 = vpop.eup %7601 }
 0xf34   : > { %v6764_v10 = vsel %vm928_vm2, %v7602_v39, 0.0 }
 0xf35   : > { %6765 = vadd.xlane.f32.xlu0 %v6764_v10  ;;  %v10968_v10 = vpop.xlane.xlu0 %3667 }
 0xf36   : > { %12442 = vst [vmem:[#allocation31_spill] sm:$0xff] %v10968_v10  ;;  %v4571_v10 = vmul.f32 %v10838_v24, %v12439_v19 }
 0xf38   : > { %v6751_v30 = vpop.xlane.xlu1 %6750 }
 0xf39   : > { %v6755_v55 = vsub.f32 %v6747_v12, %v6751_v30  ;;  %v10960_v12 = vld [vmem:[%s11979_s8 + $0x10] sm:$0xff]  ;;  %v10970_v30 = vpop.xlane.xlu0 %3673 }
 0xf3a   : > { %v4564_v18 = vmul.f32 %v10960_v12, %v12441_v8  ;;  %12443 = vst [vmem:[#allocation109_spill] sm:$0xff] %v10970_v30 }
 0xf3b   : > { %v6757_v52 = vmul.f32 1.442695, %v6755_v55 }
 0xf3c   : > { %v4584_v7 = vsel %vm928_vm2, %v4564_v18, 0.0 }
 0xf3d   : > { %7603 = vpow2.f32 %v6757_v52  ;;  %v10972_v55 = vpop.xlane.xlu0 %3679 }
 0xf3e   : > { %12444 = vst [vmem:[#allocation110_spill] sm:$0xff] %v10972_v55 }
 0xf41   : > { %v10974_v52 = vpop.xlane.xlu0 %3685 }
 0xf42   : > { %12445 = vst [vmem:[#allocation111_spill] sm:$0xff] %v10974_v52 }
 0xf4a   : > { %v7604_v0 = vpop.eup %7603 }
 0xf4b   : > { %v6761_v43 = vsel %vm928_vm2, %v7604_v0, 0.0 }
 0xf4c   : > { %6762 = vadd.xlane.f32.xlu0 %v6761_v43 }
 0xf50   : > { %4579 = vadd.xlane.f32.xlu0 %v4578_v42 }
 0xf54   : > { %4585 = vadd.xlane.f32.xlu0 %v4584_v7  ;;  %v10987_v7 = vld [vmem:[%s11979_s8 + $0x18] sm:$0xff] }
 0xf58   : > { %4588 = vadd.xlane.f32.xlu0 %v4587_v22 }
 0xfbe   : > { %v6766_v43 = vpop.xlane.xlu0 %6765 }
 0xfbf   : > { %7605 = vrcp.f32 %v6766_v43  ;;  %v10995_v43 = vld [vmem:[%s11979_s8 + $0x28] sm:$0xff] }
 0xfcc   : > { %v7606_v61 = vpop.eup %7605 }
 0xfcd   : > { %v10976_v42 = vmul.f32 %v7606_v61, %v7602_v39  ;;  %v4567_v61 = vmul.f32 %v10995_v43, %v12439_v19 }
 0xfcf   : > { %7513 = vmatpush3.xpose.msk.msra.mxu0 %vm928_vm2, %v10976_v42  ;;  %v6772_v40 = vmul.f32 %v10352_v20, %v10976_v42  ;;  %v6774_v54 = vmul.f32 %v10987_v7, %v10976_v42  ;;  %v6776_v31 = vmul.f32 %v10995_v43, %v10976_v42 }
 0xfd0   : > { %7514 = vmatprep.subr.mxu0 %v12204_v23 }
 0xfd1   : > { %v6790_v18 = vsel %vm928_vm2, %v6772_v40, 0.0  ;;  %v6796_v22 = vsel %vm928_vm2, %v6774_v54, 0.0  ;;  %v4593_v40 = vsel %vm928_vm2, %v4567_v61, 0.0  ;;  %v11006_v54 = vld [vmem:[%s11979_s8 + $0x38] sm:$0xff] }
 0xfd2   : > { %6791 = vadd.xlane.f32.xlu0 %v6790_v18  ;;  %v6802_v18 = vsel %vm928_vm2, %v6776_v31, 0.0  ;;  %v4569_v23 = vmul.f32 %v11006_v54, %v12439_v19  ;;  %v12447_v31 = vld [vmem:[#allocation44_spill] sm:$0xff] }
 0xfd5   : > { %v6763_v39 = vpop.xlane.xlu0 %6762 }
 0xfd6   : > { %7607 = vrcp.f32 %v6763_v39  ;;  %6797 = vadd.xlane.f32.xlu0 %v6796_v22  ;;  %v4599_v39 = vsel %vm928_vm2, %v4569_v23, 0.0  ;;  %v6778_v22 = vmul.f32 %v11006_v54, %v10976_v42 }
 0xfd8   : > { %v6808_v30 = vsel %vm928_vm2, %v6778_v22, 0.0  ;;  %v4605_v22 = vsel %vm928_vm2, %v4571_v10, 0.0  ;;  %v4573_v10 = vmul.f32 %v10872_v33, %v12439_v19 }
 0xfda   : > { %4594 = vadd.xlane.f32.xlu0 %v4593_v40  ;;  %v12446_v40 = vld [vmem:[#allocation12_spill] sm:$0xff] }
 0xfdb   : > { %v4118_v55 = vmul.f32 %v12447_v31, %v12446_v40 }
 0xfde   : > { %6803 = vadd.xlane.f32.xlu0 %v6802_v18  ;;  %v12448_v18 = vld [vmem:[#allocation14_spill] sm:$0xff] }
 0xfe2   : > { %4600 = vadd.xlane.f32.xlu0 %v4599_v39  ;;  %v4130_v39 = vadd.f32 %v4118_v55, %v12448_v18  ;;  %v11036_v55 = vld [vmem:[%s11979_s8 + $0x20] sm:$0xff] }
 0xfe3   : > { %v7608_v61 = vpop.eup %7607  ;;  %v4566_v31 = vmul.f32 %v11036_v55, %v12441_v8 }
 0xfe4   : > { %v11013_v52 = vmul.f32 %v7608_v61, %v7604_v0 }
 0xfe5   : > { %v4590_v18 = vsel %vm928_vm2, %v4566_v31, 0.0 }
 0xfe6   : > { %6809 = vadd.xlane.f32.xlu0 %v6808_v30  ;;  %7515 = vmatpush3.xpose.msk.msra.mxu0 %vm928_vm2, %v11013_v52  ;;  %v6771_v23 = vmul.f32 %v10952_v9, %v11013_v52  ;;  %v6773_v61 = vmul.f32 %v10960_v12, %v11013_v52  ;;  %v6780_v30 = vmul.f32 %v10838_v24, %v10976_v42 }
 0xfe8   : > { %v6787_v0 = vsel %vm928_vm2, %v6771_v23, 0.0  ;;  %v6793_v40 = vsel %vm928_vm2, %v6773_v61, 0.0  ;;  %v6814_v23 = vsel %vm928_vm2, %v6780_v30, 0.0  ;;  %v6782_v61 = vmul.f32 %v10872_v33, %v10976_v42  ;;  %v11053_v30 = vld [vmem:[%s11979_s8 + $0x30] sm:$0xff] }
 0xfe9   : > { %7517 = vmatmul.mubr.msk.f32.vlgmr.msra.gmra.mxu0 %vm928_vm2, %v4130_v39  ;;  %6788 = vadd.xlane.f32.xlu1 %v6787_v0  ;;  %v6775_v39 = vmul.f32 %v11036_v55, %v11013_v52  ;;  %v4611_v0 = vsel %vm928_vm2, %v4573_v10, 0.0  ;;  %12449 = vst [vmem:[#allocation12_spill] sm:$0xff] %v11053_v30 }
 0xfea   : > { %4606 = vadd.xlane.f32.xlu0 %v4605_v22  ;;  %v6820_v31 = vsel %vm928_vm2, %v6782_v61, 0.0  ;;  %v11070_v61 = vld [vmem:[%s11979_s8 + $0x40] sm:$0xff] }
 0xfeb   : > { %v6799_v22 = vsel %vm928_vm2, %v6775_v39, 0.0 }
 0xfed   : > { %6794 = vadd.xlane.f32.xlu1 %v6793_v40  ;;  %v4568_v40 = vmul.f32 %v11053_v30, %v12441_v8 }
 0xfee   : > { %6815 = vadd.xlane.f32.xlu0 %v6814_v23  ;;  %v4575_v23 = vmul.f32 %v10889_v29, %v12439_v19 }
 0xfef   : > { %v4596_v10 = vsel %vm928_vm2, %v4568_v40, 0.0  ;;  %v4570_v40 = vmul.f32 %v11070_v61, %v12441_v8 }
 0xff0   : > { %v4617_v39 = vsel %vm928_vm2, %v4575_v23, 0.0  ;;  %v4577_v23 = vmul.f32 %v10899_v16, %v12439_v19 }
 0xff1   : > { %4591 = vadd.xlane.f32.xlu1 %v4590_v18  ;;  %v6777_v18 = vmul.f32 %v11053_v30, %v11013_v52  ;;  %v5828_v30 = vmul.f32 %v10725_v49, %v10541_v48  ;;  %v4602_v19 = vsel %vm928_vm2, %v4570_v40, 0.0  ;;  %v5302_v40 = vmul.f32 %v10987_v7, %v10496_v15 }
 0xff2   : > { %4612 = vadd.xlane.f32.xlu0 %v4611_v0  ;;  %v6784_v0 = vmul.f32 %v10889_v29, %v10976_v42  ;;  %v6781_v7 = vmul.f32 %v10918_v25, %v11013_v52 }
 0xff5   : > { %6800 = vadd.xlane.f32.xlu1 %v6799_v22  ;;  %v6805_v22 = vsel %vm928_vm2, %v6777_v18, 0.0  ;;  %v5826_v18 = vmul.f32 %v10742_v14, %v10551_v3  ;;  %v4623_v3 = vsel %vm928_vm2, %v4577_v23, 0.0 }
 0xff6   : > { %6821 = vadd.xlane.f32.xlu0 %v6820_v31  ;;  %v6826_v31 = vsel %vm928_vm2, %v6784_v0, 0.0  ;;  %v5830_v0 = vmul.f32 %v10753_v63, %v10565_v1  ;;  %v5832_v1 = vmul.f32 %v10776_v47, %v10590_v5 }
 0xff7   : > { %v5842_v48 = vsel %vm928_vm2, %v5826_v18, 0.0 }
 0xff8   : > { %v5845_v63 = vsel %vm928_vm2, %v5830_v0, 0.0  ;;  %v5847_v23 = vsel %vm928_vm2, %v5832_v1, 0.0  ;;  %v5695_v1 = vmul.f32 %v10586_v11, %v10500_v57  ;;  %v4576_v57 = vmul.f32 %v10934_v35, %v12441_v8 }
 0xff9   : > { %4597 = vadd.xlane.f32.xlu1 %v4596_v10  ;;  %v5692_v10 = vmul.f32 %v10712_v46, %v10535_v41  ;;  %v6779_v41 = vmul.f32 %v11070_v61, %v11013_v52 }
 0xffa   : > { %4618 = vadd.xlane.f32.xlu0 %v4617_v39  ;;  %v5694_v39 = vmul.f32 %v10735_v4, %v10512_v60  ;;  %v5300_v60 = vmul.f32 %v10352_v20, %v10496_v15  ;;  %v5843_v4 = vsel %vm928_vm2, %v5828_v30, 0.0  ;;  %v4572_v20 = vmul.f32 %v10918_v25, %v12441_v8 }
 0xffb   : > { %v5708_v46 = vsel %vm928_vm2, %v5692_v10, 0.0  ;;  %v6811_v5 = vsel %vm928_vm2, %v6779_v41, 0.0  ;;  %v5836_v41 = vmul.f32 %v10828_v50, %v10679_v62  ;;  %v4574_v62 = vmul.f32 %v10926_v59, %v12441_v8 }
 0xffc   : > { %v5709_v49 = vsel %vm928_vm2, %v5694_v39, 0.0  ;;  %v5318_v30 = vsel %vm928_vm2, %v5300_v60, 0.0  ;;  %v5704_v39 = vmul.f32 %v10857_v6, %v10768_v36  ;;  %v5706_v36 = vmul.f32 %v10880_v28, %v10852_v51 }
 0xffd   : > { %6806 = vadd.xlane.f32.xlu1 %v6805_v22  ;;  %v5696_v22 = vmul.f32 %v10762_v26, %v10549_v32  ;;  %v5698_v32 = vmul.f32 %v10788_v2, %v10561_v37  ;;  %v5700_v26 = vmul.f32 %v10807_v27, %v10573_v17  ;;  %v5834_v37 = vmul.f32 %v10796_v38, %v10689_v45 }
 0xffe   : > { %6827 = vadd.xlane.f32.xlu0 %v6826_v31  ;;  %v5710_v47 = vadd.f32 %v5709_v49, %v5708_v46  ;;  %v5844_v2 = vadd.f32 %v5843_v4, %v5842_v48  ;;  %v5702_v17 = vmul.f32 %v10819_v34, %v10661_v53  ;;  %v4608_v38 = vsel %vm928_vm2, %v4572_v20, 0.0 }
 0xfff   : > { %v5711_v14 = vsel %vm928_vm2, %v5696_v22, 0.0  ;;  %v5713_v31 = vsel %vm928_vm2, %v5698_v32, 0.0  ;;  %v5715_v10 = vsel %vm928_vm2, %v5700_v26, 0.0  ;;  %v5849_v18 = vsel %vm928_vm2, %v5834_v37, 0.0  ;;  %v12450_v37 = vld [vmem:[#allocation92_spill] sm:$0xff] }
0x1000   : > { %v5712_v27 = vadd.f32 %v5711_v14, %v5710_v47  ;;  %v5846_v45 = vadd.f32 %v5845_v63, %v5844_v2  ;;  %v5324_v53 = vsel %vm928_vm2, %v5302_v40, 0.0  ;;  %v5304_v34 = vmul.f32 %v10995_v43, %v10496_v15  ;;  %v12452_v47 = vld [vmem:[#allocation97_spill] sm:$0xff]  ;;  %v12454_v40 = vld [vmem:[#allocation99_spill] sm:$0xff] }
0x1001   : > { %4603 = vadd.xlane.f32.xlu1 %v4602_v19  ;;  %v5717_v19 = vsel %vm928_vm2, %v5702_v17, 0.0  ;;  %v5719_v46 = vsel %vm928_vm2, %v5704_v39, 0.0  ;;  %v5840_v43 = vmul.f32 %v10865_v21, %v10945_v58  ;;  %v6817_v48 = vsel %vm928_vm2, %v6781_v7, 0.0  ;;  %v12455_v17 = vld [vmem:[#allocation41_spill] sm:$0xff] }
0x1002   : > { %4624 = vadd.xlane.f32.xlu0 %v4623_v3  ;;  %v5714_v22 = vadd.f32 %v5713_v31, %v5712_v27  ;;  %v5848_v0 = vadd.f32 %v5847_v23, %v5846_v45  ;;  %v5838_v3 = vmul.f32 %v10846_v56, %v10766_v44  ;;  %v5330_v44 = vsel %vm928_vm2, %v5304_v34, 0.0 }
0x1003   : > { %v5306_v56 = vmul.f32 %v11006_v54, %v10496_v15  ;;  %v5851_v51 = vsel %vm928_vm2, %v5836_v41, 0.0  ;;  %v5721_v21 = vsel %vm928_vm2, %v5706_v36, 0.0  ;;  %v5855_v49 = vsel %vm928_vm2, %v5840_v43, 0.0  ;;  %v12458_v41 = vld [vmem:[#allocation96_spill] sm:$0xff] }
0x1004   : > { %v5716_v6 = vadd.f32 %v5715_v10, %v5714_v22  ;;  %v5850_v60 = vadd.f32 %v5849_v18, %v5848_v0  ;;  %v5853_v28 = vsel %vm928_vm2, %v5838_v3, 0.0  ;;  %v4614_v4 = vsel %vm928_vm2, %v4574_v62, 0.0  ;;  %v11187_v22 = vpop.f32.mrf.mxu1  ;;  %v12460_v62 = vld [vmem:[#allocation100_spill] sm:$0xff] }
0x1005   : > { %6812 = vadd.xlane.f32.xlu1 %v6811_v5  ;;  %v6783_v54 = vmul.f32 %v10926_v59, %v11013_v52  ;;  %v5336_v63 = vsel %vm928_vm2, %v5306_v56, 0.0  ;;  %v5308_v26 = vmul.f32 %v10838_v24, %v10496_v15  ;;  %v5693_v11 = vmul.f32 %v12450_v37, %v10481_v13  ;;  %v12451_v5 = vld [vmem:[#allocation84_spill] sm:$0xff]  ;;  %v12456_v24 = vld [vmem:[#allocation95_spill] sm:$0xff]  ;;  %v12462_v56 = vld [vmem:[#allocation102_spill] sm:$0xff] }
0x1006   : > { %5319 = vadd.xlane.f32.xlu0 %v5318_v30  ;;  %v5718_v50 = vadd.f32 %v5717_v19, %v5716_v6  ;;  %v5852_v58 = vadd.f32 %v5851_v51, %v5850_v60  ;;  %v5827_v2 = vmul.f32 %v12452_v47, %v12451_v5  ;;  %v12453_v30 = vld [vmem:[#allocation62_spill] sm:$0xff]  ;;  %v5697_v27 = vmul.f32 %v12456_v24, %v12455_v17  ;;  %v12468_v5 = vld [vmem:[#allocation89_spill] sm:$0xff]  ;;  %v12469_v47 = vld [vmem:[#allocation104_spill] sm:$0xff] }
0x1007   : > { %v5829_v31 = vmul.f32 %v12454_v40, %v12453_v30  ;;  %v5986_v45 = vstv %s11136_s16  ;;  %v6823_v13 = vsel %vm928_vm2, %v6783_v54, 0.0  ;;  %v5310_v8 = vmul.f32 %v10872_v33, %v10496_v15  ;;  %v12457_v19 = vld [vmem:[#allocation86_spill] sm:$0xff] }
0x1008   : > { %v5720_v32 = vadd.f32 %v5719_v46, %v5718_v50  ;;  %v5854_v14 = vadd.f32 %v5853_v28, %v5852_v58  ;;  %v5342_v18 = vsel %vm928_vm2, %v5308_v26, 0.0  ;;  %v5723_v39 = vsel %vm928_vm2, %v5693_v11, 0.0  ;;  %v12466_v11 = vld [vmem:[#allocation87_spill] sm:$0xff] }
0x1009   : > { %4609 = vadd.xlane.f32.xlu1 %v4608_v38  ;;  %v5724_v38 = vsel %vm928_vm2, %v5695_v1, 0.0  ;;  %v5994_v7 = vstv %s11151_s21  ;;  %v5990_v0 = vstv %s11144_s26  ;;  %v5857_v33 = vsel %vm928_vm2, %v5827_v2, 0.0  ;;  %v5976_v1 = vpop.f32.mrf.mxu1 }
0x100a   : > { %5325 = vadd.xlane.f32.xlu0 %v5324_v53  ;;  %v5722_v20 = vadd.f32 %v5721_v21, %v5720_v32  ;;  %v5856_v23 = vadd.f32 %v5855_v49, %v5854_v14  ;;  %v4620_v53 = vsel %vm928_vm2, %v4576_v57, 0.0  ;;  %v5858_v34 = vsel %vm928_vm2, %v5829_v31, 0.0  ;;  %v12463_v49 = vld [vmem:[#allocation35_spill] sm:$0xff] }
0x100b   : > { %v5699_v3 = vmul.f32 %v12458_v41, %v12457_v19  ;;  %v5725_v6 = vadd.f32 %v5724_v38, %v5723_v39  ;;  %v5726_v60 = vsel %vm928_vm2, %v5697_v27, 0.0  ;;  %v5348_v46 = vsel %vm928_vm2, %v5310_v8, 0.0  ;;  %v12464_v14 = vld [vmem:[#allocation63_spill] sm:$0xff]  ;;  %v12470_v8 = vld [vmem:[#allocation90_spill] sm:$0xff] }
0x100c   : > { %v5987_v10 = vmul.f32 %v5986_v45, %v5722_v20  ;;  %v5995_v36 = vmul.f32 %v5994_v7, %v5856_v23  ;;  %v6785_v43 = vmul.f32 %v10934_v35, %v11013_v52  ;;  %v5312_v21 = vmul.f32 %v10889_v29, %v10496_v15  ;;  %v12465_v20 = vld [vmem:[#allocation98_spill] sm:$0xff]  ;;  %v12467_v29 = vld [vmem:[#allocation101_spill] sm:$0xff]  ;;  %v12471_v38 = vld [vmem:[#allocation103_spill] sm:$0xff] }
0x100d   : > { %6818 = vadd.xlane.f32.xlu1 %v6817_v48  ;;  %v12459_v48 = vld [vmem:[#allocation40_spill] sm:$0xff]  ;;  %v5859_v58 = vadd.f32 %v5858_v34, %v5857_v33  ;;  %v6000_v32 = vstv %s11165_s29  ;;  %v5299_v52 = vmul.f32 %v10952_v9, %v12463_v49  ;;  %v5727_v54 = vadd.f32 %v5726_v60, %v5725_v6  ;;  %v12473_v39 = vld [vmem:[#allocation106_spill] sm:$0xff]  ;;  %v12474_v6 = vld [vmem:[#allocation93_spill] sm:$0xff] }
0x100e   : > { %5331 = vadd.xlane.f32.xlu0 %v5330_v44  ;;  %v5831_v50 = vmul.f32 %v12460_v62, %v12459_v48  ;;  %v12461_v44 = vld [vmem:[#allocation88_spill] sm:$0xff]  ;;  %v5991_v28 = vadd.f32 %v5990_v0, %v5987_v10  ;;  %v5728_v26 = vsel %vm928_vm2, %v5699_v3, 0.0  ;;  %v5703_v57 = vmul.f32 %v12467_v29, %v12466_v11  ;;  %v12475_v60 = vld [vmem:[#allocation105_spill] sm:$0xff] }
0x100f   : > { %v5833_v51 = vmul.f32 %v12462_v56, %v12461_v44  ;;  %v5835_v2 = vmul.f32 %v12469_v47, %v12468_v5  ;;  %v6004_v30 = vstv %s11176_s28  ;;  %v6829_v9 = vsel %vm928_vm2, %v6785_v43, 0.0  ;;  %v12476_v43 = vld [vmem:[#allocation94_spill] sm:$0xff]  ;;  %v12479_v5 = vld [vmem:[#allocation12_spill] sm:$0xff] }
0x1010   : > { %v5997_v37 = vadd.f32 %v5995_v36, %v5991_v28  ;;  %v6005_v31 = vmul.f32 %v6004_v30, %v5976_v1  ;;  %v5354_v23 = vsel %vm928_vm2, %v5312_v21, 0.0  ;;  %v5729_v17 = vadd.f32 %v5728_v26, %v5727_v54  ;;  %v12477_v28 = vld [vmem:[#allocation108_spill] sm:$0xff]  ;;  %v12478_v21 = vld [vmem:[#allocation107_spill] sm:$0xff] }
0x1011   : > { %4615 = vadd.xlane.f32.xlu1 %v4614_v4  ;;  %v5314_v4 = vmul.f32 %v10899_v16, %v10496_v15  ;;  %v5860_v15 = vsel %vm928_vm2, %v5831_v50, 0.0  ;;  %v5862_v40 = vsel %vm928_vm2, %v5833_v51, 0.0  ;;  %v5705_v10 = vmul.f32 %v12471_v38, %v12470_v8 }
0x1012   : > { %5337 = vadd.xlane.f32.xlu0 %v5336_v63  ;;  %v5701_v63 = vmul.f32 %v12465_v20, %v12464_v14  ;;  %v5861_v24 = vadd.f32 %v5860_v15, %v5859_v58  ;;  %v6001_v33 = vadd.f32 %v6000_v32, %v5997_v37  ;;  %v5315_v34 = vsel %vm928_vm2, %v5299_v52, 0.0 }
0x1013   : > { %v5360_v27 = vsel %vm928_vm2, %v5314_v4, 0.0  ;;  %v5732_v41 = vsel %vm928_vm2, %v5703_v57, 0.0  ;;  %v5864_v36 = vsel %vm928_vm2, %v5835_v2, 0.0  ;;  %v6786_v50 = vmul.f32 %v10899_v16, %v10976_v42 }
0x1014   : > { %v5730_v19 = vsel %vm928_vm2, %v5701_v63, 0.0  ;;  %v5863_v3 = vadd.f32 %v5862_v40, %v5861_v24  ;;  %v6007_v62 = vadd.f32 %v6005_v31, %v6001_v33  ;;  %v5734_v56 = vsel %vm928_vm2, %v5705_v10, 0.0 }
0x1015   : > { %6824 = vadd.xlane.f32.xlu1 %v6823_v13  ;;  %v5301_v13 = vmul.f32 %v10960_v12, %v12463_v49  ;;  %v5707_v12 = vmul.f32 %v12475_v60, %v12474_v6  ;;  %v5731_v44 = vadd.f32 %v5730_v19, %v5729_v17  ;;  %v5841_v58 = vmul.f32 %v12478_v21, %v12477_v28  ;;  %v11304_v19 = vpop.xlane.xlu1 %3670  ;;  %v11308_v6 = vpop.xlane.xlu0 %4579  ;;  %v512_v60 = vld [vmem:[%s11981_s10 + $0x10] sm:$0xff] }
0x1016   : > { %5343 = vadd.xlane.f32.xlu0 %v5342_v18  ;;  %v12472_v18 = vld [vmem:[#allocation91_spill] sm:$0xff]  ;;  %v5303_v1 = vmul.f32 %v11036_v55, %v12463_v49  ;;  %v5865_v4 = vadd.f32 %v5864_v36, %v5863_v3  ;;  %v6010_v14 = vstv %s11223_s30  ;;  %v6832_v42 = vsel %vm928_vm2, %v6786_v50, 0.0  ;;  %v12487_v3 = vld [vmem:[#allocation69_spill] sm:$0xff] }
0x1017   : > { %v5733_v52 = vadd.f32 %v5732_v41, %v5731_v44  ;;  %v5321_v54 = vsel %vm928_vm2, %v5301_v13, 0.0  ;;  %v5736_v20 = vsel %vm928_vm2, %v5707_v12, 0.0  ;;  %v11262_v63 = vadd.f32 %v6010_v14, %v6007_v62  ;;  %v12486_v41 = vld [vmem:[#allocation58_spill] sm:$0xff] }
0x1018   : > { %v5870_v55 = vsel %vm928_vm2, %v5841_v58, 0.0  ;;  %v5327_v57 = vsel %vm928_vm2, %v5303_v1, 0.0  ;;  %v5305_v47 = vmul.f32 %v12479_v5, %v12463_v49  ;;  %v5307_v31 = vmul.f32 %v11070_v61, %v12463_v49 }
0x1019   : > { %4621 = vadd.xlane.f32.xlu1 %v4620_v53  ;;  %v5837_v53 = vmul.f32 %v12473_v39, %v12472_v18  ;;  %v5735_v26 = vadd.f32 %v5734_v56, %v5733_v52  ;;  %v6013_v2 = vsel %vm928_vm2, %v11262_v63, -inf  ;;  %v5311_v61 = vmul.f32 %v10926_v59, %v12463_v49  ;;  %v12480_v59 = vld [vmem:[#allocation54_spill] sm:$0xff]  ;;  %v11313_v12 = vpop.xlane.xlu1 %3676 }
0x101a   : > { %5349 = vadd.xlane.f32.xlu0 %v5348_v46  ;;  %v7761_v46 = vld [vmem:[%s11978_s7 + $0x68] sm:$0xff]  ;;  %v5333_v40 = vsel %vm928_vm2, %v5305_v47, 0.0  ;;  %v5339_v24 = vsel %vm928_vm2, %v5307_v31, 0.0  ;;  %v5313_v10 = vmul.f32 %v10934_v35, %v12463_v49  ;;  %v12485_v35 = vld [vmem:[#allocation68_spill] sm:$0xff]  ;;  %v2960_v36 = vmul.f32 %v12487_v3, %v12486_v41  ;;  %v12502_v41 = vld [vmem:[#allocation83_spill] sm:$0xff] }
0x101b   : > { %v5839_v48 = vmul.f32 %v7761_v46, %v12476_v43  ;;  %v5866_v51 = vsel %vm928_vm2, %v5837_v53, 0.0  ;;  %v5737_v11 = vadd.f32 %v5736_v20, %v5735_v26  ;;  %v12483_v53 = vld [vmem:[#allocation67_spill] sm:$0xff]  ;;  %v11318_v43 = vpop.xlane.xlu0 %4585  ;;  %v12505_v3 = vld [vmem:[#allocation37_spill] sm:$0xff] }
0x101c   : > { %v5867_v37 = vadd.f32 %v5866_v51, %v5865_v4  ;;  %v509_v46 = vld [vmem:[%s11980_s9 + $0x18] sm:$0xff] }
0x101d   : > { %6830 = vadd.xlane.f32.xlu1 %v6829_v9  ;;  %v5868_v16 = vsel %vm928_vm2, %v5839_v48, 0.0  ;;  %v5988_v15 = vmul.f32 %v5986_v45, %v5737_v11  ;;  %v6006_v45 = vmul.f32 %v11187_v22, %v6004_v30  ;;  %v12481_v30 = vld [vmem:[#allocation66_spill] sm:$0xff]  ;;  %v11320_v48 = vpop.xlane.xlu1 %3682 }
0x101e   : > { %5355 = vadd.xlane.f32.xlu0 %v5354_v23  ;;  %v5869_v29 = vadd.f32 %v5868_v16, %v5867_v37  ;;  %v2954_v39 = vmul.f32 %v12481_v30, %v12480_v59 }
0x101f   : > { %v5992_v17 = vadd.f32 %v5990_v0, %v5988_v15  ;;  %v5351_v0 = vsel %vm928_vm2, %v5311_v61, 0.0  ;;  %v11322_v62 = vpop.xlane.xlu0 %4588 }
0x1020   : > { %v5871_v9 = vadd.f32 %v5870_v55, %v5869_v29 }
0x1021   : > { %5316 = vadd.xlane.f32.xlu1 %v5315_v34  ;;  %v12484_v34 = vld [vmem:[#allocation56_spill] sm:$0xff]  ;;  %v11324_v50 = vpop.xlane.xlu1 %4582 }
0x1022   : > { %5361 = vadd.xlane.f32.xlu0 %v5360_v27  ;;  %v5996_v23 = vmul.f32 %v5994_v7, %v5871_v9  ;;  %v5309_v27 = vmul.f32 %v10918_v25, %v12463_v49  ;;  %v5357_v25 = vsel %vm928_vm2, %v5313_v10, 0.0  ;;  %v2958_v49 = vmul.f32 %v12485_v35, %v12484_v34 }
0x1024   : > { %v5998_v13 = vadd.f32 %v5996_v23, %v5992_v17  ;;  %v5345_v8 = vsel %vm928_vm2, %v5309_v27, 0.0 }
0x1025   : > { %5322 = vadd.xlane.f32.xlu1 %v5321_v54 }
0x1026   : > { %6833 = vadd.xlane.f32.xlu0 %v6832_v42  ;;  %v6002_v7 = vadd.f32 %v6000_v32, %v5998_v13  ;;  %v12482_v32 = vld [vmem:[#allocation57_spill] sm:$0xff] }
0x1027   : > { %v2956_v33 = vmul.f32 %v12483_v53, %v12482_v32  ;;  %v12499_v32 = vld [vmem:[#allocation9_spill] sm:$0xff] }
0x1028   : > { %v6008_v38 = vadd.f32 %v6006_v45, %v6002_v7  ;;  %v12506_v53 = vld [vmem:[#allocation85_spill] sm:$0xff] }
0x1029   : > { %5328 = vadd.xlane.f32.xlu1 %v5327_v57 }
0x102a   : > { %6014 = vmax.xlane.f32.xlu0 %v6013_v2  ;;  %v11294_v18 = vadd.f32 %v6010_v14, %v6008_v38 }
0x102c   : > { %v6016_v22 = vsel %vm928_vm2, %v11294_v18, -inf }
0x102d   : > { %5334 = vadd.xlane.f32.xlu1 %v5333_v40 }
0x1031   : > { %5340 = vadd.xlane.f32.xlu1 %v5339_v24 }
0x1035   : > { %5346 = vadd.xlane.f32.xlu1 %v5345_v8 }
0x1039   : > { %5352 = vadd.xlane.f32.xlu1 %v5351_v0 }
0x103d   : > { %5358 = vadd.xlane.f32.xlu1 %v5357_v25 }
0x1041   : > { %6017 = vmax.xlane.f32.xlu1 %v6016_v22 }
0x1052   : > { %3003 = vperm.xlu1 %7552, %v2954_v39  }
0x1056   : > { %3009 = vperm.xlu1 %7552, %v2956_v33   ;;  %v12500_v33 = vld [vmem:[#allocation82_spill] sm:$0xff] }
0x1057   : > { %v3042_v34 = vrot.slane %v12500_v33, %v12499_v32 }
0x105a   : > { %3015 = vperm.xlu1 %7552, %v2958_v49   ;;  %v12501_v49 = vld [vmem:[#allocation8_spill] sm:$0xff] }
0x105b   : > { %v11326_v44 = vpop.xlane.xlu0 %6791  ;;  %v3038_v35 = vrot.slane %v12505_v3, %v12501_v49  ;;  %v3056_v30 = vrot.slane %v12506_v53, %v12501_v49 }
0x105e   : > { %3021 = vperm.xlu1 %7552, %v2960_v36   ;;  %v3047_v36 = vrot.slane %v12502_v41, %v12501_v49 }
0x105f   : > { %v11330_v51 = vpop.xlane.xlu0 %6797 }
0x1062   : > { %3187 = vperm.xlu1 %7552, %v512_v60  }
0x1063   : > { %v11334_v21 = vpop.xlane.xlu0 %4594 }
0x1066   : > { %3689 = vperm.xlu1 %7552, %v509_v46   ;;  %v12503_v46 = vld [vmem:[#allocation10_spill] sm:$0xff] }
0x1067   : > { %v11340_v52 = vpop.xlane.xlu0 %6803 }
0x106b   : > { %v11344_v54 = vpop.xlane.xlu0 %4600 }
0x106f   : > { %v11350_v16 = vpop.xlane.xlu0 %6809 }
0x1072   : > { %v11328_v56 = vpop.xlane.xlu1 %6788 }
0x1073   : > { %v11354_v26 = vpop.xlane.xlu0 %4606 }
0x1076   : > { %v11332_v28 = vpop.xlane.xlu1 %6794 }
0x1077   : > { %v11360_v11 = vpop.xlane.xlu0 %6815 }
0x107a   : > { %v11336_v58 = vpop.xlane.xlu1 %4591 }
0x107b   : > { %v11364_v57 = vpop.xlane.xlu0 %4612 }
0x107e   : > { %v11338_v1 = vpop.xlane.xlu1 %6800 }
0x107f   : > { %v11370_v2 = vpop.xlane.xlu0 %6821 }
0x1082   : > { %v11342_v4 = vpop.xlane.xlu1 %4597 }
0x1083   : > { %v11376_v40 = vpop.xlane.xlu0 %4618 }
0x1086   : > { %v11346_v14 = vpop.xlane.xlu1 %6806 }
0x1087   : > { %v11382_v24 = vpop.xlane.xlu0 %6827 }
0x108a   : > { %v11348_v20 = vpop.xlane.xlu1 %4603 }
0x108b   : > { %v11386_v13 = vpop.xlane.xlu0 %4624 }
0x108c   : > { %12495 = vst [vmem:[#allocation41_spill] sm:$0xff] %v11386_v13 }
0x108e   : > { %v11352_v42 = vpop.xlane.xlu1 %6812 }
0x108f   : > { %v11392_v61 = vpop.xlane.xlu0 %5319 }
0x1092   : > { %v11356_v37 = vpop.xlane.xlu1 %4609 }
0x1093   : > { %12488 = vst [vmem:[#allocation44_spill] sm:$0xff] %v11356_v37  ;;  %v11396_v38 = vpop.xlane.xlu0 %5325 }
0x1096   : > { %v11358_v55 = vpop.xlane.xlu1 %6818 }
0x1097   : > { %12489 = vst [vmem:[#allocation14_spill] sm:$0xff] %v11358_v55  ;;  %v11402_v25 = vpop.xlane.xlu0 %5331 }
0x109a   : > { %v11362_v29 = vpop.xlane.xlu1 %4615 }
0x109b   : > { %12490 = vst [vmem:[#allocation92_spill] sm:$0xff] %v11362_v29  ;;  %v11406_v59 = vpop.xlane.xlu0 %5337  ;;  %v12509_v29 = vld [vmem:[#allocation48_spill] sm:$0xff] }
0x109c   : > { %v3069_v3 = vrot.slane %v12509_v29, %v12499_v32 }
0x109e   : > { %v11366_v5 = vpop.xlane.xlu1 %6824 }
0x109f   : > { %12491 = vst [vmem:[#allocation84_spill] sm:$0xff] %v11366_v5  ;;  %v11422_v33 = vpop.xlane.xlu0 %5343  ;;  %v12508_v5 = vld [vmem:[#allocation26_spill] sm:$0xff] }
0x10a2   : > { %v11368_v47 = vpop.xlane.xlu1 %4621 }
0x10a3   : > { %12492 = vst [vmem:[#allocation97_spill] sm:$0xff] %v11368_v47 }
0x10a6   : > { %v11372_v9 = vpop.xlane.xlu1 %6830 }
0x10a7   : > { %12493 = vst [vmem:[#allocation62_spill] sm:$0xff] %v11372_v9 }
0x10a9   : > { %v11374_v15 = vpop.f32.mrf.mxu0 }
0x10aa   : > { %12494 = vst [vmem:[#allocation99_spill] sm:$0xff] %v11374_v15  ;;  %v11378_v31 = vpop.xlane.xlu1 %5316  ;;  %v12504_v15 = vld [vmem:[#allocation36_spill] sm:$0xff] }
0x10ab   : > { %v7518_v23 = vpop.f32.mrf.mxu0  ;;  %v3033_v9 = vrot.slane %v12504_v15, %v12499_v32 }
0x10ac   : > { %v3029_v23 = vrot.slane %v12503_v46, %v12501_v49  ;;  %v3043_v46 = vsel %vm1456_vm4, %v3042_v34, %v3038_v35 }
0x10ae   : > { %v11380_v17 = vpop.xlane.xlu1 %5322 }
0x10b2   : > { %v11384_v27 = vpop.xlane.xlu1 %5328 }
0x10b6   : > { %v11388_v45 = vpop.xlane.xlu1 %5334 }
0x10ba   : > { %v11390_v8 = vpop.xlane.xlu1 %5340 }
0x10be   : > { %v11394_v7 = vpop.xlane.xlu1 %5346 }
0x10bf   : > { %12496 = vst [vmem:[#allocation95_spill] sm:$0xff] %v11394_v7  ;;  %v3034_v7 = vsel %vm1456_vm4, %v3033_v9, %v3029_v23  ;;  %v12512_v23 = vld [vmem:[#allocation79_spill] sm:$0xff] }
0x10c0   : > { %v3098_v34 = vsel %vm1521_vm5, %v3043_v46, %v3034_v7 }
0x10c2   : > { %v11398_v0 = vpop.xlane.xlu1 %5352 }
0x10c3   : > { %12497 = vst [vmem:[#allocation86_spill] sm:$0xff] %v11398_v0  ;;  %v3060_v0 = vrot.slane %v12508_v5, %v12499_v32  ;;  %v12511_v5 = vld [vmem:[#allocation77_spill] sm:$0xff] }
0x10c4   : > { %v3087_v35 = vrot.slane %v12511_v5, %v12499_v32 }
0x10c6   : > { %v11400_v10 = vpop.xlane.xlu1 %5358 }
0x10c7   : > { %12498 = vst [vmem:[#allocation96_spill] sm:$0xff] %v11400_v10  ;;  %v12507_v10 = vld [vmem:[#allocation46_spill] sm:$0xff] }
0x10c8   : > { %v3051_v47 = vrot.slane %v12507_v10, %v12499_v32  ;;  %v12510_v10 = vld [vmem:[#allocation29_spill] sm:$0xff] }
0x10c9   : > { %v3078_v37 = vrot.slane %v12510_v10, %v12499_v32 }
0x10ca   : > { %v11404_v22 = vpop.xlane.xlu1 %6017  ;;  %v3052_v55 = vsel %vm1456_vm4, %v3051_v47, %v3047_v36  ;;  %v11444_v36 = vpop.xlane.xlu0 %5349 }
0x10cb   : > { %v3099_v29 = vsel %vm1523_vm6, %v3052_v55, %v3098_v34  ;;  %v12515_v34 = vld [vmem:[#allocation13_spill] sm:$0xff] }
0x10ce   : > { %v3004_v39 = vpop.permute.xlu1 %3003 }
0x10cf   : > { %v3065_v41 = vrot.slane %v3004_v39, %v12501_v49  ;;  %v3061_v39 = vsel %vm1456_vm4, %v3060_v0, %v3056_v30 }
0x10d0   : > { %v3100_v9 = vsel %vm1525_vm7, %v3061_v39, %v3099_v29  ;;  %v11458_v39 = vpop.xlane.xlu0 %5355  ;;  %v12516_v29 = vld [vmem:[#allocation23_spill] sm:$0xff] }
0x10d2   : > { %v3010_v60 = vpop.permute.xlu1 %3009 }
0x10d3   : > { %v3074_v15 = vrot.slane %v3010_v60, %v12501_v49  ;;  %v3070_v60 = vsel %vm1456_vm4, %v3069_v3, %v3065_v41  ;;  %v12514_v3 = vld [vmem:[#allocation43_spill] sm:$0xff] }
0x10d4   : > { %v3101_v10 = vsel %vm1527_vm8, %v3070_v60, %v3100_v9  ;;  %v12517_v9 = vld [vmem:[#allocation27_spill] sm:$0xff] }
0x10d5   : > { %v3079_v47 = vsel %vm1456_vm4, %v3078_v37, %v3074_v15 }
0x10d6   : > { %v3016_v53 = vpop.permute.xlu1 %3015  ;;  %v3102_v41 = vsel %vm1529_vm9, %v3079_v47, %v3101_v10 }
0x10d7   : > { %v3083_v13 = vrot.slane %v3016_v53, %v12501_v49  ;;  %v3096_v53 = vrot.slane %v12512_v23, %v12499_v32 }
0x10d9   : > { %v3088_v30 = vsel %vm1456_vm4, %v3087_v35, %v3083_v13 }
0x10da   : > { %v3022_v0 = vpop.permute.xlu1 %3021  ;;  %v3103_v55 = vsel %vm1531_vm10, %v3088_v30, %v3102_v41  ;;  %v12521_v41 = vld [vmem:[#allocation33_spill] sm:$0xff] }
0x10db   : > { %v3092_v7 = vrot.slane %v3022_v0, %v12501_v49  ;;  %v12518_v0 = vld [vmem:[#allocation15_spill] sm:$0xff] }
0x10dd   : > { %v3097_v37 = vsel %vm1456_vm4, %v3096_v53, %v3092_v7  ;;  %v12519_v53 = vld [vmem:[#allocation16_spill] sm:$0xff]  ;;  %v11476_v7 = vpop.xlane.xlu0 %5361 }
0x10de   : > { %v3104_v46 = vsel %vm1533_vm11, %v3097_v37, %v3103_v55  ;;  %v11455_v15 = vpop.permute.xlu1 %3187  ;;  %12520 = vst [vmem:[#allocation100_spill] sm:$0xff] %v11476_v7  ;;  %v12522_v37 = vld [vmem:[#allocation11_spill] sm:$0xff]  ;;  %v12532_v7 = vld [vmem:[#allocation20_spill] sm:$0xff] }
0x10df   : > { %12513 = vst [vmem:[#allocation40_spill] sm:$0xff] %v11455_v15  ;;  %v3182_v13 = vadd.f32 %v12514_v3, %v3104_v46  ;;  %v12523_v3 = vld [vmem:[#allocation18_spill] sm:$0xff] }
0x10e1   : > { %v3190_v5 = vadd.f32 %v11455_v15, %v3182_v13  ;;  %v12528_v15 = vld [vmem:[#allocation19_spill] sm:$0xff] }
0x10e2   : > { %v3690_v35 = vpop.permute.xlu1 %3689 }
0x10e3   : > { %3191 = vst.msk [vmem:[%s10083_s20 + $0x10] sm:$0xff] %vm928_vm2, %v3190_v5  ;;  %v11464_v60 = vrot.slane %v3690_v35, %v12515_v34  ;;  %v11471_v23 = vrot.slane %v3690_v35, %v12518_v0  ;;  %v11474_v10 = vrot.slane %v3690_v35, %v12519_v53  ;;  %v11483_v13 = vrot.slane %v3690_v35, %v12523_v3  ;;  %v12524_v5 = vld [vmem:[#allocation21_spill] sm:$0xff]  ;;  %v12527_v53 = vld [vmem:[#allocation31_spill] sm:$0xff] }
0x10e4   : > { %v11486_v34 = vrot.slane %v3690_v35, %v12524_v5  ;;  %v12531_v5 = vld [vmem:[#allocation109_spill] sm:$0xff]  ;;  %v11506_v49 = vrot.slane %v3690_v35, %v12532_v7 }
0x10e5   : > { %v3732_v47 = vmul.f32 %v11464_v60, %v12516_v29  ;;  %v3731_v30 = vmul.f32 %v11464_v60, %v12517_v9  ;;  %v3733_v55 = vmul.f32 %v11471_v23, %v12521_v41  ;;  %v3738_v46 = vmul.f32 %v11474_v10, %v12522_v37  ;;  %v6834_v29 = vpop.xlane.xlu0 %6833  ;;  %v12525_v9 = vld [vmem:[#allocation17_spill] sm:$0xff] }
0x10e6   : > { %v11489_v0 = vrot.slane %v3690_v35, %v12525_v9  ;;  %v3740_v41 = vmul.f32 %v11483_v13, %v12527_v53  ;;  %v11496_v37 = vrot.slane %v3690_v35, %v12528_v15  ;;  %v11499_v3 = vmul.f32 %v6834_v29, %v11486_v34  ;;  %v12534_v53 = vld [vmem:[#allocation110_spill] sm:$0xff]  ;;  %v12537_v35 = vld [vmem:[#allocation28_spill] sm:$0xff] }
0x10e7   : > { %3767 = vperm.xlu1 %7552, %v3732_v47   ;;  %3764 = vperm.xlu0 %7551, %v3731_v30   ;;  %v12526_v47 = vld [vmem:[#allocation38_spill] sm:$0xff]  ;;  %v3744_v29 = vmul.f32 %v11506_v49, %v12534_v53  ;;  %v4627_v7 = vmul.f32 %v11324_v50, %v12537_v35  ;;  %v12540_v53 = vld [vmem:[#allocation72_spill] sm:$0xff]  ;;  %v3745_v50 = vmul.f32 %v11486_v34, %v11320_v48 }
0x10e8   : > { %v3734_v30 = vmul.f32 %v11471_v23, %v12526_v47  ;;  %12529 = vst [vmem:[#allocation88_spill] sm:$0xff] %v11499_v3  ;;  %v3742_v9 = vmul.f32 %v11496_v37, %v12531_v5  ;;  %v12533_v47 = vld [vmem:[#allocation39_spill] sm:$0xff] }
0x10e9   : > { %v3736_v15 = vmul.f32 %v11489_v0, %v12533_v47 }
0x10eb   : > { %3770 = vperm.xlu1 %7552, %v3733_v55   ;;  %3785 = vperm.xlu0 %7551, %v3738_v46   ;;  %v12530_v55 = vld [vmem:[#allocation78_spill] sm:$0xff] }
0x10ec   : > { %v3735_v46 = vmul.f32 %v11489_v0, %v12530_v55  ;;  %v12536_v55 = vld [vmem:[#allocation111_spill] sm:$0xff] }
0x10ed   : > { %v3746_v3 = vmul.f32 %v11486_v34, %v12536_v55  ;;  %v12541_v55 = vld [vmem:[#allocation24_spill] sm:$0xff] }
0x10ee   : > { %v4628_v48 = vmul.f32 %v11318_v43, %v12541_v55 }
0x10ef   : > { %3773 = vperm.xlu1 %7552, %v3734_v30   ;;  %3791 = vperm.xlu0 %7551, %v3740_v41   ;;  %v12535_v30 = vld [vmem:[#allocation80_spill] sm:$0xff] }
0x10f0   : > { %v3737_v41 = vmul.f32 %v11474_v10, %v12535_v30  ;;  %v6015_v30 = vpop.xlane.xlu0 %6014 }
0x10f3   : > { %3776 = vperm.xlu1 %7552, %v3735_v46   ;;  %3797 = vperm.xlu0 %7551, %v3742_v9   ;;  %v12538_v46 = vld [vmem:[#allocation81_spill] sm:$0xff]  ;;  %v12539_v9 = vld [vmem:[#allocation71_spill] sm:$0xff] }
0x10f4   : > { %v3739_v5 = vmul.f32 %v11483_v13, %v12538_v46  ;;  %v5363_v47 = vmul.f32 %v11378_v31, %v12539_v9  ;;  %v513_v31 = vld [vmem:[%s11981_s10 + $0x18] sm:$0xff]  ;;  %v4629_v46 = vmul.f32 %v11322_v62, %v12541_v55 }
0x10f7   : > { %3779 = vperm.xlu1 %7552, %v3736_v15   ;;  %3803 = vperm.xlu0 %7551, %v3744_v29   ;;  %v3741_v15 = vmul.f32 %v11496_v37, %v11304_v19  ;;  %v5365_v29 = vmul.f32 %v11380_v17, %v12540_v53  ;;  %v6020_v19 = vsub.f32 %v11294_v18, %v11404_v22 }
0x10f8   : > { %v4626_v17 = vmul.f32 %v11308_v6, %v12537_v35  ;;  %v5364_v18 = vmul.f32 %v11392_v61, %v12539_v9  ;;  %v6836_v22 = vmul.f32 %v11326_v44, %v11464_v60  ;;  %v6838_v61 = vmul.f32 %v11330_v51, %v11471_v23  ;;  %v12543_v9 = vld [vmem:[#allocation73_spill] sm:$0xff] }
0x10f9   : > { %v6840_v44 = vmul.f32 %v11340_v52, %v11489_v0  ;;  %v12546_v52 = vld [vmem:[#allocation45_spill] sm:$0xff] }
0x10fb   : > { %3782 = vperm.xlu1 %7552, %v3737_v41   ;;  %3809 = vperm.xlu0 %7551, %v3746_v3   ;;  %v3743_v3 = vmul.f32 %v11506_v49, %v11313_v12  ;;  %v6019_v12 = vsub.f32 %v11262_v63, %v6015_v30  ;;  %v6023_v41 = vmul.f32 1.442695, %v6020_v19  ;;  %v5366_v63 = vmul.f32 %v11396_v38, %v12540_v53  ;;  %v12542_v38 = vld [vmem:[#allocation34_spill] sm:$0xff] }
0x10fd   : > { %7609 = vpow2.f32 %v6023_v41 }
0x10ff   : > { %3788 = vperm.xlu1 %7552, %v3739_v5   ;;  %4662 = vperm.xlu0 %7551, %v4627_v7   ;;  %v6021_v7 = vmul.f32 1.442695, %v6019_v12  ;;  %v4631_v5 = vmul.f32 %v11334_v21, %v12542_v38  ;;  %v6842_v21 = vmul.f32 %v11350_v16, %v11474_v10  ;;  %v6839_v16 = vmul.f32 %v11338_v1, %v11489_v0 }
0x1100   : > { %v6846_v1 = vmul.f32 %v11370_v2, %v11496_v37  ;;  %v4634_v0 = vmul.f32 %v11348_v20, %v12546_v52  ;;  %v12552_v20 = vld [vmem:[#allocation65_spill] sm:$0xff] }
0x1101   : > { %7611 = vpow2.f32 %v6021_v7 }
0x1103   : > { %3794 = vperm.xlu1 %7552, %v3741_v15   ;;  %5396 = vperm.xlu0 %7551, %v5363_v47   ;;  %v5368_v47 = vmul.f32 %v11402_v25, %v12543_v9  ;;  %v12544_v15 = vld [vmem:[#allocation61_spill] sm:$0xff]  ;;  %v6837_v25 = vmul.f32 %v11332_v28, %v11471_v23  ;;  %v6844_v28 = vmul.f32 %v11360_v11, %v11483_v13 }
0x1104   : > { %v4633_v53 = vmul.f32 %v11344_v54, %v12544_v15  ;;  %v4635_v54 = vmul.f32 %v11354_v26, %v12546_v52  ;;  %v12548_v26 = vld [vmem:[#allocation64_spill] sm:$0xff]  ;;  %v4632_v23 = vmul.f32 %v11342_v4, %v12544_v15  ;;  %v6841_v11 = vmul.f32 %v11346_v14, %v11474_v10 }
0x1105   : > { %v6848_v14 = vmul.f32 %v11382_v24, %v11506_v49 }
0x1107   : > { %3800 = vperm.xlu1 %7552, %v3743_v3   ;;  %5402 = vperm.xlu0 %7551, %v5365_v29   ;;  %v12545_v29 = vld [vmem:[#allocation74_spill] sm:$0xff]  ;;  %v6835_v3 = vmul.f32 %v11328_v56, %v11464_v60  ;;  %v5367_v60 = vmul.f32 %v11384_v27, %v12543_v9 }
0x1108   : > { %v5370_v51 = vmul.f32 %v11406_v59, %v12545_v29  ;;  %v12547_v59 = vld [vmem:[#allocation76_spill] sm:$0xff] }
0x1109   : > { %v5372_v56 = vmul.f32 %v11422_v33, %v12547_v59  ;;  %v12549_v33 = vld [vmem:[#allocation32_spill] sm:$0xff]  ;;  %v5371_v19 = vmul.f32 %v11390_v8, %v12547_v59 }
0x110a   : > { %v11546_v6 = vpop.eup %7609  ;;  %v5374_v27 = vmul.f32 %v11444_v36, %v12549_v33  ;;  %v12551_v36 = vld [vmem:[#allocation53_spill] sm:$0xff] }
0x110b   : > { %3806 = vperm.xlu1 %7552, %v3745_v50   ;;  %v6028_v43 = vsel %vm928_vm2, %v11546_v6, 0.0  ;;  %v4630_v50 = vmul.f32 %v11336_v58, %v12542_v38  ;;  %v4637_v58 = vmul.f32 %v11364_v57, %v12548_v26  ;;  %v12550_v57 = vld [vmem:[#allocation25_spill] sm:$0xff] }
0x110c   : > { %v4639_v4 = vmul.f32 %v11376_v40, %v12550_v57  ;;  %v6843_v40 = vmul.f32 %v11352_v42, %v11483_v13  ;;  %v12556_v42 = vld [vmem:[#allocation14_spill] sm:$0xff] }
0x110d   : > { %v6845_v13 = vmul.f32 %v12556_v42, %v11496_v37 }
0x110e   : > { %v11552_v35 = vpop.eup %7611 }
0x110f   : > { %3972 = vperm.xlu1 %7552, %v513_v31   ;;  %v6025_v62 = vsel %vm928_vm2, %v11552_v35, 0.0  ;;  %v5369_v31 = vmul.f32 %v11388_v45, %v12545_v29  ;;  %v5376_v45 = vmul.f32 %v11458_v39, %v12551_v36  ;;  %v12554_v39 = vld [vmem:[#allocation44_spill] sm:$0xff] }
0x1110   : > { %v4636_v41 = vmul.f32 %v12554_v39, %v12548_v26 }
0x1113   : > { %4659 = vperm.xlu1 %7552, %v4626_v17   ;;  %v12553_v17 = vld [vmem:[#allocation41_spill] sm:$0xff] }
0x1114   : > { %v4641_v12 = vmul.f32 %v12553_v17, %v12552_v20  ;;  %v12560_v17 = vld [vmem:[#allocation47_spill] sm:$0xff] }
0x1117   : > { %4665 = vperm.xlu1 %7552, %v4628_v48   ;;  %v12555_v48 = vld [vmem:[#allocation95_spill] sm:$0xff] }
0x1118   : > { %v5373_v24 = vmul.f32 %v12555_v48, %v12549_v33 }
0x111b   : > { %4668 = vperm.xlu1 %7552, %v4629_v46  }
0x111f   : > { %5399 = vperm.xlu1 %7552, %v5364_v18  }
0x1123   : > { %5405 = vperm.xlu1 %7552, %v5366_v63   ;;  %v12557_v63 = vld [vmem:[#allocation92_spill] sm:$0xff] }
0x1126   : > { %6029 = vadd.xlane.f32.xlu0 %v6028_v43  ;;  %v4638_v43 = vmul.f32 %v12557_v63, %v12550_v57 }
0x1127   : > { %6871 = vperm.xlu1 %7552, %v6836_v22  }
0x112a   : > { %6026 = vadd.xlane.f32.xlu0 %v6025_v62 }
0x112b   : > { %6877 = vperm.xlu1 %7552, %v6838_v61   ;;  %v12558_v61 = vld [vmem:[#allocation86_spill] sm:$0xff] }
0x112c   : > { %v5375_v38 = vmul.f32 %v12558_v61, %v12551_v36 }
0x112f   : > { %4674 = vperm.xlu1 %7552, %v4631_v5  }
0x1133   : > { %5411 = vperm.xlu1 %7552, %v5368_v47  }
0x1137   : > { %6883 = vperm.xlu1 %7552, %v6840_v44  }
0x113b   : > { %4680 = vperm.xlu1 %7552, %v4633_v53   ;;  %v12559_v53 = vld [vmem:[#allocation8_spill] sm:$0xff] }
0x113f   : > { %5417 = vperm.xlu1 %7552, %v5370_v51  }
0x1140   : > { %6868 = vperm.xlu0 %7551, %v6835_v3  }
0x1143   : > { %6889 = vperm.xlu1 %7552, %v6842_v21  }
0x1144   : > { %6874 = vperm.xlu0 %7551, %v6837_v25  }
0x1147   : > { %4686 = vperm.xlu1 %7552, %v4635_v54  }
0x1148   : > { %4671 = vperm.xlu0 %7551, %v4630_v50  }
0x114b   : > { %5423 = vperm.xlu1 %7552, %v5372_v56  }
0x114c   : > { %5408 = vperm.xlu0 %7551, %v5367_v60  }
0x114f   : > { %6895 = vperm.xlu1 %7552, %v6844_v28  }
0x1150   : > { %6880 = vperm.xlu0 %7551, %v6839_v16  }
0x1153   : > { %4692 = vperm.xlu1 %7552, %v4637_v58  }
0x1154   : > { %4677 = vperm.xlu0 %7551, %v4632_v23  }
0x1157   : > { %5429 = vperm.xlu1 %7552, %v5374_v27  }
0x1158   : > { %5414 = vperm.xlu0 %7551, %v5369_v31  }
0x115b   : > { %6901 = vperm.xlu1 %7552, %v6846_v1  }
0x115c   : > { %6886 = vperm.xlu0 %7551, %v6841_v11  }
0x115f   : > { %4698 = vperm.xlu1 %7552, %v4639_v4  }
0x1160   : > { %4683 = vperm.xlu0 %7551, %v4634_v0  }
0x1162   : > { %v3768_v2 = vpop.permute.xlu1 %3767  ;;  %v3765_v10 = vpop.permute.xlu0 %3764 }
0x1163   : > { %5435 = vperm.xlu1 %7552, %v5376_v45   ;;  %v3818_v37 = vrot.slane %v3768_v2, %v12499_v32  ;;  %v3814_v29 = vrot.slane %v3765_v10, %v12559_v53 }
0x1164   : > { %5420 = vperm.xlu0 %7551, %v5371_v19  }
0x1165   : > { %v3819_v28 = vsel %vm1456_vm4, %v3818_v37, %v3814_v29 }
0x1166   : > { %v3771_v30 = vpop.permute.xlu1 %3770  ;;  %v3786_v55 = vpop.permute.xlu0 %3785 }
0x1167   : > { %6907 = vperm.xlu1 %7552, %v6848_v14   ;;  %v3823_v51 = vrot.slane %v3771_v30, %v12559_v53  ;;  %v3845_v52 = vrot.slane %v3786_v55, %v12499_v32 }
0x1168   : > { %6892 = vperm.xlu0 %7551, %v6843_v40  }
0x116a   : > { %v3774_v8 = vpop.permute.xlu1 %3773  ;;  %v3792_v46 = vpop.permute.xlu0 %3791 }
0x116b   : > { %4704 = vperm.xlu1 %7552, %v4641_v12   ;;  %v3827_v9 = vrot.slane %v3774_v8, %v12499_v32  ;;  %v3854_v59 = vrot.slane %v3792_v46, %v12499_v32 }
0x116c   : > { %4689 = vperm.xlu0 %7551, %v4636_v41  }
0x116d   : > { %v3828_v54 = vsel %vm1456_vm4, %v3827_v9, %v3823_v51 }
0x116e   : > { %v3777_v7 = vpop.permute.xlu1 %3776  ;;  %v3798_v62 = vpop.permute.xlu0 %3797  ;;  %v3883_v23 = vsel %vm1521_vm5, %v3828_v54, %v3819_v28 }
0x116f   : > { %v3832_v21 = vrot.slane %v3777_v7, %v12559_v53  ;;  %v3863_v16 = vrot.slane %v3798_v62, %v12499_v32 }
0x1170   : > { %5426 = vperm.xlu0 %7551, %v5373_v24  }
0x1172   : > { %v3780_v18 = vpop.permute.xlu1 %3779  ;;  %v3804_v44 = vpop.permute.xlu0 %3803 }
0x1173   : > { %v3836_v47 = vrot.slane %v3780_v18, %v12499_v32  ;;  %v3872_v33 = vrot.slane %v3804_v44, %v12499_v32 }
0x1174   : > { %6898 = vperm.xlu0 %7551, %v6845_v13  }
0x1175   : > { %v3837_v56 = vsel %vm1456_vm4, %v3836_v47, %v3832_v21 }
0x1176   : > { %v3783_v22 = vpop.permute.xlu1 %3782  ;;  %v3810_v27 = vpop.permute.xlu0 %3809  ;;  %v3884_v1 = vsel %vm1523_vm6, %v3837_v56, %v3883_v23 }
0x1177   : > { %v3841_v3 = vrot.slane %v3783_v22, %v12559_v53  ;;  %v3881_v36 = vrot.slane %v3810_v27, %v12499_v32  ;;  %v7762_v27 = vld [vmem:[%s11979_s8 + $0x8] sm:$0xff] }
0x1178   : > { %4695 = vperm.xlu0 %7551, %v4638_v43  }
0x1179   : > { %v3846_v26 = vsel %vm1456_vm4, %v3845_v52, %v3841_v3 }
0x117a   : > { %v3789_v5 = vpop.permute.xlu1 %3788  ;;  %v3885_v57 = vsel %vm1525_vm7, %v3846_v26, %v3884_v1  ;;  %v4663_v39 = vpop.permute.xlu0 %4662 }
0x117b   : > { %v3850_v25 = vrot.slane %v3789_v5, %v12559_v53  ;;  %v4713_v55 = vrot.slane %v4663_v39, %v12499_v32 }
0x117c   : > { %5432 = vperm.xlu0 %7551, %v5375_v38  }
0x117d   : > { %v3855_v31 = vsel %vm1456_vm4, %v3854_v59, %v3850_v25 }
0x117e   : > { %v3795_v15 = vpop.permute.xlu1 %3794  ;;  %v3886_v45 = vsel %vm1527_vm8, %v3855_v31, %v3885_v57  ;;  %v5397_v46 = vpop.permute.xlu0 %5396 }
0x117f   : > { %v3859_v50 = vrot.slane %v3795_v15, %v12559_v53  ;;  %v5446_v62 = vrot.slane %v5397_v46, %v12559_v53 }
0x1181   : > { %v3864_v11 = vsel %vm1456_vm4, %v3863_v16, %v3859_v50 }
0x1182   : > { %v3801_v60 = vpop.permute.xlu1 %3800  ;;  %v3887_v2 = vsel %vm1529_vm9, %v3864_v11, %v3886_v45  ;;  %v5403_v38 = vpop.permute.xlu0 %5402  ;;  %v12561_v11 = vld [vmem:[#allocation50_spill] sm:$0xff] }
0x1183   : > { %v3868_v58 = vrot.slane %v3801_v60, %v12559_v53  ;;  %v5455_v47 = vrot.slane %v5403_v38, %v12559_v53 }
0x1185   : > { %v3873_v4 = vsel %vm1456_vm4, %v3872_v33, %v3868_v58 }
0x1186   : > { %v3807_v0 = vpop.permute.xlu1 %3806  ;;  %v3888_v10 = vsel %vm1531_vm10, %v3873_v4, %v3887_v2  ;;  %v12563_v4 = vmov 0.0  }
0x1187   : > { %v3877_v19 = vrot.slane %v3807_v0, %v12559_v53 }
0x1189   : > { %v3882_v14 = vsel %vm1456_vm4, %v3881_v36, %v3877_v19  ;;  %v7763_v19 = vld [vmem:[%s11979_s8 + $0x18] sm:$0xff] }
0x118a   : > { %v11652_v30 = vpop.permute.xlu1 %3972  ;;  %v3889_v40 = vsel %vm1533_vm11, %v3882_v14, %v3888_v10 }
0x118b   : > { %v3967_v12 = vadd.f32 %v12560_v17, %v3889_v40 }
0x118d   : > { %v3975_v41 = vadd.f32 %v11652_v30, %v3967_v12  ;;  %v7764_v12 = vld [vmem:[%s11979_s8] sm:$0xff] }
0x118e   : > { %v4660_v8 = vpop.permute.xlu1 %4659 }
0x118f   : > { %3976 = vst.msk [vmem:[%s10083_s20 + $0x18] sm:$0xff] %vm928_vm2, %v3975_v41  ;;  %v4709_v48 = vrot.slane %v4660_v8, %v12559_v53  ;;  %v12564_v41 = vld [vmem:[#allocation49_spill] sm:$0xff] }
0x1191   : > { %v4714_v24 = vsel %vm1456_vm4, %v4713_v55, %v4709_v48 }
0x1192   : > { %v4666_v7 = vpop.permute.xlu1 %4665 }
0x1193   : > { %v4718_v42 = vrot.slane %v4666_v7, %v12559_v53  ;;  %v7765_v7 = vld [vmem:[%s11979_s8 + $0x28] sm:$0xff] }
0x1196   : > { %v4669_v18 = vpop.permute.xlu1 %4668 }
0x1197   : > { %v4722_v13 = vrot.slane %v4669_v18, %v12499_v32 }
0x1199   : > { %v4723_v63 = vsel %vm1456_vm4, %v4722_v13, %v4718_v42  ;;  %v7766_v13 = vld [vmem:[%s11979_s8 + $0x10] sm:$0xff] }
0x119a   : > { %v4778_v43 = vsel %vm1521_vm5, %v4723_v63, %v4714_v24  ;;  %v5400_v22 = vpop.permute.xlu1 %5399 }
0x119b   : > { %v5450_v61 = vrot.slane %v5400_v22, %v12499_v32 }
0x119d   : > { %v5451_v5 = vsel %vm1456_vm4, %v5450_v61, %v5446_v62 }
0x119e   : > { %v5406_v9 = vpop.permute.xlu1 %5405 }
0x119f   : > { %v5459_v44 = vrot.slane %v5406_v9, %v12499_v32 }
0x11a1   : > { %v5460_v15 = vsel %vm1456_vm4, %v5459_v44, %v5455_v47 }
0x11a2   : > { %v5515_v37 = vsel %vm1521_vm5, %v5460_v15, %v5451_v5  ;;  %v6872_v29 = vpop.permute.xlu1 %6871  ;;  %v7767_v5 = vld [vmem:[%s11979_s8 + $0x38] sm:$0xff] }
0x11a3   : > { %v6922_v59 = vrot.slane %v6872_v29, %v12499_v32  ;;  %v7768_v29 = vld [vmem:[%s11979_s8 + $0x20] sm:$0xff] }
0x11a6   : > { %v6878_v51 = vpop.permute.xlu1 %6877 }
0x11a7   : > { %v6931_v23 = vrot.slane %v6878_v51, %v12499_v32 }
0x11aa   : > { %v4675_v3 = vpop.permute.xlu1 %4674 }
0x11ab   : > { %v4731_v17 = vrot.slane %v4675_v3, %v12499_v32 }
0x11ae   : > { %v5412_v25 = vpop.permute.xlu1 %5411 }
0x11af   : > { %v6030_v21 = vpop.xlane.xlu0 %6029  ;;  %v5468_v22 = vrot.slane %v5412_v25, %v12499_v32 }
0x11b0   : > { %7613 = vrcp.f32 %v6030_v21 }
0x11b2   : > { %v6884_v54 = vpop.permute.xlu1 %6883 }
0x11b3   : > { %v6027_v52 = vpop.xlane.xlu0 %6026  ;;  %v6940_v3 = vrot.slane %v6884_v54, %v12499_v32 }
0x11b4   : > { %7615 = vrcp.f32 %v6027_v52 }
0x11b6   : > { %v11675_v28 = vpop.permute.xlu1 %4680 }
0x11ba   : > { %v11701_v14 = vpop.permute.xlu1 %5417 }
0x11bb   : > { %v6869_v50 = vpop.permute.xlu0 %6868 }
0x11bc   : > { %v6918_v56 = vrot.slane %v6869_v50, %v12559_v53 }
0x11bd   : > { %v7614_v60 = vpop.eup %7613 }
0x11be   : > { %v11678_v16 = vmul.f32 %v7614_v60, %v11546_v6  ;;  %v6923_v26 = vsel %vm1456_vm4, %v6922_v59, %v6918_v56  ;;  %v12562_v6 = vld [vmem:[#allocation42_spill] sm:$0xff]  ;;  %v6890_v61 = vpop.permute.xlu1 %6889 }
0x11bf   : > { %v6875_v58 = vpop.permute.xlu0 %6874  ;;  %v4115_v57 = vmul.f32 %v12562_v6, %v12561_v11 }
0x11c0   : > { %v6927_v33 = vrot.slane %v6875_v58, %v12559_v53  ;;  %7501 = vmatpush3.xpose.msk.msra.mxu1 %vm928_vm2, %v11678_v16  ;;  %v6036_v31 = vmul.f32 %v7762_v27, %v11678_v16  ;;  %v6038_v2 = vmul.f32 %v7763_v19, %v11678_v16  ;;  %v6040_v46 = vmul.f32 %v7765_v7, %v11678_v16 }
0x11c1   : > { %v7616_v1 = vpop.eup %7615  ;;  %7502 = vmatprep.subr.mxu1 %v12563_v4  ;;  %v4127_v8 = vadd.f32 %v4115_v57, %v12564_v41  ;;  %v6042_v9 = vmul.f32 %v7767_v5, %v11678_v16  ;;  %v7774_v41 = vld [vmem:[%s11979_s8 + $0x50] sm:$0xff] }
0x11c2   : > { %v11693_v0 = vmul.f32 %v7616_v1, %v11552_v35  ;;  %v6932_v36 = vsel %vm1456_vm4, %v6931_v23, %v6927_v33  ;;  %v6054_v45 = vsel %vm928_vm2, %v6036_v31, 0.0  ;;  %v6060_v48 = vsel %vm928_vm2, %v6038_v2, 0.0  ;;  %v4687_v59 = vpop.permute.xlu1 %4686  ;;  %v7771_v1 = vld [vmem:[%s11979_s8 + $0x58] sm:$0xff] }
0x11c3   : > { %v6987_v10 = vsel %vm1521_vm5, %v6932_v36, %v6923_v26  ;;  %6055 = vadd.xlane.f32.xlu0 %v6054_v45  ;;  %v4672_v40 = vpop.permute.xlu0 %4671  ;;  %v6072_v52 = vsel %vm928_vm2, %v6042_v9, 0.0  ;;  %v7770_v26 = vld [vmem:[%s11979_s8 + $0x30] sm:$0xff]  ;;  %v4740_v23 = vrot.slane %v11675_v28, %v12499_v32  ;;  %v6046_v11 = vmul.f32 %v7771_v1, %v11678_v16  ;;  %v7772_v28 = vld [vmem:[%s11979_s8 + $0x40] sm:$0xff] }
0x11c4   : > { %v4727_v35 = vrot.slane %v4672_v40, %v12559_v53  ;;  %7503 = vmatpush3.xpose.msk.msra.mxu1 %vm928_vm2, %v11693_v0  ;;  %v6035_v39 = vmul.f32 %v7764_v12, %v11693_v0  ;;  %v6037_v63 = vmul.f32 %v7766_v13, %v11693_v0  ;;  %v6039_v51 = vmul.f32 %v7768_v29, %v11693_v0 }
0x11c5   : > { %v6041_v58 = vmul.f32 %v7770_v26, %v11693_v0  ;;  %v6043_v36 = vmul.f32 %v7772_v28, %v11693_v0  ;;  %v5477_v45 = vrot.slane %v11701_v14, %v12499_v32  ;;  %v6084_v40 = vsel %vm928_vm2, %v6046_v11, 0.0  ;;  %v12565_v11 = vld [vmem:[#allocation55_spill] sm:$0xff]  ;;  %v12567_v28 = vld [vmem:[#allocation84_spill] sm:$0xff] }
0x11c6   : > { %v4732_v55 = vsel %vm1456_vm4, %v4731_v17, %v4727_v35  ;;  %v6051_v24 = vsel %vm928_vm2, %v6035_v39, 0.0  ;;  %v6057_v44 = vsel %vm928_vm2, %v6037_v63, 0.0  ;;  %v6063_v60 = vsel %vm928_vm2, %v6039_v51, 0.0  ;;  %v5424_v2 = vpop.permute.xlu1 %5423  ;;  %v7773_v17 = vld [vmem:[%s11979_s8 + $0x68] sm:$0xff] }
0x11c7   : > { %v4779_v18 = vsel %vm1523_vm6, %v4732_v55, %v4778_v43  ;;  %6061 = vadd.xlane.f32.xlu0 %v6060_v48  ;;  %7505 = vmatmul.mubr.msk.f32.vlgmr.msra.gmra.mxu1 %vm928_vm2, %v4127_v8  ;;  %v5409_v42 = vpop.permute.xlu0 %5408  ;;  %v6066_v43 = vsel %vm928_vm2, %v6040_v46, 0.0  ;;  %v6069_v57 = vsel %vm928_vm2, %v6041_v58, 0.0  ;;  %v6048_v35 = vmul.f32 %v7773_v17, %v11678_v16  ;;  %v7775_v46 = vld [vmem:[%s11979_s8 + $0x78] sm:$0xff] }
0x11c8   : > { %6052 = vadd.xlane.f32.xlu1 %v6051_v24  ;;  %v5464_v62 = vrot.slane %v5409_v42, %v12559_v53  ;;  %v6075_v39 = vsel %vm928_vm2, %v6043_v36, 0.0  ;;  %v6045_v8 = vmul.f32 %v7774_v41, %v11693_v0  ;;  %v6949_v55 = vrot.slane %v6890_v61, %v12499_v32  ;;  %v12570_v41 = vld [vmem:[#allocation60_spill] sm:$0xff] }
0x11c9   : > { %v6090_v7 = vsel %vm928_vm2, %v6048_v35, 0.0  ;;  %v5486_v51 = vrot.slane %v5424_v2, %v12499_v32  ;;  %v6847_v36 = vmul.f32 %v12567_v28, %v11506_v49  ;;  %v12569_v2 = vld [vmem:[#allocation96_spill] sm:$0xff] }
0x11ca   : > { %v5469_v38 = vsel %vm1456_vm4, %v5468_v22, %v5464_v62  ;;  %v6896_v42 = vpop.permute.xlu1 %6895  ;;  %v6081_v63 = vsel %vm928_vm2, %v6045_v8, 0.0  ;;  %v7776_v62 = vld [vmem:[%s11979_s8 + $0x60] sm:$0xff] }
0x11cb   : > { %v5516_v47 = vsel %vm1523_vm6, %v5469_v38, %v5515_v37  ;;  %6067 = vadd.xlane.f32.xlu0 %v6066_v43  ;;  %v6881_v15 = vpop.permute.xlu0 %6880  ;;  %v7769_v37 = vld [vmem:[%s11979_s8 + $0x48] sm:$0xff]  ;;  %v6047_v61 = vmul.f32 %v7776_v62, %v11693_v0  ;;  %v4749_v38 = vrot.slane %v4687_v59, %v12499_v32  ;;  %v6958_v59 = vrot.slane %v6896_v42, %v12499_v32  ;;  %v12572_v42 = vld [vmem:[#allocation52_spill] sm:$0xff] }
0x11cc   : > { %6058 = vadd.xlane.f32.xlu1 %v6057_v44  ;;  %v6936_v21 = vrot.slane %v6881_v15, %v12559_v53  ;;  %v6044_v50 = vmul.f32 %v7769_v37, %v11678_v16  ;;  %v7777_v15 = vld [vmem:[%s11979_s8 + $0x70] sm:$0xff]  ;;  %v12578_v28 = vld [vmem:[#allocation88_spill] sm:$0xff] }
0x11cd   : > { %v6049_v29 = vmul.f32 %v7777_v15, %v11693_v0 }
0x11ce   : > { %v6941_v25 = vsel %vm1456_vm4, %v6940_v3, %v6936_v21  ;;  %v6078_v31 = vsel %vm928_vm2, %v6044_v50, 0.0  ;;  %v11812_v21 = vpop.permute.xlu1 %4692 }
0x11cf   : > { %v6988_v56 = vsel %vm1523_vm6, %v6941_v25, %v6987_v10  ;;  %6073 = vadd.xlane.f32.xlu0 %v6072_v52  ;;  %v4678_v54 = vpop.permute.xlu0 %4677  ;;  %v6093_v37 = vsel %vm928_vm2, %v6049_v29, 0.0 }
0x11d0   : > { %6064 = vadd.xlane.f32.xlu1 %v6063_v60  ;;  %v4736_v33 = vrot.slane %v4678_v54, %v12559_v53 }
0x11d2   : > { %v4741_v27 = vsel %vm1456_vm4, %v4740_v23, %v4736_v33  ;;  %v11822_v60 = vpop.permute.xlu1 %5429 }
0x11d3   : > { %v4780_v6 = vsel %vm1525_vm7, %v4741_v27, %v4779_v18  ;;  %6079 = vadd.xlane.f32.xlu0 %v6078_v31  ;;  %v5415_v4 = vpop.permute.xlu0 %5414  ;;  %v6050_v18 = vmul.f32 %v7775_v46, %v11678_v16 }
0x11d4   : > { %6070 = vadd.xlane.f32.xlu1 %v6069_v57  ;;  %v5473_v19 = vrot.slane %v5415_v4, %v12559_v53 }
0x11d5   : > { %v6096_v5 = vsel %vm928_vm2, %v6050_v18, 0.0 }
0x11d6   : > { %v5478_v10 = vsel %vm1456_vm4, %v5477_v45, %v5473_v19  ;;  %v6902_v23 = vpop.permute.xlu1 %6901  ;;  %v12568_v45 = vld [vmem:[#allocation97_spill] sm:$0xff] }
0x11d7   : > { %v5517_v12 = vsel %vm1525_vm7, %v5478_v10, %v5516_v47  ;;  %6085 = vadd.xlane.f32.xlu0 %v6084_v40  ;;  %v6887_v14 = vpop.permute.xlu0 %6886  ;;  %v6087_v47 = vsel %vm928_vm2, %v6047_v61, 0.0  ;;  %v6967_v27 = vrot.slane %v6902_v23, %v12499_v32  ;;  %v4640_v19 = vmul.f32 %v12568_v45, %v12552_v20  ;;  %v12573_v61 = vld [vmem:[#allocation70_spill] sm:$0xff] }
0x11d8   : > { %6076 = vadd.xlane.f32.xlu1 %v6075_v39  ;;  %v6945_v48 = vrot.slane %v6887_v14, %v12559_v53  ;;  %v5377_v10 = vmul.f32 %v12569_v2, %v12565_v11 }
0x11da   : > { %v6950_v24 = vsel %vm1456_vm4, %v6949_v55, %v6945_v48  ;;  %v11843_v40 = vpop.permute.xlu1 %4698  ;;  %v12571_v48 = vld [vmem:[#allocation22_spill] sm:$0xff] }
0x11db   : > { %v6989_v13 = vsel %vm1525_vm7, %v6950_v24, %v6988_v56  ;;  %6091 = vadd.xlane.f32.xlu0 %v6090_v7  ;;  %v4684_v22 = vpop.permute.xlu0 %4683 }
0x11dc   : > { %6082 = vadd.xlane.f32.xlu1 %v6081_v63  ;;  %v4745_v43 = vrot.slane %v4684_v22, %v12559_v53 }
0x11de   : > { %v4750_v16 = vsel %vm1456_vm4, %v4749_v38, %v4745_v43  ;;  %v11845_v17 = vpop.permute.xlu1 %5435 }
0x11df   : > { %v11803_v9 = vsel %vm1527_vm8, %v4750_v16, %v4780_v6  ;;  %6097 = vadd.xlane.f32.xlu0 %v6096_v5  ;;  %v5421_v44 = vpop.permute.xlu0 %5420  ;;  %v12566_v6 = vld [vmem:[#allocation100_spill] sm:$0xff] }
0x11e0   : > { %6088 = vadd.xlane.f32.xlu1 %v6087_v47  ;;  %v5482_v3 = vrot.slane %v5421_v44, %v12559_v53  ;;  %v5378_v57 = vmul.f32 %v12566_v6, %v12565_v11  ;;  %v12574_v47 = vld [vmem:[#allocation66_spill] sm:$0xff] }
0x11e2   : > { %v5487_v25 = vsel %vm1456_vm4, %v5486_v51, %v5482_v3  ;;  %v12575_v3 = vld [vmem:[#allocation67_spill] sm:$0xff] }
0x11e3   : > { %v11816_v52 = vsel %vm1527_vm8, %v5487_v25, %v5517_v12  ;;  %v6893_v50 = vpop.permute.xlu0 %6892  ;;  %v11849_v12 = vpop.permute.xlu1 %6907 }
0x11e4   : > { %6094 = vadd.xlane.f32.xlu1 %v6093_v37  ;;  %v6954_v0 = vrot.slane %v6893_v50, %v12559_v53  ;;  %v6976_v2 = vrot.slane %v11849_v12, %v12499_v32 }
0x11e6   : > { %v6959_v56 = vsel %vm1456_vm4, %v6958_v59, %v6954_v0  ;;  %v12576_v0 = vld [vmem:[#allocation68_spill] sm:$0xff] }
0x11e7   : > { %v6990_v54 = vsel %vm1527_vm8, %v6959_v56, %v6989_v13  ;;  %v11825_v26 = vpop.permute.xlu0 %4689  ;;  %v11853_v14 = vpop.permute.xlu1 %4704 }
0x11eb   : > { %v11827_v58 = vpop.permute.xlu0 %5426 }
0x11ef   : > { %v6899_v33 = vpop.permute.xlu0 %6898 }
0x11f0   : > { %v6963_v31 = vrot.slane %v6899_v33, %v12559_v53 }
0x11f2   : > { %v6968_v1 = vsel %vm1456_vm4, %v6967_v27, %v6963_v31  ;;  %v12577_v27 = vld [vmem:[#allocation69_spill] sm:$0xff] }
0x11f3   : > { %v11835_v4 = vsel %vm1529_vm9, %v6968_v1, %v6990_v54  ;;  %v11847_v35 = vpop.permute.xlu0 %4695 }
0x11f5   : > { %5441 = vperm.xlu1 %7552, %v5378_v57   ;;  %6904 = vperm.xlu0 %7551, %v6847_v36   ;;  %v4754_v57 = vrot.slane %v11825_v26, %v12559_v53  ;;  %v4763_v36 = vrot.slane %v11847_v35, %v12559_v53  ;;  %v12579_v26 = vld [vmem:[#allocation62_spill] sm:$0xff]  ;;  %v5491_v35 = vrot.slane %v11827_v58, %v12559_v53 }
0x11f7   : > { %v11851_v39 = vpop.permute.xlu0 %5432 }
0x11f8   : > { %v5500_v12 = vrot.slane %v11851_v39, %v12559_v53 }
0x11f9   : > { %4701 = vperm.xlu0 %7551, %v4640_v19   ;;  %v4758_v19 = vrot.slane %v11812_v21, %v12499_v32 }
0x11fd   : > { %5438 = vperm.xlu0 %7551, %v5377_v10  }
0x124c   : > { %v6056_v49 = vpop.xlane.xlu0 %6055 }
0x124d   : > { %v6100_v20 = vmul.f32 %v6056_v49, %v12570_v41  ;;  %v4767_v49 = vrot.slane %v11843_v40, %v12499_v32 }
0x124f   : > { %6135 = vperm.xlu1 %7552, %v6100_v20   ;;  %v4759_v20 = vsel %vm1456_vm4, %v4758_v19, %v4754_v57  ;;  %v4768_v21 = vsel %vm1456_vm4, %v4767_v49, %v4763_v36 }
0x1250   : > { %v6062_v8 = vpop.xlane.xlu0 %6061  ;;  %v4782_v39 = vsel %vm1529_vm9, %v4759_v20, %v11803_v9 }
0x1251   : > { %v6053_v55 = vpop.xlane.xlu1 %6052  ;;  %v6102_v24 = vmul.f32 %v6062_v8, %v12571_v48 }
0x1252   : > { %v6099_v7 = vmul.f32 %v6053_v55, %v12570_v41  ;;  %v6849_v41 = vmul.f32 %v12579_v26, %v11486_v34  ;;  %v5495_v34 = vrot.slane %v11822_v60, %v12499_v32 }
0x1253   : > { %6141 = vperm.xlu1 %7552, %v6102_v24   ;;  %v5504_v24 = vrot.slane %v11845_v17, %v12499_v32  ;;  %v12580_v17 = vld [vmem:[#allocation75_spill] sm:$0xff] }
0x1254   : > { %6132 = vperm.xlu0 %7551, %v6099_v7   ;;  %v6068_v46 = vpop.xlane.xlu0 %6067 }
0x1255   : > { %v6059_v18 = vpop.xlane.xlu1 %6058  ;;  %v6104_v13 = vmul.f32 %v6068_v46, %v12572_v42  ;;  %v4783_v46 = vsel %vm1531_vm10, %v4768_v21, %v4782_v39 }
0x1256   : > { %v6101_v63 = vmul.f32 %v6059_v18, %v12571_v48  ;;  %v4776_v48 = vrot.slane %v11853_v14, %v12499_v32  ;;  %v5505_v18 = vsel %vm1456_vm4, %v5504_v24, %v5500_v12 }
0x1257   : > { %6147 = vperm.xlu1 %7552, %v6104_v13  }
0x1258   : > { %6138 = vperm.xlu0 %7551, %v6101_v63   ;;  %v6074_v22 = vpop.xlane.xlu0 %6073 }
0x1259   : > { %v6065_v62 = vpop.xlane.xlu1 %6064  ;;  %v6106_v38 = vmul.f32 %v6074_v22, %v12573_v61 }
0x125a   : > { %v6103_v43 = vmul.f32 %v6065_v62, %v12572_v42 }
0x125b   : > { %6153 = vperm.xlu1 %7552, %v6106_v38  }
0x125c   : > { %6144 = vperm.xlu0 %7551, %v6103_v43   ;;  %v6080_v16 = vpop.xlane.xlu0 %6079 }
0x125d   : > { %v6071_v5 = vpop.xlane.xlu1 %6070  ;;  %v6108_v44 = vmul.f32 %v6080_v16, %v12574_v47 }
0x125e   : > { %v6105_v15 = vmul.f32 %v6071_v5, %v12573_v61  ;;  %v12581_v61 = vld [vmem:[#allocation51_spill] sm:$0xff]  ;;  %v12582_v5 = vld [vmem:[#allocation30_spill] sm:$0xff] }
0x125f   : > { %6159 = vperm.xlu1 %7552, %v6108_v44   ;;  %v12583_v44 = vld [vmem:[#allocation59_spill] sm:$0xff] }
0x1260   : > { %6150 = vperm.xlu0 %7551, %v6105_v15   ;;  %v6086_v29 = vpop.xlane.xlu0 %6085 }
0x1261   : > { %v6077_v51 = vpop.xlane.xlu1 %6076  ;;  %v6110_v25 = vmul.f32 %v6086_v29, %v12575_v3 }
0x1262   : > { %v6107_v37 = vmul.f32 %v6077_v51, %v12574_v47 }
0x1263   : > { %6165 = vperm.xlu1 %7552, %v6110_v25  }
0x1264   : > { %6156 = vperm.xlu0 %7551, %v6107_v37   ;;  %v6092_v50 = vpop.xlane.xlu0 %6091 }
0x1265   : > { %v6083_v59 = vpop.xlane.xlu1 %6082  ;;  %v6112_v56 = vmul.f32 %v6092_v50, %v12576_v0 }
0x1266   : > { %v6109_v54 = vmul.f32 %v6083_v59, %v12575_v3 }
0x1267   : > { %6171 = vperm.xlu1 %7552, %v6112_v56  }
0x1268   : > { %6162 = vperm.xlu0 %7551, %v6109_v54   ;;  %v6098_v23 = vpop.xlane.xlu0 %6097 }
0x1269   : > { %v6089_v33 = vpop.xlane.xlu1 %6088  ;;  %v6114_v31 = vmul.f32 %v6098_v23, %v12577_v27 }
0x126a   : > { %v6111_v1 = vmul.f32 %v6089_v33, %v12576_v0 }
0x126b   : > { %6177 = vperm.xlu1 %7552, %v6114_v31  }
0x126c   : > { %6168 = vperm.xlu0 %7551, %v6111_v1  }
0x126d   : > { %v6095_v11 = vpop.xlane.xlu1 %6094 }
0x126e   : > { %v6113_v6 = vmul.f32 %v6095_v11, %v12577_v27 }
0x126f   : > { %6913 = vperm.xlu1 %7552, %v12578_v28  }
0x1270   : > { %6174 = vperm.xlu0 %7551, %v6113_v6   ;;  %v6905_v45 = vpop.permute.xlu0 %6904 }
0x1271   : > { %v6972_v10 = vrot.slane %v6905_v45, %v12559_v53  ;;  %v5442_v7 = vpop.permute.xlu1 %5441 }
0x1272   : > { %v5513_v13 = vrot.slane %v5442_v7, %v12499_v32 }
0x1273   : > { %v6977_v8 = vsel %vm1456_vm4, %v6976_v2, %v6972_v10 }
0x1274   : > { %v11894_v55 = vsel %vm1531_vm10, %v6977_v8, %v11835_v4  ;;  %6910 = vperm.xlu0 %7551, %v6849_v41   ;;  %v4702_v40 = vpop.permute.xlu0 %4701  ;;  %v5496_v4 = vsel %vm1456_vm4, %v5495_v34, %v5491_v35 }
0x1275   : > { %v4772_v58 = vrot.slane %v4702_v40, %v12559_v53  ;;  %v5519_v22 = vsel %vm1529_vm9, %v5496_v4, %v11816_v52 }
0x1276   : > { %v5520_v62 = vsel %vm1531_vm10, %v5505_v18, %v5519_v22 }
0x1277   : > { %v4777_v60 = vsel %vm1456_vm4, %v4776_v48, %v4772_v58 }
0x1278   : > { %v4784_v14 = vsel %vm1533_vm11, %v4777_v60, %v4783_v46  ;;  %v5439_v42 = vpop.permute.xlu0 %5438 }
0x1279   : > { %v4862_v63 = vadd.f32 %v12580_v17, %v4784_v14  ;;  %v5509_v9 = vrot.slane %v5439_v42, %v12559_v53 }
0x127b   : > { %v4865_v38 = vadd.f32 %v4862_v63, %v12581_v61  ;;  %v5514_v43 = vsel %vm1456_vm4, %v5513_v13, %v5509_v9 }
0x127c   : > { %v5521_v16 = vsel %vm1533_vm11, %v5514_v43, %v5520_v62  ;;  %v12584_v43 = vld [vmem:[#allocation40_spill] sm:$0xff] }
0x127d   : > { %7250 = vst.msk [vmem:[%s10083_s20 + $0x20] sm:$0xff] %vm928_vm2, %v4865_v38  ;;  %v5599_v47 = vadd.f32 %v12582_v5, %v5521_v16 }
0x127f   : > { %v5602_v15 = vadd.f32 %v5599_v47, %v12583_v44  ;;  %v12585_v44 = vld [vmem:[#allocation99_spill] sm:$0xff] }
0x1281   : > { %7262 = vst.msk [vmem:[%s10083_s20 + $0x28] sm:$0xff] %vm928_vm2, %v5602_v15 }
0x1287   : > { %v6334_v29 = vpop.f32.mrf.mxu1 }
0x1289   : > { %v7506_v51 = vpop.f32.mrf.mxu1 }
0x12ca   : > { %v6136_v3 = vpop.permute.xlu1 %6135 }
0x12cb   : > { %v6186_v19 = vrot.slane %v6136_v3, %v12499_v32 }
0x12ce   : > { %v6142_v52 = vpop.permute.xlu1 %6141 }
0x12cf   : > { %v6133_v25 = vpop.permute.xlu0 %6132  ;;  %v6195_v6 = vrot.slane %v6142_v52, %v12499_v32 }
0x12d0   : > { %v6182_v57 = vrot.slane %v6133_v25, %v12559_v53 }
0x12d2   : > { %v6148_v37 = vpop.permute.xlu1 %6147  ;;  %v6187_v8 = vsel %vm1456_vm4, %v6186_v19, %v6182_v57 }
0x12d3   : > { %v6139_v50 = vpop.permute.xlu0 %6138  ;;  %v6204_v36 = vrot.slane %v6148_v37, %v12499_v32 }
0x12d4   : > { %v6191_v27 = vrot.slane %v6139_v50, %v12559_v53 }
0x12d6   : > { %v6154_v59 = vpop.permute.xlu1 %6153  ;;  %v6196_v2 = vsel %vm1456_vm4, %v6195_v6, %v6191_v27 }
0x12d7   : > { %v6145_v0 = vpop.permute.xlu0 %6144  ;;  %v6213_v10 = vrot.slane %v6154_v59, %v12499_v32  ;;  %v6251_v34 = vsel %vm1521_vm5, %v6196_v2, %v6187_v8 }
0x12d8   : > { %v6200_v1 = vrot.slane %v6145_v0, %v12559_v53 }
0x12da   : > { %v6160_v56 = vpop.permute.xlu1 %6159  ;;  %v6205_v26 = vsel %vm1456_vm4, %v6204_v36, %v6200_v1 }
0x12db   : > { %v6151_v54 = vpop.permute.xlu0 %6150  ;;  %v6222_v41 = vrot.slane %v6160_v56, %v12499_v32  ;;  %v6252_v24 = vsel %vm1523_vm6, %v6205_v26, %v6251_v34 }
0x12dc   : > { %v6209_v28 = vrot.slane %v6151_v54, %v12559_v53 }
0x12de   : > { %v6166_v23 = vpop.permute.xlu1 %6165  ;;  %v6214_v21 = vsel %vm1456_vm4, %v6213_v10, %v6209_v28 }
0x12df   : > { %v6157_v33 = vpop.permute.xlu0 %6156  ;;  %v6231_v12 = vrot.slane %v6166_v23, %v12499_v32  ;;  %v6253_v7 = vsel %vm1525_vm7, %v6214_v21, %v6252_v24 }
0x12e0   : > { %v6218_v45 = vrot.slane %v6157_v33, %v12559_v53 }
0x12e2   : > { %v6172_v31 = vpop.permute.xlu1 %6171  ;;  %v6223_v48 = vsel %vm1456_vm4, %v6222_v41, %v6218_v45 }
0x12e3   : > { %v6163_v11 = vpop.permute.xlu0 %6162  ;;  %v6240_v58 = vrot.slane %v6172_v31, %v12499_v32  ;;  %v6254_v60 = vsel %vm1527_vm8, %v6223_v48, %v6253_v7 }
0x12e4   : > { %v6227_v49 = vrot.slane %v6163_v11, %v12559_v53 }
0x12e6   : > { %v6178_v20 = vpop.permute.xlu1 %6177  ;;  %v6232_v39 = vsel %vm1456_vm4, %v6231_v12, %v6227_v49 }
0x12e7   : > { %v6169_v35 = vpop.permute.xlu0 %6168  ;;  %v6249_v18 = vrot.slane %v6178_v20, %v12499_v32  ;;  %v6255_v42 = vsel %vm1529_vm9, %v6232_v39, %v6254_v60 }
0x12e8   : > { %v6236_v40 = vrot.slane %v6169_v35, %v12559_v53 }
0x12ea   : > { %v6241_v4 = vsel %vm1456_vm4, %v6240_v58, %v6236_v40  ;;  %v6914_v13 = vpop.permute.xlu1 %6913 }
0x12eb   : > { %v6175_v46 = vpop.permute.xlu0 %6174  ;;  %v6256_v17 = vsel %vm1531_vm10, %v6241_v4, %v6255_v42  ;;  %v6985_v62 = vrot.slane %v6914_v13, %v12499_v32 }
0x12ec   : > { %v6245_v14 = vrot.slane %v6175_v46, %v12559_v53 }
0x12ee   : > { %v6250_v63 = vsel %vm1456_vm4, %v6249_v18, %v6245_v14 }
0x12ef   : > { %v6257_v9 = vsel %vm1533_vm11, %v6250_v63, %v6256_v17  ;;  %v6911_v22 = vpop.permute.xlu0 %6910 }
0x12f0   : > { %v6335_v61 = vadd.f32 %v6334_v29, %v6257_v9  ;;  %v6981_v38 = vrot.slane %v6911_v22, %v12559_v53 }
0x12f2   : > { %v6338_v16 = vadd.f32 %v6335_v61, %v12584_v43  ;;  %v6986_v5 = vsel %vm1456_vm4, %v6985_v62, %v6981_v38 }
0x12f3   : > { %v6993_v47 = vsel %vm1533_vm11, %v6986_v5, %v11894_v55 }
0x12f4   : > { %7274 = vst.msk [vmem:[%s10083_s20 + $0x30] sm:$0xff] %vm928_vm2, %v6338_v16  ;;  %v7071_v15 = vadd.f32 %v12585_v44, %v6993_v47 }
0x12f6   : > { %v7074_v51 = vadd.f32 %v7071_v15, %v11652_v30 }
0x12f8   : > { %7286 = vst.msk [vmem:[%s10083_s20 + $0x38] sm:$0xff] %vm928_vm2, %v7074_v51 }
0x12f9 PF: > { %s23_s17 = sadd.s32 1, %s7822_s17  }
0x12fa   : > { %p20_p3 = scmp.ge.s32.totalorder %s23_s17, 4  }
0x12fc   :  { %22 = sbr.rel (!%p20_p3) target bundleno = 2 (0x2), region = 105 }
0x1301   :  { %7100 = vsyncpa [#allocation3], 1 }
0x1302   :  { %7102 = vsyncpa [#allocation3 + $0x1], 1 }
0x1303   :  { %7103 = vsyncpa [#allocation5], 1 }

</bundles_post_ra>
